<compile_context>
chip_gen: v7x
topology: tpu7x:2x2x1
jax: 0.10.0
libtpu: 0.0.40
codegen_flags: <defaults>
</compile_context>

<pallas_src>
import functools

import jax
import jax.numpy as jnp
import numpy as np
from jax.experimental import pallas as pl
from jax.experimental.pallas import tpu as pltpu


# ----------------------------- Pallas kernels -----------------------------

def _pool2x2_lanepacked(y, w, c):
    """2x2/stride-2 max pool on a lane-packed (H, W*C) slab -> (H//2, (W//2)*C).

    Column index is w*C + c.  Uses only static lane/sublane slices + maximum +
    concatenate (no reshapes / relayouts)."""
    h = y.shape[0]
    cols = [jnp.maximum(y[:, (2 * i) * c:(2 * i + 1) * c],
                        y[:, (2 * i + 1) * c:(2 * i + 2) * c])
            for i in range(w // 2)]
    y = jnp.concatenate(cols, axis=1)                  # (H, (W//2)*C)
    rows = [jnp.maximum(y[2 * i:2 * i + 1, :], y[2 * i + 1:2 * i + 2, :])
            for i in range(h // 2)]
    return jnp.concatenate(rows, axis=0)               # (H//2, (W//2)*C)


def _backbone_kernel(x_ref, a1_ref, b1_ref, a2_ref, b2_ref, feat_ref):
    """Per-image fused conv1+ReLU+pool1+conv2+ReLU+pool2 -> NHWC-flattened features.

    x_ref   : (1, 30, 30)   zero-padded 28x28 input image
    a1_ref  : (3, 30, 896)  width-banded conv1 weights   (out cols = w*32 + co)
    b1_ref  : (1, 896)      conv1 bias tiled over w
    a2_ref  : (3, 512, 896) width-banded conv2 weights   (in cols = w*32 + ci,
                                                          out cols = w*64 + co)
    b2_ref  : (1, 896)      conv2 bias tiled over w
    feat_ref: (1, 7, 448)   pooled2 output, lane-packed (h, w*64 + co)
    """
    xp = x_ref[0]                                      # (30, 30)

    # conv1 (1->32): 3 banded MXU matmuls, output (28, 28*32) lane-dense.
    o1 = jnp.dot(xp[0:28, :], a1_ref[0], preferred_element_type=jnp.float32)
    o1 = o1 + jnp.dot(xp[1:29, :], a1_ref[1], preferred_element_type=jnp.float32)
    o1 = o1 + jnp.dot(xp[2:30, :], a1_ref[2], preferred_element_type=jnp.float32)
    o1 = jnp.maximum(o1 + b1_ref[...], 0.0)            # bias + ReLU

    # maxpool 2x2 -> (14, 14*32), then zero-pad to (16, 16*32) for conv2 (pad=1).
    p1 = _pool2x2_lanepacked(o1, w=28, c=32)           # (14, 448)
    zl = jnp.zeros((14, 32), jnp.float32)
    p1 = jnp.concatenate([zl, p1, zl], axis=1)         # (14, 512)
    zr = jnp.zeros((1, 512), jnp.float32)
    p1 = jnp.concatenate([zr, p1, zr], axis=0)         # (16, 512)

    # conv2 (32->64): 3 banded MXU matmuls, output (14, 14*64) lane-dense.
    o2 = jnp.dot(p1[0:14, :], a2_ref[0], preferred_element_type=jnp.float32)
    o2 = o2 + jnp.dot(p1[1:15, :], a2_ref[1], preferred_element_type=jnp.float32)
    o2 = o2 + jnp.dot(p1[2:16, :], a2_ref[2], preferred_element_type=jnp.float32)
    o2 = jnp.maximum(o2 + b2_ref[...], 0.0)            # bias + ReLU

    # maxpool 2x2 -> (7, 7*64); row-major flatten of this is NHWC feature order.
    p2 = _pool2x2_lanepacked(o2, w=14, c=64)           # (7, 448)
    feat_ref[...] = p2[None, :, :]


def _head_kernel(f_ref, w1_ref, b1_ref, w2_ref, b2_ref, o_ref):
    """Fused fc1(+ReLU) and classi: logits = relu(f@W1+b1)@W2+b2."""
    h = jnp.dot(f_ref[...], w1_ref[...], preferred_element_type=jnp.float32)
    h = jnp.maximum(h + b1_ref[...], 0.0)
    o_ref[...] = (jnp.dot(h, w2_ref[...], preferred_element_type=jnp.float32)
                  + b2_ref[...]).astype(o_ref.dtype)


# ----------------------------- pallas wrappers -----------------------------

def _backbone_call(xpad, prep):
    n = xpad.shape[0]
    return pl.pallas_call(
        _backbone_kernel,
        out_shape=jax.ShapeDtypeStruct((n, 7, 448), jnp.float32),
        grid_spec=pltpu.PrefetchScalarGridSpec(
            num_scalar_prefetch=0,
            grid=(n,),
            in_specs=[
                pl.BlockSpec((1, 30, 30), lambda i: (i, 0, 0)),
                pl.BlockSpec((3, 30, 896), lambda i: (0, 0, 0)),
                pl.BlockSpec((1, 896), lambda i: (0, 0)),
                pl.BlockSpec((3, 512, 896), lambda i: (0, 0, 0)),
                pl.BlockSpec((1, 896), lambda i: (0, 0)),
            ],
            out_specs=pl.BlockSpec((1, 7, 448), lambda i: (i, 0, 0)),
        ),
        compiler_params=pltpu.CompilerParams(
            dimension_semantics=("parallel",),
            vmem_limit_bytes=48 * 1024 * 1024,
        ),
    )(xpad, prep["a1"], prep["b1"], prep["a2"], prep["b2"])


def _head_call(feat, prep, *, bm_cap=256):
    m, k = feat.shape
    c = prep["w_cls"].shape[1]
    if m <= bm_cap:
        bm, mp = m, m
    else:
        bm = bm_cap                                    # multiple of 8, VMEM-safe on v7x
        mp = pl.cdiv(m, bm) * bm
        if mp != m:
            feat = jnp.pad(feat, ((0, mp - m), (0, 0)))
    out = pl.pallas_call(
        _head_kernel,
        out_shape=jax.ShapeDtypeStruct((mp, c), jnp.float32),
        grid_spec=pltpu.PrefetchScalarGridSpec(
            num_scalar_prefetch=0,
            grid=(mp // bm,),
            in_specs=[
                pl.BlockSpec((bm, k), lambda i: (i, 0)),
                pl.BlockSpec((k, 128), lambda i: (0, 0)),
                pl.BlockSpec((1, 128), lambda i: (0, 0)),
                pl.BlockSpec((128, c), lambda i: (0, 0)),
                pl.BlockSpec((1, c), lambda i: (0, 0)),
            ],
            out_specs=pl.BlockSpec((bm, c), lambda i: (i, 0)),
        ),
        compiler_params=pltpu.CompilerParams(dimension_semantics=("parallel",)),
    )(feat, prep["w_fc1"], prep["b_fc1"], prep["w_cls"], prep["b_cls"])
    return out[:m] if mp != m else out


# ----------------------------- model parameters ----------------------------

def init_params(key, class_num=10):
    ks = jax.random.split(key, 8)
    s = 0.05
    return {
        # PyTorch layouts: conv weights OIHW, linear weights (out, in).
        "conv1_w": s * jax.random.normal(ks[0], (32, 1, 3, 3), jnp.float32),
        "conv1_b": s * jax.random.normal(ks[1], (32,), jnp.float32),
        "conv2_w": s * jax.random.normal(ks[2], (64, 32, 3, 3), jnp.float32),
        "conv2_b": s * jax.random.normal(ks[3], (64,), jnp.float32),
        "fc1_w": s * jax.random.normal(ks[4], (128, 64 * 7 * 7), jnp.float32),
        "fc1_b": s * jax.random.normal(ks[5], (128,), jnp.float32),
        "classi_w": s * jax.random.normal(ks[6], (class_num, 128), jnp.float32),
        "classi_b": s * jax.random.normal(ks[7], (class_num,), jnp.float32),
    }


def prepare_params(p):
    """One-time host-side conversion of PyTorch-layout params into kernel layouts."""
    w1 = np.asarray(p["conv1_w"])[:, 0]                # (32, 3, 3)   [co, kh, kw]
    b1 = np.asarray(p["conv1_b"])                      # (32,)
    w2 = np.asarray(p["conv2_w"])                      # (64, 32, 3, 3) [co, ci, kh, kw]
    b2 = np.asarray(p["conv2_b"])                      # (64,)

    # conv1 as width-banded matmul weights: A1[kh, w_in, w_out*32 + co]
    a1 = np.zeros((3, 30, 28 * 32), np.float32)
    for kh in range(3):
        for wo in range(28):
            for kw in range(3):
                a1[kh, wo + kw, wo * 32:(wo + 1) * 32] = w1[:, kh, kw]
    b1p = np.tile(b1, 28)[None, :].astype(np.float32)  # (1, 896)

    # conv2 as width-banded matmul weights: A2[kh, w_in*32 + ci, w_out*64 + co]
    a2 = np.zeros((3, 16 * 32, 14 * 64), np.float32)
    for kh in range(3):
        for wo in range(14):
            for kw in range(3):
                a2[kh, (wo + kw) * 32:(wo + kw + 1) * 32,
                   wo * 64:(wo + 1) * 64] = w2[:, :, kh, kw].T        # [ci, co]
    b2p = np.tile(b2, 14)[None, :].astype(np.float32)  # (1, 896)

    # fc1: fold the PyTorch NCHW-flatten order (c*49 + h*7 + w) into the weight rows
    # so the kernel consumes NHWC-flattened features (h*448 + w*64 + c) directly.
    hh, ww, cc = np.meshgrid(np.arange(7), np.arange(7), np.arange(64), indexing="ij")
    perm = (cc * 49 + hh * 7 + ww).reshape(-1)
    w_fc1 = np.asarray(p["fc1_w"])[:, perm].T.astype(np.float32)      # (3136, 128)
    b_fc1 = np.asarray(p["fc1_b"])[None, :].astype(np.float32)        # (1, 128)
    w_cls = np.asarray(p["classi_w"]).T.astype(np.float32)            # (128, C)
    b_cls = np.asarray(p["classi_b"])[None, :].astype(np.float32)     # (1, C)

    return {
        "a1": jnp.asarray(a1), "b1": jnp.asarray(b1p),
        "a2": jnp.asarray(a2), "b2": jnp.asarray(b2p),
        "w_fc1": jnp.asarray(w_fc1), "b_fc1": jnp.asarray(b_fc1),
        "w_cls": jnp.asarray(w_cls), "b_cls": jnp.asarray(b_cls),
    }


# ----------------------------- forward pass --------------------------------

def forward(prep, x_nchw):
    """MyNetwork_dmnistn.forward: logits = classi(MnistModel(x))."""
    n = x_nchw.shape[0]
    x = x_nchw[:, 0]                                   # (N, 28, 28), Cin == 1
    xpad = jnp.pad(x, ((0, 0), (1, 1), (1, 1)))        # (N, 30, 30) -- tiny XLA glue
    feat = _backbone_call(xpad, prep)                  # (N, 7, 448), NHWC-packed
    feat = feat.reshape(n, 7 * 448)                    # contiguous -> free reshape
    return _head_call(feat, prep)                      # (N, class_num)


# ----------------------------- pure-JAX reference --------------------------

def _ref_conv_relu_pool(x, w, b):
    dn = jax.lax.conv_dimension_numbers(x.shape, w.shape, ("NCHW", "OIHW", "NCHW"))
    y = jax.lax.conv_general_dilated(x, w, window_strides=(1, 1),
                                     padding=((1, 1), (1, 1)),
                                     dimension_numbers=dn)
    y = jax.nn.relu(y + b[None, :, None, None])
    return jax.lax.reduce_window(y, -jnp.inf, jax.lax.max,
                                 (1, 1, 2, 2), (1, 1, 2, 2), "VALID")


def reference(params, x_nchw):
    x = _ref_conv_relu_pool(x_nchw, params["conv1_w"], params["conv1_b"])
    x = _ref_conv_relu_pool(x, params["conv2_w"], params["conv2_b"])
    feat = x.reshape(x.shape[0], -1)                   # NCHW flatten, like torch .view
    h = jax.nn.relu(feat @ params["fc1_w"].T + params["fc1_b"])
    return h @ params["classi_w"].T + params["classi_b"]


# ----------------------------------- main ----------------------------------

if __name__ == "__main__":
    key = jax.random.PRNGKey(0)
    pkey, xkey = jax.random.split(key)
    params = init_params(pkey, class_num=10)
    prep = prepare_params(params)                      # one-time host-side weight prep
    x = jax.random.normal(xkey, (2, 1, 28, 28), jnp.float32)   # NCHW, like PyTorch

    out = jax.jit(forward)(prep, x)
    out = jax.block_until_ready(out)
    assert out.shape == (2, 10) and out.dtype == jnp.float32

    ref = reference(params, x)
    np.testing.assert_allclose(np.asarray(out), np.asarray(ref), rtol=2e-2, atol=2e-2)

    print("KERNEL_OK")
</pallas_src>

<mosaic_0001>
module attributes {stable_mosaic.version = 11 : i64} {
  func.func @_backbone_kernel(%arg0: i32, %arg1: memref<1x30x30xf32, #tpu.memory_space<vmem>>, %arg2: memref<3x30x896xf32, #tpu.memory_space<vmem>>, %arg3: memref<1x896xf32, #tpu.memory_space<vmem>>, %arg4: memref<3x512x896xf32, #tpu.memory_space<vmem>>, %arg5: memref<1x896xf32, #tpu.memory_space<vmem>>, %arg6: memref<1x7x448xf32, #tpu.memory_space<vmem>>) attributes {dimension_semantics = [#tpu.dimension_semantics<parallel>], iteration_bounds = array<i64: 2>, scalar_prefetch = 0 : i64, scratch_operands = 0 : i64, tpu.core_type = #tpu.core_type<tc>, window_params = [{transform_indices = @transform_0, window_bounds = array<i64: 1, 30, 30>}, {pipeline_mode = #tpu.pipeline_mode<synchronous>, transform_indices = @transform_1, window_bounds = array<i64: 3, 30, 896>}, {pipeline_mode = #tpu.pipeline_mode<synchronous>, transform_indices = @transform_2, window_bounds = array<i64: 1, 896>}, {pipeline_mode = #tpu.pipeline_mode<synchronous>, transform_indices = @transform_3, window_bounds = array<i64: 3, 512, 896>}, {pipeline_mode = #tpu.pipeline_mode<synchronous>, transform_indices = @transform_4, window_bounds = array<i64: 1, 896>}, {transform_indices = @transform_5, window_bounds = array<i64: 1, 7, 448>}]} {
    %c0 = arith.constant 0 : index
    %c0_0 = arith.constant 0 : index
    %c0_1 = arith.constant 0 : index
    %0 = vector.load %arg1[%c0, %c0_0, %c0_1] : memref<1x30x30xf32, #tpu.memory_space<vmem>>, vector<1x30x30xf32>
    %1 = vector.shape_cast %0 : vector<1x30x30xf32> to vector<30x30xf32>
    %2 = vector.extract_strided_slice %1 {offsets = [0, 0], sizes = [28, 30], strides = [1, 1]} : vector<30x30xf32> to vector<28x30xf32>
    %c0_2 = arith.constant 0 : index
    %c0_3 = arith.constant 0 : index
    %c0_4 = arith.constant 0 : index
    %3 = vector.load %arg2[%c0_2, %c0_3, %c0_4] : memref<3x30x896xf32, #tpu.memory_space<vmem>>, vector<1x30x896xf32>
    %4 = vector.shape_cast %3 : vector<1x30x896xf32> to vector<30x896xf32>
    %cst = arith.constant dense<0.000000e+00> : vector<28x896xf32>
    %5 = tpu.matmul %2, %4, %cst {dimension_numbers = #tpu.dot_dimension_numbers<[1], [0], [0], [1], [0, 0, 1, 1], [], []>} : vector<28x30xf32>, vector<30x896xf32>, vector<28x896xf32> -> vector<28x896xf32>
    %6 = vector.extract_strided_slice %1 {offsets = [1, 0], sizes = [28, 30], strides = [1, 1]} : vector<30x30xf32> to vector<28x30xf32>
    %c1 = arith.constant 1 : index
    %c0_5 = arith.constant 0 : index
    %c0_6 = arith.constant 0 : index
    %7 = vector.load %arg2[%c1, %c0_5, %c0_6] : memref<3x30x896xf32, #tpu.memory_space<vmem>>, vector<1x30x896xf32>
    %8 = vector.shape_cast %7 : vector<1x30x896xf32> to vector<30x896xf32>
    %cst_7 = arith.constant dense<0.000000e+00> : vector<28x896xf32>
    %9 = tpu.matmul %6, %8, %cst_7 {dimension_numbers = #tpu.dot_dimension_numbers<[1], [0], [0], [1], [0, 0, 1, 1], [], []>} : vector<28x30xf32>, vector<30x896xf32>, vector<28x896xf32> -> vector<28x896xf32>
    %10 = arith.addf %5, %9 : vector<28x896xf32>
    %11 = vector.extract_strided_slice %1 {offsets = [2, 0], sizes = [28, 30], strides = [1, 1]} : vector<30x30xf32> to vector<28x30xf32>
    %c2 = arith.constant 2 : index
    %c0_8 = arith.constant 0 : index
    %c0_9 = arith.constant 0 : index
    %12 = vector.load %arg2[%c2, %c0_8, %c0_9] : memref<3x30x896xf32, #tpu.memory_space<vmem>>, vector<1x30x896xf32>
    %13 = vector.shape_cast %12 : vector<1x30x896xf32> to vector<30x896xf32>
    %cst_10 = arith.constant dense<0.000000e+00> : vector<28x896xf32>
    %14 = tpu.matmul %11, %13, %cst_10 {dimension_numbers = #tpu.dot_dimension_numbers<[1], [0], [0], [1], [0, 0, 1, 1], [], []>} : vector<28x30xf32>, vector<30x896xf32>, vector<28x896xf32> -> vector<28x896xf32>
    %15 = arith.addf %10, %14 : vector<28x896xf32>
    %c0_11 = arith.constant 0 : index
    %c0_12 = arith.constant 0 : index
    %16 = vector.load %arg3[%c0_11, %c0_12] : memref<1x896xf32, #tpu.memory_space<vmem>>, vector<1x896xf32>
    %17 = vector.broadcast %16 : vector<1x896xf32> to vector<28x896xf32>
    %18 = arith.addf %15, %17 : vector<28x896xf32>
    %cst_13 = arith.constant 0.000000e+00 : f32
    %19 = vector.broadcast %cst_13 : f32 to vector<28x896xf32>
    %20 = arith.maximumf %18, %19 : vector<28x896xf32>
    %21 = vector.extract_strided_slice %20 {offsets = [0, 0], sizes = [28, 32], strides = [1, 1]} : vector<28x896xf32> to vector<28x32xf32>
    %22 = vector.extract_strided_slice %20 {offsets = [0, 32], sizes = [28, 32], strides = [1, 1]} : vector<28x896xf32> to vector<28x32xf32>
    %23 = arith.maximumf %21, %22 : vector<28x32xf32>
    %24 = vector.extract_strided_slice %20 {offsets = [0, 64], sizes = [28, 32], strides = [1, 1]} : vector<28x896xf32> to vector<28x32xf32>
    %25 = vector.extract_strided_slice %20 {offsets = [0, 96], sizes = [28, 32], strides = [1, 1]} : vector<28x896xf32> to vector<28x32xf32>
    %26 = arith.maximumf %24, %25 : vector<28x32xf32>
    %27 = vector.extract_strided_slice %20 {offsets = [0, 128], sizes = [28, 32], strides = [1, 1]} : vector<28x896xf32> to vector<28x32xf32>
    %28 = vector.extract_strided_slice %20 {offsets = [0, 160], sizes = [28, 32], strides = [1, 1]} : vector<28x896xf32> to vector<28x32xf32>
    %29 = arith.maximumf %27, %28 : vector<28x32xf32>
    %30 = vector.extract_strided_slice %20 {offsets = [0, 192], sizes = [28, 32], strides = [1, 1]} : vector<28x896xf32> to vector<28x32xf32>
    %31 = vector.extract_strided_slice %20 {offsets = [0, 224], sizes = [28, 32], strides = [1, 1]} : vector<28x896xf32> to vector<28x32xf32>
    %32 = arith.maximumf %30, %31 : vector<28x32xf32>
    %33 = vector.extract_strided_slice %20 {offsets = [0, 256], sizes = [28, 32], strides = [1, 1]} : vector<28x896xf32> to vector<28x32xf32>
    %34 = vector.extract_strided_slice %20 {offsets = [0, 288], sizes = [28, 32], strides = [1, 1]} : vector<28x896xf32> to vector<28x32xf32>
    %35 = arith.maximumf %33, %34 : vector<28x32xf32>
    %36 = vector.extract_strided_slice %20 {offsets = [0, 320], sizes = [28, 32], strides = [1, 1]} : vector<28x896xf32> to vector<28x32xf32>
    %37 = vector.extract_strided_slice %20 {offsets = [0, 352], sizes = [28, 32], strides = [1, 1]} : vector<28x896xf32> to vector<28x32xf32>
    %38 = arith.maximumf %36, %37 : vector<28x32xf32>
    %39 = vector.extract_strided_slice %20 {offsets = [0, 384], sizes = [28, 32], strides = [1, 1]} : vector<28x896xf32> to vector<28x32xf32>
    %40 = vector.extract_strided_slice %20 {offsets = [0, 416], sizes = [28, 32], strides = [1, 1]} : vector<28x896xf32> to vector<28x32xf32>
    %41 = arith.maximumf %39, %40 : vector<28x32xf32>
    %42 = vector.extract_strided_slice %20 {offsets = [0, 448], sizes = [28, 32], strides = [1, 1]} : vector<28x896xf32> to vector<28x32xf32>
    %43 = vector.extract_strided_slice %20 {offsets = [0, 480], sizes = [28, 32], strides = [1, 1]} : vector<28x896xf32> to vector<28x32xf32>
    %44 = arith.maximumf %42, %43 : vector<28x32xf32>
    %45 = vector.extract_strided_slice %20 {offsets = [0, 512], sizes = [28, 32], strides = [1, 1]} : vector<28x896xf32> to vector<28x32xf32>
    %46 = vector.extract_strided_slice %20 {offsets = [0, 544], sizes = [28, 32], strides = [1, 1]} : vector<28x896xf32> to vector<28x32xf32>
    %47 = arith.maximumf %45, %46 : vector<28x32xf32>
    %48 = vector.extract_strided_slice %20 {offsets = [0, 576], sizes = [28, 32], strides = [1, 1]} : vector<28x896xf32> to vector<28x32xf32>
    %49 = vector.extract_strided_slice %20 {offsets = [0, 608], sizes = [28, 32], strides = [1, 1]} : vector<28x896xf32> to vector<28x32xf32>
    %50 = arith.maximumf %48, %49 : vector<28x32xf32>
    %51 = vector.extract_strided_slice %20 {offsets = [0, 640], sizes = [28, 32], strides = [1, 1]} : vector<28x896xf32> to vector<28x32xf32>
    %52 = vector.extract_strided_slice %20 {offsets = [0, 672], sizes = [28, 32], strides = [1, 1]} : vector<28x896xf32> to vector<28x32xf32>
    %53 = arith.maximumf %51, %52 : vector<28x32xf32>
    %54 = vector.extract_strided_slice %20 {offsets = [0, 704], sizes = [28, 32], strides = [1, 1]} : vector<28x896xf32> to vector<28x32xf32>
    %55 = vector.extract_strided_slice %20 {offsets = [0, 736], sizes = [28, 32], strides = [1, 1]} : vector<28x896xf32> to vector<28x32xf32>
    %56 = arith.maximumf %54, %55 : vector<28x32xf32>
    %57 = vector.extract_strided_slice %20 {offsets = [0, 768], sizes = [28, 32], strides = [1, 1]} : vector<28x896xf32> to vector<28x32xf32>
    %58 = vector.extract_strided_slice %20 {offsets = [0, 800], sizes = [28, 32], strides = [1, 1]} : vector<28x896xf32> to vector<28x32xf32>
    %59 = arith.maximumf %57, %58 : vector<28x32xf32>
    %60 = vector.extract_strided_slice %20 {offsets = [0, 832], sizes = [28, 32], strides = [1, 1]} : vector<28x896xf32> to vector<28x32xf32>
    %61 = vector.extract_strided_slice %20 {offsets = [0, 864], sizes = [28, 32], strides = [1, 1]} : vector<28x896xf32> to vector<28x32xf32>
    %62 = arith.maximumf %60, %61 : vector<28x32xf32>
    %63 = tpu.concatenate %23, %26, %29, %32, %35, %38, %41, %44, %47, %50, %53, %56, %59, %62 in 1 : vector<28x32xf32>, vector<28x32xf32>, vector<28x32xf32>, vector<28x32xf32>, vector<28x32xf32>, vector<28x32xf32>, vector<28x32xf32>, vector<28x32xf32>, vector<28x32xf32>, vector<28x32xf32>, vector<28x32xf32>, vector<28x32xf32>, vector<28x32xf32>, vector<28x32xf32> -> vector<28x448xf32>
    %64 = vector.extract_strided_slice %63 {offsets = [0, 0], sizes = [1, 448], strides = [1, 1]} : vector<28x448xf32> to vector<1x448xf32>
    %65 = vector.extract_strided_slice %63 {offsets = [1, 0], sizes = [1, 448], strides = [1, 1]} : vector<28x448xf32> to vector<1x448xf32>
    %66 = arith.maximumf %64, %65 : vector<1x448xf32>
    %67 = vector.extract_strided_slice %63 {offsets = [2, 0], sizes = [1, 448], strides = [1, 1]} : vector<28x448xf32> to vector<1x448xf32>
    %68 = vector.extract_strided_slice %63 {offsets = [3, 0], sizes = [1, 448], strides = [1, 1]} : vector<28x448xf32> to vector<1x448xf32>
    %69 = arith.maximumf %67, %68 : vector<1x448xf32>
    %70 = vector.extract_strided_slice %63 {offsets = [4, 0], sizes = [1, 448], strides = [1, 1]} : vector<28x448xf32> to vector<1x448xf32>
    %71 = vector.extract_strided_slice %63 {offsets = [5, 0], sizes = [1, 448], strides = [1, 1]} : vector<28x448xf32> to vector<1x448xf32>
    %72 = arith.maximumf %70, %71 : vector<1x448xf32>
    %73 = vector.extract_strided_slice %63 {offsets = [6, 0], sizes = [1, 448], strides = [1, 1]} : vector<28x448xf32> to vector<1x448xf32>
    %74 = vector.extract_strided_slice %63 {offsets = [7, 0], sizes = [1, 448], strides = [1, 1]} : vector<28x448xf32> to vector<1x448xf32>
    %75 = arith.maximumf %73, %74 : vector<1x448xf32>
    %76 = vector.extract_strided_slice %63 {offsets = [8, 0], sizes = [1, 448], strides = [1, 1]} : vector<28x448xf32> to vector<1x448xf32>
    %77 = vector.extract_strided_slice %63 {offsets = [9, 0], sizes = [1, 448], strides = [1, 1]} : vector<28x448xf32> to vector<1x448xf32>
    %78 = arith.maximumf %76, %77 : vector<1x448xf32>
    %79 = vector.extract_strided_slice %63 {offsets = [10, 0], sizes = [1, 448], strides = [1, 1]} : vector<28x448xf32> to vector<1x448xf32>
    %80 = vector.extract_strided_slice %63 {offsets = [11, 0], sizes = [1, 448], strides = [1, 1]} : vector<28x448xf32> to vector<1x448xf32>
    %81 = arith.maximumf %79, %80 : vector<1x448xf32>
    %82 = vector.extract_strided_slice %63 {offsets = [12, 0], sizes = [1, 448], strides = [1, 1]} : vector<28x448xf32> to vector<1x448xf32>
    %83 = vector.extract_strided_slice %63 {offsets = [13, 0], sizes = [1, 448], strides = [1, 1]} : vector<28x448xf32> to vector<1x448xf32>
    %84 = arith.maximumf %82, %83 : vector<1x448xf32>
    %85 = vector.extract_strided_slice %63 {offsets = [14, 0], sizes = [1, 448], strides = [1, 1]} : vector<28x448xf32> to vector<1x448xf32>
    %86 = vector.extract_strided_slice %63 {offsets = [15, 0], sizes = [1, 448], strides = [1, 1]} : vector<28x448xf32> to vector<1x448xf32>
    %87 = arith.maximumf %85, %86 : vector<1x448xf32>
    %88 = vector.extract_strided_slice %63 {offsets = [16, 0], sizes = [1, 448], strides = [1, 1]} : vector<28x448xf32> to vector<1x448xf32>
    %89 = vector.extract_strided_slice %63 {offsets = [17, 0], sizes = [1, 448], strides = [1, 1]} : vector<28x448xf32> to vector<1x448xf32>
    %90 = arith.maximumf %88, %89 : vector<1x448xf32>
    %91 = vector.extract_strided_slice %63 {offsets = [18, 0], sizes = [1, 448], strides = [1, 1]} : vector<28x448xf32> to vector<1x448xf32>
    %92 = vector.extract_strided_slice %63 {offsets = [19, 0], sizes = [1, 448], strides = [1, 1]} : vector<28x448xf32> to vector<1x448xf32>
    %93 = arith.maximumf %91, %92 : vector<1x448xf32>
    %94 = vector.extract_strided_slice %63 {offsets = [20, 0], sizes = [1, 448], strides = [1, 1]} : vector<28x448xf32> to vector<1x448xf32>
    %95 = vector.extract_strided_slice %63 {offsets = [21, 0], sizes = [1, 448], strides = [1, 1]} : vector<28x448xf32> to vector<1x448xf32>
    %96 = arith.maximumf %94, %95 : vector<1x448xf32>
    %97 = vector.extract_strided_slice %63 {offsets = [22, 0], sizes = [1, 448], strides = [1, 1]} : vector<28x448xf32> to vector<1x448xf32>
    %98 = vector.extract_strided_slice %63 {offsets = [23, 0], sizes = [1, 448], strides = [1, 1]} : vector<28x448xf32> to vector<1x448xf32>
    %99 = arith.maximumf %97, %98 : vector<1x448xf32>
    %100 = vector.extract_strided_slice %63 {offsets = [24, 0], sizes = [1, 448], strides = [1, 1]} : vector<28x448xf32> to vector<1x448xf32>
    %101 = vector.extract_strided_slice %63 {offsets = [25, 0], sizes = [1, 448], strides = [1, 1]} : vector<28x448xf32> to vector<1x448xf32>
    %102 = arith.maximumf %100, %101 : vector<1x448xf32>
    %103 = vector.extract_strided_slice %63 {offsets = [26, 0], sizes = [1, 448], strides = [1, 1]} : vector<28x448xf32> to vector<1x448xf32>
    %104 = vector.extract_strided_slice %63 {offsets = [27, 0], sizes = [1, 448], strides = [1, 1]} : vector<28x448xf32> to vector<1x448xf32>
    %105 = arith.maximumf %103, %104 : vector<1x448xf32>
    %106 = tpu.concatenate %66, %69, %72, %75, %78, %81, %84, %87, %90, %93, %96, %99, %102, %105 in 0 : vector<1x448xf32>, vector<1x448xf32>, vector<1x448xf32>, vector<1x448xf32>, vector<1x448xf32>, vector<1x448xf32>, vector<1x448xf32>, vector<1x448xf32>, vector<1x448xf32>, vector<1x448xf32>, vector<1x448xf32>, vector<1x448xf32>, vector<1x448xf32>, vector<1x448xf32> -> vector<14x448xf32>
    %cst_14 = arith.constant 0.000000e+00 : f32
    %107 = vector.broadcast %cst_14 : f32 to vector<14x32xf32>
    %108 = tpu.concatenate %107, %106, %107 in 1 : vector<14x32xf32>, vector<14x448xf32>, vector<14x32xf32> -> vector<14x512xf32>
    %cst_15 = arith.constant 0.000000e+00 : f32
    %109 = vector.broadcast %cst_15 : f32 to vector<1x512xf32>
    %110 = tpu.concatenate %109, %108, %109 in 0 : vector<1x512xf32>, vector<14x512xf32>, vector<1x512xf32> -> vector<16x512xf32>
    %111 = vector.extract_strided_slice %110 {offsets = [0, 0], sizes = [14, 512], strides = [1, 1]} : vector<16x512xf32> to vector<14x512xf32>
    %c0_16 = arith.constant 0 : index
    %c0_17 = arith.constant 0 : index
    %c0_18 = arith.constant 0 : index
    %112 = vector.load %arg4[%c0_16, %c0_17, %c0_18] : memref<3x512x896xf32, #tpu.memory_space<vmem>>, vector<1x512x896xf32>
    %113 = vector.shape_cast %112 : vector<1x512x896xf32> to vector<512x896xf32>
    %cst_19 = arith.constant dense<0.000000e+00> : vector<14x896xf32>
    %114 = tpu.matmul %111, %113, %cst_19 {dimension_numbers = #tpu.dot_dimension_numbers<[1], [0], [0], [1], [0, 0, 1, 1], [], []>} : vector<14x512xf32>, vector<512x896xf32>, vector<14x896xf32> -> vector<14x896xf32>
    %115 = vector.extract_strided_slice %110 {offsets = [1, 0], sizes = [14, 512], strides = [1, 1]} : vector<16x512xf32> to vector<14x512xf32>
    %c1_20 = arith.constant 1 : index
    %c0_21 = arith.constant 0 : index
    %c0_22 = arith.constant 0 : index
    %116 = vector.load %arg4[%c1_20, %c0_21, %c0_22] : memref<3x512x896xf32, #tpu.memory_space<vmem>>, vector<1x512x896xf32>
    %117 = vector.shape_cast %116 : vector<1x512x896xf32> to vector<512x896xf32>
    %cst_23 = arith.constant dense<0.000000e+00> : vector<14x896xf32>
    %118 = tpu.matmul %115, %117, %cst_23 {dimension_numbers = #tpu.dot_dimension_numbers<[1], [0], [0], [1], [0, 0, 1, 1], [], []>} : vector<14x512xf32>, vector<512x896xf32>, vector<14x896xf32> -> vector<14x896xf32>
    %119 = arith.addf %114, %118 : vector<14x896xf32>
    %120 = vector.extract_strided_slice %110 {offsets = [2, 0], sizes = [14, 512], strides = [1, 1]} : vector<16x512xf32> to vector<14x512xf32>
    %c2_24 = arith.constant 2 : index
    %c0_25 = arith.constant 0 : index
    %c0_26 = arith.constant 0 : index
    %121 = vector.load %arg4[%c2_24, %c0_25, %c0_26] : memref<3x512x896xf32, #tpu.memory_space<vmem>>, vector<1x512x896xf32>
    %122 = vector.shape_cast %121 : vector<1x512x896xf32> to vector<512x896xf32>
    %cst_27 = arith.constant dense<0.000000e+00> : vector<14x896xf32>
    %123 = tpu.matmul %120, %122, %cst_27 {dimension_numbers = #tpu.dot_dimension_numbers<[1], [0], [0], [1], [0, 0, 1, 1], [], []>} : vector<14x512xf32>, vector<512x896xf32>, vector<14x896xf32> -> vector<14x896xf32>
    %124 = arith.addf %119, %123 : vector<14x896xf32>
    %c0_28 = arith.constant 0 : index
    %c0_29 = arith.constant 0 : index
    %125 = vector.load %arg5[%c0_28, %c0_29] : memref<1x896xf32, #tpu.memory_space<vmem>>, vector<1x896xf32>
    %126 = vector.broadcast %125 : vector<1x896xf32> to vector<14x896xf32>
    %127 = arith.addf %124, %126 : vector<14x896xf32>
    %cst_30 = arith.constant 0.000000e+00 : f32
    %128 = vector.broadcast %cst_30 : f32 to vector<14x896xf32>
    %129 = arith.maximumf %127, %128 : vector<14x896xf32>
    %130 = vector.extract_strided_slice %129 {offsets = [0, 0], sizes = [14, 64], strides = [1, 1]} : vector<14x896xf32> to vector<14x64xf32>
    %131 = vector.extract_strided_slice %129 {offsets = [0, 64], sizes = [14, 64], strides = [1, 1]} : vector<14x896xf32> to vector<14x64xf32>
    %132 = arith.maximumf %130, %131 : vector<14x64xf32>
    %133 = vector.extract_strided_slice %129 {offsets = [0, 128], sizes = [14, 64], strides = [1, 1]} : vector<14x896xf32> to vector<14x64xf32>
    %134 = vector.extract_strided_slice %129 {offsets = [0, 192], sizes = [14, 64], strides = [1, 1]} : vector<14x896xf32> to vector<14x64xf32>
    %135 = arith.maximumf %133, %134 : vector<14x64xf32>
    %136 = vector.extract_strided_slice %129 {offsets = [0, 256], sizes = [14, 64], strides = [1, 1]} : vector<14x896xf32> to vector<14x64xf32>
    %137 = vector.extract_strided_slice %129 {offsets = [0, 320], sizes = [14, 64], strides = [1, 1]} : vector<14x896xf32> to vector<14x64xf32>
    %138 = arith.maximumf %136, %137 : vector<14x64xf32>
    %139 = vector.extract_strided_slice %129 {offsets = [0, 384], sizes = [14, 64], strides = [1, 1]} : vector<14x896xf32> to vector<14x64xf32>
    %140 = vector.extract_strided_slice %129 {offsets = [0, 448], sizes = [14, 64], strides = [1, 1]} : vector<14x896xf32> to vector<14x64xf32>
    %141 = arith.maximumf %139, %140 : vector<14x64xf32>
    %142 = vector.extract_strided_slice %129 {offsets = [0, 512], sizes = [14, 64], strides = [1, 1]} : vector<14x896xf32> to vector<14x64xf32>
    %143 = vector.extract_strided_slice %129 {offsets = [0, 576], sizes = [14, 64], strides = [1, 1]} : vector<14x896xf32> to vector<14x64xf32>
    %144 = arith.maximumf %142, %143 : vector<14x64xf32>
    %145 = vector.extract_strided_slice %129 {offsets = [0, 640], sizes = [14, 64], strides = [1, 1]} : vector<14x896xf32> to vector<14x64xf32>
    %146 = vector.extract_strided_slice %129 {offsets = [0, 704], sizes = [14, 64], strides = [1, 1]} : vector<14x896xf32> to vector<14x64xf32>
    %147 = arith.maximumf %145, %146 : vector<14x64xf32>
    %148 = vector.extract_strided_slice %129 {offsets = [0, 768], sizes = [14, 64], strides = [1, 1]} : vector<14x896xf32> to vector<14x64xf32>
    %149 = vector.extract_strided_slice %129 {offsets = [0, 832], sizes = [14, 64], strides = [1, 1]} : vector<14x896xf32> to vector<14x64xf32>
    %150 = arith.maximumf %148, %149 : vector<14x64xf32>
    %151 = tpu.concatenate %132, %135, %138, %141, %144, %147, %150 in 1 : vector<14x64xf32>, vector<14x64xf32>, vector<14x64xf32>, vector<14x64xf32>, vector<14x64xf32>, vector<14x64xf32>, vector<14x64xf32> -> vector<14x448xf32>
    %152 = vector.extract_strided_slice %151 {offsets = [0, 0], sizes = [1, 448], strides = [1, 1]} : vector<14x448xf32> to vector<1x448xf32>
    %153 = vector.extract_strided_slice %151 {offsets = [1, 0], sizes = [1, 448], strides = [1, 1]} : vector<14x448xf32> to vector<1x448xf32>
    %154 = arith.maximumf %152, %153 : vector<1x448xf32>
    %155 = vector.extract_strided_slice %151 {offsets = [2, 0], sizes = [1, 448], strides = [1, 1]} : vector<14x448xf32> to vector<1x448xf32>
    %156 = vector.extract_strided_slice %151 {offsets = [3, 0], sizes = [1, 448], strides = [1, 1]} : vector<14x448xf32> to vector<1x448xf32>
    %157 = arith.maximumf %155, %156 : vector<1x448xf32>
    %158 = vector.extract_strided_slice %151 {offsets = [4, 0], sizes = [1, 448], strides = [1, 1]} : vector<14x448xf32> to vector<1x448xf32>
    %159 = vector.extract_strided_slice %151 {offsets = [5, 0], sizes = [1, 448], strides = [1, 1]} : vector<14x448xf32> to vector<1x448xf32>
    %160 = arith.maximumf %158, %159 : vector<1x448xf32>
    %161 = vector.extract_strided_slice %151 {offsets = [6, 0], sizes = [1, 448], strides = [1, 1]} : vector<14x448xf32> to vector<1x448xf32>
    %162 = vector.extract_strided_slice %151 {offsets = [7, 0], sizes = [1, 448], strides = [1, 1]} : vector<14x448xf32> to vector<1x448xf32>
    %163 = arith.maximumf %161, %162 : vector<1x448xf32>
    %164 = vector.extract_strided_slice %151 {offsets = [8, 0], sizes = [1, 448], strides = [1, 1]} : vector<14x448xf32> to vector<1x448xf32>
    %165 = vector.extract_strided_slice %151 {offsets = [9, 0], sizes = [1, 448], strides = [1, 1]} : vector<14x448xf32> to vector<1x448xf32>
    %166 = arith.maximumf %164, %165 : vector<1x448xf32>
    %167 = vector.extract_strided_slice %151 {offsets = [10, 0], sizes = [1, 448], strides = [1, 1]} : vector<14x448xf32> to vector<1x448xf32>
    %168 = vector.extract_strided_slice %151 {offsets = [11, 0], sizes = [1, 448], strides = [1, 1]} : vector<14x448xf32> to vector<1x448xf32>
    %169 = arith.maximumf %167, %168 : vector<1x448xf32>
    %170 = vector.extract_strided_slice %151 {offsets = [12, 0], sizes = [1, 448], strides = [1, 1]} : vector<14x448xf32> to vector<1x448xf32>
    %171 = vector.extract_strided_slice %151 {offsets = [13, 0], sizes = [1, 448], strides = [1, 1]} : vector<14x448xf32> to vector<1x448xf32>
    %172 = arith.maximumf %170, %171 : vector<1x448xf32>
    %173 = tpu.concatenate %154, %157, %160, %163, %166, %169, %172 in 0 : vector<1x448xf32>, vector<1x448xf32>, vector<1x448xf32>, vector<1x448xf32>, vector<1x448xf32>, vector<1x448xf32>, vector<1x448xf32> -> vector<7x448xf32>
    %174 = vector.shape_cast %173 : vector<7x448xf32> to vector<1x7x448xf32>
    %c0_31 = arith.constant 0 : index
    %c0_32 = arith.constant 0 : index
    %c0_33 = arith.constant 0 : index
    %175 = vector.load %arg6[%c0_31, %c0_32, %c0_33] : memref<1x7x448xf32, #tpu.memory_space<vmem>>, vector<1x7x448xf32>
    tpu.vector_store %arg6[%c0_31, %c0_32, %c0_33], %174 {strides = array<i32>} : memref<1x7x448xf32, #tpu.memory_space<vmem>>, vector<1x7x448xf32>,
    return
  }
  func.func @transform_0(%arg0: i32) -> (i32, i32, i32) {
    %c0_i32 = arith.constant 0 : i32
    %c0_i32_0 = arith.constant 0 : i32
    %c0_i32_1 = arith.constant 0 : i32
    return %arg0, %c0_i32, %c0_i32_0 : i32, i32, i32
  }
  func.func @transform_1(%arg0: i32) -> (i32, i32, i32) {
    %c0_i32 = arith.constant 0 : i32
    %c0_i32_0 = arith.constant 0 : i32
    %c0_i32_1 = arith.constant 0 : i32
    %c0_i32_2 = arith.constant 0 : i32
    return %c0_i32, %c0_i32_0, %c0_i32_1 : i32, i32, i32
  }
  func.func @transform_2(%arg0: i32) -> (i32, i32) {
    %c0_i32 = arith.constant 0 : i32
    %c0_i32_0 = arith.constant 0 : i32
    %c0_i32_1 = arith.constant 0 : i32
    return %c0_i32, %c0_i32_0 : i32, i32
  }
  func.func @transform_3(%arg0: i32) -> (i32, i32, i32) {
    %c0_i32 = arith.constant 0 : i32
    %c0_i32_0 = arith.constant 0 : i32
    %c0_i32_1 = arith.constant 0 : i32
    %c0_i32_2 = arith.constant 0 : i32
    return %c0_i32, %c0_i32_0, %c0_i32_1 : i32, i32, i32
  }
  func.func @transform_4(%arg0: i32) -> (i32, i32) {
    %c0_i32 = arith.constant 0 : i32
    %c0_i32_0 = arith.constant 0 : i32
    %c0_i32_1 = arith.constant 0 : i32
    return %c0_i32, %c0_i32_0 : i32, i32
  }
  func.func @transform_5(%arg0: i32) -> (i32, i32, i32) {
    %c0_i32 = arith.constant 0 : i32
    %c0_i32_0 = arith.constant 0 : i32
    %c0_i32_1 = arith.constant 0 : i32
    return %arg0, %c0_i32, %c0_i32_0 : i32, i32, i32
  }
}

module attributes {stable_mosaic.version = 11 : i64} {
  func.func @_head_kernel(%arg0: i32, %arg1: memref<2x3136xf32, #tpu.memory_space<vmem>>, %arg2: memref<3136x128xf32, #tpu.memory_space<vmem>>, %arg3: memref<1x128xf32, #tpu.memory_space<vmem>>, %arg4: memref<128x10xf32, #tpu.memory_space<vmem>>, %arg5: memref<1x10xf32, #tpu.memory_space<vmem>>, %arg6: memref<2x10xf32, #tpu.memory_space<vmem>>) attributes {dimension_semantics = [#tpu.dimension_semantics<parallel>], iteration_bounds = array<i64: 1>, scalar_prefetch = 0 : i64, scratch_operands = 0 : i64, tpu.core_type = #tpu.core_type<tc>, window_params = [{transform_indices = @transform_0, window_bounds = array<i64: 2, 3136>}, {pipeline_mode = #tpu.pipeline_mode<synchronous>, transform_indices = @transform_1, window_bounds = array<i64: 3136, 128>}, {pipeline_mode = #tpu.pipeline_mode<synchronous>, transform_indices = @transform_2, window_bounds = array<i64: 1, 128>}, {pipeline_mode = #tpu.pipeline_mode<synchronous>, transform_indices = @transform_3, window_bounds = array<i64: 128, 10>}, {pipeline_mode = #tpu.pipeline_mode<synchronous>, transform_indices = @transform_4, window_bounds = array<i64: 1, 10>}, {transform_indices = @transform_5, window_bounds = array<i64: 2, 10>}]} {
    %c0 = arith.constant 0 : index
    %c0_0 = arith.constant 0 : index
    %0 = vector.load %arg1[%c0, %c0_0] : memref<2x3136xf32, #tpu.memory_space<vmem>>, vector<2x3136xf32>
    %c0_1 = arith.constant 0 : index
    %c0_2 = arith.constant 0 : index
    %1 = vector.load %arg2[%c0_1, %c0_2] : memref<3136x128xf32, #tpu.memory_space<vmem>>, vector<3136x128xf32>
    %cst = arith.constant dense<0.000000e+00> : vector<2x128xf32>
    %2 = tpu.matmul %0, %1, %cst {dimension_numbers = #tpu.dot_dimension_numbers<[1], [0], [0], [1], [0, 0, 1, 1], [], []>} : vector<2x3136xf32>, vector<3136x128xf32>, vector<2x128xf32> -> vector<2x128xf32>
    %c0_3 = arith.constant 0 : index
    %c0_4 = arith.constant 0 : index
    %3 = vector.load %arg3[%c0_3, %c0_4] : memref<1x128xf32, #tpu.memory_space<vmem>>, vector<1x128xf32>
    %4 = vector.broadcast %3 : vector<1x128xf32> to vector<2x128xf32>
    %5 = arith.addf %2, %4 : vector<2x128xf32>
    %cst_5 = arith.constant 0.000000e+00 : f32
    %6 = vector.broadcast %cst_5 : f32 to vector<2x128xf32>
    %7 = arith.maximumf %5, %6 : vector<2x128xf32>
    %c0_6 = arith.constant 0 : index
    %c0_7 = arith.constant 0 : index
    %8 = vector.load %arg4[%c0_6, %c0_7] : memref<128x10xf32, #tpu.memory_space<vmem>>, vector<128x10xf32>
    %cst_8 = arith.constant dense<0.000000e+00> : vector<2x10xf32>
    %9 = tpu.matmul %7, %8, %cst_8 {dimension_numbers = #tpu.dot_dimension_numbers<[1], [0], [0], [1], [0, 0, 1, 1], [], []>} : vector<2x128xf32>, vector<128x10xf32>, vector<2x10xf32> -> vector<2x10xf32>
    %c0_9 = arith.constant 0 : index
    %c0_10 = arith.constant 0 : index
    %10 = vector.load %arg5[%c0_9, %c0_10] : memref<1x10xf32, #tpu.memory_space<vmem>>, vector<1x10xf32>
    %11 = vector.broadcast %10 : vector<1x10xf32> to vector<2x10xf32>
    %12 = arith.addf %9, %11 : vector<2x10xf32>
    %c0_11 = arith.constant 0 : index
    %c0_12 = arith.constant 0 : index
    %13 = vector.load %arg6[%c0_11, %c0_12] : memref<2x10xf32, #tpu.memory_space<vmem>>, vector<2x10xf32>
    tpu.vector_store %arg6[%c0_11, %c0_12], %12 {strides = array<i32>} : memref<2x10xf32, #tpu.memory_space<vmem>>, vector<2x10xf32>,
    return
  }
  func.func @transform_0(%arg0: i32) -> (i32, i32) {
    %c0_i32 = arith.constant 0 : i32
    %c0_i32_0 = arith.constant 0 : i32
    return %arg0, %c0_i32 : i32, i32
  }
  func.func @transform_1(%arg0: i32) -> (i32, i32) {
    %c0_i32 = arith.constant 0 : i32
    %c0_i32_0 = arith.constant 0 : i32
    %c0_i32_1 = arith.constant 0 : i32
    return %c0_i32, %c0_i32_0 : i32, i32
  }
  func.func @transform_2(%arg0: i32) -> (i32, i32) {
    %c0_i32 = arith.constant 0 : i32
    %c0_i32_0 = arith.constant 0 : i32
    %c0_i32_1 = arith.constant 0 : i32
    return %c0_i32, %c0_i32_0 : i32, i32
  }
  func.func @transform_3(%arg0: i32) -> (i32, i32) {
    %c0_i32 = arith.constant 0 : i32
    %c0_i32_0 = arith.constant 0 : i32
    %c0_i32_1 = arith.constant 0 : i32
    return %c0_i32, %c0_i32_0 : i32, i32
  }
  func.func @transform_4(%arg0: i32) -> (i32, i32) {
    %c0_i32 = arith.constant 0 : i32
    %c0_i32_0 = arith.constant 0 : i32
    %c0_i32_1 = arith.constant 0 : i32
    return %c0_i32, %c0_i32_0 : i32, i32
  }
  func.func @transform_5(%arg0: i32) -> (i32, i32) {
    %c0_i32 = arith.constant 0 : i32
    %c0_i32_0 = arith.constant 0 : i32
    return %arg0, %c0_i32 : i32, i32
  }
}

</mosaic_0001>

<bundles_post_ra>
// kernel: forward.3
= control target key start
LH: loop header
LB: loop body
LE: loop exit
PB: predicated region body
PF: predicated region fallthrough
CT: control target
= control target key end

     0   :  { %v2549_v43 = vmov 1983009808   ;;  %v438_v45 = vlaneseq  ;;  %s3923_s0 = inlined_call_operand.vmem [shape: f32[2,3136], index: 0, kind: input, shape index: {}]   ;;  %s3924_s1 = inlined_call_operand.vmem [shape: f32[3136,128], index: 1, kind: input, shape index: {}]   ;;  %s3925_s2 = inlined_call_operand.vmem [shape: f32[1,128], index: 2, kind: input, shape index: {}]   ;;  %s3926_s3 = inlined_call_operand.vmem [shape: f32[128,10], index: 3, kind: input, shape index: {}]   ;;  %s3927_s4 = inlined_call_operand.vmem [shape: f32[1,10], index: 4, kind: input, shape index: {}]   ;;  %s3928_s5 = inlined_call_operand.hbm [shape: f32[2,10], index: 5, kind: output, shape index: {}]  }
   0x1   :  { %v44_v0 = vld [vmem:[%s3924_s1 + $0x80] sm:$0xff]  ;;  %v45_v1 = vld [vmem:[%s3924_s1 + $0x88] sm:$0xff]  ;;  %v46_v11 = vld [vmem:[%s3924_s1 + $0x90] sm:$0xff]  ;;  %v436_v44 = vunpack.c.l.s4 %v2549_v43 }
   0x2   :  { %v28_v2 = vld [vmem:[%s3924_s1] sm:$0xff]  ;;  %v2094_v3 = vpack.c.bf16 %v45_v1, %v44_v0  ;;  %v29_v4 = vld [vmem:[%s3924_s1 + $0x8] sm:$0xff]  ;;  %v47_v13 = vld [vmem:[%s3924_s1 + $0x98] sm:$0xff]  ;;  %v439_v60 = vshrl.u32 %v438_v45, 7 }
   0x3   :  { %v76_v5 = vld [vmem:[%s3924_s1 + $0x180] sm:$0xff]  ;;  %v77_v6 = vld [vmem:[%s3924_s1 + $0x188] sm:$0xff]  ;;  %v2096_v7 = vpack.c.bf16 %v29_v4, %v28_v2  ;;  %v30_v14 = vld [vmem:[%s3924_s1 + $0x10] sm:$0xff]  ;;  %v2098_v16 = vpack.c.bf16 %v47_v13, %v46_v11  ;;  %v437_v59 = vunpack.c.0.s8 %v436_v44 }
   0x4   :  { %v2126_v8 = vpack.c.bf16 %v77_v6, %v76_v5  ;;  %v60_v9 = vld [vmem:[%s3924_s1 + $0x100] sm:$0xff]  ;;  %v61_v10 = vld [vmem:[%s3924_s1 + $0x108] sm:$0xff]  ;;  %2095 = vmatprep.subr.bf16.mxu0 %v2094_v3  ;;  %v31_v15 = vld [vmem:[%s3924_s1 + $0x18] sm:$0xff] }
   0x5   :  { %v2128_v12 = vpack.c.bf16 %v61_v10, %v60_v9  ;;  %2097 = vmatpush3.bf16.msra.mxu0 %v2096_v7  ;;  %v2100_v17 = vpack.c.bf16 %v31_v15, %v30_v14  ;;  %v78_v18 = vld [vmem:[%s3924_s1 + $0x190] sm:$0xff]  ;;  %v79_v19 = vld [vmem:[%s3924_s1 + $0x198] sm:$0xff]  ;;  %v48_v23 = vld [vmem:[%s3924_s1 + $0xa0] sm:$0xff]  ;;  %v2728_v10 = vsub.s32 %v437_v59, %v439_v60 }
   0x6   :  { %2127 = vmatprep.subr.bf16.mxu1 %v2126_v8  ;;  %v62_v20 = vld [vmem:[%s3924_s1 + $0x110] sm:$0xff]  ;;  %v2130_v21 = vpack.c.bf16 %v79_v19, %v78_v18  ;;  %v63_v22 = vld [vmem:[%s3924_s1 + $0x118] sm:$0xff]  ;;  %v49_v24 = vld [vmem:[%s3924_s1 + $0xa8] sm:$0xff]  ;;  %2099 = vmatprep.subr.bf16.mxu0 %v2098_v16 }
   0x7   :  { %2129 = vmatpush3.bf16.msra.mxu1 %v2128_v12  ;;  %v2132_v25 = vpack.c.bf16 %v63_v22, %v62_v20  ;;  %v2102_v26 = vpack.c.bf16 %v49_v24, %v48_v23  ;;  %v32_v27 = vld [vmem:[%s3924_s1 + $0x20] sm:$0xff]  ;;  %v33_v28 = vld [vmem:[%s3924_s1 + $0x28] sm:$0xff]  ;;  %v50_v35 = vld [vmem:[%s3924_s1 + $0xb0] sm:$0xff] }
   0x8   :  { %v80_v29 = vld [vmem:[%s3924_s1 + $0x1a0] sm:$0xff]  ;;  %2131 = vmatprep.subr.bf16.mxu1 %v2130_v21  ;;  %v81_v30 = vld [vmem:[%s3924_s1 + $0x1a8] sm:$0xff]  ;;  %v2104_v33 = vpack.c.bf16 %v33_v28, %v32_v27  ;;  %v51_v36 = vld [vmem:[%s3924_s1 + $0xb8] sm:$0xff] }
   0x9   :  { %v64_v31 = vld [vmem:[%s3924_s1 + $0x120] sm:$0xff]  ;;  %v65_v32 = vld [vmem:[%s3924_s1 + $0x128] sm:$0xff]  ;;  %2101 = vmatpush3.bf16.msra.mxu0 %v2100_v17  ;;  %v2134_v34 = vpack.c.bf16 %v81_v30, %v80_v29  ;;  %v34_v37 = vld [vmem:[%s3924_s1 + $0x30] sm:$0xff]  ;;  %v2106_v39 = vpack.c.bf16 %v51_v36, %v50_v35 }
   0xa   :  { %2103 = vmatprep.subr.bf16.mxu0 %v2102_v26  ;;  %v2136_v38 = vpack.c.bf16 %v65_v32, %v64_v31  ;;  %v35_v40 = vld [vmem:[%s3924_s1 + $0x38] sm:$0xff]  ;;  %v82_v41 = vld [vmem:[%s3924_s1 + $0x1b0] sm:$0xff]  ;;  %v52_v49 = vld [vmem:[%s3924_s1 + $0xc0] sm:$0xff] }
   0xb   :  { %2133 = vmatpush3.bf16.msra.mxu1 %v2132_v25  ;;  %v83_v42 = vld [vmem:[%s3924_s1 + $0x1b8] sm:$0xff]  ;;  %v66_v47 = vld [vmem:[%s3924_s1 + $0x130] sm:$0xff]  ;;  %v53_v50 = vld [vmem:[%s3924_s1 + $0xc8] sm:$0xff]  ;;  %v2108_v51 = vpack.c.bf16 %v35_v40, %v34_v37 }
   0xc   :  { %2135 = vmatprep.subr.bf16.mxu1 %v2134_v34  ;;  %v2138_v46 = vpack.c.bf16 %v83_v42, %v82_v41  ;;  %v67_v48 = vld [vmem:[%s3924_s1 + $0x138] sm:$0xff]  ;;  %v84_v52 = vld [vmem:[%s3924_s1 + $0x1c0] sm:$0xff]  ;;  %v85_v53 = vld [vmem:[%s3924_s1 + $0x1c8] sm:$0xff]  ;;  %v2110_v55 = vpack.c.bf16 %v53_v50, %v52_v49 }
   0xd   :  { %2105 = vmatpush3.bf16.msra.mxu0 %v2104_v33  ;;  %v2140_v54 = vpack.c.bf16 %v67_v48, %v66_v47  ;;  %v36_v56 = vld [vmem:[%s3924_s1 + $0x40] sm:$0xff]  ;;  %v37_v57 = vld [vmem:[%s3924_s1 + $0x48] sm:$0xff]  ;;  %v2142_v61 = vpack.c.bf16 %v85_v53, %v84_v52  ;;  %v54_v63 = vld [vmem:[%s3924_s1 + $0xd0] sm:$0xff] }
   0xe   :  { %2107 = vmatprep.subr.bf16.mxu0 %v2106_v39  ;;  %v68_v58 = vld [vmem:[%s3924_s1 + $0x140] sm:$0xff]  ;;  %v69_v62 = vld [vmem:[%s3924_s1 + $0x148] sm:$0xff]  ;;  %v55_v0 = vld [vmem:[%s3924_s1 + $0xd8] sm:$0xff]  ;;  %v2112_v3 = vpack.c.bf16 %v37_v57, %v36_v56 }
   0xf   :  { %2137 = vmatpush3.bf16.msra.mxu1 %v2136_v38  ;;  %v86_v1 = vld [vmem:[%s3924_s1 + $0x1d0] sm:$0xff]  ;;  %v87_v2 = vld [vmem:[%s3924_s1 + $0x1d8] sm:$0xff]  ;;  %v2144_v5 = vpack.c.bf16 %v69_v62, %v68_v58  ;;  %v2114_v6 = vpack.c.bf16 %v55_v0, %v54_v63  ;;  %v56_v12 = vld [vmem:[%s3924_s1 + $0xe0] sm:$0xff] }
  0x10   :  { %2139 = vmatprep.subr.bf16.mxu1 %v2138_v46  ;;  %v38_v4 = vld [vmem:[%s3924_s1 + $0x50] sm:$0xff]  ;;  %v39_v7 = vld [vmem:[%s3924_s1 + $0x58] sm:$0xff]  ;;  %v2146_v11 = vpack.c.bf16 %v87_v2, %v86_v1  ;;  %v57_v13 = vld [vmem:[%s3924_s1 + $0xe8] sm:$0xff] }
  0x11   :  { %2109 = vmatpush3.bf16.msra.mxu0 %v2108_v51  ;;  %v70_v8 = vld [vmem:[%s3924_s1 + $0x150] sm:$0xff]  ;;  %v71_v9 = vld [vmem:[%s3924_s1 + $0x158] sm:$0xff]  ;;  %v88_v14 = vld [vmem:[%s3924_s1 + $0x1e0] sm:$0xff]  ;;  %v2116_v16 = vpack.c.bf16 %v39_v7, %v38_v4  ;;  %v2118_v19 = vpack.c.bf16 %v57_v13, %v56_v12 }
  0x12   :  { %2111 = vmatprep.subr.bf16.mxu0 %v2110_v55  ;;  %v89_v15 = vld [vmem:[%s3924_s1 + $0x1e8] sm:$0xff]  ;;  %v2148_v17 = vpack.c.bf16 %v71_v9, %v70_v8  ;;  %v21_v18 = vld [vmem:[%s3923_s0] sm:$0xff]  ;;  %v58_v27 = vld [vmem:[%s3924_s1 + $0xf0] sm:$0xff] }
  0x13   :  { %2141 = vmatpush3.bf16.msra.mxu1 %v2140_v54  ;;  %v40_v20 = vld [vmem:[%s3924_s1 + $0x60] sm:$0xff]  ;;  %v41_v21 = vld [vmem:[%s3924_s1 + $0x68] sm:$0xff]  ;;  %v441_v23 = vrot.slane %v21_v18, %v2728_v10  ;;  %v434_v24 = vcombine.high %v21_v18, %v21_v18  ;;  %v2150_v25 = vpack.c.bf16 %v89_v15, %v88_v14  ;;  %v59_v28 = vld [vmem:[%s3924_s1 + $0xf8] sm:$0xff] }
  0x14   :  { %2143 = vmatprep.subr.bf16.mxu1 %v2142_v61  ;;  %v72_v22 = vld [vmem:[%s3924_s1 + $0x160] sm:$0xff]  ;;  %v73_v26 = vld [vmem:[%s3924_s1 + $0x168] sm:$0xff]  ;;  %v90_v29 = vld [vmem:[%s3924_s1 + $0x1f0] sm:$0xff]  ;;  %v2120_v33 = vpack.c.bf16 %v41_v21, %v40_v20  ;;  %v2122_v35 = vpack.c.bf16 %v59_v28, %v58_v27 }
  0x15   :  { %2113 = vmatpush3.bf16.msra.mxu0 %v2112_v3  ;;  %v91_v30 = vld [vmem:[%s3924_s1 + $0x1f8] sm:$0xff]  ;;  %v449_v31 = vcombine.high %v441_v23, %v441_v23  ;;  %v448_v32 = vrot.slane %v434_v24, %v2728_v10  ;;  %v2152_v34 = vpack.c.bf16 %v73_v26, %v72_v22  ;;  %v42_v36 = vld [vmem:[%s3924_s1 + $0x70] sm:$0xff]  ;;  %v108_v42 = vld [vmem:[%s3924_s1 + $0x280] sm:$0xff] }
  0x16   :  { %2115 = vmatprep.subr.bf16.mxu0 %v2114_v6  ;;  %v43_v37 = vld [vmem:[%s3924_s1 + $0x78] sm:$0xff]  ;;  %v74_v38 = vld [vmem:[%s3924_s1 + $0x170] sm:$0xff]  ;;  %v2154_v40 = vpack.c.bf16 %v91_v30, %v90_v29  ;;  %v109_v43 = vld [vmem:[%s3924_s1 + $0x288] sm:$0xff] }
  0x17   :  { %2145 = vmatpush3.bf16.msra.mxu1 %v2144_v5  ;;  %v450_v39 = vcombine.high %v448_v32, %v448_v32  ;;  %634 = vmatprep.mubr.f32.mxu0 %v449_v31  ;;  %v75_v41 = vld [vmem:[%s3924_s1 + $0x178] sm:$0xff]  ;;  %v140_v44 = vld [vmem:[%s3924_s1 + $0x380] sm:$0xff]  ;;  %v141_v45 = vld [vmem:[%s3924_s1 + $0x388] sm:$0xff]  ;;  %v2124_v46 = vpack.c.bf16 %v43_v37, %v42_v36  ;;  %v2158_v48 = vpack.c.bf16 %v109_v43, %v108_v42 }
  0x18   :  { %2147 = vmatprep.subr.bf16.mxu1 %v2146_v11  ;;  %v2156_v47 = vpack.c.bf16 %v75_v41, %v74_v38  ;;  %v92_v49 = vld [vmem:[%s3924_s1 + $0x200] sm:$0xff]  ;;  %v93_v50 = vld [vmem:[%s3924_s1 + $0x208] sm:$0xff]  ;;  %v2190_v52 = vpack.c.bf16 %v141_v45, %v140_v44  ;;  %v110_v54 = vld [vmem:[%s3924_s1 + $0x290] sm:$0xff] }
  0x19   :  { %2117 = vmatpush3.bf16.msra.mxu0 %v2116_v16  ;;  %704 = vmatprep.mubr.f32.mxu1 %v450_v39  ;;  %v124_v51 = vld [vmem:[%s3924_s1 + $0x300] sm:$0xff]  ;;  %v125_v53 = vld [vmem:[%s3924_s1 + $0x308] sm:$0xff]  ;;  %v111_v55 = vld [vmem:[%s3924_s1 + $0x298] sm:$0xff]  ;;  %v2160_v58 = vpack.c.bf16 %v93_v50, %v92_v49 }
  0x1a   :  { %2119 = vmatprep.subr.bf16.mxu0 %v2118_v19  ;;  %v142_v56 = vld [vmem:[%s3924_s1 + $0x390] sm:$0xff]  ;;  %v143_v57 = vld [vmem:[%s3924_s1 + $0x398] sm:$0xff]  ;;  %v2192_v59 = vpack.c.bf16 %v125_v53, %v124_v51  ;;  %v2162_v60 = vpack.c.bf16 %v111_v55, %v110_v54  ;;  %v112_v2 = vld [vmem:[%s3924_s1 + $0x2a0] sm:$0xff] }
  0x1b   :  { %2149 = vmatpush3.bf16.msra.mxu1 %v2148_v17  ;;  %v94_v61 = vld [vmem:[%s3924_s1 + $0x210] sm:$0xff]  ;;  %v95_v62 = vld [vmem:[%s3924_s1 + $0x218] sm:$0xff]  ;;  %v2194_v0 = vpack.c.bf16 %v143_v57, %v142_v56  ;;  %v113_v3 = vld [vmem:[%s3924_s1 + $0x2a8] sm:$0xff] }
  0x1c   :  { %2151 = vmatprep.subr.bf16.mxu1 %v2150_v25  ;;  %v126_v63 = vld [vmem:[%s3924_s1 + $0x310] sm:$0xff]  ;;  %v127_v1 = vld [vmem:[%s3924_s1 + $0x318] sm:$0xff]  ;;  %v144_v4 = vld [vmem:[%s3924_s1 + $0x3a0] sm:$0xff]  ;;  %v2164_v6 = vpack.c.bf16 %v95_v62, %v94_v61  ;;  %v2166_v8 = vpack.c.bf16 %v113_v3, %v112_v2 }
  0x1d   :  { %2121 = vmatpush3.bf16.msra.mxu0 %v2120_v33  ;;  %v145_v5 = vld [vmem:[%s3924_s1 + $0x3a8] sm:$0xff]  ;;  %v2196_v7 = vpack.c.bf16 %v127_v1, %v126_v63  ;;  %v96_v9 = vld [vmem:[%s3924_s1 + $0x220] sm:$0xff]  ;;  %v114_v15 = vld [vmem:[%s3924_s1 + $0x2b0] sm:$0xff] }
  0x1e   :  { %2123 = vmatprep.subr.bf16.mxu0 %v2122_v35  ;;  %v97_v11 = vld [vmem:[%s3924_s1 + $0x228] sm:$0xff]  ;;  %v128_v12 = vld [vmem:[%s3924_s1 + $0x320] sm:$0xff]  ;;  %v2198_v13 = vpack.c.bf16 %v145_v5, %v144_v4  ;;  %v115_v16 = vld [vmem:[%s3924_s1 + $0x2b8] sm:$0xff] }
  0x1f   :  { %2153 = vmatpush3.bf16.msra.mxu1 %v2152_v34  ;;  %v129_v14 = vld [vmem:[%s3924_s1 + $0x328] sm:$0xff]  ;;  %v146_v17 = vld [vmem:[%s3924_s1 + $0x3b0] sm:$0xff]  ;;  %v147_v18 = vld [vmem:[%s3924_s1 + $0x3b8] sm:$0xff]  ;;  %v2168_v19 = vpack.c.bf16 %v97_v11, %v96_v9  ;;  %v2170_v22 = vpack.c.bf16 %v115_v16, %v114_v15 }
  0x20   :  { %2155 = vmatprep.subr.bf16.mxu1 %v2154_v40  ;;  %v98_v20 = vld [vmem:[%s3924_s1 + $0x230] sm:$0xff]  ;;  %v2200_v21 = vpack.c.bf16 %v129_v14, %v128_v12  ;;  %v131_v25 = vld [vmem:[%s3924_s1 + $0x338] sm:$0xff]  ;;  %v2202_v26 = vpack.c.bf16 %v147_v18, %v146_v17  ;;  %v116_v27 = vld [vmem:[%s3924_s1 + $0x2c0] sm:$0xff] }
  0x21   :  { %2125 = vmatpush3.bf16.msra.mxu0 %v2124_v46  ;;  %v130_v24 = vld [vmem:[%s3924_s1 + $0x330] sm:$0xff]  ;;  %v117_v28 = vld [vmem:[%s3924_s1 + $0x2c8] sm:$0xff]  ;;  %v148_v30 = vld [vmem:[%s3924_s1 + $0x3c0] sm:$0xff] }
  0x22   :  { %2159 = vmatprep.subr.bf16.mxu0 %v2158_v48  ;;  %v22_v29 = vld [vmem:[%s3923_s0 + $0x8] sm:$0xff]  ;;  %v2204_v35 = vpack.c.bf16 %v131_v25, %v130_v24  ;;  %v2174_v36 = vpack.c.bf16 %v117_v28, %v116_v27  ;;  %v100_v37 = vld [vmem:[%s3924_s1 + $0x240] sm:$0xff]  ;;  %v118_v44 = vld [vmem:[%s3924_s1 + $0x2d0] sm:$0xff] }
  0x23   :  { %2157 = vmatpush3.bf16.msra.mxu1 %v2156_v47  ;;  %v149_v31 = vld [vmem:[%s3924_s1 + $0x3c8] sm:$0xff]  ;;  %v451_v33 = vcombine.high %v22_v29, %v22_v29  ;;  %v132_v39 = vld [vmem:[%s3924_s1 + $0x340] sm:$0xff]  ;;  %v119_v45 = vld [vmem:[%s3924_s1 + $0x2d8] sm:$0xff] }
  0x24   :  { %2191 = vmatprep.subr.bf16.mxu1 %v2190_v52  ;;  %635 = vmatmul.mubr.f32.vlgmr.msra.gmra.mrb[0].mxu0 %v441_v23  ;;  %v99_v23 = vld [vmem:[%s3924_s1 + $0x238] sm:$0xff]  ;;  %v101_v38 = vld [vmem:[%s3924_s1 + $0x248] sm:$0xff]  ;;  %v2206_v42 = vpack.c.bf16 %v149_v31, %v148_v30  ;;  %v150_v46 = vld [vmem:[%s3924_s1 + $0x3d0] sm:$0xff]  ;;  %v2178_v51 = vpack.c.bf16 %v119_v45, %v118_v44 }
  0x25   :  { %2161 = vmatpush3.bf16.msra.mxu0 %v2160_v58  ;;  %v2172_v34 = vpack.c.bf16 %v99_v23, %v98_v20  ;;  %v2909_v41 = vrot.slane %v451_v33, %v2728_v10  ;;  %v133_v43 = vld [vmem:[%s3924_s1 + $0x348] sm:$0xff]  ;;  %v151_v47 = vld [vmem:[%s3924_s1 + $0x3d8] sm:$0xff]  ;;  %v2176_v49 = vpack.c.bf16 %v101_v38, %v100_v37  ;;  %v102_v52 = vld [vmem:[%s3924_s1 + $0x250] sm:$0xff] }
  0x26   :  { %705 = vmatmul.mubr.f32.vlgmr.msra.gmra.mrb[0].mxu1 %v448_v32  ;;  %2163 = vmatprep.subr.bf16.mxu0 %v2162_v60  ;;  %v2895_v32 = vrot.slane %v22_v29, %v2728_v10  ;;  %v2208_v50 = vpack.c.bf16 %v133_v43, %v132_v39  ;;  %v103_v53 = vld [vmem:[%s3924_s1 + $0x258] sm:$0xff]  ;;  %v134_v54 = vld [vmem:[%s3924_s1 + $0x350] sm:$0xff]  ;;  %v2210_v55 = vpack.c.bf16 %v151_v47, %v150_v46  ;;  %v120_v57 = vld [vmem:[%s3924_s1 + $0x2e0] sm:$0xff] }
  0x27   :  { %2193 = vmatpush3.bf16.msra.mxu1 %v2192_v59  ;;  %v467_v48 = vcombine.high %v2909_v41, %v2909_v41  ;;  %v135_v56 = vld [vmem:[%s3924_s1 + $0x358] sm:$0xff]  ;;  %v121_v58 = vld [vmem:[%s3924_s1 + $0x2e8] sm:$0xff]  ;;  %v152_v59 = vld [vmem:[%s3924_s1 + $0x3e0] sm:$0xff]  ;;  %v2180_v61 = vpack.c.bf16 %v103_v53, %v102_v52 }
  0x28   :  { %2195 = vmatprep.subr.bf16.mxu1 %v2194_v0  ;;  %v466_v40 = vcombine.high %v2895_v32, %v2895_v32  ;;  %v153_v60 = vld [vmem:[%s3924_s1 + $0x3e8] sm:$0xff]  ;;  %v2212_v62 = vpack.c.bf16 %v135_v56, %v134_v54  ;;  %v2182_v63 = vpack.c.bf16 %v121_v58, %v120_v57  ;;  %v104_v0 = vld [vmem:[%s3924_s1 + $0x260] sm:$0xff]  ;;  %v122_v5 = vld [vmem:[%s3924_s1 + $0x2f0] sm:$0xff] }
  0x29   :  { %2165 = vmatpush3.bf16.msra.mxu0 %v2164_v6  ;;  %844 = vmatprep.mubr.f32.mxu1 %v467_v48  ;;  %v105_v1 = vld [vmem:[%s3924_s1 + $0x268] sm:$0xff]  ;;  %v136_v2 = vld [vmem:[%s3924_s1 + $0x360] sm:$0xff]  ;;  %v2214_v3 = vpack.c.bf16 %v153_v60, %v152_v59  ;;  %v123_v6 = vld [vmem:[%s3924_s1 + $0x2f8] sm:$0xff] }
  0x2a   :  { %2167 = vmatprep.subr.bf16.mxu0 %v2166_v8  ;;  %774 = vmatprep.mubr.f32.mxu0 %v466_v40  ;;  %v137_v4 = vld [vmem:[%s3924_s1 + $0x368] sm:$0xff]  ;;  %v155_v8 = vld [vmem:[%s3924_s1 + $0x3f8] sm:$0xff]  ;;  %v2184_v9 = vpack.c.bf16 %v105_v1, %v104_v0  ;;  %v2186_v12 = vpack.c.bf16 %v123_v6, %v122_v5  ;;  %v138_v15 = vld [vmem:[%s3924_s1 + $0x370] sm:$0xff] }
  0x2b   :  { %2197 = vmatpush3.bf16.msra.mxu1 %v2196_v7  ;;  %v154_v7 = vld [vmem:[%s3924_s1 + $0x3f0] sm:$0xff]  ;;  %v2216_v11 = vpack.c.bf16 %v137_v4, %v136_v2  ;;  %v107_v14 = vld [vmem:[%s3924_s1 + $0x278] sm:$0xff]  ;;  %v172_v18 = vld [vmem:[%s3924_s1 + $0x480] sm:$0xff] }
  0x2c   :  { %2199 = vmatprep.subr.bf16.mxu1 %v2198_v13  ;;  %v106_v13 = vld [vmem:[%s3924_s1 + $0x270] sm:$0xff]  ;;  %v2218_v16 = vpack.c.bf16 %v155_v8, %v154_v7  ;;  %v139_v17 = vld [vmem:[%s3924_s1 + $0x378] sm:$0xff]  ;;  %v204_v20 = vld [vmem:[%s3924_s1 + $0x580] sm:$0xff] }
  0x2d   :  { %2169 = vmatpush3.bf16.msra.mxu0 %v2168_v19  ;;  %v173_v19 = vld [vmem:[%s3924_s1 + $0x488] sm:$0xff]  ;;  %v156_v23 = vld [vmem:[%s3924_s1 + $0x400] sm:$0xff]  ;;  %v2220_v24 = vpack.c.bf16 %v139_v17, %v138_v15  ;;  %v174_v30 = vld [vmem:[%s3924_s1 + $0x490] sm:$0xff] }
  0x2e   :  { %2171 = vmatprep.subr.bf16.mxu0 %v2170_v22  ;;  %v2188_v22 = vpack.c.bf16 %v107_v14, %v106_v13  ;;  %v2222_v25 = vpack.c.bf16 %v173_v19, %v172_v18  ;;  %v188_v27 = vld [vmem:[%s3924_s1 + $0x500] sm:$0xff]  ;;  %v189_v28 = vld [vmem:[%s3924_s1 + $0x508] sm:$0xff]  ;;  %v175_v31 = vld [vmem:[%s3924_s1 + $0x498] sm:$0xff] }
  0x2f   :  { %2201 = vmatpush3.bf16.msra.mxu1 %v2200_v21  ;;  %v205_v21 = vld [vmem:[%s3924_s1 + $0x588] sm:$0xff]  ;;  %v206_v33 = vld [vmem:[%s3924_s1 + $0x590] sm:$0xff]  ;;  %v2226_v38 = vpack.c.bf16 %v175_v31, %v174_v30  ;;  %v159_v40 = vld [vmem:[%s3924_s1 + $0x418] sm:$0xff] }
  0x30   :  { %2203 = vmatprep.subr.bf16.mxu1 %v2202_v26  ;;  %v157_v26 = vld [vmem:[%s3924_s1 + $0x408] sm:$0xff]  ;;  %v2254_v29 = vpack.c.bf16 %v205_v21, %v204_v20  ;;  %v23_v37 = vld [vmem:[%s3923_s0 + $0x10] sm:$0xff]  ;;  %v191_v46 = vld [vmem:[%s3924_s1 + $0x518] sm:$0xff] }
  0x31   :  { %2173 = vmatpush3.bf16.msra.mxu0 %v2172_v34  ;;  %v207_v34 = vld [vmem:[%s3924_s1 + $0x598] sm:$0xff]  ;;  %v158_v39 = vld [vmem:[%s3924_s1 + $0x410] sm:$0xff]  ;;  %v3037_v43 = vrot.slane %v23_v37, %v2728_v10  ;;  %v468_v44 = vcombine.high %v23_v37, %v23_v37  ;;  %v176_v47 = vld [vmem:[%s3924_s1 + $0x4a0] sm:$0xff] }
  0x32   :  { %2175 = vmatprep.subr.bf16.mxu0 %v2174_v36  ;;  %v2256_v36 = vpack.c.bf16 %v189_v28, %v188_v27  ;;  %v2258_v45 = vpack.c.bf16 %v207_v34, %v206_v33  ;;  %v177_v48 = vld [vmem:[%s3924_s1 + $0x4a8] sm:$0xff]  ;;  %v2228_v53 = vpack.c.bf16 %v159_v40, %v158_v39  ;;  %v192_v57 = vld [vmem:[%s3924_s1 + $0x520] sm:$0xff]  ;;  %v178_v60 = vld [vmem:[%s3924_s1 + $0x4b0] sm:$0xff] }
  0x33   :  { %2205 = vmatpush3.bf16.msra.mxu1 %v2204_v35  ;;  %v2224_v35 = vpack.c.bf16 %v157_v26, %v156_v23  ;;  %v3058_v52 = vrot.slane %v468_v44, %v2728_v10  ;;  %v2230_v54 = vpack.c.bf16 %v177_v48, %v176_v47  ;;  %v161_v56 = vld [vmem:[%s3924_s1 + $0x428] sm:$0xff]  ;;  %v163_v4 = vld [vmem:[%s3924_s1 + $0x438] sm:$0xff]  ;;  %v194_v5 = vld [vmem:[%s3924_s1 + $0x530] sm:$0xff] }
  0x34   :  { %2207 = vmatprep.subr.bf16.mxu1 %v2206_v42  ;;  %v190_v42 = vld [vmem:[%s3924_s1 + $0x510] sm:$0xff]  ;;  %v193_v59 = vld [vmem:[%s3924_s1 + $0x528] sm:$0xff]  ;;  %v195_v7 = vld [vmem:[%s3924_s1 + $0x538] sm:$0xff] }
  0x35   :  { %2177 = vmatpush3.bf16.msra.mxu0 %v2176_v49  ;;  %v208_v49 = vld [vmem:[%s3924_s1 + $0x5a0] sm:$0xff]  ;;  %v2264_v1 = vpack.c.bf16 %v193_v59, %v192_v57  ;;  %v2268_v14 = vpack.c.bf16 %v195_v7, %v194_v5  ;;  %v165_v17 = vld [vmem:[%s3924_s1 + $0x448] sm:$0xff]  ;;  %v182_v21 = vld [vmem:[%s3924_s1 + $0x4d0] sm:$0xff] }
  0x36   :  { %2179 = vmatprep.subr.bf16.mxu0 %v2178_v51  ;;  %v483_v51 = vcombine.high %v3037_v43, %v3037_v43  ;;  %v180_v8 = vld [vmem:[%s3924_s1 + $0x4c0] sm:$0xff]  ;;  %v197_v20 = vld [vmem:[%s3924_s1 + $0x548] sm:$0xff]  ;;  %v214_v23 = vld [vmem:[%s3924_s1 + $0x5d0] sm:$0xff] }
  0x37   :  { %2209 = vmatpush3.bf16.msra.mxu1 %v2208_v50  ;;  %v209_v50 = vld [vmem:[%s3924_s1 + $0x5a8] sm:$0xff]  ;;  %v196_v18 = vld [vmem:[%s3924_s1 + $0x540] sm:$0xff]  ;;  %v166_v28 = vld [vmem:[%s3924_s1 + $0x450] sm:$0xff] }
  0x38   :  { %2211 = vmatprep.subr.bf16.mxu1 %v2210_v55  ;;  %v160_v55 = vld [vmem:[%s3924_s1 + $0x420] sm:$0xff]  ;;  %v2262_v58 = vpack.c.bf16 %v209_v50, %v208_v49  ;;  %v2272_v26 = vpack.c.bf16 %v197_v20, %v196_v18  ;;  %v198_v30 = vld [vmem:[%s3924_s1 + $0x550] sm:$0xff]  ;;  %v199_v33 = vld [vmem:[%s3924_s1 + $0x558] sm:$0xff] }
  0x39   :  { %2181 = vmatpush3.bf16.msra.mxu0 %v2180_v61  ;;  %v179_v61 = vld [vmem:[%s3924_s1 + $0x4b8] sm:$0xff]  ;;  %v2232_v0 = vpack.c.bf16 %v161_v56, %v160_v55  ;;  %v184_v34 = vld [vmem:[%s3924_s1 + $0x4e0] sm:$0xff]  ;;  %v217_v37 = vld [vmem:[%s3924_s1 + $0x5e8] sm:$0xff]  ;;  %v2276_v39 = vpack.c.bf16 %v199_v33, %v198_v30 }
  0x3a   :  { %2183 = vmatprep.subr.bf16.mxu0 %v2182_v63  ;;  %v211_v63 = vld [vmem:[%s3924_s1 + $0x5b8] sm:$0xff]  ;;  %v2234_v2 = vpack.c.bf16 %v179_v61, %v178_v60  ;;  %v169_v44 = vld [vmem:[%s3924_s1 + $0x468] sm:$0xff]  ;;  %v186_v48 = vld [vmem:[%s3924_s1 + $0x4f0] sm:$0xff] }
  0x3b   :  { %2213 = vmatpush3.bf16.msra.mxu1 %v2212_v62  ;;  %v210_v62 = vld [vmem:[%s3924_s1 + $0x5b0] sm:$0xff]  ;;  %v201_v47 = vld [vmem:[%s3924_s1 + $0x568] sm:$0xff]  ;;  %v187_v49 = vld [vmem:[%s3924_s1 + $0x4f8] sm:$0xff] }
  0x3c   :  { %2215 = vmatprep.subr.bf16.mxu1 %v2214_v3  ;;  %v162_v3 = vld [vmem:[%s3924_s1 + $0x430] sm:$0xff]  ;;  %v2266_v6 = vpack.c.bf16 %v211_v63, %v210_v62  ;;  %v2250_v55 = vpack.c.bf16 %v187_v49, %v186_v48  ;;  %v171_v57 = vld [vmem:[%s3924_s1 + $0x478] sm:$0xff]  ;;  %v236_v60 = vld [vmem:[%s3924_s1 + $0x680] sm:$0xff] }
  0x3d   :  { %2185 = vmatpush3.bf16.msra.mxu0 %v2184_v9  ;;  %v181_v9 = vld [vmem:[%s3924_s1 + $0x4c8] sm:$0xff]  ;;  %v2236_v13 = vpack.c.bf16 %v163_v4, %v162_v3  ;;  %v218_v50 = vld [vmem:[%s3924_s1 + $0x5f0] sm:$0xff]  ;;  %v203_v59 = vld [vmem:[%s3924_s1 + $0x578] sm:$0xff] }
  0x3e   :  { %2187 = vmatprep.subr.bf16.mxu0 %v2186_v12  ;;  %v213_v12 = vld [vmem:[%s3924_s1 + $0x5c8] sm:$0xff]  ;;  %v2238_v15 = vpack.c.bf16 %v181_v9, %v180_v8  ;;  %v170_v56 = vld [vmem:[%s3924_s1 + $0x470] sm:$0xff]  ;;  %v268_v62 = vld [vmem:[%s3924_s1 + $0x780] sm:$0xff] }
  0x3f   :  { %2217 = vmatpush3.bf16.msra.mxu1 %v2216_v11  ;;  %v212_v11 = vld [vmem:[%s3924_s1 + $0x5c0] sm:$0xff]  ;;  %v237_v61 = vld [vmem:[%s3924_s1 + $0x688] sm:$0xff]  ;;  %v238_v9 = vld [vmem:[%s3924_s1 + $0x690] sm:$0xff] }
  0x40   :  { %2219 = vmatprep.subr.bf16.mxu1 %v2218_v16  ;;  %v164_v16 = vld [vmem:[%s3924_s1 + $0x440] sm:$0xff]  ;;  %v2270_v19 = vpack.c.bf16 %v213_v12, %v212_v11  ;;  %v269_v63 = vld [vmem:[%s3924_s1 + $0x788] sm:$0xff]  ;;  %v2286_v3 = vpack.c.bf16 %v237_v61, %v236_v60  ;;  %v239_v11 = vld [vmem:[%s3924_s1 + $0x698] sm:$0xff] }
  0x41   :  { %2189 = vmatpush3.bf16.msra.mxu0 %v2188_v22  ;;  %v183_v22 = vld [vmem:[%s3924_s1 + $0x4d8] sm:$0xff]  ;;  %v220_v4 = vld [vmem:[%s3924_s1 + $0x600] sm:$0xff]  ;;  %v221_v5 = vld [vmem:[%s3924_s1 + $0x608] sm:$0xff]  ;;  %v2318_v7 = vpack.c.bf16 %v269_v63, %v268_v62  ;;  %v2290_v18 = vpack.c.bf16 %v239_v11, %v238_v9 }
  0x42   :  { %2223 = vmatprep.subr.bf16.mxu0 %v2222_v25  ;;  %v2240_v25 = vpack.c.bf16 %v165_v17, %v164_v16  ;;  %v2242_v27 = vpack.c.bf16 %v183_v22, %v182_v21  ;;  %v253_v8 = vld [vmem:[%s3924_s1 + $0x708] sm:$0xff]  ;;  %v2288_v16 = vpack.c.bf16 %v221_v5, %v220_v4  ;;  %v223_v20 = vld [vmem:[%s3924_s1 + $0x618] sm:$0xff]  ;;  %v254_v21 = vld [vmem:[%s3924_s1 + $0x710] sm:$0xff] }
  0x43   :  { %2221 = vmatpush3.bf16.msra.mxu1 %v2220_v24  ;;  %v215_v24 = vld [vmem:[%s3924_s1 + $0x5d8] sm:$0xff]  ;;  %v258_v48 = vld [vmem:[%s3924_s1 + $0x730] sm:$0xff]  ;;  %v261_v61 = vld [vmem:[%s3924_s1 + $0x748] sm:$0xff] }
  0x44   :  { %2255 = vmatprep.subr.bf16.mxu1 %v2254_v29  ;;  %775 = vmatmul.mubr.f32.vlgmr.msra.gmra.mrb[2].mxu0 %v2895_v32  ;;  %v2260_v32 = vpack.c.bf16 %v191_v46, %v190_v42  ;;  %v167_v29 = vld [vmem:[%s3924_s1 + $0x458] sm:$0xff]  ;;  %v2274_v31 = vpack.c.bf16 %v215_v24, %v214_v23  ;;  %v168_v42 = vld [vmem:[%s3924_s1 + $0x460] sm:$0xff]  ;;  %v246_v62 = vld [vmem:[%s3924_s1 + $0x6d0] sm:$0xff] }
  0x45   :  { %2225 = vmatpush3.bf16.msra.mxu0 %v2224_v35  ;;  %914 = vmatprep.mubr.f32.mxu0 %v483_v51  ;;  %v185_v35 = vld [vmem:[%s3924_s1 + $0x4e8] sm:$0xff]  ;;  %v219_v51 = vld [vmem:[%s3924_s1 + $0x5f8] sm:$0xff]  ;;  %v240_v24 = vld [vmem:[%s3924_s1 + $0x6a0] sm:$0xff] }
  0x46   :  { %845 = vmatmul.mubr.f32.vlgmr.msra.gmra.mrb[2].mxu1 %v2909_v41  ;;  %2227 = vmatprep.subr.bf16.mxu0 %v2226_v38  ;;  %v484_v41 = vcombine.high %v3058_v52, %v3058_v52  ;;  %v2244_v38 = vpack.c.bf16 %v167_v29, %v166_v28  ;;  %v2246_v40 = vpack.c.bf16 %v185_v35, %v184_v34  ;;  %v255_v23 = vld [vmem:[%s3924_s1 + $0x718] sm:$0xff]  ;;  %v273_v28 = vld [vmem:[%s3924_s1 + $0x7a8] sm:$0xff]  ;;  %v256_v35 = vld [vmem:[%s3924_s1 + $0x720] sm:$0xff] }
  0x47   :  { %2257 = vmatpush3.bf16.msra.mxu1 %v2256_v36  ;;  %v216_v36 = vld [vmem:[%s3924_s1 + $0x5e0] sm:$0xff]  ;;  %v225_v34 = vld [vmem:[%s3924_s1 + $0x628] sm:$0xff]  ;;  %v247_v63 = vld [vmem:[%s3924_s1 + $0x6d8] sm:$0xff] }
  0x48   :  { %2259 = vmatprep.subr.bf16.mxu1 %v2258_v45  ;;  %984 = vmatprep.mubr.f32.mxu1 %v484_v41  ;;  %v200_v45 = vld [vmem:[%s3924_s1 + $0x560] sm:$0xff]  ;;  %v2278_v46 = vpack.c.bf16 %v217_v37, %v216_v36  ;;  %v202_v41 = vld [vmem:[%s3924_s1 + $0x570] sm:$0xff]  ;;  %v2306_v4 = vpack.c.bf16 %v247_v63, %v246_v62  ;;  %v263_v9 = vld [vmem:[%s3924_s1 + $0x758] sm:$0xff] }
  0x49   :  { %2229 = vmatpush3.bf16.msra.mxu0 %v2228_v53  ;;  %v2248_v53 = vpack.c.bf16 %v169_v44, %v168_v42  ;;  %v242_v37 = vld [vmem:[%s3924_s1 + $0x6b0] sm:$0xff]  ;;  %v248_v11 = vld [vmem:[%s3924_s1 + $0x6e0] sm:$0xff] }
  0x4a   :  { %2231 = vmatprep.subr.bf16.mxu0 %v2230_v54  ;;  %v2280_v54 = vpack.c.bf16 %v201_v47, %v200_v45  ;;  %v227_v47 = vld [vmem:[%s3924_s1 + $0x638] sm:$0xff]  ;;  %v230_v5 = vld [vmem:[%s3924_s1 + $0x650] sm:$0xff] }
  0x4b   :  { %2261 = vmatpush3.bf16.msra.mxu1 %v2260_v32  ;;  %v24_v32 = vld [vmem:[%s3923_s0 + $0x18] sm:$0xff]  ;;  %v318_v62 = vld [vmem:[%s3924_s1 + $0x910] sm:$0xff] }
  0x4c   :  { %2263 = vmatprep.subr.bf16.mxu1 %v2262_v58  ;;  %v2282_v58 = vpack.c.bf16 %v219_v51, %v218_v50  ;;  %v3229_v12 = vrot.slane %v24_v32, %v2728_v10  ;;  %v259_v50 = vld [vmem:[%s3924_s1 + $0x738] sm:$0xff]  ;;  %v244_v51 = vld [vmem:[%s3924_s1 + $0x6c0] sm:$0xff] }
  0x4d   :  { %2233 = vmatpush3.bf16.msra.mxu0 %v2232_v0  ;;  %v485_v0 = vcombine.high %v24_v32, %v24_v32  ;;  %v276_v32 = vld [vmem:[%s3924_s1 + $0x7c0] sm:$0xff] }
  0x4e   :  { %2235 = vmatprep.subr.bf16.mxu0 %v2234_v2  ;;  %v2284_v2 = vpack.c.bf16 %v203_v59, %v202_v41  ;;  %v228_v41 = vld [vmem:[%s3924_s1 + $0x640] sm:$0xff] }
  0x4f   :  { %2265 = vmatpush3.bf16.msra.mxu1 %v2264_v1  ;;  %v2252_v1 = vpack.c.bf16 %v171_v57, %v170_v56  ;;  %v2332_v56 = vpack.c.bf16 %v259_v50, %v258_v48  ;;  %v260_v59 = vld [vmem:[%s3924_s1 + $0x740] sm:$0xff]  ;;  %v285_v48 = vld [vmem:[%s3924_s1 + $0x808] sm:$0xff] }
  0x50   :  { %2267 = vmatprep.subr.bf16.mxu1 %v2266_v6  ;;  %v252_v6 = vld [vmem:[%s3924_s1 + $0x700] sm:$0xff] }
  0x51   :  { %2237 = vmatpush3.bf16.msra.mxu0 %v2236_v13  ;;  %v270_v13 = vld [vmem:[%s3924_s1 + $0x790] sm:$0xff]  ;;  %v2320_v17 = vpack.c.bf16 %v253_v8, %v252_v6  ;;  %v231_v6 = vld [vmem:[%s3924_s1 + $0x658] sm:$0xff] }
  0x52   :  { %2239 = vmatprep.subr.bf16.mxu0 %v2238_v15  ;;  %v3238_v15 = vrot.slane %v485_v0, %v2728_v10  ;;  %v278_v0 = vld [vmem:[%s3924_s1 + $0x7d0] sm:$0xff] }
  0x53   :  { %2269 = vmatpush3.bf16.msra.mxu1 %v2268_v14  ;;  %v271_v14 = vld [vmem:[%s3924_s1 + $0x798] sm:$0xff] }
  0x54   :  { %2271 = vmatprep.subr.bf16.mxu1 %v2270_v19  ;;  %v222_v19 = vld [vmem:[%s3924_s1 + $0x610] sm:$0xff]  ;;  %v2322_v22 = vpack.c.bf16 %v271_v14, %v270_v13  ;;  %v501_v29 = vcombine.high %v3238_v15, %v3238_v15  ;;  %v249_v13 = vld [vmem:[%s3924_s1 + $0x6e8] sm:$0xff]  ;;  %v280_v14 = vld [vmem:[%s3924_s1 + $0x7e0] sm:$0xff] }
  0x55   :  { %2241 = vmatpush3.bf16.msra.mxu0 %v2240_v25  ;;  %v241_v25 = vld [vmem:[%s3924_s1 + $0x6a8] sm:$0xff]  ;;  %v2292_v30 = vpack.c.bf16 %v223_v20, %v222_v19  ;;  %v2310_v19 = vpack.c.bf16 %v249_v13, %v248_v11  ;;  %v232_v20 = vld [vmem:[%s3924_s1 + $0x660] sm:$0xff] }
  0x56   :  { %2243 = vmatprep.subr.bf16.mxu0 %v2242_v27  ;;  %v272_v27 = vld [vmem:[%s3924_s1 + $0x7a0] sm:$0xff]  ;;  %v2294_v33 = vpack.c.bf16 %v241_v25, %v240_v24  ;;  %v265_v24 = vld [vmem:[%s3924_s1 + $0x768] sm:$0xff]  ;;  %v250_v25 = vld [vmem:[%s3924_s1 + $0x6f0] sm:$0xff] }
  0x57   :  { %2273 = vmatpush3.bf16.msra.mxu1 %v2272_v26  ;;  %v500_v26 = vcombine.high %v3229_v12, %v3229_v12  ;;  %v2326_v36 = vpack.c.bf16 %v273_v28, %v272_v27  ;;  %v282_v27 = vld [vmem:[%s3924_s1 + $0x7f0] sm:$0xff]  ;;  %v283_v28 = vld [vmem:[%s3924_s1 + $0x7f8] sm:$0xff]  ;;  %v289_v11 = vld [vmem:[%s3924_s1 + $0x828] sm:$0xff] }
  0x58   :  { %2275 = vmatprep.subr.bf16.mxu1 %v2274_v31  ;;  %v2324_v31 = vpack.c.bf16 %v255_v23, %v254_v21  ;;  %v233_v21 = vld [vmem:[%s3924_s1 + $0x668] sm:$0xff]  ;;  %v320_v13 = vld [vmem:[%s3924_s1 + $0x920] sm:$0xff] }
  0x59   :  { %2245 = vmatpush3.bf16.msra.mxu0 %v2244_v38  ;;  %v243_v38 = vld [vmem:[%s3924_s1 + $0x6b8] sm:$0xff] }
  0x5a   :  { %2247 = vmatprep.subr.bf16.mxu0 %v2246_v40  ;;  %v275_v40 = vld [vmem:[%s3924_s1 + $0x7b8] sm:$0xff]  ;;  %v2298_v45 = vpack.c.bf16 %v243_v38, %v242_v37  ;;  %v300_v37 = vld [vmem:[%s3924_s1 + $0x880] sm:$0xff]  ;;  %v301_v38 = vld [vmem:[%s3924_s1 + $0x888] sm:$0xff] }
  0x5b   :  { %2277 = vmatpush3.bf16.msra.mxu1 %v2276_v39  ;;  %v274_v39 = vld [vmem:[%s3924_s1 + $0x7b0] sm:$0xff] }
  0x5c   :  { %2279 = vmatprep.subr.bf16.mxu1 %v2278_v46  ;;  %v226_v46 = vld [vmem:[%s3924_s1 + $0x630] sm:$0xff]  ;;  %v2330_v49 = vpack.c.bf16 %v275_v40, %v274_v39  ;;  %v332_v39 = vld [vmem:[%s3924_s1 + $0x980] sm:$0xff]  ;;  %v333_v40 = vld [vmem:[%s3924_s1 + $0x988] sm:$0xff] }
  0x5d   :  { %2249 = vmatpush3.bf16.msra.mxu0 %v2248_v53  ;;  %v245_v53 = vld [vmem:[%s3924_s1 + $0x6c8] sm:$0xff]  ;;  %v2382_v50 = vpack.c.bf16 %v333_v40, %v332_v39 }
  0x5e   :  { %2251 = vmatprep.subr.bf16.mxu0 %v2250_v55  ;;  %v2300_v55 = vpack.c.bf16 %v227_v47, %v226_v46  ;;  %v2302_v57 = vpack.c.bf16 %v245_v53, %v244_v51  ;;  %v2350_v46 = vpack.c.bf16 %v301_v38, %v300_v37  ;;  %v284_v47 = vld [vmem:[%s3924_s1 + $0x800] sm:$0xff]  ;;  %v317_v51 = vld [vmem:[%s3924_s1 + $0x908] sm:$0xff]  ;;  %v302_v53 = vld [vmem:[%s3924_s1 + $0x890] sm:$0xff] }
  0x5f   :  { %2281 = vmatpush3.bf16.msra.mxu1 %v2280_v54  ;;  %v277_v54 = vld [vmem:[%s3924_s1 + $0x7c8] sm:$0xff] }
  0x60   :  { %2283 = vmatprep.subr.bf16.mxu1 %v2282_v58  ;;  %v229_v58 = vld [vmem:[%s3924_s1 + $0x648] sm:$0xff]  ;;  %v2334_v60 = vpack.c.bf16 %v277_v54, %v276_v32  ;;  %v303_v32 = vld [vmem:[%s3924_s1 + $0x898] sm:$0xff] }
  0x61   :  { %2253 = vmatpush3.bf16.msra.mxu0 %v2252_v1  ;;  %v279_v1 = vld [vmem:[%s3924_s1 + $0x7d8] sm:$0xff] }
  0x62   :  { %2287 = vmatprep.subr.bf16.mxu0 %v2286_v3  ;;  %v2336_v3 = vpack.c.bf16 %v261_v61, %v260_v59  ;;  %v2338_v8 = vpack.c.bf16 %v279_v1, %v278_v0  ;;  %v2354_v59 = vpack.c.bf16 %v303_v32, %v302_v53  ;;  %v287_v61 = vld [vmem:[%s3924_s1 + $0x818] sm:$0xff]  ;;  %v304_v1 = vld [vmem:[%s3924_s1 + $0x8a0] sm:$0xff] }
  0x63   :  { %2285 = vmatpush3.bf16.msra.mxu1 %v2284_v2  ;;  %v2304_v2 = vpack.c.bf16 %v229_v58, %v228_v41  ;;  %v2352_v41 = vpack.c.bf16 %v285_v48, %v284_v47  ;;  %v319_v0 = vld [vmem:[%s3924_s1 + $0x918] sm:$0xff] }
  0x64   :  { %2319 = vmatprep.subr.bf16.mxu1 %v2318_v7  ;;  %915 = vmatmul.mubr.f32.vlgmr.msra.gmra.mrb[4].mxu0 %v3037_v43  ;;  %v224_v43 = vld [vmem:[%s3924_s1 + $0x620] sm:$0xff]  ;;  %v262_v7 = vld [vmem:[%s3924_s1 + $0x750] sm:$0xff] }
  0x65   :  { %2289 = vmatpush3.bf16.msra.mxu0 %v2288_v16  ;;  %1054 = vmatprep.mubr.f32.mxu0 %v500_v26  ;;  %v2296_v42 = vpack.c.bf16 %v225_v34, %v224_v43  ;;  %v281_v16 = vld [vmem:[%s3924_s1 + $0x7e8] sm:$0xff]  ;;  %v251_v26 = vld [vmem:[%s3924_s1 + $0x6f8] sm:$0xff]  ;;  %v234_v43 = vld [vmem:[%s3924_s1 + $0x670] sm:$0xff] }
  0x66   :  { %985 = vmatmul.mubr.f32.vlgmr.msra.gmra.mrb[4].mxu1 %v3058_v52  ;;  %2291 = vmatprep.subr.bf16.mxu0 %v2290_v18  ;;  %v257_v52 = vld [vmem:[%s3924_s1 + $0x728] sm:$0xff]  ;;  %v2340_v18 = vpack.c.bf16 %v263_v9, %v262_v7  ;;  %v2342_v23 = vpack.c.bf16 %v281_v16, %v280_v14  ;;  %v235_v34 = vld [vmem:[%s3924_s1 + $0x678] sm:$0xff] }
  0x67   :  { %2321 = vmatpush3.bf16.msra.mxu1 %v2320_v17  ;;  %1124 = vmatprep.mubr.f32.mxu1 %v501_v29  ;;  %v2328_v44 = vpack.c.bf16 %v257_v52, %v256_v35  ;;  %v2308_v17 = vpack.c.bf16 %v231_v6, %v230_v5  ;;  %v2312_v29 = vpack.c.bf16 %v233_v21, %v232_v20  ;;  %v266_v35 = vld [vmem:[%s3924_s1 + $0x770] sm:$0xff]  ;;  %v267_v52 = vld [vmem:[%s3924_s1 + $0x778] sm:$0xff]  ;;  %v337_v5 = vld [vmem:[%s3924_s1 + $0x9a8] sm:$0xff] }
  0x68   :  { %2323 = vmatprep.subr.bf16.mxu1 %v2322_v22  ;;  %v264_v22 = vld [vmem:[%s3924_s1 + $0x760] sm:$0xff] }
  0x69   :  { %2293 = vmatpush3.bf16.msra.mxu0 %v2292_v30  ;;  %v25_v30 = vld [vmem:[%s3923_s0 + $0x20] sm:$0xff] }
  0x6a   :  { %2295 = vmatprep.subr.bf16.mxu0 %v2294_v33  ;;  %v2314_v33 = vpack.c.bf16 %v251_v26, %v250_v25  ;;  %v3436_v54 = vrot.slane %v25_v30, %v2728_v10 }
  0x6b   :  { %2325 = vmatpush3.bf16.msra.mxu1 %v2324_v31  ;;  %v2344_v31 = vpack.c.bf16 %v265_v24, %v264_v22 }
  0x6c   :  { %2327 = vmatprep.subr.bf16.mxu1 %v2326_v36  ;;  %v2346_v36 = vpack.c.bf16 %v283_v28, %v282_v27 }
  0x6d   :  { %2297 = vmatpush3.bf16.msra.mxu0 %v2296_v42  ;;  %v502_v42 = vcombine.high %v25_v30, %v25_v30 }
  0x6e   :  { %2299 = vmatprep.subr.bf16.mxu0 %v2298_v45  ;;  %v2348_v45 = vpack.c.bf16 %v267_v52, %v266_v35 }
  0x6f   :  { %2329 = vmatpush3.bf16.msra.mxu1 %v2328_v44  ;;  %v2316_v44 = vpack.c.bf16 %v235_v34, %v234_v43 }
  0x70   :  { %2331 = vmatprep.subr.bf16.mxu1 %v2330_v49  ;;  %v316_v49 = vld [vmem:[%s3924_s1 + $0x900] sm:$0xff] }
  0x71   :  { %2301 = vmatpush3.bf16.msra.mxu0 %v2300_v55  ;;  %v334_v55 = vld [vmem:[%s3924_s1 + $0x990] sm:$0xff]  ;;  %v2384_v58 = vpack.c.bf16 %v317_v51, %v316_v49 }
  0x72   :  { %2303 = vmatprep.subr.bf16.mxu0 %v2302_v57  ;;  %v3445_v57 = vrot.slane %v502_v42, %v2728_v10 }
  0x73   :  { %2333 = vmatpush3.bf16.msra.mxu1 %v2332_v56  ;;  %v335_v56 = vld [vmem:[%s3924_s1 + $0x998] sm:$0xff] }
  0x74   :  { %2335 = vmatprep.subr.bf16.mxu1 %v2334_v60  ;;  %v286_v60 = vld [vmem:[%s3924_s1 + $0x810] sm:$0xff]  ;;  %v2386_v63 = vpack.c.bf16 %v335_v56, %v334_v55  ;;  %v518_v6 = vcombine.high %v3445_v57, %v3445_v57 }
  0x75   :  { %2305 = vmatpush3.bf16.msra.mxu0 %v2304_v2  ;;  %v305_v2 = vld [vmem:[%s3924_s1 + $0x8a8] sm:$0xff]  ;;  %v2356_v7 = vpack.c.bf16 %v287_v61, %v286_v60 }
  0x76   :  { %2307 = vmatprep.subr.bf16.mxu0 %v2306_v4  ;;  %v336_v4 = vld [vmem:[%s3924_s1 + $0x9a0] sm:$0xff]  ;;  %v2358_v9 = vpack.c.bf16 %v305_v2, %v304_v1 }
  0x77   :  { %2337 = vmatpush3.bf16.msra.mxu1 %v2336_v3  ;;  %v517_v3 = vcombine.high %v3436_v54, %v3436_v54 }
  0x78   :  { %2339 = vmatprep.subr.bf16.mxu1 %v2338_v8  ;;  %v288_v8 = vld [vmem:[%s3924_s1 + $0x820] sm:$0xff] }
  0x79   :  { %2309 = vmatpush3.bf16.msra.mxu0 %v2308_v17 }
  0x7a   :  { %2311 = vmatprep.subr.bf16.mxu0 %v2310_v19 }
  0x7b   :  { %2341 = vmatpush3.bf16.msra.mxu1 %v2340_v18 }
  0x7c   :  { %2343 = vmatprep.subr.bf16.mxu1 %v2342_v23 }
  0x7d   :  { %2313 = vmatpush3.bf16.msra.mxu0 %v2312_v29 }
  0x7e   :  { %2315 = vmatprep.subr.bf16.mxu0 %v2314_v33 }
  0x7f   :  { %2345 = vmatpush3.bf16.msra.mxu1 %v2344_v31 }
  0x80   :  { %2347 = vmatprep.subr.bf16.mxu1 %v2346_v36 }
  0x81   :  { %2317 = vmatpush3.bf16.msra.mxu0 %v2316_v44 }
  0x82   :  { %2351 = vmatprep.subr.bf16.mxu0 %v2350_v46 }
  0x83   :  { %2349 = vmatpush3.bf16.msra.mxu1 %v2348_v45 }
  0x84   :  { %2383 = vmatprep.subr.bf16.mxu1 %v2382_v50  ;;  %1055 = vmatmul.mubr.f32.vlgmr.msra.gmra.mrb[6].mxu0 %v3229_v12  ;;  %v2388_v12 = vpack.c.bf16 %v319_v0, %v318_v62 }
  0x85   :  { %2353 = vmatpush3.bf16.msra.mxu0 %v2352_v41 }
  0x86   :  { %1125 = vmatmul.mubr.f32.vlgmr.msra.gmra.mrb[6].mxu1 %v3238_v15  ;;  %2355 = vmatprep.subr.bf16.mxu0 %v2354_v59 }
  0x87   :  { %2385 = vmatpush3.bf16.msra.mxu1 %v2384_v58 }
  0x88   :  { %10 = vsyncpa [#allocation3], 0  ;;  %2387 = vmatprep.subr.bf16.mxu1 %v2386_v63  ;;  %v2390_v15 = vpack.c.bf16 %v337_v5, %v336_v4  ;;  %v321_v14 = vld [vmem:[%s3924_s1 + $0x928] sm:$0xff]  ;;  %v306_v16 = vld [vmem:[%s3924_s1 + $0x8b0] sm:$0xff]  ;;  %1194 = vmatprep.mubr.f32.mxu0 %v517_v3  ;;  %v2360_v20 = vpack.c.bf16 %v289_v11, %v288_v8  ;;  %vm2551_vm0 = vmmov 0   ;;  %vm567_vm1 = vcmask 523264  }
  0x89   :  { %v307_v17 = vld [vmem:[%s3924_s1 + $0x8b8] sm:$0xff]  ;;  %v338_v18 = vld [vmem:[%s3924_s1 + $0x9b0] sm:$0xff]  ;;  %1264 = vmatprep.mubr.f32.mxu1 %v518_v6  ;;  %2357 = vmatpush3.bf16.msra.mxu0 %v2356_v7  ;;  %v2392_v21 = vpack.c.bf16 %v321_v14, %v320_v13  ;;  %v308_v28 = vld [vmem:[%s3924_s1 + $0x8c0] sm:$0xff]  ;;  %s2553_s21 = smov [#allocation2]   ;;  %vm1574_vm2 = vcmask 74752  }
  0x8a   :  { %v339_v19 = vld [vmem:[%s3924_s1 + $0x9b8] sm:$0xff]  ;;  %2359 = vmatprep.subr.bf16.mxu0 %v2358_v9  ;;  %v2362_v22 = vpack.c.bf16 %v307_v17, %v306_v16  ;;  %v290_v23 = vld [vmem:[%s3924_s1 + $0x830] sm:$0xff]  ;;  %v309_v29 = vld [vmem:[%s3924_s1 + $0x8c8] sm:$0xff] }
  0x8b   :  { %2389 = vmatpush3.bf16.msra.mxu1 %v2388_v12  ;;  %v291_v24 = vld [vmem:[%s3924_s1 + $0x838] sm:$0xff]  ;;  %v322_v25 = vld [vmem:[%s3924_s1 + $0x930] sm:$0xff]  ;;  %v2394_v26 = vpack.c.bf16 %v339_v19, %v338_v18  ;;  %v340_v30 = vld [vmem:[%s3924_s1 + $0x9c0] sm:$0xff]  ;;  %v2366_v34 = vpack.c.bf16 %v309_v29, %v308_v28 }
  0x8c   :  { %2391 = vmatprep.subr.bf16.mxu1 %v2390_v15  ;;  %v323_v27 = vld [vmem:[%s3924_s1 + $0x938] sm:$0xff]  ;;  %v341_v31 = vld [vmem:[%s3924_s1 + $0x9c8] sm:$0xff]  ;;  %v2364_v33 = vpack.c.bf16 %v291_v24, %v290_v23  ;;  %v292_v35 = vld [vmem:[%s3924_s1 + $0x840] sm:$0xff] }
  0x8d   :  { %2361 = vmatpush3.bf16.msra.mxu0 %v2360_v20  ;;  %v2396_v43 = vpack.c.bf16 %v323_v27, %v322_v25  ;;  %v293_v36 = vld [vmem:[%s3924_s1 + $0x848] sm:$0xff]  ;;  %v324_v52 = vld [vmem:[%s3924_s1 + $0x940] sm:$0xff]  ;;  %v2398_v37 = vpack.c.bf16 %v341_v31, %v340_v30  ;;  %v310_v39 = vld [vmem:[%s3924_s1 + $0x8d0] sm:$0xff] }
  0x8e   :  { %2363 = vmatprep.subr.bf16.mxu0 %v2362_v22  ;;  %v325_v38 = vld [vmem:[%s3924_s1 + $0x948] sm:$0xff]  ;;  %v311_v40 = vld [vmem:[%s3924_s1 + $0x8d8] sm:$0xff]  ;;  %v342_v42 = vld [vmem:[%s3924_s1 + $0x9d0] sm:$0xff]  ;;  %v2368_v45 = vpack.c.bf16 %v293_v36, %v292_v35 }
  0x8f   :  { %2393 = vmatpush3.bf16.msra.mxu1 %v2392_v21  ;;  %v343_v44 = vld [vmem:[%s3924_s1 + $0x9d8] sm:$0xff]  ;;  %v2400_v46 = vpack.c.bf16 %v325_v38, %v324_v52  ;;  %v2370_v47 = vpack.c.bf16 %v311_v40, %v310_v39  ;;  %v294_v48 = vld [vmem:[%s3924_s1 + $0x850] sm:$0xff]  ;;  %v312_v32 = vld [vmem:[%s3924_s1 + $0x8e0] sm:$0xff] }
  0x90   :  { %2395 = vmatprep.subr.bf16.mxu1 %v2394_v26  ;;  %v295_v49 = vld [vmem:[%s3924_s1 + $0x858] sm:$0xff]  ;;  %v326_v50 = vld [vmem:[%s3924_s1 + $0x950] sm:$0xff]  ;;  %v2402_v51 = vpack.c.bf16 %v343_v44, %v342_v42  ;;  %v313_v55 = vld [vmem:[%s3924_s1 + $0x8e8] sm:$0xff] }
  0x91   :  { %2365 = vmatpush3.bf16.msra.mxu0 %v2364_v33  ;;  %v327_v53 = vld [vmem:[%s3924_s1 + $0x958] sm:$0xff]  ;;  %v344_v56 = vld [vmem:[%s3924_s1 + $0x9e0] sm:$0xff]  ;;  %v345_v41 = vld [vmem:[%s3924_s1 + $0x9e8] sm:$0xff]  ;;  %v2372_v58 = vpack.c.bf16 %v295_v49, %v294_v48  ;;  %v2374_v60 = vpack.c.bf16 %v313_v55, %v312_v32 }
  0x92   :  { %2367 = vmatprep.subr.bf16.mxu0 %v2366_v34  ;;  %v2404_v59 = vpack.c.bf16 %v327_v53, %v326_v50  ;;  %v296_v61 = vld [vmem:[%s3924_s1 + $0x860] sm:$0xff]  ;;  %v297_v62 = vld [vmem:[%s3924_s1 + $0x868] sm:$0xff]  ;;  %v2406_v0 = vpack.c.bf16 %v345_v41, %v344_v56  ;;  %v314_v2 = vld [vmem:[%s3924_s1 + $0x8f0] sm:$0xff] }
  0x93   :  { %2397 = vmatpush3.bf16.msra.mxu1 %v2396_v43  ;;  %v328_v63 = vld [vmem:[%s3924_s1 + $0x960] sm:$0xff]  ;;  %v329_v1 = vld [vmem:[%s3924_s1 + $0x968] sm:$0xff]  ;;  %v315_v3 = vld [vmem:[%s3924_s1 + $0x8f8] sm:$0xff]  ;;  %v2376_v6 = vpack.c.bf16 %v297_v62, %v296_v61 }
  0x94   :  { %2399 = vmatprep.subr.bf16.mxu1 %v2398_v37  ;;  %v346_v4 = vld [vmem:[%s3924_s1 + $0x9f0] sm:$0xff]  ;;  %v347_v5 = vld [vmem:[%s3924_s1 + $0x9f8] sm:$0xff]  ;;  %v26_v7 = vld [vmem:[%s3923_s0 + $0x28] sm:$0xff]  ;;  %v2408_v8 = vpack.c.bf16 %v329_v1, %v328_v63  ;;  %v2378_v12 = vpack.c.bf16 %v315_v3, %v314_v2 }
  0x95   :  { %2369 = vmatpush3.bf16.msra.mxu0 %v2368_v45  ;;  %v298_v9 = vld [vmem:[%s3924_s1 + $0x870] sm:$0xff]  ;;  %v299_v11 = vld [vmem:[%s3924_s1 + $0x878] sm:$0xff]  ;;  %v2410_v15 = vpack.c.bf16 %v347_v5, %v346_v4  ;;  %v364_v16 = vld [vmem:[%s3924_s1 + $0xa80] sm:$0xff]  ;;  %v519_v20 = vcombine.high %v26_v7, %v26_v7  ;;  %v3643_v31 = vrot.slane %v26_v7, %v2728_v10 }
  0x96   :  { %2371 = vmatprep.subr.bf16.mxu0 %v2370_v47  ;;  %v330_v13 = vld [vmem:[%s3924_s1 + $0x970] sm:$0xff]  ;;  %v331_v14 = vld [vmem:[%s3924_s1 + $0x978] sm:$0xff]  ;;  %v365_v17 = vld [vmem:[%s3924_s1 + $0xa88] sm:$0xff]  ;;  %v2380_v21 = vpack.c.bf16 %v299_v11, %v298_v9 }
  0x97   :  { %2401 = vmatpush3.bf16.msra.mxu1 %v2400_v46  ;;  %v396_v18 = vld [vmem:[%s3924_s1 + $0xb80] sm:$0xff]  ;;  %v397_v19 = vld [vmem:[%s3924_s1 + $0xb88] sm:$0xff]  ;;  %v2412_v22 = vpack.c.bf16 %v331_v14, %v330_v13  ;;  %v2414_v23 = vpack.c.bf16 %v365_v17, %v364_v16  ;;  %v366_v29 = vld [vmem:[%s3924_s1 + $0xa90] sm:$0xff]  ;;  %v3652_v34 = vrot.slane %v519_v20, %v2728_v10  ;;  %v534_v45 = vcombine.high %v3643_v31, %v3643_v31 }
  0x98   :  { %2403 = vmatprep.subr.bf16.mxu1 %v2402_v51  ;;  %v348_v24 = vld [vmem:[%s3924_s1 + $0xa00] sm:$0xff]  ;;  %v349_v25 = vld [vmem:[%s3924_s1 + $0xa08] sm:$0xff]  ;;  %v2446_v27 = vpack.c.bf16 %v397_v19, %v396_v18  ;;  %v367_v30 = vld [vmem:[%s3924_s1 + $0xa98] sm:$0xff] }
  0x99   :  { %2373 = vmatpush3.bf16.msra.mxu0 %v2372_v58  ;;  %v380_v26 = vld [vmem:[%s3924_s1 + $0xb00] sm:$0xff]  ;;  %v381_v28 = vld [vmem:[%s3924_s1 + $0xb08] sm:$0xff]  ;;  %v398_v33 = vld [vmem:[%s3924_s1 + $0xb90] sm:$0xff]  ;;  %v2416_v35 = vpack.c.bf16 %v349_v25, %v348_v24  ;;  %v2418_v52 = vpack.c.bf16 %v367_v30, %v366_v29  ;;  %v535_v48 = vcombine.high %v3652_v34, %v3652_v34 }
  0x9a   :  { %2375 = vmatprep.subr.bf16.mxu0 %v2374_v60  ;;  %v399_v43 = vld [vmem:[%s3924_s1 + $0xb98] sm:$0xff]  ;;  %v2448_v36 = vpack.c.bf16 %v381_v28, %v380_v26  ;;  %v350_v37 = vld [vmem:[%s3924_s1 + $0xa10] sm:$0xff]  ;;  %v368_v42 = vld [vmem:[%s3924_s1 + $0xaa0] sm:$0xff] }
  0x9b   :  { %2405 = vmatpush3.bf16.msra.mxu1 %v2404_v59  ;;  %v351_v38 = vld [vmem:[%s3924_s1 + $0xa18] sm:$0xff]  ;;  %v382_v39 = vld [vmem:[%s3924_s1 + $0xb10] sm:$0xff]  ;;  %v2450_v10 = vpack.c.bf16 %v399_v43, %v398_v33  ;;  %v369_v44 = vld [vmem:[%s3924_s1 + $0xaa8] sm:$0xff] }
  0x9c   :  { %2407 = vmatprep.subr.bf16.mxu1 %v2406_v0  ;;  %v383_v40 = vld [vmem:[%s3924_s1 + $0xb18] sm:$0xff]  ;;  %v400_v46 = vld [vmem:[%s3924_s1 + $0xba0] sm:$0xff]  ;;  %v401_v47 = vld [vmem:[%s3924_s1 + $0xba8] sm:$0xff]  ;;  %v2420_v49 = vpack.c.bf16 %v351_v38, %v350_v37  ;;  %v2422_v51 = vpack.c.bf16 %v369_v44, %v368_v42 }
  0x9d   :  { %2377 = vmatpush3.bf16.msra.mxu0 %v2376_v6  ;;  %v2452_v50 = vpack.c.bf16 %v383_v40, %v382_v39  ;;  %v353_v53 = vld [vmem:[%s3924_s1 + $0xa28] sm:$0xff]  ;;  %v384_v32 = vld [vmem:[%s3924_s1 + $0xb20] sm:$0xff]  ;;  %v2454_v55 = vpack.c.bf16 %v401_v47, %v400_v46  ;;  %v370_v56 = vld [vmem:[%s3924_s1 + $0xab0] sm:$0xff] }
  0x9e   :  { %2379 = vmatprep.subr.bf16.mxu0 %v2378_v12  ;;  %v371_v41 = vld [vmem:[%s3924_s1 + $0xab8] sm:$0xff]  ;;  %v402_v58 = vld [vmem:[%s3924_s1 + $0xbb0] sm:$0xff]  ;;  %v372_v4 = vld [vmem:[%s3924_s1 + $0xac0] sm:$0xff] }
  0x9f   :  { %2409 = vmatpush3.bf16.msra.mxu1 %v2408_v8  ;;  %v403_v59 = vld [vmem:[%s3924_s1 + $0xbb8] sm:$0xff]  ;;  %v2426_v62 = vpack.c.bf16 %v371_v41, %v370_v56  ;;  %v354_v63 = vld [vmem:[%s3924_s1 + $0xa30] sm:$0xff]  ;;  %v373_v5 = vld [vmem:[%s3924_s1 + $0xac8] sm:$0xff] }
  0xa0   :  { %2411 = vmatprep.subr.bf16.mxu1 %v2410_v15  ;;  %v355_v0 = vld [vmem:[%s3924_s1 + $0xa38] sm:$0xff]  ;;  %v386_v1 = vld [vmem:[%s3924_s1 + $0xb30] sm:$0xff]  ;;  %v2458_v2 = vpack.c.bf16 %v403_v59, %v402_v58  ;;  %v404_v6 = vld [vmem:[%s3924_s1 + $0xbc0] sm:$0xff]  ;;  %v2430_v9 = vpack.c.bf16 %v373_v5, %v372_v4  ;;  %v2550_v59 = vmov 0.0|0.0  }
  0xa1   :  { %2381 = vmatpush3.bf16.msra.mxu0 %v2380_v21  ;;  %v387_v3 = vld [vmem:[%s3924_s1 + $0xb38] sm:$0xff]  ;;  %v405_v7 = vld [vmem:[%s3924_s1 + $0xbc8] sm:$0xff]  ;;  %v2428_v8 = vpack.c.bf16 %v355_v0, %v354_v63  ;;  %v356_v11 = vld [vmem:[%s3924_s1 + $0xa40] sm:$0xff] }
  0xa2   :  { %2415 = vmatprep.subr.bf16.mxu0 %v2414_v23  ;;  %v2460_v12 = vpack.c.bf16 %v387_v3, %v386_v1  ;;  %v357_v13 = vld [vmem:[%s3924_s1 + $0xa48] sm:$0xff]  ;;  %v388_v15 = vld [vmem:[%s3924_s1 + $0xb40] sm:$0xff]  ;;  %v2462_v14 = vpack.c.bf16 %v405_v7, %v404_v6  ;;  %v374_v17 = vld [vmem:[%s3924_s1 + $0xad0] sm:$0xff]  ;;  %v2552_v1 = vmov 0.0  }
  0xa3   :  { %2413 = vmatpush3.bf16.msra.mxu1 %v2412_v22  ;;  %v389_v16 = vld [vmem:[%s3924_s1 + $0xb48] sm:$0xff]  ;;  %v375_v18 = vld [vmem:[%s3924_s1 + $0xad8] sm:$0xff]  ;;  %v406_v19 = vld [vmem:[%s3924_s1 + $0xbd0] sm:$0xff]  ;;  %v2432_v21 = vpack.c.bf16 %v357_v13, %v356_v11 }
  0xa4   :  { %2447 = vmatprep.subr.bf16.mxu1 %v2446_v27  ;;  %1195 = vmatmul.mubr.f32.vlgmr.msra.gmra.mrb[8].mxu0 %v3436_v54  ;;  %v352_v54 = vld [vmem:[%s3924_s1 + $0xa20] sm:$0xff]  ;;  %v407_v20 = vld [vmem:[%s3924_s1 + $0xbd8] sm:$0xff]  ;;  %v2464_v22 = vpack.c.bf16 %v389_v16, %v388_v15  ;;  %v2434_v23 = vpack.c.bf16 %v375_v18, %v374_v17  ;;  %v358_v24 = vld [vmem:[%s3924_s1 + $0xa50] sm:$0xff] }
  0xa5   :  { %2417 = vmatpush3.bf16.msra.mxu0 %v2416_v35  ;;  %1334 = vmatprep.mubr.f32.mxu0 %v534_v45  ;;  %v2424_v60 = vpack.c.bf16 %v353_v53, %v352_v54  ;;  %v359_v25 = vld [vmem:[%s3924_s1 + $0xa58] sm:$0xff]  ;;  %v390_v26 = vld [vmem:[%s3924_s1 + $0xb50] sm:$0xff]  ;;  %v2466_v27 = vpack.c.bf16 %v407_v20, %v406_v19  ;;  %v376_v29 = vld [vmem:[%s3924_s1 + $0xae0] sm:$0xff] }
  0xa6   :  { %1265 = vmatmul.mubr.f32.vlgmr.msra.gmra.mrb[8].mxu1 %v3445_v57  ;;  %2419 = vmatprep.subr.bf16.mxu0 %v2418_v52  ;;  %v385_v57 = vld [vmem:[%s3924_s1 + $0xb28] sm:$0xff]  ;;  %v391_v28 = vld [vmem:[%s3924_s1 + $0xb58] sm:$0xff]  ;;  %v408_v33 = vld [vmem:[%s3924_s1 + $0xbe0] sm:$0xff]  ;;  %v2436_v35 = vpack.c.bf16 %v359_v25, %v358_v24 }
  0xa7   :  { %2449 = vmatpush3.bf16.msra.mxu1 %v2448_v36  ;;  %1404 = vmatprep.mubr.f32.mxu1 %v535_v48  ;;  %v2456_v61 = vpack.c.bf16 %v385_v57, %v384_v32  ;;  %v377_v30 = vld [vmem:[%s3924_s1 + $0xae8] sm:$0xff]  ;;  %v2468_v36 = vpack.c.bf16 %v391_v28, %v390_v26  ;;  %v360_v37 = vld [vmem:[%s3924_s1 + $0xa60] sm:$0xff]  ;;  %v378_v42 = vld [vmem:[%s3924_s1 + $0xaf0] sm:$0xff] }
  0xa8   :  { %2451 = vmatprep.subr.bf16.mxu1 %v2450_v10  ;;  %v409_v43 = vld [vmem:[%s3924_s1 + $0xbe8] sm:$0xff]  ;;  %v2438_v52 = vpack.c.bf16 %v377_v30, %v376_v29  ;;  %v392_v39 = vld [vmem:[%s3924_s1 + $0xb60] sm:$0xff]  ;;  %v379_v44 = vld [vmem:[%s3924_s1 + $0xaf8] sm:$0xff] }
  0xa9   :  { %2421 = vmatpush3.bf16.msra.mxu0 %v2420_v49  ;;  %v361_v38 = vld [vmem:[%s3924_s1 + $0xa68] sm:$0xff]  ;;  %v2470_v10 = vpack.c.bf16 %v409_v43, %v408_v33  ;;  %v410_v45 = vld [vmem:[%s3924_s1 + $0xbf0] sm:$0xff]  ;;  %v411_v46 = vld [vmem:[%s3924_s1 + $0xbf8] sm:$0xff]  ;;  %v2442_v49 = vpack.c.bf16 %v379_v44, %v378_v42 }
  0xaa   :  { %2423 = vmatprep.subr.bf16.mxu0 %v2422_v51  ;;  %v393_v40 = vld [vmem:[%s3924_s1 + $0xb68] sm:$0xff]  ;;  %v2440_v47 = vpack.c.bf16 %v361_v38, %v360_v37  ;;  %v363_v51 = vld [vmem:[%s3924_s1 + $0xa78] sm:$0xff]  ;;  %v2474_v54 = vpack.c.bf16 %v411_v46, %v410_v45  ;;  %v394_v53 = vld [vmem:[%s3924_s1 + $0xb70] sm:$0xff] }
  0xab   :  { %2453 = vmatpush3.bf16.msra.mxu1 %v2452_v50  ;;  %v2472_v48 = vpack.c.bf16 %v393_v40, %v392_v39  ;;  %v362_v50 = vld [vmem:[%s3924_s1 + $0xa70] sm:$0xff]  ;;  %v395_v32 = vld [vmem:[%s3924_s1 + $0xb78] sm:$0xff]  ;;  %v412_v56 = vld [vmem:[%s3924_s1 + $0xc00] sm:$0xff] }
  0xac   :  { %2455 = vmatprep.subr.bf16.mxu1 %v2454_v55  ;;  %v2444_v55 = vpack.c.bf16 %v363_v51, %v362_v50  ;;  %v2476_v57 = vpack.c.bf16 %v395_v32, %v394_v53  ;;  %v413_v41 = vld [vmem:[%s3924_s1 + $0xc08] sm:$0xff]  ;;  %v416_v63 = vld [vmem:[%s3924_s1 + $0xc20] sm:$0xff]  ;;  %v1591_v4 = vld.sshfl [vmem:[%s3923_s0 + $0x30] sm:$0x3 pattern:$0x76325410] }
  0xad   :  { %2425 = vmatpush3.bf16.msra.mxu0 %v2424_v60  ;;  %v2479_v58 = vpack.c.bf16 %v413_v41, %v412_v56  ;;  %v414_v60 = vld [vmem:[%s3924_s1 + $0xc10] sm:$0xff]  ;;  %v417_v0 = vld [vmem:[%s3924_s1 + $0xc28] sm:$0xff]  ;;  %v1590_v6 = vld [vmem:[%s3925_s2] ss:$0 sm:$0xff]  ;;  %s1582_s2 = sshll.u32 %s2553_s21, 4  ;;  %s1583_s2 = int_to_ptr.vmem [resolvable:$true] %s1582_s2 }
  0xae   :  { %2427 = vmatprep.subr.bf16.mxu0 %v2426_v62  ;;  %v1482_v16 = vld [vmem:[%s3926_s3 + $0x8] sm:$0xff]  ;;  %v1483_v17 = vld [vmem:[%s3926_s3 + $0x10] sm:$0xff]  ;;  %v1484_v19 = vld [vmem:[%s3926_s3 + $0x18] sm:$0xff]  ;;  %s2525_s22 = scalar_lea.vmem %s1583_s2, 32  ;;  %p2530_p1 = scmp.lt.s32.totalorder %s1583_s2, %s1583_s2 }
  0xaf   :  { %2457 = vmatpush3.bf16.msra.mxu1 %v2456_v61  ;;  %v415_v61 = vld [vmem:[%s3924_s1 + $0xc18] sm:$0xff]  ;;  %v2494_v20 = vpack.c.bf16 %v1484_v19, %v1483_v17  ;;  %v1487_v24 = vld [vmem:[%s3926_s3 + $0x30] sm:$0xff]  ;;  %v1493_v42 = vld [vmem:[%s3926_s3 + $0x60] sm:$0xff]  ;;  %p2526_p0 = scmp.ne.s32.totalorder %s1583_s2, %s2525_s22  ;;  %p2531_p2 = scmp.lt.s32.totalorder %s2525_s22, %s2525_s22 }
  0xb0   :  { %2459 = vmatprep.subr.bf16.mxu1 %v2458_v2  ;;  %v2482_v62 = vpack.c.bf16 %v415_v61, %v414_v60  ;;  %v419_v2 = vld [vmem:[%s3924_s1 + $0xc38] sm:$0xff]  ;;  %v1491_v38 = vld [vmem:[%s3926_s3 + $0x50] sm:$0xff]  ;;  %v1494_v44 = vld [vmem:[%s3926_s3 + $0x68] sm:$0xff] }
  0xb1   :  { %2429 = vmatpush3.bf16.msra.mxu0 %v2428_v8  ;;  %v1488_v25 = vld [vmem:[%s3926_s3 + $0x38] sm:$0xff]  ;;  %v2509_v45 = vpack.c.bf16 %v1494_v44, %v1493_v42  ;;  %v1495_v46 = vld [vmem:[%s3926_s3 + $0x70] sm:$0xff]  ;;  %v1593_v19 = vld [vmem:[%s3927_s4] ss:$0 sm:$0xff]  ;;  %p2532_p3 = por %p2531_p2, %p2530_p1 }
  0xb2   :  { %2431 = vmatprep.subr.bf16.mxu0 %v2430_v9  ;;  %v1492_v39 = vld [vmem:[%s3926_s3 + $0x58] sm:$0xff] }
  0xb3   :  { %2461 = vmatpush3.bf16.msra.mxu1 %v2460_v12  ;;  %v2506_v40 = vpack.c.bf16 %v1492_v39, %v1491_v38  ;;  %p2533_p4 = pnand %p2532_p3, %p2526_p0 }
  0xb4   :  { %2463 = vmatprep.subr.bf16.mxu1 %v2462_v14  ;;  %v1481_v14 = vld [vmem:[%s3926_s3] sm:$0xff] }
  0xb5   :  { %2433 = vmatpush3.bf16.msra.mxu0 %v2432_v21  ;;  %v2491_v18 = vpack.c.bf16 %v1482_v16, %v1481_v14  ;;  %v1485_v21 = vld [vmem:[%s3926_s3 + $0x20] sm:$0xff] }
  0xb6   :  { %2435 = vmatprep.subr.bf16.mxu0 %v2434_v23 }
  0xb7   :  { %2465 = vmatpush3.bf16.msra.mxu1 %v2464_v22  ;;  %v1486_v22 = vld [vmem:[%s3926_s3 + $0x28] sm:$0xff] }
  0xb8   :  { %2467 = vmatprep.subr.bf16.mxu1 %v2466_v27  ;;  %v2497_v23 = vpack.c.bf16 %v1486_v22, %v1485_v21  ;;  %v2500_v27 = vpack.c.bf16 %v1488_v25, %v1487_v24 }
  0xb9   :  { %2437 = vmatpush3.bf16.msra.mxu0 %v2436_v35  ;;  %v1489_v35 = vld [vmem:[%s3926_s3 + $0x40] sm:$0xff] }
  0xba   :  { %2439 = vmatprep.subr.bf16.mxu0 %v2438_v52 }
  0xbb   :  { %2469 = vmatpush3.bf16.msra.mxu1 %v2468_v36  ;;  %v1490_v36 = vld [vmem:[%s3926_s3 + $0x48] sm:$0xff] }
  0xbc   :  { %2471 = vmatprep.subr.bf16.mxu1 %v2470_v10  ;;  %v2503_v37 = vpack.c.bf16 %v1490_v36, %v1489_v35 }
  0xbd   :  { %2441 = vmatpush3.bf16.msra.mxu0 %v2440_v47  ;;  %v1496_v47 = vld [vmem:[%s3926_s3 + $0x78] sm:$0xff] }
  0xbe   :  { %2443 = vmatprep.subr.bf16.mxu0 %v2442_v49 }
  0xbf   :  { %2473 = vmatpush3.bf16.msra.mxu1 %v2472_v48  ;;  %v2512_v48 = vpack.c.bf16 %v1496_v47, %v1495_v46 }
  0xc0   :  { %2475 = vmatprep.subr.bf16.mxu1 %v2474_v54 }
  0xc1   :  { %2445 = vmatpush3.bf16.msra.mxu0 %v2444_v55 }
  0xc2   :  { %2478 = vmatprep.subr.bf16.mxu0 %v2550_v59 }
  0xc3   :  { %2477 = vmatpush3.bf16.msra.mxu1 %v2476_v57 }
  0xc4   :  { %2490 = vmatprep.subr.bf16.mxu1 %v2550_v59  ;;  %1335 = vmatmul.mubr.f32.vlgmr.msra.gmra.mrb[10].mxu0 %v3643_v31  ;;  %v2485_v31 = vpack.c.bf16 %v417_v0, %v416_v63 }
  0xc5   :  { %2480 = vmatpush3.bf16.msra.mxu0 %v2479_v58  ;;  %2056 = vmatprep.mubr.msk.f32.mxu0 %vm2551_vm0, %v2552_v1 }
  0xc6   :  { %1405 = vmatmul.mubr.f32.vlgmr.msra.gmra.mrb[10].mxu1 %v3652_v34  ;;  %2481 = vmatprep.subr.bf16.mxu0 %v2550_v59  ;;  %v418_v34 = vld [vmem:[%s3924_s1 + $0xc30] sm:$0xff] }
  0xc7   :  { %2091 = vmatprep.mubr.msk.f32.mxu1 %vm2551_vm0, %v2552_v1  ;;  %v2488_v3 = vpack.c.bf16 %v419_v2, %v418_v34  ;;  %2492 = vmatpush3.bf16.msra.mxu1 %v2491_v18 }
  0xc8   :  { %2493 = vmatprep.subr.bf16.mxu1 %v2550_v59 }
  0xc9   :  { %2483 = vmatpush3.bf16.msra.mxu0 %v2482_v62 }
  0xca   :  { %2484 = vmatprep.subr.bf16.mxu0 %v2550_v59 }
  0xcb   :  { %2495 = vmatpush3.bf16.msra.mxu1 %v2494_v20 }
  0xcc   :  { %2496 = vmatprep.subr.bf16.mxu1 %v2550_v59 }
  0xcd   :  { %2486 = vmatpush3.bf16.msra.mxu0 %v2485_v31 }
  0xce   :  { %2487 = vmatprep.subr.bf16.mxu0 %v2550_v59 }
  0xcf   :  { %2498 = vmatpush3.bf16.msra.mxu1 %v2497_v23 }
  0xd0   :  { %2499 = vmatprep.subr.bf16.mxu1 %v2550_v59 }
  0xd1   :  { %2489 = vmatpush3.bf16.msra.mxu0 %v2488_v3 }
  0xd3   :  { %2501 = vmatpush3.bf16.msra.mxu1 %v2500_v27 }
  0xd4   :  { %2057 = vmatmul.mubr.msk.f32.vlgmr.msra.gmra.mrb[12].mxu0 %vm567_vm1, %v1591_v4  ;;  %2502 = vmatprep.subr.bf16.mxu1 %v2550_v59 }
  0xd7   :  { %2504 = vmatpush3.bf16.msra.mxu1 %v2503_v37 }
  0xd8   :  { %2505 = vmatprep.subr.bf16.mxu1 %v2550_v59 }
  0xdb   :  { %2507 = vmatpush3.bf16.msra.mxu1 %v2506_v40 }
  0xdc   :  { %2508 = vmatprep.subr.bf16.mxu1 %v2550_v59 }
  0xdf   :  { %2510 = vmatpush3.bf16.msra.mxu1 %v2509_v45 }
  0xe0   :  { %2511 = vmatprep.subr.bf16.mxu1 %v2550_v59 }
  0xe3   :  { %2513 = vmatpush3.bf16.msra.mxu1 %v2512_v48 }
  0xf7   :  { %v1626_v5 = vpop.f32.mrb[0].mxu0 }
  0xf8   :  { %v1627_v7 = vpop.f32.mrb[1].mxu0 }
  0xf9   :  { %v1661_v8 = vpop.f32.mrb[0].mxu1  ;;  %v1628_v12 = vadd.f32 %v1627_v7, %v1626_v5 }
  0xfa   :  { %v1662_v9 = vpop.f32.mrb[1].mxu1 }
  0xfb   :  { %v1663_v11 = vadd.f32 %v1662_v9, %v1661_v8  ;;  %v637_v13 = vadd.f32 %v1628_v12, %v1590_v6 }
  0xfd   :  { %v707_v15 = vadd.f32 %v1663_v11, %v637_v13 }
 0x117   :  { %v1696_v26 = vpop.f32.mrb[2].mxu0 }
 0x118   :  { %v1697_v28 = vpop.f32.mrb[3].mxu0 }
 0x119   :  { %v1731_v29 = vpop.f32.mrb[2].mxu1  ;;  %v1698_v30 = vadd.f32 %v1697_v28, %v1696_v26 }
 0x11a   :  { %v1732_v33 = vpop.f32.mrb[3].mxu1 }
 0x11b   :  { %v1733_v43 = vadd.f32 %v1732_v33, %v1731_v29  ;;  %v777_v52 = vadd.f32 %v1698_v30, %v707_v15 }
 0x11d   :  { %v847_v10 = vadd.f32 %v1733_v43, %v777_v52 }
 0x137   :  { %v1766_v49 = vpop.f32.mrb[4].mxu0 }
 0x138   :  { %v1767_v50 = vpop.f32.mrb[5].mxu0 }
 0x139   :  { %v1801_v51 = vpop.f32.mrb[4].mxu1  ;;  %v1768_v54 = vadd.f32 %v1767_v50, %v1766_v49 }
 0x13a   :  { %v1802_v53 = vpop.f32.mrb[5].mxu1 }
 0x13b   :  { %v1803_v32 = vadd.f32 %v1802_v53, %v1801_v51  ;;  %v917_v55 = vadd.f32 %v1768_v54, %v847_v10 }
 0x13d   :  { %v987_v57 = vadd.f32 %v1803_v32, %v917_v55 }
 0x157   :  { %v1836_v56 = vpop.f32.mrb[6].mxu0 }
 0x158   :  { %v1837_v41 = vpop.f32.mrb[7].mxu0 }
 0x159   :  { %v1871_v58 = vpop.f32.mrb[6].mxu1  ;;  %v1838_v59 = vadd.f32 %v1837_v41, %v1836_v56 }
 0x15a   :  { %v1872_v60 = vpop.f32.mrb[7].mxu1 }
 0x15b   :  { %v1873_v61 = vadd.f32 %v1872_v60, %v1871_v58  ;;  %v1057_v62 = vadd.f32 %v1838_v59, %v987_v57 }
 0x15d   :  { %v1127_v63 = vadd.f32 %v1873_v61, %v1057_v62 }
 0x177   :  { %v1906_v0 = vpop.f32.mrb[8].mxu0 }
 0x178   :  { %v1907_v1 = vpop.f32.mrb[9].mxu0 }
 0x179   :  { %v1941_v31 = vpop.f32.mrb[8].mxu1  ;;  %v1908_v34 = vadd.f32 %v1907_v1, %v1906_v0 }
 0x17a   :  { %v1942_v2 = vpop.f32.mrb[9].mxu1 }
 0x17b   :  { %v1943_v3 = vadd.f32 %v1942_v2, %v1941_v31  ;;  %v1197_v4 = vadd.f32 %v1908_v34, %v1127_v63 }
 0x17d   :  { %v1267_v5 = vadd.f32 %v1943_v3, %v1197_v4 }
 0x197   :  { %v1976_v6 = vpop.f32.mrb[10].mxu0 }
 0x198   :  { %v1977_v7 = vpop.f32.mrb[11].mxu0 }
 0x199   :  { %v2011_v8 = vpop.f32.mrb[10].mxu1  ;;  %v1978_v12 = vadd.f32 %v1977_v7, %v1976_v6 }
 0x19a   :  { %v2012_v9 = vpop.f32.mrb[11].mxu1 }
 0x19b   :  { %v2013_v11 = vadd.f32 %v2012_v9, %v2011_v8  ;;  %v1337_v13 = vadd.f32 %v1978_v12, %v1267_v5 }
 0x19d   :  { %v1407_v15 = vadd.f32 %v2013_v11, %v1337_v13 }
 0x1a7   :  { %v1476_v14 = vpop.f32.mrb[12].mxu0 }
 0x1a8   :  { %v1477_v16 = vadd.f32 %v1476_v14, %v1407_v15  ;;  %v2058_v17 = vpop.f32.mrb[13].mxu0 }
 0x1aa   :  { %v1480_v18 = vmax.f32 %v1477_v16, 0.0 }
 0x1ac   :  { %2092 = vmatmul.mubr.f32.vlgmr.msra.gmra.mrb[12].mxu1 %v1480_v18 }
 0x27f   :  { %v1570_v20 = vpop.f32.mrb[12].mxu1 }
 0x280   :  { %v1571_v21 = vadd.f32 %v1593_v19, %v1570_v20  ;;  %v2093_v22 = vpop.f32.mrb[13].mxu1 }
 0x282   :  { %1575 = vst.msk [vmem:[#allocation2] sm:$0x3] %vm1574_vm2, %v1571_v21 }
 0x283   :  { %2536 = shalt.err (!%p2533_p4)
}
 0x284   :  { %s2537_s25 = scalar_lea.hbm %s3928_s5, 32 }
 0x285   :  { %p2538_p5 = scmp.ne.s32.totalorder %s3928_s5, %s2537_s25  ;;  %p2541_p6 = scmp.lt.u32.totalorder %s2537_s25, %s3928_s5 }
 0x287   :  { %p2543_p7 = pnand %p2541_p6, %p2538_p5 }
 0x289   :  { %2546 = shalt.err (!%p2543_p7)
}
 0x28a   :  { %1585 = dma.vmem_to_hbm [thread:$0]  %s1583_s2, 32, %s3928_s5, [#allocation3]  }
 0x28b   :  { %2547 = dma.done.wait [#allocation3], 32  }
 0x28c   :  { %2548 = vsyncadd [#allocation3], 4294967264 }
 0x28d   :  { %1589 = vsyncpa [#allocation3], 1 }

// kernel: forward.2
= control target key start
LH: loop header
LB: loop body
LE: loop exit
PB: predicated region body
PF: predicated region fallthrough
CT: control target
= control target key end

     0   :  { %10 = vsyncpa [#allocation3], 0  ;;  %s9508_s0 = inlined_call_operand.vmem [shape: f32[2,30,30], index: 0, kind: input, shape index: {}]   ;;  %s9509_s1 = inlined_call_operand.hbm [shape: f32[3,30,896], index: 1, kind: input, shape index: {}]   ;;  %s9510_s2 = inlined_call_operand.hbm [shape: f32[1,896], index: 2, kind: input, shape index: {}]   ;;  %s9511_s3 = inlined_call_operand.hbm [shape: f32[3,512,896], index: 3, kind: input, shape index: {}]   ;;  %s9512_s4 = inlined_call_operand.hbm [shape: f32[1,896], index: 4, kind: input, shape index: {}]   ;;  %s9513_s5 = inlined_call_operand.vmem [shape: f32[2,7,448], index: 5, kind: output, shape index: {}]  }
   0x1   :  { %11 = vsyncpa [#allocation5], 0 }
   0x2   :  { %12 = vsyncpa [#allocation8], 0  ;;  %s8148_s18 = smov 0  }
   0x3 LB: > { %s8107_s19 = smov [#allocation4]   ;;  %s8154_s21 = sadd.s32 4294967295, %s8105_s18   ;;  %s8105_s18 = sphi %s8148_s18, %s18_s18  }
   0x4   : > { %s185_s20 = sshll.u32 %s8107_s19, 4  ;;  %p5909_p0 = scmp.ge.s32.totalorder %s8105_s18, 1  ;;  %s8159_s20 = int_to_ptr.vmem [resolvable:$true] %s185_s20 }
   0x5   : > { %p159_p1 = scmp.lt.s32.totalorder %s8105_s18, 3  ;;  %p9514_p2 = scmp.eq.s32.totalorder %s8154_s21, 0 }
   0x6   : > { %s8108_s23 = smov [#allocation2]   ;;  %s8109_s26 = smov [#allocation6]  }
   0x7   : > { %p8161_p3 = pnand %p5909_p0, %p159_p1  ;;  %s171_s24 = sshll.u32 %s8108_s23, 4  ;;  %s8167_s24 = int_to_ptr.vmem [resolvable:$true] %s171_s24 }
   0x8   : > { %s195_s27 = sshll.u32 %s8109_s26, 4  ;;  %s8110_s28 = smov [#allocation7]   ;;  %s8175_s27 = int_to_ptr.vmem [resolvable:$true] %s195_s27 }
   0x9   : > { %s9520_s22 = scalar_select %p8161_p3, 1, 0 }
   0xa   : > { %p7935_p4 = pneg %p8161_p3  ;;  %s8177_s29 = sshll.u32 %s8110_s28, 4  ;;  %s210_s29 = int_to_ptr.vmem [resolvable:$true] %s8177_s29 }
   0xb   : > { %s7975_s7 = scalar_lea.hbm %s9510_s2, 112 }
   0xc   : > { %p8171_p5 = pnand %p9514_p2, %p7935_p4  ;;  %p7976_p6 = scmp.ne.s32.totalorder %s9510_s2, %s7975_s7 }
   0xd   : > { %p7982_p10 = scmp.lt.u32.totalorder %s7975_s7, %s9510_s2 }
   0xe   : > { %p8187_p7 = pneg %p8171_p5 }
  0x10   : > { %p7978_p8 = pnand %p8187_p7, %p7976_p6 }
  0x12   : > { %p7979_p9 = pneg %p7978_p8 }
  0x14   : > { %p7984_p11 = pnand %p7982_p10, %p7979_p9 }
  0x16   : > { %7987 = shalt.err (!%p7984_p11)
}
  0x17   : > { %s7988_s13 = scalar_lea.vmem %s8159_s20, 112  ;;  %s7995_s14 = scalar_lea.vmem %s8159_s20, 128 }
  0x18   : > { %p7989_p12 = scmp.ne.s32.totalorder %s8159_s20, %s7988_s13  ;;  %p7996_p1 = scmp.lt.s32.totalorder %s8159_s20, %s8159_s20 }
  0x19   : > { %p7997_p4 = scmp.lt.s32.totalorder %s7995_s14, %s7988_s13 }
  0x1a   : > { %p7991_p13 = pnand %p7989_p12, %p8187_p7 }
  0x1b   : > { %p7998_p6 = por %p7997_p4, %p7996_p1 }
  0x1c   : > { %p7992_p0 = pneg %p7991_p13 }
  0x1e   : > { %p7999_p8 = pnand %p7998_p6, %p7992_p0 }
  0x20   : > { %8002 = shalt.err (!%p7999_p8)
}
  0x21   : > { %7941 = dma.hbm_to_vmem [thread:$0]  (!%p8171_p5), %s9510_s2, 112, %s8159_s20, [#allocation5]  }
  0x22   : > { %s8003_s23 = scalar_lea.hbm %s9509_s1, 10752 }
  0x23   : > { %p8004_p9 = scmp.ne.s32.totalorder %s9509_s1, %s8003_s23  ;;  %p8010_p12 = scmp.lt.u32.totalorder %s8003_s23, %s9509_s1 }
  0x25   : > { %p8006_p10 = pnand %p8004_p9, %p8187_p7 }
  0x27   : > { %p8007_p11 = pneg %p8006_p10 }
  0x29   : > { %p8012_p13 = pnand %p8010_p12, %p8007_p11 }
  0x2b   : > { %8015 = shalt.err (!%p8012_p13)
}
  0x2c   : > { %s8016_s20 = scalar_lea.vmem %s8167_s24, 10752  ;;  %p8024_p6 = scmp.lt.s32.totalorder %s8167_s24, %s8167_s24 }
  0x2d   : > { %p8017_p0 = scmp.ne.s32.totalorder %s8167_s24, %s8016_s20  ;;  %p8025_p8 = scmp.lt.s32.totalorder %s8016_s20, %s8016_s20 }
  0x2f   : > { %p8019_p1 = pnand %p8017_p0, %p8187_p7  ;;  %p8026_p9 = por %p8025_p8, %p8024_p6 }
  0x31   : > { %p8020_p4 = pneg %p8019_p1 }
  0x33   : > { %p8027_p10 = pnand %p8026_p9, %p8020_p4 }
  0x35   : > { %8030 = shalt.err (!%p8027_p10)
}
  0x36   : > { %s8111_s7 = smov 896   ;;  %s8112_s8 = smov 56  }
  0x37   : > { %7938 = dma.hbm_to_vmem [thread:$0]  (!%p8171_p5), %s9509_s1, 10752, %s8167_s24, [#allocation3], %s8111_s7, %s8111_s7, %s8112_s8  }
  0x38   : > { %s8031_s14 = scalar_lea.hbm %s9511_s3, 172032 }
  0x39   : > { %p8032_p11 = scmp.ne.s32.totalorder %s9511_s3, %s8031_s14  ;;  %p8038_p0 = scmp.lt.u32.totalorder %s8031_s14, %s9511_s3 }
  0x3b   : > { %p8034_p12 = pnand %p8032_p11, %p8187_p7 }
  0x3d   : > { %p8035_p13 = pneg %p8034_p12 }
  0x3f   : > { %p8040_p1 = pnand %p8038_p0, %p8035_p13 }
  0x41   : > { %8043 = shalt.err (!%p8040_p1)
}
  0x42   : > { %s8044_s24 = scalar_lea.vmem %s8175_s27, 172032  ;;  %p8052_p9 = scmp.lt.s32.totalorder %s8175_s27, %s8175_s27 }
  0x43   : > { %p8045_p4 = scmp.ne.s32.totalorder %s8175_s27, %s8044_s24  ;;  %p8053_p10 = scmp.lt.s32.totalorder %s8044_s24, %s8044_s24 }
  0x45   : > { %p8047_p6 = pnand %p8045_p4, %p8187_p7  ;;  %p8054_p11 = por %p8053_p10, %p8052_p9 }
  0x47   : > { %p8048_p8 = pneg %p8047_p6 }
  0x49   : > { %p8055_p12 = pnand %p8054_p11, %p8048_p8 }
  0x4b   : > { %8058 = shalt.err (!%p8055_p12)
}
  0x4c   : > { %7944 = dma.hbm_to_vmem [thread:$0]  (!%p8171_p5), %s9511_s3, 172032, %s8175_s27, [#allocation5], %s8111_s7, %s8111_s7, %s8112_s8  }
  0x4d   : > { %s8059_s6 = scalar_lea.hbm %s9512_s4, 112 }
  0x4e   : > { %p8060_p13 = scmp.ne.s32.totalorder %s9512_s4, %s8059_s6  ;;  %p8066_p4 = scmp.lt.u32.totalorder %s8059_s6, %s9512_s4 }
  0x50   : > { %p8062_p0 = pnand %p8060_p13, %p8187_p7 }
  0x52   : > { %p8063_p1 = pneg %p8062_p0 }
  0x54   : > { %p8068_p6 = pnand %p8066_p4, %p8063_p1 }
  0x56   : > { %8071 = shalt.err (!%p8068_p6)
}
  0x57   : > { %s8072_s13 = scalar_lea.vmem %s210_s29, 112  ;;  %s8079_s27 = scalar_lea.vmem %s210_s29, 128 }
  0x58   : > { %p8073_p8 = scmp.ne.s32.totalorder %s210_s29, %s8072_s13  ;;  %p8080_p11 = scmp.lt.s32.totalorder %s210_s29, %s210_s29 }
  0x59   : > { %p8081_p12 = scmp.lt.s32.totalorder %s8079_s27, %s8072_s13 }
  0x5a   : > { %p8075_p9 = pnand %p8073_p8, %p8187_p7 }
  0x5b   : > { %p8082_p2 = por %p8081_p12, %p8080_p11 }
  0x5c   : > { %p8076_p10 = pneg %p8075_p9 }
  0x5e   : > { %p8083_p3 = pnand %p8082_p2, %p8076_p10 }
  0x60   : > { %8086 = shalt.err (!%p8083_p3)
}
  0x61   : > { %7947 = dma.hbm_to_vmem [thread:$0]  (!%p8171_p5), %s9512_s4, 112, %s210_s29, [#allocation8]  }
  0x62   : > { %p9523_p13 = scmp.ne.s32.totalorder %s9520_s22, 0 }
  0x63   : > { %p9524_p0 = scmp.eq.s32.totalorder (!%p9523_p13), %s8154_s21, 0 }
  0x64   : > { %230 = sbr.rel (%p9523_p13) target bundleno = 2012 (0x7dc), region = 40 }
  0x6b   : > { %8092 = dma.done.wait (%p9524_p0), [#allocation3], 10752   ;;  %p9525_p7 = pmov %p9524_p0 }
  0x6c   : > { %p9526_p1 = pmov %p9524_p0 }
  0x6d   : > { %8094 = vsyncadd (%p9525_p7), [#allocation3], 4294956544 }
  0x6e   : > { %8096 = dma.done.wait (%p9526_p1), [#allocation5], 172144   ;;  %p9527_p2 = pmov %p9524_p0 }
  0x6f   : > { %p9528_p3 = pmov %p9524_p0 }
  0x70   : > { %8098 = vsyncadd (%p9527_p2), [#allocation5], 4294795152 }
  0x71   : > { %8100 = dma.done.wait (%p9528_p3), [#allocation8], 112   ;;  %p9529_p5 = pmov %p9524_p0 }
  0x72   : > { %p270_p4 = scmp.lt.s32.totalorder %s8154_s21, 1  ;;  %v8113_v0 = vmov 0.0   ;;  %vm362_vm0 = vcmask 1045504   ;;  %vm8114_vm1 = vmmov 1   ;;  %v314_v2 = vld [vmem:[#allocation2 + $0xe8] sm:$0xff]  ;;  %v321_v3 = vld [vmem:[#allocation2 + $0x120] sm:$0xff]  ;;  %v1564_v1 = vlaneseq }
  0x73   : > { %8102 = vsyncadd (%p9529_p5), [#allocation8], 4294967184  ;;  %448 = vmatprep.mubr.f32.mxu0 %v8113_v0  ;;  %918 = vmatprep.mubr.f32.mxu1 %v8113_v0  ;;  %v287_v4 = vld [vmem:[#allocation2 + $0x18] sm:$0xff]  ;;  %v6339_v5 = vpack.c.bf16 %v321_v3, %v314_v2  ;;  %v294_v6 = vld [vmem:[#allocation2 + $0x50] sm:$0xff]  ;;  %vm345_vm3 = vcmask 1046528   ;;  %vm353_vm4 = vcmask 244736  }
  0x74   : > { %s9539_s21 = smov (!%p270_p4, %s8154_s21), 1  ;;  %vm8295_vm2 = vmpackc.low %vm362_vm0, %vm8114_vm1  ;;  %v313_v7 = vld [vmem:[#allocation2 + $0xe0] sm:$0xff]  ;;  %v320_v8 = vld [vmem:[#allocation2 + $0x118] sm:$0xff]  ;;  %v6389_v9 = vpack.c.bf16 %v294_v6, %v287_v4  ;;  %s8115_s14 = smov 96   ;;  %vm1943_vm5 = vcmask 261120   ;;  %vm1948_vm6 = vcmask 523264  }
  0x75   : > { %s6043_s22 = sshll.u32 %s9539_s21, 5  ;;  %v6341_v10 = vpack.c.bf16 %v320_v8, %v313_v7  ;;  %v286_v11 = vld [vmem:[#allocation2 + $0x10] sm:$0xff]  ;;  %v293_v12 = vld [vmem:[#allocation2 + $0x48] sm:$0xff]  ;;  %v328_v13 = vld [vmem:[#allocation2 + $0x158] sm:$0xff]  ;;  %6340 = vmatprep.subr.bf16.mxu0 %v6339_v5  ;;  %s8116_s15 = smov 64   ;;  %vm1953_vm7 = vcmask 785408  }
  0x76   : > { %s8305_s10 = scalar_lea.vmem %s9508_s0, %s6043_s22  ;;  %v6391_v14 = vpack.c.bf16 %v293_v12, %v286_v11  ;;  %v335_v15 = vld [vmem:[#allocation2 + $0x190] sm:$0x3f]  ;;  %v301_v16 = vld [vmem:[#allocation2 + $0x88] sm:$0xff]  ;;  %v308_v17 = vld [vmem:[#allocation2 + $0xc0] sm:$0x3f]  ;;  %6390 = vmatprep.subr.bf16.mxu1 %v6389_v9  ;;  %s8117_s16 = smov 32  }
  0x77   : > { %6342 = vmatpush1.bf16.msra.mxu0 %v6341_v10  ;;  %v6343_v18 = vpack.c.bf16 %v335_v15, %v328_v13  ;;  %v6393_v19 = vpack.c.bf16 %v308_v17, %v301_v16  ;;  %v327_v20 = vld [vmem:[#allocation2 + $0x150] sm:$0xff]  ;;  %v334_v21 = vld [vmem:[#allocation2 + $0x188] sm:$0x3f]  ;;  %v300_v22 = vld [vmem:[#allocation2 + $0x80] sm:$0xff]  ;;  %vm2162_vm8 = vcmask 1040384   ;;  %vm2167_vm9 = vcmask 1041408   ;;  %s9462_s24 = scalar_lea.vmem %s9513_s5, %s6043_s22 }
  0x78   : > { %6392 = vmatpush1.bf16.msra.mxu1 %v6391_v14  ;;  %v6346_v23 = vpack.c.bf16 %v334_v21, %v327_v20  ;;  %v307_v24 = vld [vmem:[#allocation2 + $0xb8] sm:$0x3f]  ;;  %v8308_v25 = vld [vmem:[%s8305_s10] sm:$0xff]  ;;  %v8311_v26 = vld [vmem:[%s8305_s10 + $0x8] sm:$0xff]  ;;  %vm2172_vm10 = vcmask 1042432   ;;  %vm2177_vm11 = vcmask 1043456  }
  0x79   : > { %6345 = vmatprep.subr.msk.bf16.mxu0 %vm8295_vm2, %v6343_v18  ;;  %6395 = vmatprep.subr.msk.bf16.mxu1 %vm8295_vm2, %v6393_v19  ;;  %v6396_v27 = vpack.c.bf16 %v307_v24, %v300_v22  ;;  %v346_v28 = vrot.slane %v8308_v25, 1  ;;  %v347_v29 = vrot.slane %v8311_v26, 1  ;;  %v316_v30 = vld [vmem:[#allocation2 + $0xf8] sm:$0xff]  ;;  %v323_v31 = vld [vmem:[#allocation2 + $0x130] sm:$0xff]  ;;  %v322_v34 = vld [vmem:[#allocation2 + $0x128] sm:$0xff]  ;;  %v1146_v20 = vrot.slane %v8308_v25, 2 }
  0x7a   : > { %v315_v32 = vld [vmem:[#allocation2 + $0xf0] sm:$0xff]  ;;  %v6349_v33 = vpack.c.bf16 %v323_v31, %v316_v30  ;;  %v330_v39 = vld [vmem:[#allocation2 + $0x168] sm:$0xff]  ;;  %v337_v40 = vld [vmem:[#allocation2 + $0x1a0] sm:$0x3f]  ;;  %v1147_v21 = vrot.slane %v8311_v26, 2  ;;  %vm2182_vm12 = vcmask 1044480  }
  0x7b   : > { %v8320_v35 = vld [vmem:[%s8305_s10 + $0x10] sm:$0xff]  ;;  %6348 = vmatpush1.bf16.msk.msra.mxu0 %vm8295_vm2, %v6346_v23  ;;  %v8325_v36 = vsel %vm345_vm3, %v346_v28, %v347_v29  ;;  %v6351_v37 = vpack.c.bf16 %v322_v34, %v315_v32  ;;  %v8331_v42 = vld [vmem:[%s8305_s10 + $0x18] sm:$0x3f]  ;;  %v297_v43 = vld [vmem:[#allocation2 + $0x68] sm:$0xff]  ;;  %v6353_v44 = vpack.c.bf16 %v337_v40, %v330_v39  ;;  %vm5809_vm14 = vcmask 522240  }
  0x7c   : > { %v349_v38 = vrot.slane %v8320_v35, 1  ;;  %v290_v41 = vld [vmem:[#allocation2 + $0x30] sm:$0xff]  ;;  %6398 = vmatpush1.bf16.msk.msra.mxu1 %vm8295_vm2, %v6396_v27  ;;  %6350 = vmatprep.subr.bf16.mxu0 %v6349_v33  ;;  %v329_v46 = vld [vmem:[#allocation2 + $0x160] sm:$0xff]  ;;  %v336_v47 = vld [vmem:[#allocation2 + $0x198] sm:$0x3f]  ;;  %v8341_v53 = vrot.slane %v8331_v42, 1 }
  0x7d   : > { %v6409_v45 = vpack.c.bf16 %v297_v43, %v290_v41  ;;  %v304_v48 = vld [vmem:[#allocation2 + $0xa0] sm:$0xff]  ;;  %v311_v49 = vld [vmem:[#allocation2 + $0xd8] sm:$0x3f]  ;;  %v318_v50 = vld [vmem:[#allocation2 + $0x108] sm:$0xff]  ;;  %v6356_v54 = vpack.c.bf16 %v336_v47, %v329_v46  ;;  %v1149_v30 = vrot.slane %v8320_v35, 2  ;;  %v8413_v33 = vrot.slane %v8331_v42, 2 }
  0x7e   : > { %5926 = vmatmul.mubr.msk.f32.vlgmr.msra.gmra.mrb[0].mxu0 %vm353_vm4, %v8325_v36  ;;  %v325_v51 = vld [vmem:[#allocation2 + $0x140] sm:$0xff]  ;;  %v8338_v52 = vsel %vm345_vm3, %v347_v29, %v349_v38  ;;  %v6413_v55 = vpack.c.bf16 %v311_v49, %v304_v48  ;;  %v1121_v57 = vld [vmem:[#allocation2 + $0x1d8] sm:$0xff]  ;;  %v1128_v58 = vld [vmem:[#allocation2 + $0x210] sm:$0xff]  ;;  %v8354_v59 = vsel %vm345_vm3, %v349_v38, %v8341_v53  ;;  %v8398_v29 = vsel %vm362_vm0, %v1146_v20, %v1147_v21 }
  0x7f   : > { %5955 = vmatmul.mubr.msk.f32.vlgmr.msra.gmra.mrb[0].mxu1 %vm353_vm4, %v8308_v25  ;;  %6352 = vmatpush1.bf16.msra.mxu0 %v6351_v37  ;;  %v6359_v56 = vpack.c.bf16 %v325_v51, %v318_v50  ;;  %v6429_v60 = vpack.c.bf16 %v1128_v58, %v1121_v57  ;;  %v317_v61 = vld [vmem:[#allocation2 + $0x100] sm:$0xff]  ;;  %v324_v62 = vld [vmem:[#allocation2 + $0x138] sm:$0xff]  ;;  %v1120_v63 = vld [vmem:[#allocation2 + $0x1d0] sm:$0xff]  ;;  %v8410_v32 = vsel %vm362_vm0, %v1147_v21, %v1149_v30 }
  0x80   : > { %454 = vmatprep.mubr.f32.mxu0 %v8113_v0  ;;  %924 = vmatprep.mubr.f32.mxu1 %v8113_v0  ;;  %v1127_v2 = vld [vmem:[#allocation2 + $0x208] sm:$0xff]  ;;  %v1142_v4 = vld [vmem:[#allocation2 + $0x280] sm:$0x3f]  ;;  %v6361_v5 = vpack.c.bf16 %v324_v62, %v317_v61  ;;  %v332_v6 = vld [vmem:[#allocation2 + $0x178] sm:$0xff]  ;;  %v8425_v38 = vsel %vm362_vm0, %v1149_v30, %v8413_v33 }
  0x81   : > { %6355 = vmatprep.subr.msk.bf16.mxu0 %vm8295_vm2, %v6353_v44  ;;  %6410 = vmatprep.subr.bf16.mxu1 %v6409_v45  ;;  %v1135_v3 = vld [vmem:[#allocation2 + $0x248] sm:$0xff]  ;;  %v339_v7 = vld [vmem:[#allocation2 + $0x1b0] sm:$0x3f]  ;;  %v6431_v8 = vpack.c.bf16 %v1127_v2, %v1120_v63  ;;  %v1134_v10 = vld [vmem:[#allocation2 + $0x240] sm:$0xff] }
  0x82   : > { %5927 = vmatmul.mubr.msk.f32.gmra.mrb[2].mxu0 %vm353_vm4, %v8338_v52  ;;  %6412 = vmatpush3.bf16.msra.mxu1 %v6409_v45  ;;  %v6433_v9 = vpack.c.bf16 %v1142_v4, %v1135_v3  ;;  %v1141_v11 = vld [vmem:[#allocation2 + $0x278] sm:$0x3f]  ;;  %v331_v12 = vld [vmem:[#allocation2 + $0x170] sm:$0xff]  ;;  %v6363_v13 = vpack.c.bf16 %v339_v7, %v332_v6  ;;  %v338_v14 = vld [vmem:[#allocation2 + $0x1a8] sm:$0x3f] }
  0x83   : > { %5956 = vmatmul.mubr.msk.f32.gmra.mrb[2].mxu1 %vm353_vm4, %v8311_v26  ;;  %460 = vmatprep.mubr.f32.mxu0 %v8113_v0  ;;  %v1124_v15 = vld [vmem:[#allocation2 + $0x1f0] sm:$0xff]  ;;  %v1131_v16 = vld [vmem:[#allocation2 + $0x228] sm:$0xff]  ;;  %v6436_v19 = vpack.c.bf16 %v1141_v11, %v1134_v10  ;;  %v6366_v22 = vpack.c.bf16 %v338_v14, %v331_v12  ;;  %v1138_v27 = vld [vmem:[#allocation2 + $0x260] sm:$0xff] }
  0x84   : > { %930 = vmatprep.mubr.f32.mxu1 %v8113_v0  ;;  %6358 = vmatpush1.bf16.msk.msra.mxu0 %vm8295_vm2, %v6356_v54  ;;  %v319_v17 = vld [vmem:[#allocation2 + $0x110] sm:$0xff]  ;;  %v326_v18 = vld [vmem:[#allocation2 + $0x148] sm:$0xff]  ;;  %v6449_v23 = vpack.c.bf16 %v1131_v16, %v1124_v15  ;;  %v1145_v28 = vld [vmem:[#allocation2 + $0x298] sm:$0x3f] }
  0x85   : > { %6415 = vmatprep.subr.msk.bf16.mxu1 %vm8295_vm2, %v6413_v55  ;;  %6360 = vmatprep.subr.bf16.mxu0 %v6359_v56  ;;  %v6369_v24 = vpack.c.bf16 %v326_v18, %v319_v17  ;;  %v6453_v31 = vpack.c.bf16 %v1145_v28, %v1138_v27  ;;  %v333_v34 = vld [vmem:[#allocation2 + $0x180] sm:$0xff]  ;;  %v340_v37 = vld [vmem:[#allocation2 + $0x1b8] sm:$0x3f]  ;;  %v285_v40 = vld [vmem:[#allocation2 + $0x8] sm:$0xff] }
  0x86   : > { %5928 = vmatmul.mubr.msk.f32.gmra.mrb[4].mxu0 %vm353_vm4, %v8354_v59  ;;  %6418 = vmatpush3.bf16.msk.msra.mxu1 %vm8295_vm2, %v6413_v55  ;;  %v6373_v39 = vpack.c.bf16 %v340_v37, %v333_v34  ;;  %v292_v41 = vld [vmem:[#allocation2 + $0x40] sm:$0xff]  ;;  %v291_v45 = vld [vmem:[#allocation2 + $0x38] sm:$0xff]  ;;  %v306_v47 = vld [vmem:[#allocation2 + $0xb0] sm:$0x3f] }
  0x87   : > { %5957 = vmatmul.mubr.msk.f32.gmra.mrb[4].mxu1 %vm353_vm4, %v8320_v35  ;;  %466 = vmatprep.mubr.f32.mxu0 %v8113_v0  ;;  %v6379_v43 = vpack.c.bf16 %v292_v41, %v285_v40  ;;  %v284_v44 = vld [vmem:[#allocation2] sm:$0xff]  ;;  %v299_v46 = vld [vmem:[#allocation2 + $0x78] sm:$0xff]  ;;  %v298_v50 = vld [vmem:[#allocation2 + $0x70] sm:$0xff] }
  0x88   : > { %936 = vmatprep.mubr.f32.mxu1 %v8113_v0  ;;  %6430 = vmatprep.subr.bf16.mxu1 %v6429_v60  ;;  %v6381_v48 = vpack.c.bf16 %v291_v45, %v284_v44  ;;  %v6383_v49 = vpack.c.bf16 %v306_v47, %v299_v46  ;;  %v305_v51 = vld [vmem:[#allocation2 + $0xa8] sm:$0x3f]  ;;  %v296_v55 = vld [vmem:[#allocation2 + $0x60] sm:$0xff]  ;;  %v295_v58 = vld [vmem:[#allocation2 + $0x58] sm:$0xff] }
  0x89   : > { %v289_v54 = vld [vmem:[#allocation2 + $0x28] sm:$0xff]  ;;  %v6386_v56 = vpack.c.bf16 %v305_v51, %v298_v50  ;;  %v288_v57 = vld [vmem:[#allocation2 + $0x20] sm:$0xff]  ;;  %v303_v60 = vld [vmem:[#allocation2 + $0x98] sm:$0xff] }
  0x8a   : > { %5929 = vmatmul.mubr.msk.f32.gmra.mrb[6].mxu0 %vm353_vm4, %v8341_v53  ;;  %v310_v61 = vld [vmem:[#allocation2 + $0xd0] sm:$0x3f]  ;;  %v309_v63 = vld [vmem:[#allocation2 + $0xc8] sm:$0x3f]  ;;  %v1126_v3 = vld [vmem:[#allocation2 + $0x200] sm:$0xff] }
  0x8b   : > { %5958 = vmatmul.mubr.msk.f32.gmra.mrb[6].mxu1 %vm353_vm4, %v8331_v42  ;;  %537 = vmatprep.mubr.f32.mxu0 %v8113_v0  ;;  %v302_v62 = vld [vmem:[#allocation2 + $0x90] sm:$0xff]  ;;  %v1119_v2 = vld [vmem:[#allocation2 + $0x1c8] sm:$0xff]  ;;  %v1125_v6 = vld [vmem:[#allocation2 + $0x1f8] sm:$0xff] }
  0x8c   : > { %6319 = vmatprep.mubr.msk.f32.mxu1 %vm353_vm4, %v8308_v25  ;;  %v6406_v4 = vpack.c.bf16 %v309_v63, %v302_v62  ;;  %v1133_v7 = vld [vmem:[#allocation2 + $0x238] sm:$0xff]  ;;  %v1132_v11 = vld [vmem:[#allocation2 + $0x230] sm:$0xff]  ;;  %v1139_v12 = vld [vmem:[#allocation2 + $0x268] sm:$0x3f] }
  0x8d   : > { %v1130_v14 = vld [vmem:[#allocation2 + $0x220] sm:$0xff]  ;;  %v6426_v15 = vpack.c.bf16 %v1139_v12, %v1132_v11  ;;  %v1129_v17 = vld [vmem:[#allocation2 + $0x218] sm:$0xff]  ;;  %v1136_v21 = vld [vmem:[#allocation2 + $0x250] sm:$0xff] }
  0x8e   : > { %5932 = vmatmul.mubr.msk.f32.vlgmr.msra.gmra.mrb[8].mxu0 %vm353_vm4, %v8325_v36  ;;  %v1137_v18 = vld [vmem:[#allocation2 + $0x258] sm:$0xff]  ;;  %v8532_v30 = vld [vmem:[#allocation4] sm:$0xff]  ;;  %vm9185_vm13 = vmneg %vm2162_vm8 }
  0x8f   : > { %6320 = vmatmul.mubr.msk.f32.vlgmr.msra.gmra.mrb[8].mxu1 %vm353_vm4, %v8311_v26  ;;  %6362 = vmatpush1.bf16.msra.mxu0 %v6361_v5  ;;  %v1118_v5 = vld [vmem:[#allocation2 + $0x1c0] sm:$0xff] }
  0x90   : > { %6432 = vmatpush1.bf16.msra.mxu1 %v6431_v8  ;;  %543 = vmatprep.mubr.f32.mxu0 %v8113_v0  ;;  %v1140_v8 = vld [vmem:[#allocation2 + $0x270] sm:$0x3f] }
  0x91   : > { %6322 = vmatprep.mubr.msk.f32.mxu1 %vm353_vm4, %v8320_v35  ;;  %6435 = vmatprep.subr.msk.bf16.mxu1 %vm8295_vm2, %v6433_v9  ;;  %v6421_v9 = vpack.c.bf16 %v1125_v6, %v1118_v5  ;;  %v6423_v10 = vpack.c.bf16 %v1140_v8, %v1133_v7 }
  0x92   : > { %5933 = vmatmul.mubr.msk.f32.gmra.mrb[10].mxu0 %vm353_vm4, %v8338_v52  ;;  %6365 = vmatprep.subr.msk.bf16.mxu0 %vm8295_vm2, %v6363_v13  ;;  %v1123_v13 = vld [vmem:[#allocation2 + $0x1e8] sm:$0xff] }
  0x93   : > { %6323 = vmatmul.mubr.msk.f32.gmra.mrb[10].mxu1 %vm353_vm4, %v8331_v42  ;;  %549 = vmatprep.mubr.f32.mxu0 %v8113_v0  ;;  %v6439_v16 = vpack.c.bf16 %v1130_v14, %v1123_v13 }
  0x94   : > { %6438 = vmatpush1.bf16.msk.msra.mxu1 %vm8295_vm2, %v6436_v19  ;;  %1335 = vmatprep.mubr.f32.mxu1 %v8113_v0  ;;  %v1144_v19 = vld [vmem:[#allocation2 + $0x290] sm:$0x3f] }
  0x95   : > { %6368 = vmatpush1.bf16.msk.msra.mxu0 %vm8295_vm2, %v6366_v22  ;;  %6450 = vmatprep.subr.bf16.mxu1 %v6449_v23  ;;  %v6443_v20 = vpack.c.bf16 %v1144_v19, %v1137_v18  ;;  %v1143_v22 = vld [vmem:[#allocation2 + $0x288] sm:$0x3f] }
  0x96   : > { %5934 = vmatmul.mubr.msk.f32.gmra.mrb[12].mxu0 %vm353_vm4, %v8354_v59  ;;  %6370 = vmatprep.subr.bf16.mxu0 %v6369_v24 }
  0x97   : > { %5978 = vmatmul.mubr.msk.f32.vlgmr.msra.gmra.mrb[0].mxu1 %vm353_vm4, %v8398_v29  ;;  %555 = vmatprep.mubr.f32.mxu0 %v8113_v0 }
  0x98   : > { %1341 = vmatprep.mubr.f32.mxu1 %v8113_v0  ;;  %6452 = vmatpush3.bf16.msra.mxu1 %v6449_v23  ;;  %v8529_v23 = vshrl.u32 %v1564_v1, 7 }
  0x99   : > { %6455 = vmatprep.subr.msk.bf16.mxu1 %vm8295_vm2, %v6453_v31 }
  0x9a   : > { %5935 = vmatmul.mubr.msk.f32.gmra.mrb[14].mxu0 %vm353_vm4, %v8341_v53  ;;  %v9518_v28 = vsub.s32 2, %v8529_v23  ;;  %v9516_v8 = vsub.s32 6, %v8529_v23 }
  0x9b   : > { %5979 = vmatmul.mubr.msk.f32.gmra.mrb[2].mxu1 %vm353_vm4, %v8410_v32  ;;  %626 = vmatprep.mubr.f32.mxu0 %v8113_v0 }
  0x9c   : > { %1347 = vmatprep.mubr.f32.mxu1 %v8113_v0  ;;  %6458 = vmatpush3.bf16.msk.msra.mxu1 %vm8295_vm2, %v6453_v31  ;;  %v1578_v31 = vsub.s32 3, %v8529_v23  ;;  %v1591_v13 = vrot.slane %v8532_v30, %v9516_v8 }
  0x9e   : > { %5938 = vmatmul.mubr.msk.f32.vlgmr.msra.gmra.mrb[16].mxu0 %vm353_vm4, %v8325_v36 }
  0x9f   : > { %5980 = vmatmul.mubr.msk.f32.gmra.mrb[4].mxu1 %vm353_vm4, %v8425_v38  ;;  %6372 = vmatpush3.bf16.msra.mxu0 %v6369_v24 }
  0xa0   : > { %632 = vmatprep.mubr.f32.mxu0 %v8113_v0  ;;  %1353 = vmatprep.mubr.f32.mxu1 %v8113_v0 }
  0xa1   : > { %6375 = vmatprep.subr.msk.bf16.mxu0 %vm8295_vm2, %v6373_v39 }
  0xa2   : > { %5939 = vmatmul.mubr.msk.f32.gmra.mrb[18].mxu0 %vm353_vm4, %v8338_v52 }
  0xa3   : > { %5981 = vmatmul.mubr.msk.f32.gmra.mrb[6].mxu1 %vm353_vm4, %v8413_v33  ;;  %638 = vmatprep.mubr.f32.mxu0 %v8113_v0 }
  0xa4   : > { %6378 = vmatpush3.bf16.msk.msra.mxu0 %vm8295_vm2, %v6373_v39  ;;  %6333 = vmatprep.mubr.msk.f32.mxu1 %vm353_vm4, %v8398_v29  ;;  %v1579_v39 = vrot.slane %v8532_v30, %v1578_v31 }
  0xa5   : > { %6380 = vmatprep.subr.bf16.mxu0 %v6379_v43 }
  0xa6   : > { %5940 = vmatmul.mubr.msk.f32.gmra.mrb[20].mxu0 %vm353_vm4, %v8354_v59 }
  0xa7   : > { %644 = vmatprep.mubr.f32.mxu0 %v8113_v0  ;;  %6334 = vmatmul.mubr.msk.f32.vlgmr.msra.gmra.mrb[8].mxu1 %vm353_vm4, %v8410_v32 }
  0xa8   : > { %6336 = vmatprep.mubr.msk.f32.mxu1 %vm353_vm4, %v8425_v38 }
  0xaa   : > { %5941 = vmatmul.mubr.msk.f32.gmra.mrb[22].mxu0 %vm353_vm4, %v8341_v53 }
  0xab   : > { %6305 = vmatprep.mubr.msk.f32.mxu0 %vm353_vm4, %v8325_v36  ;;  %6337 = vmatmul.mubr.msk.f32.gmra.mrb[10].mxu1 %vm353_vm4, %v8413_v33  ;;  %v6399_v36 = vpack.c.bf16 %v296_v55, %v289_v54 }
  0xae   : > { %6306 = vmatmul.mubr.msk.f32.vlgmr.msra.gmra.mrb[24].mxu0 %vm353_vm4, %v8338_v52  ;;  %v6401_v52 = vpack.c.bf16 %v295_v58, %v288_v57 }
  0xaf   : > { %6382 = vmatpush1.bf16.msra.mxu0 %v6381_v48  ;;  %6308 = vmatprep.mubr.msk.f32.mxu0 %vm353_vm4, %v8354_v59  ;;  %v6403_v59 = vpack.c.bf16 %v310_v61, %v303_v60 }
  0xb0   : > { %6385 = vmatprep.subr.msk.bf16.mxu0 %vm8295_vm2, %v6383_v49 }
  0xb2   : > { %6309 = vmatmul.mubr.msk.f32.gmra.mrb[26].mxu0 %vm353_vm4, %v8341_v53  ;;  %v6419_v53 = vpack.c.bf16 %v1126_v3, %v1119_v2 }
  0xb3   : > { %6388 = vmatpush1.bf16.msk.msra.mxu0 %vm8295_vm2, %v6386_v56  ;;  %829 = vmatprep.mubr.f32.mxu0 %v8113_v0 }
  0xb4   : > { %6400 = vmatprep.subr.bf16.mxu0 %v6399_v36 }
  0xb6   : > { %5949 = vmatmul.mubr.msk.f32.vlgmr.msra.gmra.mrb[0].mxu0 %vm353_vm4, %v8308_v25 }
  0xb7   : > { %6402 = vmatpush1.bf16.msra.mxu0 %v6401_v52  ;;  %835 = vmatprep.mubr.f32.mxu0 %v8113_v0 }
  0xb8   : > { %6405 = vmatprep.subr.msk.bf16.mxu0 %vm8295_vm2, %v6403_v59 }
  0xba   : > { %5950 = vmatmul.mubr.msk.f32.gmra.mrb[2].mxu0 %vm353_vm4, %v8311_v26 }
  0xbb   : > { %841 = vmatprep.mubr.f32.mxu0 %v8113_v0  ;;  %6408 = vmatpush1.bf16.msk.msra.mxu0 %vm8295_vm2, %v6406_v4 }
  0xbc   : > { %6420 = vmatprep.subr.bf16.mxu0 %v6419_v53 }
  0xbe   : > { %5951 = vmatmul.mubr.msk.f32.gmra.mrb[4].mxu0 %vm353_vm4, %v8320_v35 }
  0xbf   : > { %847 = vmatprep.mubr.f32.mxu0 %v8113_v0 }
  0xc2   : > { %5952 = vmatmul.mubr.msk.f32.gmra.mrb[6].mxu0 %vm353_vm4, %v8331_v42 }
  0xc3   : > { %1007 = vmatprep.mubr.f32.mxu0 %v8113_v0 }
  0xc6   : > { %5961 = vmatmul.mubr.msk.f32.vlgmr.msra.gmra.mrb[16].mxu0 %vm353_vm4, %v8308_v25  ;;  %v1122_v25 = vld [vmem:[#allocation2 + $0x1e0] sm:$0xff] }
  0xc7   : > { %6422 = vmatpush1.bf16.msra.mxu0 %v6421_v9  ;;  %1013 = vmatprep.mubr.f32.mxu0 %v8113_v0 }
  0xc8   : > { %6425 = vmatprep.subr.msk.bf16.mxu0 %vm8295_vm2, %v6423_v10 }
  0xca   : > { %5962 = vmatmul.mubr.msk.f32.gmra.mrb[18].mxu0 %vm353_vm4, %v8311_v26  ;;  %v6441_v26 = vpack.c.bf16 %v1129_v17, %v1122_v25 }
  0xcb   : > { %1019 = vmatprep.mubr.f32.mxu0 %v8113_v0  ;;  %6428 = vmatpush1.bf16.msk.msra.mxu0 %vm8295_vm2, %v6426_v15 }
  0xcc   : > { %6440 = vmatprep.subr.bf16.mxu0 %v6439_v16 }
  0xce   : > { %5963 = vmatmul.mubr.msk.f32.gmra.mrb[20].mxu0 %vm353_vm4, %v8320_v35  ;;  %v6446_v35 = vpack.c.bf16 %v1143_v22, %v1136_v21 }
  0xcf   : > { %1025 = vmatprep.mubr.f32.mxu0 %v8113_v0 }
  0xd2   : > { %5964 = vmatmul.mubr.msk.f32.gmra.mrb[22].mxu0 %vm353_vm4, %v8331_v42 }
  0xd3   : > { %1246 = vmatprep.mubr.f32.mxu0 %v8113_v0 }
  0xd6   : > { %5972 = vmatmul.mubr.msk.f32.vlgmr.msra.gmra.mrb[0].mxu0 %vm353_vm4, %v8398_v29 }
  0xd7   : > { %6442 = vmatpush1.bf16.msra.mxu0 %v6441_v26  ;;  %1252 = vmatprep.mubr.f32.mxu0 %v8113_v0 }
  0xd8   : > { %6445 = vmatprep.subr.msk.bf16.mxu0 %vm8295_vm2, %v6443_v20 }
  0xda   : > { %5973 = vmatmul.mubr.msk.f32.gmra.mrb[2].mxu0 %vm353_vm4, %v8410_v32 }
  0xdb   : > { %1258 = vmatprep.mubr.f32.mxu0 %v8113_v0  ;;  %6448 = vmatpush1.bf16.msk.msra.mxu0 %vm8295_vm2, %v6446_v35 }
  0xde   : > { %5974 = vmatmul.mubr.msk.f32.gmra.mrb[4].mxu0 %vm353_vm4, %v8425_v38 }
  0xdf   : > { %1264 = vmatprep.mubr.f32.mxu0 %v8113_v0 }
  0xe2   : > { %5975 = vmatmul.mubr.msk.f32.gmra.mrb[6].mxu0 %vm353_vm4, %v8413_v33 }
  0xe3   : > { %1424 = vmatprep.mubr.f32.mxu0 %v8113_v0 }
  0xe6   : > { %5984 = vmatmul.mubr.msk.f32.vlgmr.msra.gmra.mrb[16].mxu0 %vm353_vm4, %v8398_v29 }
  0xe7   : > { %1430 = vmatprep.mubr.f32.mxu0 %v8113_v0 }
  0xea   : > { %5985 = vmatmul.mubr.msk.f32.gmra.mrb[18].mxu0 %vm353_vm4, %v8410_v32 }
  0xeb   : > { %1436 = vmatprep.mubr.f32.mxu0 %v8113_v0 }
  0xee   : > { %5986 = vmatmul.mubr.msk.f32.gmra.mrb[20].mxu0 %vm353_vm4, %v8425_v38 }
  0xef   : > { %1442 = vmatprep.mubr.f32.mxu0 %v8113_v0  ;;  %v1575_v0 = vrot.slane %v8532_v30, %v9518_v28 }
  0xf2   : > { %5987 = vmatmul.mubr.msk.f32.gmra.mrb[22].mxu0 %vm353_vm4, %v8413_v33 }
 0x161   : > { %v539_v42 = vpop.f32.mrb[8].mxu0 }
 0x162   : > { %v541_v24 = vpop.f32.mrb[9].mxu0 }
 0x165   : > { %v545_v27 = vpop.f32.mrb[10].mxu0 }
 0x166   : > { %v547_v29 = vpop.f32.mrb[11].mxu0 }
 0x169   : > { %v551_v32 = vpop.f32.mrb[12].mxu0 }
 0x16a   : > { %v1337_v34 = vpop.f32.mrb[0].mxu1  ;;  %v553_v33 = vpop.f32.mrb[13].mxu0 }
 0x16b   : > { %v7803_v37 = vadd.f32 %v1337_v34, %v539_v42  ;;  %v1339_v38 = vpop.f32.mrb[1].mxu1 }
 0x16c   : > { %v7804_v40 = vadd.f32 %v1339_v38, %v541_v24 }
 0x16d   : > { %v557_v41 = vpop.f32.mrb[14].mxu0  ;;  %v8541_v43 = vadd.f32 %v7803_v37, %v1575_v0 }
 0x16e   : > { %v1343_v44 = vpop.f32.mrb[2].mxu1  ;;  %v559_v45 = vpop.f32.mrb[15].mxu0  ;;  %v8543_v46 = vadd.f32 %v7804_v40, %v1579_v39 }
 0x16f   : > { %v7805_v47 = vadd.f32 %v1343_v44, %v545_v27  ;;  %v1345_v48 = vpop.f32.mrb[3].mxu1  ;;  %v1629_v49 = vmax.f32 %v8541_v43, 0.0 }
 0x170   : > { %v7806_v50 = vadd.f32 %v1345_v48, %v547_v29  ;;  %v1630_v54 = vmax.f32 %v8543_v46, 0.0 }
 0x171   : > { %1699 = vrot.lane.b32.xlu1 %v1629_v49, %s8115_s14  ;;  %v8550_v55 = vadd.f32 %v7805_v47, %v1575_v0 }
 0x172   : > { %v1349_v51 = vpop.f32.mrb[4].mxu1  ;;  %v8557_v60 = vadd.f32 %v7806_v50, %v1579_v39 }
 0x173   : > { %v7807_v56 = vadd.f32 %v1349_v51, %v551_v32  ;;  %v1351_v36 = vpop.f32.mrb[5].mxu1  ;;  %v1636_v52 = vmax.f32 %v8550_v55, 0.0  ;;  %v9519_v32 = vsub.s32 0, %v8529_v23 }
 0x174   : > { %v7808_v57 = vadd.f32 %v1351_v36, %v553_v33  ;;  %v1637_v53 = vmax.f32 %v8557_v60, 0.0  ;;  %v1586_v36 = vsub.s32 5, %v8529_v23 }
 0x175   : > { %1719 = vrot.lane.b32.xlu1 %v1630_v54, %s8115_s14  ;;  %v8555_v58 = vadd.f32 %v7807_v56, %v1575_v0  ;;  %v1567_v34 = vrot.slane %v8532_v30, %v9519_v32  ;;  %v9517_v56 = vsub.s32 4, %v8529_v23 }
 0x176   : > { %v1355_v61 = vpop.f32.mrb[6].mxu1  ;;  %v8560_v59 = vadd.f32 %v7808_v57, %v1579_v39 }
 0x177   : > { %v7809_v62 = vadd.f32 %v1355_v61, %v557_v41  ;;  %v1357_v63 = vpop.f32.mrb[7].mxu1  ;;  %v1643_v2 = vmax.f32 %v8555_v58, 0.0 }
 0x178   : > { %v7810_v3 = vadd.f32 %v1357_v63, %v559_v45  ;;  %v1644_v5 = vmax.f32 %v8560_v59, 0.0  ;;  %v1583_v63 = vrot.slane %v8532_v30, %v9517_v56 }
 0x179   : > { %1701 = vrot.lane.b32.xlu1 %v1636_v52, %s8115_s14  ;;  %1703 = vrot.lane.b32.xlu0 %v1643_v2, %s8115_s14  ;;  %v8571_v6 = vadd.f32 %v7809_v62, %v1575_v0  ;;  %v1570_v0 = vsub.s32 1, %v8529_v23 }
 0x17a   : > { %v6335_v4 = vpop.f32.mrb[8].mxu1  ;;  %v8581_v11 = vadd.f32 %v7810_v3, %v1579_v39 }
 0x17b   : > { %v1515_v7 = vpop.f32.mrb[9].mxu1  ;;  %v1650_v10 = vmax.f32 %v8571_v6, 0.0  ;;  %v1571_v33 = vrot.slane %v8532_v30, %v1570_v0 }
 0x17c   : > { %v1651_v25 = vmax.f32 %v8581_v11, 0.0 }
 0x17d   : > { %1721 = vrot.lane.b32.xlu1 %v1637_v53, %s8115_s14  ;;  %1723 = vrot.lane.b32.xlu0 %v1644_v5, %s8115_s14 }
 0x17e   : > { %v6338_v9 = vpop.f32.mrb[10].mxu1 }
 0x17f   : > { %v1525_v12 = vpop.f32.mrb[11].mxu1 }
 0x181   : > { %1705 = vrot.lane.b32.xlu1 %v1650_v10, %s8115_s14  ;;  %v6307_v14 = vpop.f32.mrb[24].mxu0 }
 0x182   : > { %v7811_v15 = vadd.f32 %v6335_v4, %v6307_v14  ;;  %v717_v16 = vpop.f32.mrb[25].mxu0  ;;  %v1587_v4 = vrot.slane %v8532_v30, %v1586_v36 }
 0x183   : > { %v7812_v17 = vadd.f32 %v1515_v7, %v717_v16 }
 0x184   : > { %v8590_v18 = vadd.f32 %v7811_v15, %v1591_v13 }
 0x185   : > { %1725 = vrot.lane.b32.xlu1 %v1651_v25, %s8115_s14  ;;  %v6310_v19 = vpop.f32.mrb[26].mxu0  ;;  %v8596_v20 = vadd.f32 %v7812_v17, %v1591_v13 }
 0x186   : > { %v1640_v26 = vmax.f32 %v8590_v18, 0.0  ;;  %v7813_v21 = vadd.f32 %v6338_v9, %v6310_v19  ;;  %v727_v22 = vpop.f32.mrb[27].mxu0 }
 0x187   : > { %v7814_v35 = vadd.f32 %v1525_v12, %v727_v22  ;;  %v1633_v1 = vmax.f32 %v8596_v20, 0.0 }
 0x188   : > { %1781 = vrot.lane.b32.xlu0 %v1640_v26, %s8115_s14  ;;  %v8602_v42 = vadd.f32 %v7813_v21, %v1591_v13 }
 0x189   : > { %v8608_v27 = vadd.f32 %v7814_v35, %v1591_v13 }
 0x18a   : > { %v1654_v24 = vmax.f32 %v8602_v42, 0.0 }
 0x18b   : > { %v1647_v29 = vmax.f32 %v8608_v27, 0.0 }
 0x18c   : > { %1779 = vrot.lane.b32.xlu0 %v1633_v1, %s8115_s14 }
 0x190   : > { %1785 = vrot.lane.b32.xlu0 %v1654_v24, %s8115_s14 }
 0x194   : > { %1783 = vrot.lane.b32.xlu0 %v1647_v29, %s8115_s14 }
 0x1a9   : > { %v1248_v37 = vpop.f32.mrb[0].mxu0 }
 0x1aa   : > { %v8625_v38 = vadd.f32 %v1567_v34, %v1248_v37  ;;  %v1250_v39 = vpop.f32.mrb[1].mxu0 }
 0x1ab   : > { %v8628_v41 = vadd.f32 %v1571_v33, %v1250_v39 }
 0x1ac   : > { %v1627_v40 = vmax.f32 %v8625_v38, 0.0 }
 0x1ad   : > { %v1254_v44 = vpop.f32.mrb[2].mxu0  ;;  %v1628_v48 = vmax.f32 %v8628_v41, 0.0  ;;  %v2979_v41 = vld [vmem:[#allocation6 + $0x15a8] sm:$0xff] }
 0x1ae   : > { %1659 = vrot.lane.b32.xlu0 %v1627_v40, %s8115_s14  ;;  %v1256_v45 = vpop.f32.mrb[3].mxu0 }
 0x1af   : > { %v8633_v47 = vadd.f32 %v1571_v33, %v1256_v45 }
 0x1b1   : > { %v1260_v50 = vpop.f32.mrb[4].mxu0 }
 0x1b2   : > { %1679 = vrot.lane.b32.xlu0 %v1628_v48, %s8115_s14  ;;  %v1262_v51 = vpop.f32.mrb[5].mxu0 }
 0x1b5   : > { %v1266_v57 = vpop.f32.mrb[6].mxu0 }
 0x1b6   : > { %v8641_v61 = vadd.f32 %v1567_v34, %v1266_v57  ;;  %v1268_v62 = vpop.f32.mrb[7].mxu0 }
 0x1b7   : > { %v8646_v3 = vadd.f32 %v1571_v33, %v1268_v62 }
 0x1b9   : > { %v1426_v7 = vpop.f32.mrb[16].mxu0  ;;  %v1649_v38 = vmax.f32 %v8646_v3, 0.0 }
 0x1ba   : > { %v8651_v9 = vadd.f32 %v1583_v63, %v1426_v7  ;;  %v1428_v12 = vpop.f32.mrb[17].mxu0 }
 0x1bb   : > { %v8654_v14 = vadd.f32 %v1587_v4, %v1428_v12 }
 0x1bc   : > { %v1631_v13 = vmax.f32 %v8651_v9, 0.0 }
 0x1bd   : > { %v1432_v15 = vpop.f32.mrb[18].mxu0  ;;  %v1632_v19 = vmax.f32 %v8654_v14, 0.0 }
 0x1be   : > { %1739 = vrot.lane.b32.xlu0 %v1631_v13, %s8115_s14  ;;  %v1434_v16 = vpop.f32.mrb[19].mxu0  ;;  %v8662_v21 = vadd.f32 %v1583_v63, %v1432_v15  ;;  %v8685_v15 = vadd.f32 %v1567_v34, %v1260_v50  ;;  %v8700_v50 = vadd.f32 %v1571_v33, %v1262_v51 }
 0x1bf   : > { %v8659_v17 = vadd.f32 %v1587_v4, %v1434_v16 }
 0x1c0   : > { %v1638_v39 = vmax.f32 %v8662_v21, 0.0  ;;  %v1635_v21 = vmax.f32 %v8633_v47, 0.0 }
 0x1c1   : > { %v1639_v30 = vmax.f32 %v8659_v17, 0.0  ;;  %v1438_v22 = vpop.f32.mrb[20].mxu0 }
 0x1c2   : > { %v8665_v35 = vadd.f32 %v1583_v63, %v1438_v22  ;;  %1759 = vrot.lane.b32.xlu0 %v1632_v19, %s8115_s14  ;;  %v1440_v37 = vpop.f32.mrb[21].mxu0 }
 0x1c3   : > { %1761 = vrot.lane.b32.xlu1 %v1639_v30, %s8115_s14  ;;  %v8675_v57 = vadd.f32 %v1587_v4, %v1440_v37 }
 0x1c4   : > { %v1645_v45 = vmax.f32 %v8665_v35, 0.0 }
 0x1c5   : > { %v1444_v62 = vpop.f32.mrb[22].mxu0  ;;  %v1646_v16 = vmax.f32 %v8675_v57, 0.0 }
 0x1c6   : > { %1741 = vrot.lane.b32.xlu0 %v1638_v39, %s8115_s14  ;;  %v1446_v7 = vpop.f32.mrb[23].mxu0  ;;  %v8688_v22 = vadd.f32 %v1583_v63, %v1444_v62  ;;  %v1642_v62 = vmax.f32 %v8700_v50, 0.0 }
 0x1c7   : > { %v8680_v12 = vadd.f32 %v1587_v4, %v1446_v7  ;;  %1743 = vrot.lane.b32.xlu1 %v1645_v45, %s8115_s14  ;;  %v8697_v4 = vadd.f32 %v1567_v34, %v1254_v44  ;;  %v1641_v7 = vmax.f32 %v8685_v15, 0.0 }
 0x1c8   : > { %v1652_v8 = vmax.f32 %v8688_v22, 0.0 }
 0x1c9   : > { %v1653_v37 = vmax.f32 %v8680_v12, 0.0  ;;  %v1634_v63 = vmax.f32 %v8697_v4, 0.0  ;;  %v2958_v4 = vld [vmem:[#allocation6 + $0x1500] sm:$0xff] }
 0x1cb   : > { %1763 = vrot.lane.b32.xlu1 %v1646_v16, %s8115_s14  ;;  %1765 = vrot.lane.b32.xlu0 %v1653_v37, %s8115_s14 }
 0x1cf   : > { %1745 = vrot.lane.b32.xlu1 %v1652_v8, %s8115_s14  ;;  %1663 = vrot.lane.b32.xlu0 %v1641_v7, %s8115_s14 }
 0x1d3   : > { %1661 = vrot.lane.b32.xlu1 %v1634_v63, %s8115_s14  ;;  %1683 = vrot.lane.b32.xlu0 %v1642_v62, %s8115_s14 }
 0x1e3   : > { %v1700_v34 = vpop.permute.xlu1 %1699 }
 0x1e4   : > { %v8719_v33 = vmax.f32 %v1629_v49, %v1700_v34 }
 0x1e6   : > { %1843 = vrot.lane.b32.xlu0 %v8719_v33, %s8115_s14 }
 0x1e7   : > { %v1720_v44 = vpop.permute.xlu1 %1719 }
 0x1e8   : > { %v1731_v51 = vmax.f32 %v1630_v54, %v1720_v44  ;;  %v2965_v44 = vld [vmem:[#allocation6 + $0x1538] sm:$0xff] }
 0x1ea   : > { %1859 = vrot.lane.b32.xlu0 %v1731_v51, %s8116_s15 }
 0x1eb   : > { %v1702_v56 = vpop.permute.xlu1 %1701  ;;  %v1704_v28 = vpop.permute.xlu0 %1703 }
 0x1ec   : > { %v8728_v32 = vmax.f32 %v1636_v52, %v1702_v56  ;;  %v8739_v55 = vmax.f32 %v1643_v2, %v1704_v28 }
 0x1ee   : > { %1845 = vrot.lane.b32.xlu1 %v8728_v32, %s8115_s14  ;;  %1871 = vrot.lane.b32.xlu0 %v1731_v51, %s8117_s16  ;;  %v2973_v51 = vld [vmem:[#allocation6 + $0x1578] sm:$0xff] }
 0x1ef   : > { %v1722_v43 = vpop.permute.xlu1 %1721  ;;  %v1724_v49 = vpop.permute.xlu0 %1723 }
 0x1f0   : > { %v1732_v46 = vmax.f32 %v1637_v53, %v1722_v43  ;;  %v1733_v52 = vmax.f32 %v1644_v5, %v1724_v49  ;;  %v2980_v43 = vld [vmem:[#allocation6 + $0x15b0] sm:$0xff]  ;;  %v6525_v49 = vpack.c.bf16 %v2965_v44, %v2958_v4  ;;  %v3049_v4 = vld [vmem:[#allocation6 + $0x17d8] sm:$0xff] }
 0x1f1   : > { %v3064_v44 = vld [vmem:[#allocation6 + $0x1850] sm:$0xff] }
 0x1f2   : > { %1861 = vrot.lane.b32.xlu1 %v1732_v46, %s8116_s15  ;;  %1873 = vrot.lane.b32.xlu0 %v1732_v46, %s8117_s16 }
 0x1f3   : > { %v1706_v54 = vpop.permute.xlu1 %1705 }
 0x1f4   : > { %v8748_v60 = vmax.f32 %v1650_v10, %v1706_v54  ;;  %v6527_v54 = vpack.c.bf16 %v2980_v43, %v2973_v51 }
 0x1f6   : > { %1847 = vrot.lane.b32.xlu1 %v8739_v55, %s8115_s14  ;;  %1863 = vrot.lane.b32.xlu0 %v1733_v52, %s8116_s15 }
 0x1f7   : > { %v1726_v53 = vpop.permute.xlu1 %1725 }
 0x1f8   : > { %v1734_v58 = vmax.f32 %v1651_v25, %v1726_v53  ;;  %v2994_v53 = vld [vmem:[#allocation6 + $0x1620] sm:$0xff] }
 0x1fa   : > { %1849 = vrot.lane.b32.xlu1 %v8748_v60, %s8115_s14  ;;  %1875 = vrot.lane.b32.xlu0 %v1733_v52, %s8117_s16  ;;  %v1782_v28 = vpop.permute.xlu0 %1781  ;;  %v2972_v52 = vld [vmem:[#allocation6 + $0x1570] sm:$0xff] }
 0x1fb   : > { %v8758_v2 = vmax.f32 %v1640_v26, %v1782_v28  ;;  %v6529_v28 = vpack.c.bf16 %v2979_v41, %v2972_v52 }
 0x1fe   : > { %1865 = vrot.lane.b32.xlu1 %v1734_v58, %s8116_s15  ;;  %v1780_v59 = vpop.permute.xlu0 %1779 }
 0x1ff   : > { %v8768_v10 = vmax.f32 %v1633_v1, %v1780_v59  ;;  %v2986_v59 = vld [vmem:[#allocation6 + $0x15e0] sm:$0xff] }
 0x202   : > { %1933 = vrot.lane.b32.xlu1 %v8758_v2, %s8115_s14  ;;  %v1786_v5 = vpop.permute.xlu0 %1785 }
 0x203   : > { %v8764_v6 = vmax.f32 %v1654_v24, %v1786_v5  ;;  %v2993_v5 = vld [vmem:[#allocation6 + $0x1618] sm:$0xff] }
 0x204   : > { %v6533_v50 = vpack.c.bf16 %v2993_v5, %v2986_v59 }
 0x205   : > { %1937 = vrot.lane.b32.xlu0 %v8764_v6, %s8115_s14 }
 0x206   : > { %1931 = vrot.lane.b32.xlu1 %v8768_v10, %s8115_s14  ;;  %v1784_v11 = vpop.permute.xlu0 %1783 }
 0x207   : > { %v8776_v25 = vmax.f32 %v1647_v29, %v1784_v11  ;;  %v3001_v11 = vld [vmem:[#allocation6 + $0x1658] sm:$0xff] }
 0x20a   : > { %1935 = vrot.lane.b32.xlu1 %v8776_v25, %s8115_s14 }
 0x220   : > { %v1660_v18 = vpop.permute.xlu0 %1659 }
 0x224   : > { %v1680_v26 = vpop.permute.xlu0 %1679 }
 0x225   : > { %v1691_v12 = vmax.f32 %v1628_v48, %v1680_v26  ;;  %v2987_v48 = vld [vmem:[#allocation6 + $0x15e8] sm:$0xff]  ;;  %v3000_v26 = vld [vmem:[#allocation6 + $0x1650] sm:$0xff] }
 0x230   : > { %v1740_v42 = vpop.permute.xlu0 %1739 }
 0x231   : > { %v8782_v20 = vmax.f32 %v1631_v13, %v1740_v42  ;;  %v3007_v42 = vld [vmem:[#allocation6 + $0x1688] sm:$0xff] }
 0x233   : > { %1887 = vrot.lane.b32.xlu0 %v8782_v20, %s8115_s14 }
 0x234   : > { %v1760_v1 = vpop.permute.xlu0 %1759 }
 0x235   : > { %v1771_v24 = vmax.f32 %v1632_v19, %v1760_v1  ;;  %v1762_v27 = vpop.permute.xlu1 %1761  ;;  %v3015_v1 = vld [vmem:[#allocation6 + $0x16c8] sm:$0xff] }
 0x236   : > { %v1772_v56 = vmax.f32 %v1639_v30, %v1762_v27  ;;  %v6537_v27 = vpack.c.bf16 %v3007_v42, %v3000_v26 }
 0x237   : > { %1903 = vrot.lane.b32.xlu1 %v1771_v24, %s8116_s15  ;;  %1915 = vrot.lane.b32.xlu0 %v1771_v24, %s8117_s16  ;;  %v3022_v24 = vld [vmem:[#allocation6 + $0x1700] sm:$0xff] }
 0x238   : > { %v1742_v29 = vpop.permute.xlu0 %1741 }
 0x239   : > { %v8794_v9 = vmax.f32 %v1638_v39, %v1742_v29  ;;  %v1744_v13 = vpop.permute.xlu1 %1743  ;;  %v6539_v29 = vpack.c.bf16 %v3022_v24, %v3015_v1 }
 0x23a   : > { %v8805_v17 = vmax.f32 %v1645_v45, %v1744_v13  ;;  %v1648_v45 = vmax.f32 %v8641_v61, 0.0  ;;  %v3021_v13 = vld [vmem:[#allocation6 + $0x16f8] sm:$0xff] }
 0x23b   : > { %1889 = vrot.lane.b32.xlu1 %v8794_v9, %s8115_s14  ;;  %1917 = vrot.lane.b32.xlu0 %v1772_v56, %s8117_s16 }
 0x23d   : > { %v1764_v14 = vpop.permute.xlu1 %1763  ;;  %v1766_v39 = vpop.permute.xlu0 %1765 }
 0x23e   : > { %v1773_v19 = vmax.f32 %v1646_v16, %v1764_v14  ;;  %v1774_v57 = vmax.f32 %v1653_v37, %v1766_v39  ;;  %v8829_v16 = vmax.f32 %v1627_v40, %v1660_v18  ;;  %v2959_v37 = vld [vmem:[#allocation6 + $0x1508] sm:$0xff]  ;;  %v3008_v18 = vld [vmem:[#allocation6 + $0x1690] sm:$0xff]  ;;  %v3029_v14 = vld [vmem:[#allocation6 + $0x1738] sm:$0xff] }
 0x23f   : > { %1905 = vrot.lane.b32.xlu1 %v1772_v56, %s8116_s15  ;;  %v3014_v56 = vld [vmem:[#allocation6 + $0x16c0] sm:$0xff] }
 0x240   : > { %1907 = vrot.lane.b32.xlu0 %v1773_v19, %s8116_s15 }
 0x241   : > { %v1746_v30 = vpop.permute.xlu1 %1745  ;;  %v1664_v34 = vpop.permute.xlu0 %1663 }
 0x242   : > { %v8817_v35 = vmax.f32 %v1652_v8, %v1746_v30  ;;  %v8836_v8 = vmax.f32 %v1641_v7, %v1664_v34  ;;  %v2966_v7 = vld [vmem:[#allocation6 + $0x1540] sm:$0xff]  ;;  %v6541_v30 = vpack.c.bf16 %v3021_v13, %v3014_v56  ;;  %v3035_v34 = vld [vmem:[#allocation6 + $0x1768] sm:$0xff] }
 0x243   : > { %1891 = vrot.lane.b32.xlu1 %v8805_v17, %s8115_s14 }
 0x244   : > { %1919 = vrot.lane.b32.xlu0 %v1773_v19, %s8117_s16  ;;  %v3036_v19 = vld [vmem:[#allocation6 + $0x1770] sm:$0xff] }
 0x245   : > { %v1662_v22 = vpop.permute.xlu1 %1661  ;;  %v1684_v15 = vpop.permute.xlu0 %1683  ;;  %v6543_v39 = vpack.c.bf16 %v3036_v19, %v3029_v14 }
 0x246   : > { %v8844_v40 = vmax.f32 %v1634_v63, %v1662_v22  ;;  %v6523_v63 = vpack.c.bf16 %v2966_v7, %v2959_v37  ;;  %v1693_v46 = vmax.f32 %v1642_v62, %v1684_v15  ;;  %v6535_v62 = vpack.c.bf16 %v3008_v18, %v3001_v11  ;;  %v3043_v22 = vld [vmem:[#allocation6 + $0x17a8] sm:$0xff]  ;;  %v3042_v7 = vld [vmem:[#allocation6 + $0x17a0] sm:$0xff] }
 0x247   : > { %1877 = vrot.lane.b32.xlu1 %v1734_v58, %s8117_s16  ;;  %v6531_v58 = vpack.c.bf16 %v2994_v53, %v2987_v48  ;;  %v6549_v51 = vpack.c.bf16 %v3049_v4, %v3042_v7 }
 0x248   : > { %1681 = vrot.lane.b32.xlu0 %v1635_v21, %s8115_s14  ;;  %6524 = vmatprep.subr.bf16.mxu1 %v6523_v63  ;;  %v3057_v63 = vld [vmem:[#allocation6 + $0x1818] sm:$0xff] }
 0x249   : > { %6526 = vmatpush1.bf16.msra.mxu1 %v6525_v49  ;;  %v6551_v43 = vpack.c.bf16 %v3064_v44, %v3057_v63 }
 0x24a   : > { %6528 = vmatprep.subr.bf16.mxu1 %v6527_v54 }
 0x24b   : > { %1893 = vrot.lane.b32.xlu1 %v8817_v35, %s8115_s14 }
 0x24c   : > { %1665 = vrot.lane.b32.xlu0 %v1648_v45, %s8115_s14 }
 0x24d   : > { %6530 = vmatpush1.bf16.msra.mxu1 %v6529_v28 }
 0x24e   : > { %6532 = vmatprep.subr.bf16.mxu1 %v6531_v58 }
 0x24f   : > { %1909 = vrot.lane.b32.xlu1 %v1774_v57, %s8116_s15 }
 0x250   : > { %1799 = vrot.lane.b32.xlu0 %v8829_v16, %s8115_s14 }
 0x251   : > { %6534 = vmatpush1.bf16.msra.mxu1 %v6533_v50 }
 0x252   : > { %6536 = vmatprep.subr.bf16.mxu1 %v6535_v62 }
 0x253   : > { %1921 = vrot.lane.b32.xlu1 %v1774_v57, %s8117_s16  ;;  %v3028_v57 = vld [vmem:[#allocation6 + $0x1730] sm:$0xff] }
 0x254   : > { %1803 = vrot.lane.b32.xlu0 %v8836_v8, %s8115_s14  ;;  %v6545_v15 = vpack.c.bf16 %v3035_v34, %v3028_v57  ;;  %v3056_v34 = vld [vmem:[#allocation6 + $0x1810] sm:$0xff] }
 0x255   : > { %6538 = vmatpush1.bf16.msra.mxu1 %v6537_v27 }
 0x256   : > { %6540 = vmatprep.subr.bf16.mxu1 %v6539_v29 }
 0x257   : > { %1685 = vrot.lane.b32.xlu1 %v1649_v38, %s8115_s14 }
 0x258   : > { %1801 = vrot.lane.b32.xlu0 %v8844_v40, %s8115_s14  ;;  %v1844_v49 = vpop.permute.xlu0 %1843 }
 0x259   : > { %6542 = vmatpush1.bf16.msra.mxu1 %v6541_v30  ;;  %v1958_v42 = vsel %vm1943_vm5, %v8719_v33, %v1844_v49  ;;  %v3078_v49 = vld [vmem:[#allocation6 + $0x18c0] sm:$0xff] }
 0x25a   : > { %6544 = vmatprep.subr.bf16.mxu1 %v6543_v39 }
 0x25b   : > { %1815 = vrot.lane.b32.xlu1 %v1691_v12, %s8116_s15 }
 0x25c   : > { %v1860_v52 = vpop.permute.xlu0 %1859 }
 0x25d   : > { %6546 = vmatpush1.bf16.msra.mxu1 %v6545_v15  ;;  %v1962_v1 = vsel %vm1948_vm6, %v1958_v42, %v1860_v52  ;;  %v3070_v52 = vld [vmem:[#allocation6 + $0x1880] sm:$0xff]  ;;  %v3092_v42 = vld [vmem:[#allocation6 + $0x1930] sm:$0xff] }
 0x25f   : > { %1827 = vrot.lane.b32.xlu1 %v1691_v12, %s8117_s16  ;;  %v3050_v12 = vld [vmem:[#allocation6 + $0x17e0] sm:$0xff] }
 0x260   : > { %v6547_v37 = vpack.c.bf16 %v3050_v12, %v3043_v22  ;;  %v1872_v48 = vpop.permute.xlu0 %1871  ;;  %v3063_v22 = vld [vmem:[#allocation6 + $0x1848] sm:$0xff] }
 0x261   : > { %v1966_v24 = vsel %vm1953_vm7, %v1962_v1, %v1872_v48 }
 0x262   : > { %6548 = vmatprep.subr.bf16.mxu1 %v6547_v37  ;;  %v1991_v14 = vrot.slane %v1966_v24, 1  ;;  %v6553_v37 = vpack.c.bf16 %v3063_v22, %v3056_v34 }
 0x263   : > { %1819 = vrot.lane.b32.xlu1 %v1693_v46, %s8116_s15  ;;  %6550 = vmatpush1.bf16.msra.mxu1 %v6549_v51 }
 0x264   : > { %6552 = vmatprep.subr.bf16.mxu1 %v6551_v43  ;;  %v1874_v28 = vpop.permute.xlu0 %1873  ;;  %v8879_v15 = vmax.f32 %v1966_v24, %v1991_v14  ;;  %v3071_v43 = vld [vmem:[#allocation6 + $0x1888] sm:$0xff] }
 0x265   : > { %v3099_v14 = vld [vmem:[#allocation6 + $0x1968] sm:$0xff] }
 0x266   : > { %v2055_v48 = vrot.slane %v8879_v15, 1 }
 0x267   : > { %1831 = vrot.lane.b32.xlu1 %v1693_v46, %s8117_s16  ;;  %v1846_v46 = vpop.permute.xlu1 %1845  ;;  %6554 = vmatpush1.bf16.msra.mxu1 %v6553_v37  ;;  %v3105_v37 = vld [vmem:[#allocation6 + $0x1998] sm:$0xff] }
 0x268   : > { %v1864_v59 = vpop.permute.xlu0 %1863  ;;  %v1959_v12 = vsel %vm1943_vm5, %v8728_v32, %v1846_v46  ;;  %v6555_v46 = vpack.c.bf16 %v3078_v49, %v3071_v43 }
 0x26a   : > { %6556 = vmatprep.subr.bf16.mxu1 %v6555_v46 }
 0x26b   : > { %v1862_v54 = vpop.permute.xlu1 %1861 }
 0x26c   : > { %v1876_v11 = vpop.permute.xlu0 %1875 }
 0x26f   : > { %v1848_v41 = vpop.permute.xlu1 %1847 }
 0x273   : > { %v8859_v53 = vpop.permute.xlu1 %1849 }
 0x277   : > { %v8861_v58 = vpop.permute.xlu1 %1865  ;;  %v8863_v50 = vpop.permute.xlu0 %1937 }
 0x27b   : > { %v1934_v5 = vpop.permute.xlu1 %1933 }
 0x27c   : > { %v1983_v24 = vsel %vm1943_vm5, %v8758_v2, %v1934_v5  ;;  %v2063_v2 = vrot.slane %v8879_v15, 2 }
 0x27f   : > { %v1932_v18 = vpop.permute.xlu1 %1931 }
 0x280   : > { %v1982_v56 = vsel %vm1943_vm5, %v8768_v10, %v1932_v18  ;;  %v1963_v10 = vsel %vm1948_vm6, %v1959_v12, %v1862_v54  ;;  %v3077_v54 = vld [vmem:[#allocation6 + $0x18b8] sm:$0xff]  ;;  %v3098_v12 = vld [vmem:[#allocation6 + $0x1960] sm:$0xff] }
 0x281   : > { %v1993_v30 = vrot.slane %v1982_v56, 1  ;;  %v6557_v18 = vpack.c.bf16 %v3077_v54, %v3070_v52  ;;  %v2071_v54 = vrot.slane %v8879_v15, 3 }
 0x283   : > { %v8865_v62 = vpop.permute.xlu1 %1935  ;;  %v8884_v7 = vmax.f32 %v1982_v56, %v1993_v30  ;;  %6558 = vmatpush1.bf16.msra.mxu1 %v6557_v18 }
 0x2a5   : > { %v1888_v26 = vpop.permute.xlu0 %1887 }
 0x2a6   : > { %v1970_v13 = vsel %vm1943_vm5, %v8782_v20, %v1888_v26  ;;  %v1960_v20 = vsel %vm1943_vm5, %v8739_v55, %v1848_v41  ;;  %v1967_v55 = vsel %vm1953_vm7, %v1963_v10, %v1874_v28  ;;  %v3085_v26 = vld [vmem:[#allocation6 + $0x18f8] sm:$0xff]  ;;  %v2009_v10 = vrot.slane %v1983_v24, 1 }
 0x2a7   : > { %v1964_v41 = vsel %vm1948_vm6, %v1960_v20, %v1864_v59  ;;  %v6559_v56 = vpack.c.bf16 %v3092_v42, %v3085_v26  ;;  %v2007_v5 = vrot.slane %v1967_v55, 1  ;;  %v2065_v20 = vrot.slane %v8884_v7, 2 }
 0x2a8   : > { %v1968_v1 = vsel %vm1953_vm7, %v1964_v41, %v1876_v11 }
 0x2a9   : > { %v1904_v27 = vpop.permute.xlu1 %1903  ;;  %v1916_v29 = vpop.permute.xlu0 %1915  ;;  %6560 = vmatprep.subr.bf16.mxu1 %v6559_v56  ;;  %v8915_v46 = vmax.f32 %v1967_v55, %v2007_v5  ;;  %v2073_v55 = vrot.slane %v8884_v7, 3 }
 0x2aa   : > { %v1974_v19 = vsel %vm1948_vm6, %v1970_v13, %v1904_v27  ;;  %v2057_v27 = vrot.slane %v8884_v7, 1  ;;  %v3091_v13 = vld [vmem:[#allocation6 + $0x1928] sm:$0xff] }
 0x2ab   : > { %v1978_v33 = vsel %vm1953_vm7, %v1974_v19, %v1916_v29  ;;  %v3106_v19 = vld [vmem:[#allocation6 + $0x19a0] sm:$0xff]  ;;  %v2083_v56 = vrot.slane %v8915_v46, 4 }
 0x2ac   : > { %v1992_v63 = vrot.slane %v1978_v33, 1  ;;  %v6563_v22 = vpack.c.bf16 %v3106_v19, %v3099_v14  ;;  %v3112_v14 = vld [vmem:[#allocation6 + $0x19d0] sm:$0xff]  ;;  %v3119_v19 = vld [vmem:[#allocation6 + $0x1a08] sm:$0xff] }
 0x2ad   : > { %v1890_v39 = vpop.permute.xlu1 %1889  ;;  %v1918_v57 = vpop.permute.xlu0 %1917 }
 0x2ae   : > { %v1971_v44 = vsel %vm1943_vm5, %v8794_v9, %v1890_v39  ;;  %v3084_v9 = vld [vmem:[#allocation6 + $0x18f0] sm:$0xff]  ;;  %v8896_v28 = vmax.f32 %v1978_v33, %v1992_v63  ;;  %v2164_v33 = vsel %vm2162_vm8, %v8879_v15, %v2055_v48  ;;  %v8921_v48 = vmax.f32 %v1983_v24, %v2009_v10 }
 0x2af   : > { %v6561_v11 = vpack.c.bf16 %v3091_v13, %v3084_v9  ;;  %v2169_v52 = vsel %vm2167_vm9, %v2164_v33, %v2063_v2 }
 0x2b0   : > { %v2064_v41 = vrot.slane %v8896_v28, 2  ;;  %v8935_v24 = vsel %vm2172_vm10, %v2169_v52, %v2071_v54  ;;  %v2085_v2 = vrot.slane %v8921_v48, 4  ;;  %v2093_v10 = vrot.slane %v8921_v48, 5 }
 0x2b1   : > { %v1906_v4 = vpop.permute.xlu1 %1905  ;;  %6562 = vmatpush1.bf16.msra.mxu1 %v6561_v11  ;;  %v6569_v11 = vpack.c.bf16 %v3119_v19, %v3112_v14 }
 0x2b2   : > { %v1908_v51 = vpop.permute.xlu0 %1907  ;;  %v1975_v32 = vsel %vm1948_vm6, %v1971_v44, %v1906_v4  ;;  %v2166_v44 = vsel %vm2162_vm8, %v8884_v7, %v2057_v27  ;;  %6564 = vmatprep.subr.bf16.mxu1 %v6563_v22  ;;  %v3113_v27 = vld [vmem:[#allocation6 + $0x19d8] sm:$0xff]  ;;  %v2072_v22 = vrot.slane %v8896_v28, 3 }
 0x2b3   : > { %v1979_v59 = vsel %vm1953_vm7, %v1975_v32, %v1918_v57  ;;  %v2023_v57 = vrot.slane %v1968_v1, 1  ;;  %v6565_v32 = vpack.c.bf16 %v3105_v37, %v3098_v12  ;;  %v2171_v47 = vsel %vm2167_vm9, %v2166_v44, %v2065_v20  ;;  %v3127_v12 = vld [vmem:[#allocation6 + $0x1a48] sm:$0xff]  ;;  %v3134_v37 = vld [vmem:[#allocation6 + $0x1a80] sm:$0xff] }
 0x2b4   : > { %v2008_v4 = vrot.slane %v1979_v59, 1  ;;  %v3126_v20 = vld [vmem:[#allocation6 + $0x1a40] sm:$0xff] }
 0x2b5   : > { %v1892_v29 = vpop.permute.xlu1 %1891  ;;  %6566 = vmatpush1.bf16.msra.mxu1 %v6565_v32 }
 0x2b6   : > { %v1972_v30 = vsel %vm1943_vm5, %v8805_v17, %v1892_v29  ;;  %v1920_v39 = vpop.permute.xlu0 %1919  ;;  %v1984_v17 = vsel %vm1943_vm5, %v8776_v25, %v8865_v62  ;;  %v8924_v18 = vmax.f32 %v1979_v59, %v2008_v4  ;;  %v3120_v29 = vld [vmem:[#allocation6 + $0x1a10] sm:$0xff]  ;;  %v3133_v4 = vld [vmem:[#allocation6 + $0x1a78] sm:$0xff] }
 0x2b7   : > { %v1976_v34 = vsel %vm1948_vm6, %v1972_v30, %v1908_v51  ;;  %v2056_v51 = vrot.slane %v8896_v28, 1  ;;  %v2025_v25 = vrot.slane %v1984_v17, 1  ;;  %v2176_v30 = vsel %vm2172_vm10, %v2171_v47, %v2073_v55 }
 0x2b8   : > { %v1980_v43 = vsel %vm1953_vm7, %v1976_v34, %v1920_v39  ;;  %v6567_v39 = vpack.c.bf16 %v3120_v29, %v3113_v27  ;;  %v2084_v61 = vrot.slane %v8924_v18, 4  ;;  %v1985_v34 = vsel %vm1943_vm5, %v8764_v6, %v8863_v50 }
 0x2b9   : > { %v8909_v63 = vpop.permute.xlu1 %1877  ;;  %v2024_v26 = vrot.slane %v1980_v43, 1  ;;  %v2165_v15 = vsel %vm2162_vm8, %v8896_v28, %v2056_v51  ;;  %v8941_v13 = vmax.f32 %v1984_v17, %v2025_v25  ;;  %v2181_v17 = vsel %vm2177_vm11, %v2176_v30, %v2085_v2 }
 0x2ba   : > { %v1682_v49 = vpop.permute.xlu0 %1681  ;;  %6568 = vmatprep.subr.bf16.mxu1 %v6567_v39  ;;  %v2092_v6 = vrot.slane %v8924_v18, 5  ;;  %v6573_v28 = vpack.c.bf16 %v3133_v4, %v3126_v20  ;;  %v2186_v47 = vsel %vm2182_vm12, %v2181_v17, %v2093_v10  ;;  %v2101_v30 = vrot.slane %v8921_v48, 6  ;;  %v3154_v17 = vld [vmem:[#allocation6 + $0x1b20] sm:$0xff] }
 0x2bb   : > { %v1692_v62 = vmax.f32 %v1635_v21, %v1682_v49  ;;  %v8929_v21 = vmax.f32 %v1968_v1, %v2023_v57  ;;  %v1961_v1 = vsel %vm1943_vm5, %v8748_v60, %v8859_v53  ;;  %v8951_v5 = vmax.f32 %v1980_v43, %v2024_v26  ;;  %6570 = vmatpush1.bf16.msra.mxu1 %v6569_v11  ;;  %v3148_v26 = vld [vmem:[#allocation6 + $0x1af0] sm:$0xff] }
 0x2bc   : > { %v1965_v59 = vsel %vm1948_vm6, %v1961_v1, %v8861_v58  ;;  %v2121_v33 = vrot.slane %v8941_v13, 1  ;;  %v6571_v57 = vpack.c.bf16 %v3134_v37, %v3127_v12  ;;  %v2129_v52 = vrot.slane %v8941_v13, 2 }
 0x2bd   : > { %v1894_v42 = vpop.permute.xlu1 %1893  ;;  %1829 = vrot.lane.b32.xlu1 %v1692_v62, %s8117_s16  ;;  %1817 = vrot.lane.b32.xlu0 %v1692_v62, %s8116_s15  ;;  %v2119_v53 = vrot.slane %v8929_v21, 1  ;;  %v2127_v58 = vrot.slane %v8929_v21, 2  ;;  %v2120_v51 = vrot.slane %v8951_v5, 1  ;;  %v1969_v43 = vsel %vm1953_vm7, %v1965_v59, %v8909_v63 }
 0x2be   : > { %v1666_v9 = vpop.permute.xlu0 %1665  ;;  %v1973_v44 = vsel %vm1943_vm5, %v8817_v35, %v1894_v42  ;;  %6572 = vmatprep.subr.bf16.mxu1 %v6571_v57  ;;  %v2041_v62 = vrot.slane %v1985_v34, 1  ;;  %v2198_v63 = vsel %vm2162_vm8, %v8941_v13, %v2121_v33  ;;  %v2128_v27 = vrot.slane %v8951_v5, 2  ;;  %v3161_v57 = vld [vmem:[#allocation6 + $0x1b58] sm:$0xff] }
 0x2bf   : > { %v8945_v7 = vmax.f32 %v1648_v45, %v1666_v9  ;;  %v2170_v45 = vsel %vm2167_vm9, %v2165_v15, %v2064_v41  ;;  %v2196_v54 = vsel %vm2162_vm8, %v8929_v21, %v2119_v53  ;;  %v3141_v41 = vld [vmem:[#allocation6 + $0x1ab8] sm:$0xff]  ;;  %6574 = vmatpush1.bf16.msra.mxu1 %v6573_v28  ;;  %v3140_v15 = vld [vmem:[#allocation6 + $0x1ab0] sm:$0xff]  ;;  %v3147_v9 = vld [vmem:[#allocation6 + $0x1ae8] sm:$0xff]  ;;  %v2039_v29 = vrot.slane %v1969_v43, 1 }
 0x2c0   : > { %v2175_v50 = vsel %vm2172_vm10, %v2170_v45, %v2072_v22  ;;  %v6575_v55 = vpack.c.bf16 %v3148_v26, %v3141_v41  ;;  %v6577_v14 = vpack.c.bf16 %v3147_v9, %v3140_v15  ;;  %v2100_v39 = vrot.slane %v8924_v18, 6  ;;  %v3155_v53 = vld [vmem:[#allocation6 + $0x1b28] sm:$0xff]  ;;  %v3162_v22 = vld [vmem:[#allocation6 + $0x1b60] sm:$0xff] }
 0x2c1   : > { %v1910_v60 = vpop.permute.xlu1 %1909  ;;  %1805 = vrot.lane.b32.xlu0 %v8945_v7, %s8115_s14  ;;  %v2180_v25 = vsel %vm2177_vm11, %v2175_v50, %v2084_v61  ;;  %v2197_v11 = vsel %vm2162_vm8, %v8951_v5, %v2120_v51  ;;  %v2049_v2 = vmax.f32 %v1985_v34, %v2041_v62  ;;  %v2109_v61 = vrot.slane %v8921_v48, 7 }
 0x2c2   : > { %v1977_v49 = vsel %vm1948_vm6, %v1973_v44, %v1910_v60  ;;  %v2185_v1 = vsel %vm2182_vm12, %v2180_v25, %v2092_v6  ;;  %6576 = vmatprep.subr.bf16.mxu1 %v6575_v55  ;;  %v2202_v45 = vsel %vm2167_vm9, %v2198_v63, %v2129_v52  ;;  %v2190_v12 = vsel %vm362_vm0, %v2186_v47, %v2101_v30  ;;  %v3175_v52 = vld [vmem:[#allocation6 + $0x1bc8] sm:$0xff] }
 0x2c3   : > { %v2189_v37 = vsel %vm362_vm0, %v2185_v1, %v2100_v39  ;;  %v2137_v33 = vrot.slane %v8941_v13, 3  ;;  %6578 = vmatpush1.bf16.msra.mxu1 %v6577_v14  ;;  %v6579_v10 = vpack.c.bf16 %v3162_v22, %v3155_v53  ;;  %v2047_v34 = vmax.f32 %v1969_v43, %v2039_v29  ;;  %v3176_v43 = vld [vmem:[#allocation6 + $0x1bd0] sm:$0xff]  ;;  %v2735_v14 = vld [vmem:[#allocation6 + $0xe08] sm:$0xff]  ;;  %v2746_v39 = vld [vmem:[#allocation6 + $0xe60] sm:$0xff] }
 0x2c4   : > { %v2201_v3 = vsel %vm2167_vm9, %v2197_v11, %v2128_v27  ;;  %v2108_v48 = vrot.slane %v8924_v18, 7  ;;  %v2136_v44 = vrot.slane %v8951_v5, 3  ;;  %v2091_v13 = vrot.slane %v8915_v46, 5  ;;  %v3169_v18 = vld [vmem:[#allocation6 + $0x1b98] sm:$0xff]  ;;  %v2734_v11 = vld [vmem:[#allocation6 + $0xe00] sm:$0xff]  ;;  %v2748_v22 = vld [vmem:[#allocation6 + $0xe70] sm:$0xff] }
 0x2c5   : > { %v1922_v32 = vpop.permute.xlu1 %1921  ;;  %v2206_v4 = vsel %vm2172_vm10, %v2202_v45, %v2137_v33  ;;  %6580 = vmatprep.subr.bf16.mxu1 %v6579_v10  ;;  %v2149_v6 = vrot.slane %v2049_v2, 4  ;;  %v2194_v50 = vsel %vm345_vm3, %v2190_v12, %v2109_v61  ;;  %v2200_v28 = vsel %vm2167_vm9, %v2196_v54, %v2127_v58  ;;  %v2749_v45 = vld [vmem:[#allocation6 + $0xe78] sm:$0xff]  ;;  %v2755_v12 = vld [vmem:[#allocation6 + $0xea8] sm:$0xff]  ;;  %v2770_v10 = vld [vmem:[#allocation6 + $0xf20] sm:$0xff] }
 0x2c6   : > { %v1981_v35 = vsel %vm1953_vm7, %v1977_v49, %v1922_v32  ;;  %v2179_v51 = vsel %vm2177_vm11, %v8935_v24, %v2083_v56  ;;  %v3168_v49 = vld [vmem:[#allocation6 + $0x1b90] sm:$0xff]  ;;  %v2193_v5 = vsel %vm345_vm3, %v2189_v37, %v2108_v48  ;;  %v2205_v25 = vsel %vm2172_vm10, %v2201_v3, %v2136_v44  ;;  %v2763_v33 = vld [vmem:[#allocation6 + $0xee8] sm:$0xff]  ;;  %v2777_v3 = vld [vmem:[#allocation6 + $0xf58] sm:$0xff] }
 0x2c7   : > { %v2040_v42 = vrot.slane %v1981_v35, 1  ;;  %v6583_v62 = vpack.c.bf16 %v3176_v43, %v3169_v18  ;;  %v2210_v58 = vsel %vm2177_vm11, %v2206_v4, %v2149_v6  ;;  %v6585_v56 = vpack.c.bf16 %v3175_v52, %v3168_v49  ;;  %v2776_v4 = vld [vmem:[#allocation6 + $0xf50] sm:$0xff]  ;;  %v2783_v44 = vld [vmem:[#allocation6 + $0xf88] sm:$0xff]  ;;  %v2798_v6 = vld [vmem:[#allocation6 + $0x1000] sm:$0xff] }
 0x2c8   : > { %v2157_v54 = vrot.slane %v2049_v2, 5  ;;  %v2135_v41 = vrot.slane %v8929_v21, 3  ;;  %v2184_v26 = vsel %vm2182_vm12, %v2179_v51, %v2091_v13  ;;  %v2155_v47 = vrot.slane %v2047_v34, 5  ;;  %v2741_v2 = vld [vmem:[#allocation6 + $0xe38] sm:$0xff]  ;;  %v2791_v13 = vld [vmem:[#allocation6 + $0xfc8] sm:$0xff]  ;;  %v2790_v51 = vld [vmem:[#allocation6 + $0xfc0] sm:$0xff] }
 0x2c9   : > { %v2048_v19 = vmax.f32 %v1981_v35, %v2040_v42  ;;  %v1686_v59 = vpop.permute.xlu1 %1685  ;;  %v2147_v35 = vrot.slane %v2047_v34, 4  ;;  %v2099_v42 = vrot.slane %v8915_v46, 6  ;;  %v2107_v27 = vrot.slane %v8915_v46, 7  ;;  %v2756_v46 = vld [vmem:[#allocation6 + $0xeb0] sm:$0xff]  ;;  %v2769_v34 = vld [vmem:[#allocation6 + $0xf18] sm:$0xff]  ;;  %v2819_v52 = vld [vmem:[#allocation6 + $0x10a8] sm:$0xff] }
 0x2ca   : > { %v1694_v60 = vmax.f32 %v1649_v38, %v1686_v59  ;;  %v6581_v38 = vpack.c.bf16 %v3161_v57, %v3154_v17  ;;  %v2214_v63 = vsel %vm2182_vm12, %v2210_v58, %v2157_v54  ;;  %v2204_v15 = vsel %vm2172_vm10, %v2200_v28, %v2135_v41  ;;  %v2739_v59 = vld [vmem:[#allocation6 + $0xe28] sm:$0xff]  ;;  %v2762_v57 = vld [vmem:[#allocation6 + $0xee0] sm:$0xff]  ;;  %v2797_v18 = vld [vmem:[#allocation6 + $0xff8] sm:$0xff] }
 0x2cb   : > { %v2148_v20 = vrot.slane %v2048_v19, 4  ;;  %v2156_v32 = vrot.slane %v2048_v19, 5  ;;  %v2208_v9 = vsel %vm2177_vm11, %v2204_v15, %v2147_v35  ;;  %v2188_v21 = vsel %vm362_vm0, %v2184_v26, %v2099_v42  ;;  %v2742_v19 = vld [vmem:[#allocation6 + $0xe40] sm:$0xff]  ;;  %v2805_v43 = vld [vmem:[#allocation6 + $0x1038] sm:$0xff]  ;;  %v2812_v49 = vld [vmem:[#allocation6 + $0x1070] sm:$0xff] }
 0x2cc   : > { %1833 = vrot.lane.b32.xlu1 %v1694_v60, %s8117_s16  ;;  %1821 = vrot.lane.b32.xlu0 %v1694_v60, %s8116_s15  ;;  %v2212_v29 = vsel %vm2182_vm12, %v2208_v9, %v2155_v47  ;;  %v2192_v1 = vsel %vm345_vm3, %v2188_v21, %v2107_v27  ;;  %v6459_v30 = vpack.c.bf16 %v2742_v19, %v2735_v14  ;;  %v2826_v35 = vld [vmem:[#allocation6 + $0x10e0] sm:$0xff]  ;;  %v2825_v54 = vld [vmem:[#allocation6 + $0x10d8] sm:$0xff]  ;;  %v2840_v26 = vld [vmem:[#allocation6 + $0x1150] sm:$0xff] }
 0x2cd   : > { %6582 = vmatpush1.bf16.msra.mxu1 %v6581_v38  ;;  %v2209_v24 = vsel %vm2177_vm11, %v2205_v25, %v2148_v20  ;;  %v6715_v60 = vpack.c.bf16 %v2746_v39, %v2739_v59  ;;  %v6461_v61 = vpack.c.bf16 %v2741_v2, %v2734_v11  ;;  %v6463_v53 = vpack.c.bf16 %v2756_v46, %v2749_v45  ;;  %v2784_v38 = vld [vmem:[#allocation6 + $0xf90] sm:$0xff]  ;;  %v2833_v41 = vld [vmem:[#allocation6 + $0x1118] sm:$0xff]  ;;  %v2847_v15 = vld [vmem:[#allocation6 + $0x1188] sm:$0xff] }
 0x2ce   : > { %6584 = vmatprep.subr.bf16.mxu1 %v6583_v62  ;;  %v2213_v55 = vsel %vm2182_vm12, %v2209_v24, %v2156_v32  ;;  %6460 = vmatprep.subr.bf16.mxu0 %v6459_v30  ;;  %v6465_v37 = vpack.c.bf16 %v2755_v12, %v2748_v22  ;;  %v6467_v17 = vpack.c.bf16 %v2770_v10, %v2763_v33  ;;  %v2804_v25 = vld [vmem:[#allocation6 + $0x1030] sm:$0xff]  ;;  %v2811_v62 = vld [vmem:[#allocation6 + $0x1068] sm:$0xff]  ;;  %v2854_v9 = vld [vmem:[#allocation6 + $0x11c0] sm:$0xff]  ;;  %v1816_v12 = vpop.permute.xlu1 %1815 }
 0x2cf   : > { %6462 = vmatpush1.bf16.msra.mxu0 %v6461_v61  ;;  %v6469_v20 = vpack.c.bf16 %v2769_v34, %v2762_v57  ;;  %v6471_v48 = vpack.c.bf16 %v2784_v38, %v2777_v3  ;;  %v6475_v28 = vpack.c.bf16 %v2798_v6, %v2791_v13  ;;  %v6477_v32 = vpack.c.bf16 %v2797_v18, %v2790_v51  ;;  %v2861_v14 = vld [vmem:[#allocation6 + $0x11f8] sm:$0xff]  ;;  %v2868_v19 = vld [vmem:[#allocation6 + $0x1230] sm:$0xff]  ;;  %v2867_v11 = vld [vmem:[#allocation6 + $0x1228] sm:$0xff] }
 0x2d0   : > { %2229 = vrot.lane.b32.xlu1 %v2194_v50, %s8117_s16  ;;  %2227 = vrot.lane.b32.xlu0 %v2193_v5, %s8117_s16  ;;  %v6473_v50 = vpack.c.bf16 %v2783_v44, %v2776_v4  ;;  %v6479_v5 = vpack.c.bf16 %v2812_v49, %v2805_v43  ;;  %v6481_v58 = vpack.c.bf16 %v2811_v62, %v2804_v25  ;;  %v2860_v39 = vld [vmem:[#allocation6 + $0x11f0] sm:$0xff]  ;;  %v2875_v2 = vld [vmem:[#allocation6 + $0x1268] sm:$0xff]  ;;  %v2874_v46 = vld [vmem:[#allocation6 + $0x1260] sm:$0xff] }
 0x2d1   : > { %6586 = vmatpush1.bf16.msra.mxu1 %v6585_v56  ;;  %6464 = vmatprep.subr.bf16.mxu0 %v6463_v53  ;;  %v6483_v24 = vpack.c.bf16 %v2826_v35, %v2819_v52  ;;  %v2818_v56 = vld [vmem:[#allocation6 + $0x10a0] sm:$0xff]  ;;  %v6487_v47 = vpack.c.bf16 %v2840_v26, %v2833_v41  ;;  %v6491_v27 = vpack.c.bf16 %v2854_v9, %v2847_v15  ;;  %v2881_v53 = vld [vmem:[#allocation6 + $0x1298] sm:$0xff]  ;;  %v2896_v51 = vld [vmem:[#allocation6 + $0x1310] sm:$0xff] }
 0x2d2   : > { %6716 = vmatprep.subr.bf16.mxu1 %v6715_v60  ;;  %v6485_v42 = vpack.c.bf16 %v2825_v54, %v2818_v56  ;;  %v6495_v30 = vpack.c.bf16 %v2868_v19, %v2861_v14  ;;  %v2882_v60 = vld [vmem:[#allocation6 + $0x12a0] sm:$0xff]  ;;  %v6497_v61 = vpack.c.bf16 %v2867_v11, %v2860_v39  ;;  %v6501_v22 = vpack.c.bf16 %v2881_v53, %v2874_v46  ;;  %v1828_v33 = vpop.permute.xlu1 %1827  ;;  %v2895_v25 = vld [vmem:[#allocation6 + $0x1308] sm:$0xff]  ;;  %v2909_v41 = vld [vmem:[#allocation6 + $0x1378] sm:$0xff] }
 0x2d3   : > { %6466 = vmatpush1.bf16.msra.mxu0 %v6465_v37  ;;  %v6499_v45 = vpack.c.bf16 %v2882_v60, %v2875_v2  ;;  %v1800_v37 = vpop.permute.xlu0 %1799  ;;  %v2902_v54 = vld [vmem:[#allocation6 + $0x1340] sm:$0xff]  ;;  %v2924_v15 = vld [vmem:[#allocation6 + $0x13f0] sm:$0xff]  ;;  %v2923_v14 = vld [vmem:[#allocation6 + $0x13e8] sm:$0xff] }
 0x2d4   : > { %2237 = vrot.lane.b32.xlu1 %v2214_v63, %s8117_s16  ;;  %2235 = vrot.lane.b32.xlu0 %v2213_v55, %s8117_s16  ;;  %v2832_v63 = vld [vmem:[#allocation6 + $0x1110] sm:$0xff]  ;;  %v2839_v55 = vld [vmem:[#allocation6 + $0x1148] sm:$0xff]  ;;  %v1944_v10 = vsel %vm1943_vm5, %v8829_v16, %v1800_v37  ;;  %v2889_v16 = vld [vmem:[#allocation6 + $0x12d8] sm:$0xff] }
 0x2d5   : > { %6468 = vmatprep.subr.bf16.mxu0 %v6467_v17  ;;  %v6489_v21 = vpack.c.bf16 %v2839_v55, %v2832_v63  ;;  %v1949_v17 = vsel %vm1948_vm6, %v1944_v10, %v1816_v12  ;;  %v6509_v63 = vpack.c.bf16 %v2909_v41, %v2902_v54  ;;  %v2917_v55 = vld [vmem:[#allocation6 + $0x13b8] sm:$0xff]  ;;  %v2931_v53 = vld [vmem:[#allocation6 + $0x1428] sm:$0xff] }
 0x2d6   : > { %v1954_v57 = vsel %vm1953_vm7, %v1949_v17, %v1828_v33  ;;  %v1820_v3 = vpop.permute.xlu1 %1819  ;;  %v2930_v33 = vld [vmem:[#allocation6 + $0x1420] sm:$0xff]  ;;  %v2937_v10 = vld [vmem:[#allocation6 + $0x1458] sm:$0xff] }
 0x2d7   : > { %6470 = vmatpush1.bf16.msra.mxu0 %v6469_v20  ;;  %v1804_v34 = vpop.permute.xlu0 %1803  ;;  %v1990_v20 = vrot.slane %v1954_v57, 1  ;;  %v6517_v17 = vpack.c.bf16 %v2937_v10, %v2930_v33  ;;  %v2752_v10 = vld [vmem:[#allocation6 + $0xe90] sm:$0xff] }
 0x2d8   : > { %2233 = vrot.lane.b32.xlu1 %v2212_v29, %s8117_s16  ;;  %2225 = vrot.lane.b32.xlu0 %v2192_v1, %s8117_s16  ;;  %v2846_v29 = vld [vmem:[#allocation6 + $0x1180] sm:$0xff]  ;;  %v2853_v1 = vld [vmem:[#allocation6 + $0x11b8] sm:$0xff]  ;;  %v1946_v13 = vsel %vm1943_vm5, %v8836_v8, %v1804_v34 }
 0x2d9   : > { %6472 = vmatprep.subr.bf16.mxu0 %v6471_v48  ;;  %v6493_v59 = vpack.c.bf16 %v2853_v1, %v2846_v29  ;;  %v1998_v38 = vmax.f32 %v1954_v57, %v1990_v20  ;;  %v1951_v43 = vsel %vm1948_vm6, %v1946_v13, %v1820_v3 }
 0x2da   : > { %v1832_v4 = vpop.permute.xlu1 %1831 }
 0x2db   : > { %6474 = vmatpush1.bf16.msra.mxu0 %v6473_v50  ;;  %v1802_v48 = vpop.permute.xlu0 %1801  ;;  %v2054_v44 = vrot.slane %v1998_v38, 1  ;;  %v2062_v18 = vrot.slane %v1998_v38, 2  ;;  %v1956_v52 = vsel %vm1953_vm7, %v1951_v43, %v1832_v4  ;;  %v2070_v9 = vrot.slane %v1998_v38, 3  ;;  %v2952_v4 = vld [vmem:[#allocation6 + $0x14d0] sm:$0xff] }
 0x2dc   : > { %6476 = vmatprep.subr.bf16.mxu0 %v6475_v28  ;;  %v1945_v6 = vsel %vm1943_vm5, %v8844_v40, %v1802_v48  ;;  %v2903_v40 = vld [vmem:[#allocation6 + $0x1348] sm:$0xff]  ;;  %v2022_v26 = vrot.slane %v1956_v52, 1  ;;  %v2945_v48 = vld [vmem:[#allocation6 + $0x1498] sm:$0xff] }
 0x2dd   : > { %v2163_v62 = vsel %vm2162_vm8, %v1998_v38, %v2054_v44 }
 0x2df   : > { %6478 = vmatpush1.bf16.msra.mxu0 %v6477_v32  ;;  %v6503_v32 = vpack.c.bf16 %v2896_v51, %v2889_v16 }
 0x2e0   : > { %6480 = vmatprep.subr.bf16.mxu0 %v6479_v5  ;;  %v2888_v5 = vld [vmem:[#allocation6 + $0x12d0] sm:$0xff] }
 0x2e1   : > { %v6505_v35 = vpack.c.bf16 %v2895_v25, %v2888_v5  ;;  %v2737_v5 = vld [vmem:[#allocation6 + $0xe18] sm:$0xff]  ;;  %v2744_v25 = vld [vmem:[#allocation6 + $0xe50] sm:$0xff] }
 0x2e3   : > { %6482 = vmatpush1.bf16.msra.mxu0 %v6481_v58 }
 0x2e4   : > { %6484 = vmatprep.subr.bf16.mxu0 %v6483_v24  ;;  %v2910_v24 = vld [vmem:[#allocation6 + $0x1380] sm:$0xff] }
 0x2e5   : > { %v6507_v56 = vpack.c.bf16 %v2910_v24, %v2903_v40 }
 0x2e7   : > { %6486 = vmatpush1.bf16.msra.mxu0 %v6485_v42 }
 0x2e8   : > { %6488 = vmatprep.subr.bf16.mxu0 %v6487_v47  ;;  %v2168_v47 = vsel %vm2167_vm9, %v2163_v62, %v2062_v18 }
 0x2e9   : > { %v2173_v19 = vsel %vm2172_vm10, %v2168_v47, %v2070_v9 }
 0x2eb   : > { %6490 = vmatpush1.bf16.msra.mxu0 %v6489_v21  ;;  %v6511_v21 = vpack.c.bf16 %v2924_v15, %v2917_v55 }
 0x2ec   : > { %6492 = vmatprep.subr.bf16.mxu0 %v6491_v27  ;;  %v2916_v27 = vld [vmem:[#allocation6 + $0x13b0] sm:$0xff] }
 0x2ef   : > { %6494 = vmatpush1.bf16.msra.mxu0 %v6493_v59  ;;  %v6513_v59 = vpack.c.bf16 %v2923_v14, %v2916_v27 }
 0x2f0   : > { %6496 = vmatprep.subr.bf16.mxu0 %v6495_v30  ;;  %v2030_v30 = vmax.f32 %v1956_v52, %v2022_v26 }
 0x2f2   : > { %v2118_v12 = vrot.slane %v2030_v30, 1  ;;  %v2126_v3 = vrot.slane %v2030_v30, 2  ;;  %v2134_v52 = vrot.slane %v2030_v30, 3 }
 0x2f3   : > { %6498 = vmatpush1.bf16.msra.mxu0 %v6497_v61 }
 0x2f4   : > { %6500 = vmatprep.subr.bf16.mxu0 %v6499_v45  ;;  %v2195_v13 = vsel %vm2162_vm8, %v2030_v30, %v2118_v12 }
 0x2f7   : > { %6502 = vmatpush1.bf16.msra.mxu0 %v6501_v22  ;;  %v2938_v22 = vld [vmem:[#allocation6 + $0x1460] sm:$0xff] }
 0x2f8   : > { %6504 = vmatprep.subr.bf16.mxu0 %v6503_v32  ;;  %v6515_v37 = vpack.c.bf16 %v2938_v22, %v2931_v53  ;;  %v2199_v32 = vsel %vm2167_vm9, %v2195_v13, %v2126_v3  ;;  %v2788_v13 = vld [vmem:[#allocation6 + $0xfb0] sm:$0xff] }
 0x2f9   : > { %v2203_v54 = vsel %vm2172_vm10, %v2199_v32, %v2134_v52  ;;  %v2801_v32 = vld [vmem:[#allocation6 + $0x1018] sm:$0xff] }
 0x2fb   : > { %6506 = vmatpush1.bf16.msra.mxu0 %v6505_v35 }
 0x2fc   : > { %6508 = vmatprep.subr.bf16.mxu0 %v6507_v56 }
 0x2ff   : > { %6510 = vmatpush1.bf16.msra.mxu0 %v6509_v63 }
 0x300   : > { %6512 = vmatprep.subr.bf16.mxu0 %v6511_v21 }
 0x303   : > { %6514 = vmatpush1.bf16.msra.mxu0 %v6513_v59 }
 0x304   : > { %6516 = vmatprep.subr.bf16.mxu0 %v6515_v37 }
 0x307   : > { %6518 = vmatpush1.bf16.msra.mxu0 %v6517_v17  ;;  %v2759_v17 = vld [vmem:[#allocation6 + $0xec8] sm:$0xff] }
 0x308   : > { %v6721_v3 = vpack.c.bf16 %v2759_v17, %v2752_v10 }
 0x32f   : > { %v1830_v50 = vpop.permute.xlu1 %1829  ;;  %v1818_v28 = vpop.permute.xlu0 %1817 }
 0x330   : > { %v1950_v49 = vsel %vm1948_vm6, %v1945_v6, %v1818_v28  ;;  %v6519_v6 = vpack.c.bf16 %v2952_v4, %v2945_v48  ;;  %v2951_v28 = vld [vmem:[#allocation6 + $0x14c8] sm:$0xff]  ;;  %v2766_v48 = vld [vmem:[#allocation6 + $0xf00] sm:$0xff]  ;;  %v2773_v4 = vld [vmem:[#allocation6 + $0xf38] sm:$0xff] }
 0x331   : > { %v1955_v8 = vsel %vm1953_vm7, %v1950_v49, %v1830_v50  ;;  %v2944_v50 = vld [vmem:[#allocation6 + $0x1490] sm:$0xff] }
 0x332   : > { %v2006_v58 = vrot.slane %v1955_v8, 1  ;;  %v6521_v51 = vpack.c.bf16 %v2951_v28, %v2944_v50  ;;  %6520 = vmatprep.subr.bf16.mxu0 %v6519_v6  ;;  %v6725_v6 = vpack.c.bf16 %v2773_v4, %v2766_v48  ;;  %v2780_v28 = vld [vmem:[#allocation6 + $0xf70] sm:$0xff] }
 0x333   : > { %v1806_v61 = vpop.permute.xlu0 %1805 }
 0x334   : > { %v2014_v42 = vmax.f32 %v1955_v8, %v2006_v58  ;;  %v1947_v57 = vsel %vm1943_vm5, %v8945_v7, %v1806_v61  ;;  %6522 = vmatpush1.bf16.msra.mxu0 %v6521_v51  ;;  %v6587_v8 = vpack.c.bf16 %v2744_v25, %v2737_v5  ;;  %v2753_v61 = vld [vmem:[#allocation6 + $0xe98] sm:$0xff]  ;;  %v2795_v51 = vld [vmem:[#allocation6 + $0xfe8] sm:$0xff]  ;;  %v2816_v25 = vld [vmem:[#allocation6 + $0x1090] sm:$0xff] }
 0x335   : > { %v2809_v5 = vld [vmem:[#allocation6 + $0x1058] sm:$0xff] }
 0x336   : > { %v2082_v29 = vrot.slane %v2014_v42, 4  ;;  %v2090_v1 = vrot.slane %v2014_v42, 5  ;;  %v2098_v39 = vrot.slane %v2014_v42, 6  ;;  %v2106_v2 = vrot.slane %v2014_v42, 7  ;;  %6588 = vmatprep.subr.bf16.mxu0 %v6587_v8  ;;  %v2808_v8 = vld [vmem:[#allocation6 + $0x1050] sm:$0xff] }
 0x337   : > { %v6735_v52 = vpack.c.bf16 %v2816_v25, %v2809_v5  ;;  %v2906_v5 = vld [vmem:[#allocation6 + $0x1360] sm:$0xff]  ;;  %v2913_v25 = vld [vmem:[#allocation6 + $0x1398] sm:$0xff] }
 0x338   : > { %v2178_v11 = vsel %vm2177_vm11, %v2173_v19, %v2082_v29 }
 0x339   : > { %v2183_v60 = vsel %vm2182_vm12, %v2178_v11, %v2090_v1  ;;  %v2745_v11 = vld [vmem:[#allocation6 + $0xe58] sm:$0xff] }
 0x33a   : > { %v2187_v45 = vsel %vm362_vm0, %v2183_v60, %v2098_v39  ;;  %v2738_v39 = vld [vmem:[#allocation6 + $0xe20] sm:$0xff] }
 0x33b   : > { %v2191_v46 = vsel %vm345_vm3, %v2187_v45, %v2106_v2  ;;  %v2760_v45 = vld [vmem:[#allocation6 + $0xed0] sm:$0xff]  ;;  %v6717_v37 = vpack.c.bf16 %v2745_v11, %v2738_v39  ;;  %v2858_v39 = vld [vmem:[#allocation6 + $0x11e0] sm:$0xff] }
 0x33c   : > { %2223 = vrot.lane.b32.xlu0 %v2191_v46, %s8117_s16  ;;  %v6719_v33 = vpack.c.bf16 %v2760_v45, %v2753_v61  ;;  %v2850_v45 = vld [vmem:[#allocation6 + $0x11a0] sm:$0xff] }
 0x33e   : > { %v1834_v34 = vpop.permute.xlu1 %1833  ;;  %v1822_v20 = vpop.permute.xlu0 %1821 }
 0x33f   : > { %v1952_v38 = vsel %vm1948_vm6, %v1947_v57, %v1822_v20  ;;  %v2774_v20 = vld [vmem:[#allocation6 + $0xf40] sm:$0xff] }
 0x340   : > { %v1957_v44 = vsel %vm1953_vm7, %v1952_v38, %v1834_v34  ;;  %v2767_v34 = vld [vmem:[#allocation6 + $0xf08] sm:$0xff] }
 0x341   : > { %v2038_v16 = vrot.slane %v1957_v44, 1  ;;  %v6723_v38 = vpack.c.bf16 %v2774_v20, %v2767_v34  ;;  %v2864_v34 = vld [vmem:[#allocation6 + $0x1210] sm:$0xff]  ;;  %v2871_v20 = vld [vmem:[#allocation6 + $0x1248] sm:$0xff] }
 0x342   : > { %v2230_v18 = vpop.permute.xlu1 %2229  ;;  %v2228_v7 = vpop.permute.xlu0 %2227  ;;  %v6753_v48 = vpack.c.bf16 %v2871_v20, %v2864_v34 }
 0x343   : > { %v2046_v43 = vmax.f32 %v1957_v44, %v2038_v16  ;;  %v2241_v49 = vsel %vm1943_vm5, %v2228_v7, %v2230_v18  ;;  %v2781_v44 = vld [vmem:[#allocation6 + $0xf78] sm:$0xff]  ;;  %v2787_v16 = vld [vmem:[#allocation6 + $0xfa8] sm:$0xff]  ;;  %v2802_v18 = vld [vmem:[#allocation6 + $0x1020] sm:$0xff] }
 0x344   : > { %v2251_v62 = vsel %vm1953_vm7, %v2241_v49, 0.0  ;;  %v6727_v50 = vpack.c.bf16 %v2788_v13, %v2781_v44  ;;  %v2794_v49 = vld [vmem:[#allocation6 + $0xfe0] sm:$0xff]  ;;  %v2885_v13 = vld [vmem:[#allocation6 + $0x12b8] sm:$0xff] }
 0x345   : > { %v2146_v35 = vrot.slane %v2046_v43, 4  ;;  %v2154_v40 = vrot.slane %v2046_v43, 5  ;;  %v9059_v58 = vrot.slane %v2251_v62, 7  ;;  %v6731_v43 = vpack.c.bf16 %v2802_v18, %v2795_v51  ;;  %v2878_v44 = vld [vmem:[#allocation6 + $0x1280] sm:$0xff]  ;;  %v2892_v51 = vld [vmem:[#allocation6 + $0x12f0] sm:$0xff]  ;;  %v2899_v18 = vld [vmem:[#allocation6 + $0x1328] sm:$0xff] }
 0x346   : > { %v2238_v24 = vpop.permute.xlu1 %2237  ;;  %v2236_v56 = vpop.permute.xlu0 %2235  ;;  %v6733_v62 = vpack.c.bf16 %v2801_v32, %v2794_v49  ;;  %v6761_v49 = vpack.c.bf16 %v2899_v18, %v2892_v51 }
 0x347   : > { %v2244_v41 = vsel %vm1943_vm5, %v2236_v56, %v2238_v24  ;;  %v2207_v26 = vsel %vm2177_vm11, %v2203_v54, %v2146_v35  ;;  %v9073_v9 = vsel %vm2162_vm8, 0.0, %v9059_v58  ;;  %v2815_v35 = vld [vmem:[#allocation6 + $0x1088] sm:$0xff]  ;;  %v2830_v24 = vld [vmem:[#allocation6 + $0x1100] sm:$0xff] }
 0x348   : > { %v2252_v42 = vsel %vm1953_vm7, %v2244_v41, 0.0  ;;  %v2211_v47 = vsel %vm2182_vm12, %v2207_v26, %v2154_v40  ;;  %v3199_v30 = vrot.slane %v9073_v9, 1  ;;  %v2823_v40 = vld [vmem:[#allocation6 + $0x10c8] sm:$0xff]  ;;  %v2822_v41 = vld [vmem:[#allocation6 + $0x10c0] sm:$0xff]  ;;  %v2829_v26 = vld [vmem:[#allocation6 + $0x10f8] sm:$0xff] }
 0x349   : > { %v2267_v63 = vrot.slane %v2252_v42, 7  ;;  %2231 = vrot.lane.b32.xlu1 %v2211_v47, %s8117_s16  ;;  %v6739_v54 = vpack.c.bf16 %v2830_v24, %v2823_v40  ;;  %v2837_v42 = vld [vmem:[#allocation6 + $0x1138] sm:$0xff]  ;;  %v2844_v47 = vld [vmem:[#allocation6 + $0x1170] sm:$0xff]  ;;  %v2927_v24 = vld [vmem:[#allocation6 + $0x1408] sm:$0xff] }
 0x34a   : > { %v9067_v55 = vpop.permute.xlu1 %2233  ;;  %v9069_v15 = vpop.permute.xlu0 %2225  ;;  %v2920_v40 = vld [vmem:[#allocation6 + $0x13d0] sm:$0xff] }
 0x34b   : > { %v9077_v21 = vsel %vm2162_vm8, %v9059_v58, %v2267_v63  ;;  %v2243_v27 = vsel %vm1943_vm5, %v9067_v55, %v2236_v56  ;;  %v2240_v29 = vsel %vm1943_vm5, %v9069_v15, %v2228_v7  ;;  %v6729_v7 = vpack.c.bf16 %v2787_v16, %v2780_v28 }
 0x34c   : > { %v9085_v1 = vsel %vm345_vm3, %v9077_v21, 0.0  ;;  %v2265_v14 = vrot.slane %v2243_v27, 7  ;;  %v9087_v19 = vrot.slane %v2240_v29, 7  ;;  %v6737_v56 = vpack.c.bf16 %v2815_v35, %v2808_v8  ;;  %v2836_v29 = vld [vmem:[#allocation6 + $0x1130] sm:$0xff] }
 0x34d   : > { %v9090_v59 = vrot.slane %v9085_v1, 1  ;;  %v6741_v63 = vpack.c.bf16 %v2829_v26, %v2822_v41  ;;  %v6743_v27 = vpack.c.bf16 %v2844_v47, %v2837_v42  ;;  %v6757_v28 = vpack.c.bf16 %v2885_v13, %v2878_v44  ;;  %v2934_v42 = vld [vmem:[#allocation6 + $0x1440] sm:$0xff]  ;;  %v2941_v47 = vld [vmem:[#allocation6 + $0x1478] sm:$0xff]  ;;  %v2736_v13 = vld [vmem:[#allocation6 + $0xe10] sm:$0xff] }
 0x34e   : > { %v9095_v2 = vsel %vm2162_vm8, %v9087_v19, %v2265_v14  ;;  %v9099_v60 = vsel %vm2162_vm8, 0.0, %v9087_v19  ;;  %v2843_v14 = vld [vmem:[#allocation6 + $0x1168] sm:$0xff]  ;;  %v6765_v8 = vpack.c.bf16 %v2913_v25, %v2906_v5  ;;  %v6769_v41 = vpack.c.bf16 %v2927_v24, %v2920_v40  ;;  %v2750_v40 = vld [vmem:[#allocation6 + $0xe80] sm:$0xff] }
 0x34f   : > { %v9103_v46 = vsel %vm345_vm3, %v3199_v30, %v9090_v59  ;;  %v9107_v53 = vsel %vm345_vm3, %v9095_v2, 0.0  ;;  %v3196_v22 = vrot.slane %v9099_v60, 1  ;;  %v2851_v30 = vld [vmem:[#allocation6 + $0x11a8] sm:$0xff]  ;;  %v6745_v11 = vpack.c.bf16 %v2843_v14, %v2836_v29 }
 0x350   : > { %3351 = vmatprep.mubr.f32.mxu1 %v9103_v46  ;;  %v9112_v12 = vrot.slane %v9107_v53, 1  ;;  %v6747_v61 = vpack.c.bf16 %v2858_v39, %v2851_v30  ;;  %v6773_v29 = vpack.c.bf16 %v2941_v47, %v2934_v42  ;;  %v2948_v30 = vld [vmem:[#allocation6 + $0x14b0] sm:$0xff]  ;;  %v2955_v39 = vld [vmem:[#allocation6 + $0x14e8] sm:$0xff] }
 0x352   : > { %v9116_v57 = vsel %vm345_vm3, %v3196_v22, %v9112_v12  ;;  %v2857_v22 = vld [vmem:[#allocation6 + $0x11d8] sm:$0xff] }
 0x353   : > { %3352 = vmatmul.mubr.f32.vlgmr.msra.gmra.mrb[12].mxu1 %v9116_v57  ;;  %v6749_v10 = vpack.c.bf16 %v2857_v22, %v2850_v45  ;;  %v6777_v45 = vpack.c.bf16 %v2955_v39, %v2948_v30 }
 0x354   : > { %3357 = vmatprep.mubr.f32.mxu1 %v9090_v59  ;;  %6718 = vmatpush1.bf16.msra.mxu1 %v6717_v37  ;;  %v2865_v37 = vld [vmem:[#allocation6 + $0x1218] sm:$0xff] }
 0x355   : > { %6720 = vmatprep.subr.bf16.mxu1 %v6719_v33  ;;  %v2872_v33 = vld [vmem:[#allocation6 + $0x1250] sm:$0xff] }
 0x356   : > { %v6751_v17 = vpack.c.bf16 %v2872_v33, %v2865_v37 }
 0x357   : > { %3358 = vmatmul.mubr.f32.gmra.mrb[14].mxu1 %v9112_v12 }
 0x358   : > { %6722 = vmatpush1.bf16.msra.mxu1 %v6721_v3  ;;  %v2879_v3 = vld [vmem:[#allocation6 + $0x1288] sm:$0xff] }
 0x359   : > { %6724 = vmatprep.subr.bf16.mxu1 %v6723_v38  ;;  %v2886_v38 = vld [vmem:[#allocation6 + $0x12c0] sm:$0xff] }
 0x35a   : > { %v6755_v4 = vpack.c.bf16 %v2886_v38, %v2879_v3 }
 0x35c   : > { %6726 = vmatpush1.bf16.msra.mxu1 %v6725_v6  ;;  %v2893_v6 = vld [vmem:[#allocation6 + $0x12f8] sm:$0xff] }
 0x35d   : > { %6728 = vmatprep.subr.bf16.mxu1 %v6727_v50  ;;  %v2900_v50 = vld [vmem:[#allocation6 + $0x1330] sm:$0xff] }
 0x35e   : > { %v6759_v16 = vpack.c.bf16 %v2900_v50, %v2893_v6  ;;  %v2743_v50 = vld [vmem:[#allocation6 + $0xe48] sm:$0xff] }
 0x360   : > { %6730 = vmatpush1.bf16.msra.mxu1 %v6729_v7  ;;  %v2907_v7 = vld [vmem:[#allocation6 + $0x1368] sm:$0xff] }
 0x361   : > { %6732 = vmatprep.subr.bf16.mxu1 %v6731_v43  ;;  %v2914_v43 = vld [vmem:[#allocation6 + $0x13a0] sm:$0xff] }
 0x362   : > { %v6763_v32 = vpack.c.bf16 %v2914_v43, %v2907_v7  ;;  %v2751_v7 = vld [vmem:[#allocation6 + $0xe88] sm:$0xff]  ;;  %v2758_v43 = vld [vmem:[#allocation6 + $0xec0] sm:$0xff] }
 0x363   : > { %v6591_v42 = vpack.c.bf16 %v2758_v43, %v2751_v7  ;;  %v3004_v7 = vld [vmem:[#allocation6 + $0x1670] sm:$0xff]  ;;  %v3011_v43 = vld [vmem:[#allocation6 + $0x16a8] sm:$0xff] }
 0x364   : > { %6734 = vmatpush1.bf16.msra.mxu1 %v6733_v62  ;;  %v2921_v62 = vld [vmem:[#allocation6 + $0x13d8] sm:$0xff] }
 0x365   : > { %6736 = vmatprep.subr.bf16.mxu1 %v6735_v52  ;;  %v2928_v52 = vld [vmem:[#allocation6 + $0x1410] sm:$0xff] }
 0x366   : > { %v6767_v35 = vpack.c.bf16 %v2928_v52, %v2921_v62  ;;  %v2977_v62 = vld [vmem:[#allocation6 + $0x1598] sm:$0xff]  ;;  %v2984_v52 = vld [vmem:[#allocation6 + $0x15d0] sm:$0xff] }
 0x367   : > { %v6783_v47 = vpack.c.bf16 %v2984_v52, %v2977_v62  ;;  %v3019_v62 = vld [vmem:[#allocation6 + $0x16e8] sm:$0xff]  ;;  %v3026_v52 = vld [vmem:[#allocation6 + $0x1720] sm:$0xff] }
 0x368   : > { %6738 = vmatpush1.bf16.msra.mxu1 %v6737_v56  ;;  %v2935_v56 = vld [vmem:[#allocation6 + $0x1448] sm:$0xff] }
 0x369   : > { %6740 = vmatprep.subr.bf16.mxu1 %v6739_v54  ;;  %v2942_v54 = vld [vmem:[#allocation6 + $0x1480] sm:$0xff] }
 0x36a   : > { %v6771_v26 = vpack.c.bf16 %v2942_v54, %v2935_v56  ;;  %v2757_v54 = vld [vmem:[#allocation6 + $0xeb8] sm:$0xff] }
 0x36b   : > { %v6593_v30 = vpack.c.bf16 %v2757_v54, %v2750_v40  ;;  %v2792_v40 = vld [vmem:[#allocation6 + $0xfd0] sm:$0xff]  ;;  %v2799_v54 = vld [vmem:[#allocation6 + $0x1008] sm:$0xff] }
 0x36c   : > { %6742 = vmatpush1.bf16.msra.mxu1 %v6741_v63  ;;  %v2949_v63 = vld [vmem:[#allocation6 + $0x14b8] sm:$0xff] }
 0x36d   : > { %6744 = vmatprep.subr.bf16.mxu1 %v6743_v27  ;;  %v2956_v27 = vld [vmem:[#allocation6 + $0x14f0] sm:$0xff] }
 0x36e   : > { %v6775_v14 = vpack.c.bf16 %v2956_v27, %v2949_v63  ;;  %v2765_v63 = vld [vmem:[#allocation6 + $0xef8] sm:$0xff]  ;;  %v2772_v27 = vld [vmem:[#allocation6 + $0xf30] sm:$0xff] }
 0x370   : > { %6746 = vmatpush1.bf16.msra.mxu1 %v6745_v11  ;;  %v2963_v11 = vld [vmem:[#allocation6 + $0x1528] sm:$0xff] }
 0x371   : > { %6748 = vmatprep.subr.bf16.mxu1 %v6747_v61  ;;  %v2970_v61 = vld [vmem:[#allocation6 + $0x1560] sm:$0xff] }
 0x372   : > { %v6779_v22 = vpack.c.bf16 %v2970_v61, %v2963_v11  ;;  %v2764_v11 = vld [vmem:[#allocation6 + $0xef0] sm:$0xff]  ;;  %v2771_v61 = vld [vmem:[#allocation6 + $0xf28] sm:$0xff] }
 0x374   : > { %6750 = vmatpush1.bf16.msra.mxu1 %v6749_v10 }
 0x375   : > { %6752 = vmatprep.subr.bf16.mxu1 %v6751_v17 }
 0x378   : > { %6754 = vmatpush1.bf16.msra.mxu1 %v6753_v48 }
 0x379   : > { %6756 = vmatprep.subr.bf16.mxu1 %v6755_v4 }
 0x37c   : > { %6758 = vmatpush1.bf16.msra.mxu1 %v6757_v28  ;;  %v2962_v28 = vld [vmem:[#allocation6 + $0x1520] sm:$0xff] }
 0x37d   : > { %6760 = vmatprep.subr.bf16.mxu1 %v6759_v16  ;;  %v2969_v16 = vld [vmem:[#allocation6 + $0x1558] sm:$0xff] }
 0x380   : > { %6762 = vmatpush1.bf16.msra.mxu1 %v6761_v49 }
 0x381   : > { %6764 = vmatprep.subr.bf16.mxu1 %v6763_v32 }
 0x384   : > { %6766 = vmatpush1.bf16.msra.mxu1 %v6765_v8  ;;  %v6589_v8 = vpack.c.bf16 %v2743_v50, %v2736_v13  ;;  %v2778_v13 = vld [vmem:[#allocation6 + $0xf60] sm:$0xff]  ;;  %v2785_v50 = vld [vmem:[#allocation6 + $0xf98] sm:$0xff] }
 0x385   : > { %6768 = vmatprep.subr.bf16.mxu1 %v6767_v35  ;;  %v6781_v35 = vpack.c.bf16 %v2969_v16, %v2962_v28 }
 0x388   : > { %6770 = vmatpush1.bf16.msra.mxu1 %v6769_v41  ;;  %v2976_v41 = vld [vmem:[#allocation6 + $0x1590] sm:$0xff] }
 0x389   : > { %6772 = vmatprep.subr.bf16.mxu1 %v6771_v26  ;;  %v2983_v26 = vld [vmem:[#allocation6 + $0x15c8] sm:$0xff] }
 0x38a   : > { %v6785_v39 = vpack.c.bf16 %v2983_v26, %v2976_v41  ;;  %v6795_v26 = vpack.c.bf16 %v3026_v52, %v3019_v62  ;;  %v3061_v62 = vld [vmem:[#allocation6 + $0x1838] sm:$0xff]  ;;  %v3068_v52 = vld [vmem:[#allocation6 + $0x1870] sm:$0xff] }
 0x38c   : > { %6774 = vmatpush1.bf16.msra.mxu1 %v6773_v29  ;;  %v2991_v29 = vld [vmem:[#allocation6 + $0x1608] sm:$0xff] }
 0x38d   : > { %6776 = vmatprep.subr.bf16.mxu1 %v6775_v14  ;;  %v2998_v14 = vld [vmem:[#allocation6 + $0x1640] sm:$0xff] }
 0x390   : > { %6778 = vmatpush1.bf16.msra.mxu1 %v6777_v45  ;;  %v2990_v45 = vld [vmem:[#allocation6 + $0x1600] sm:$0xff] }
 0x391   : > { %6780 = vmatprep.subr.bf16.mxu1 %v6779_v22  ;;  %v2997_v22 = vld [vmem:[#allocation6 + $0x1638] sm:$0xff] }
 0x3ae   : > { %v2224_v37 = vpop.permute.xlu0 %2223 }
 0x3af   : > { %v2239_v33 = vsel %vm1943_vm5, %v2224_v37, %v9069_v15  ;;  %v2249_v10 = vsel %vm1943_vm5, 0.0, %v2224_v37  ;;  %v2779_v37 = vld [vmem:[#allocation6 + $0xf68] sm:$0xff] }
 0x3b0   : > { %v9124_v17 = vrot.slane %v2249_v10, 7  ;;  %v9126_v34 = vrot.slane %v2239_v33, 7  ;;  %v6595_v33 = vpack.c.bf16 %v2772_v27, %v2765_v63  ;;  %v6787_v10 = vpack.c.bf16 %v2998_v14, %v2991_v29  ;;  %v2807_v63 = vld [vmem:[#allocation6 + $0x1048] sm:$0xff]  ;;  %v2814_v27 = vld [vmem:[#allocation6 + $0x1080] sm:$0xff]  ;;  %v3033_v29 = vld [vmem:[#allocation6 + $0x1758] sm:$0xff] }
 0x3b1   : > { %v3040_v14 = vld [vmem:[#allocation6 + $0x1790] sm:$0xff] }
 0x3b2   : > { %v9133_v44 = vsel %vm2162_vm8, 0.0, %v9126_v34  ;;  %v9137_v15 = vsel %vm2162_vm8, 0.0, %v9124_v17 }
 0x3b3   : > { %v3193_v5 = vrot.slane %v9133_v44, 1  ;;  %v3190_v25 = vrot.slane %v9137_v15, 1 }
 0x3bb   : > { %v2232_v20 = vpop.permute.xlu1 %2231 }
 0x3bc   : > { %v2242_v3 = vsel %vm1943_vm5, %v2232_v20, %v9067_v55  ;;  %v2250_v38 = vsel %vm1943_vm5, 0.0, %v2232_v20  ;;  %v2786_v20 = vld [vmem:[#allocation6 + $0xfa0] sm:$0xff] }
 0x3bd   : > { %v2261_v48 = vrot.slane %v2250_v38, 7  ;;  %v2263_v4 = vrot.slane %v2242_v3, 7  ;;  %v3005_v3 = vld [vmem:[#allocation6 + $0x1678] sm:$0xff]  ;;  %v3012_v38 = vld [vmem:[#allocation6 + $0x16b0] sm:$0xff]  ;;  %v6599_v28 = vpack.c.bf16 %v2786_v20, %v2779_v37 }
 0x3be   : > { %v6791_v16 = vpack.c.bf16 %v3012_v38, %v3005_v3  ;;  %v3032_v37 = vld [vmem:[#allocation6 + $0x1750] sm:$0xff]  ;;  %v3047_v3 = vld [vmem:[#allocation6 + $0x17c8] sm:$0xff]  ;;  %v3054_v38 = vld [vmem:[#allocation6 + $0x1800] sm:$0xff] }
 0x3bf   : > { %v9141_v6 = vsel %vm2162_vm8, %v9124_v17, %v2261_v48  ;;  %v9145_v55 = vsel %vm2162_vm8, %v9126_v34, %v2263_v4  ;;  %v6597_v48 = vpack.c.bf16 %v2771_v61, %v2764_v11  ;;  %v6789_v4 = vpack.c.bf16 %v2997_v22, %v2990_v45  ;;  %v2806_v11 = vld [vmem:[#allocation6 + $0x1040] sm:$0xff]  ;;  %v2813_v61 = vld [vmem:[#allocation6 + $0x1078] sm:$0xff]  ;;  %v2828_v20 = vld [vmem:[#allocation6 + $0x10f0] sm:$0xff] }
 0x3c0   : > { %v9149_v51 = vsel %vm345_vm3, %v9141_v6, 0.0  ;;  %v9153_v18 = vsel %vm345_vm3, %v9145_v55, 0.0  ;;  %v6607_v45 = vpack.c.bf16 %v2814_v27, %v2807_v63  ;;  %v6799_v22 = vpack.c.bf16 %v3040_v14, %v3033_v29  ;;  %v2849_v63 = vld [vmem:[#allocation6 + $0x1198] sm:$0xff]  ;;  %v2856_v27 = vld [vmem:[#allocation6 + $0x11d0] sm:$0xff]  ;;  %v3075_v29 = vld [vmem:[#allocation6 + $0x18a8] sm:$0xff] }
 0x3c1   : > { %v9156_v49 = vrot.slane %v9149_v51, 1  ;;  %v9159_v32 = vrot.slane %v9153_v18, 1  ;;  %v3082_v14 = vld [vmem:[#allocation6 + $0x18e0] sm:$0xff] }
 0x3c3   : > { %v9165_v24 = vsel %vm345_vm3, %v3193_v5, %v9159_v32  ;;  %v9169_v56 = vsel %vm345_vm3, %v3190_v25, %v9156_v49  ;;  %v2793_v5 = vld [vmem:[#allocation6 + $0xfd8] sm:$0xff]  ;;  %v2800_v25 = vld [vmem:[#allocation6 + $0x1010] sm:$0xff] }
 0x3c4   : > { %3274 = vmatprep.mubr.f32.mxu0 %v9165_v24  ;;  %3582 = vmatprep.mubr.f32.mxu1 %v9165_v24  ;;  %v6603_v41 = vpack.c.bf16 %v2800_v25, %v2793_v5  ;;  %v2835_v5 = vld [vmem:[#allocation6 + $0x1128] sm:$0xff]  ;;  %v2842_v25 = vld [vmem:[#allocation6 + $0x1160] sm:$0xff] }
 0x3c5   : > { %3275 = vmatmul.mubr.f32.vlgmr.msra.gmra.mrb[28].mxu0 %v9169_v56  ;;  %3583 = vmatmul.mubr.f32.vlgmr.msra.gmra.mrb[16].mxu1 %v9169_v56 }
 0x3c6   : > { %6590 = vmatpush1.bf16.msra.mxu0 %v6589_v8  ;;  %6782 = vmatpush1.bf16.msra.mxu1 %v6781_v35  ;;  %v6601_v8 = vpack.c.bf16 %v2785_v50, %v2778_v13  ;;  %v6793_v35 = vpack.c.bf16 %v3011_v43, %v3004_v7  ;;  %v2820_v13 = vld [vmem:[#allocation6 + $0x10b0] sm:$0xff]  ;;  %v2827_v50 = vld [vmem:[#allocation6 + $0x10e8] sm:$0xff]  ;;  %v3046_v7 = vld [vmem:[#allocation6 + $0x17c0] sm:$0xff] }
 0x3c7   : > { %3280 = vmatprep.mubr.f32.mxu0 %v9159_v32  ;;  %3588 = vmatprep.mubr.f32.mxu1 %v9159_v32  ;;  %v3053_v43 = vld [vmem:[#allocation6 + $0x17f8] sm:$0xff] }
 0x3c8   : > { %6592 = vmatprep.subr.bf16.mxu0 %v6591_v42  ;;  %6784 = vmatprep.subr.bf16.mxu1 %v6783_v47  ;;  %v3018_v42 = vld [vmem:[#allocation6 + $0x16e0] sm:$0xff]  ;;  %v3025_v47 = vld [vmem:[#allocation6 + $0x1718] sm:$0xff] }
 0x3c9   : > { %3281 = vmatmul.mubr.f32.gmra.mrb[30].mxu0 %v9156_v49  ;;  %3589 = vmatmul.mubr.f32.gmra.mrb[18].mxu1 %v9156_v49 }
 0x3ca   : > { %6594 = vmatpush1.bf16.msra.mxu0 %v6593_v30  ;;  %6786 = vmatpush1.bf16.msra.mxu1 %v6785_v39  ;;  %v6605_v30 = vpack.c.bf16 %v2799_v54, %v2792_v40  ;;  %v6797_v39 = vpack.c.bf16 %v3025_v47, %v3018_v42  ;;  %v2834_v40 = vld [vmem:[#allocation6 + $0x1120] sm:$0xff]  ;;  %v2841_v54 = vld [vmem:[#allocation6 + $0x1158] sm:$0xff]  ;;  %v3060_v42 = vld [vmem:[#allocation6 + $0x1830] sm:$0xff] }
 0x3cb   : > { %3428 = vmatprep.mubr.f32.mxu0 %v9165_v24  ;;  %3659 = vmatprep.mubr.f32.mxu1 %v9103_v46  ;;  %v3067_v47 = vld [vmem:[#allocation6 + $0x1868] sm:$0xff] }
 0x3cc   : > { %6596 = vmatprep.subr.bf16.mxu0 %v6595_v33  ;;  %6788 = vmatprep.subr.bf16.mxu1 %v6787_v10  ;;  %v3039_v33 = vld [vmem:[#allocation6 + $0x1788] sm:$0xff]  ;;  %v2821_v10 = vld [vmem:[#allocation6 + $0x10b8] sm:$0xff] }
 0x3ce   : > { %6598 = vmatpush1.bf16.msra.mxu0 %v6597_v48  ;;  %6790 = vmatpush1.bf16.msra.mxu1 %v6789_v4  ;;  %v6609_v48 = vpack.c.bf16 %v2813_v61, %v2806_v11  ;;  %v6801_v4 = vpack.c.bf16 %v3039_v33, %v3032_v37  ;;  %v2848_v11 = vld [vmem:[#allocation6 + $0x1190] sm:$0xff]  ;;  %v2855_v61 = vld [vmem:[#allocation6 + $0x11c8] sm:$0xff]  ;;  %v3074_v37 = vld [vmem:[#allocation6 + $0x18a0] sm:$0xff] }
 0x3cf   : > { %6600 = vmatprep.subr.bf16.mxu0 %v6599_v28  ;;  %6792 = vmatprep.subr.bf16.mxu1 %v6791_v16  ;;  %v6611_v28 = vpack.c.bf16 %v2828_v20, %v2821_v10  ;;  %v6803_v16 = vpack.c.bf16 %v3054_v38, %v3047_v3  ;;  %v3081_v33 = vld [vmem:[#allocation6 + $0x18d8] sm:$0xff]  ;;  %v2863_v10 = vld [vmem:[#allocation6 + $0x1208] sm:$0xff]  ;;  %v2870_v20 = vld [vmem:[#allocation6 + $0x1240] sm:$0xff] }
 0x3d0   : > { %v3089_v3 = vld [vmem:[#allocation6 + $0x1918] sm:$0xff]  ;;  %v3096_v38 = vld [vmem:[#allocation6 + $0x1950] sm:$0xff] }
 0x3d2   : > { %6602 = vmatpush1.bf16.msra.mxu0 %v6601_v8  ;;  %6794 = vmatpush1.bf16.msra.mxu1 %v6793_v35  ;;  %v6613_v8 = vpack.c.bf16 %v2827_v50, %v2820_v13  ;;  %v6805_v35 = vpack.c.bf16 %v3053_v43, %v3046_v7  ;;  %v2862_v13 = vld [vmem:[#allocation6 + $0x1200] sm:$0xff]  ;;  %v2869_v50 = vld [vmem:[#allocation6 + $0x1238] sm:$0xff]  ;;  %v3088_v7 = vld [vmem:[#allocation6 + $0x1910] sm:$0xff] }
 0x3d3   : > { %6604 = vmatprep.subr.bf16.mxu0 %v6603_v41  ;;  %6796 = vmatprep.subr.bf16.mxu1 %v6795_v26  ;;  %v6615_v41 = vpack.c.bf16 %v2842_v25, %v2835_v5  ;;  %v6807_v26 = vpack.c.bf16 %v3068_v52, %v3061_v62  ;;  %v3095_v43 = vld [vmem:[#allocation6 + $0x1948] sm:$0xff]  ;;  %v2877_v5 = vld [vmem:[#allocation6 + $0x1278] sm:$0xff]  ;;  %v2884_v25 = vld [vmem:[#allocation6 + $0x12b0] sm:$0xff] }
 0x3d4   : > { %v3103_v62 = vld [vmem:[#allocation6 + $0x1988] sm:$0xff]  ;;  %v3110_v52 = vld [vmem:[#allocation6 + $0x19c0] sm:$0xff] }
 0x3d6   : > { %6606 = vmatpush1.bf16.msra.mxu0 %v6605_v30  ;;  %6798 = vmatpush1.bf16.msra.mxu1 %v6797_v39  ;;  %v6617_v30 = vpack.c.bf16 %v2841_v54, %v2834_v40  ;;  %v6809_v39 = vpack.c.bf16 %v3067_v47, %v3060_v42  ;;  %v2876_v40 = vld [vmem:[#allocation6 + $0x1270] sm:$0xff]  ;;  %v2883_v54 = vld [vmem:[#allocation6 + $0x12a8] sm:$0xff]  ;;  %v3102_v42 = vld [vmem:[#allocation6 + $0x1980] sm:$0xff] }
 0x3d7   : > { %6608 = vmatprep.subr.bf16.mxu0 %v6607_v45  ;;  %6800 = vmatprep.subr.bf16.mxu1 %v6799_v22  ;;  %v6619_v45 = vpack.c.bf16 %v2856_v27, %v2849_v63  ;;  %v6811_v22 = vpack.c.bf16 %v3082_v14, %v3075_v29  ;;  %v3109_v47 = vld [vmem:[#allocation6 + $0x19b8] sm:$0xff]  ;;  %v2891_v63 = vld [vmem:[#allocation6 + $0x12e8] sm:$0xff]  ;;  %v2898_v27 = vld [vmem:[#allocation6 + $0x1320] sm:$0xff] }
 0x3d8   : > { %v3117_v29 = vld [vmem:[#allocation6 + $0x19f8] sm:$0xff]  ;;  %v3124_v14 = vld [vmem:[#allocation6 + $0x1a30] sm:$0xff] }
 0x3da   : > { %6610 = vmatpush1.bf16.msra.mxu0 %v6609_v48  ;;  %6802 = vmatpush1.bf16.msra.mxu1 %v6801_v4  ;;  %v6621_v48 = vpack.c.bf16 %v2855_v61, %v2848_v11  ;;  %v6813_v4 = vpack.c.bf16 %v3081_v33, %v3074_v37  ;;  %v2890_v11 = vld [vmem:[#allocation6 + $0x12e0] sm:$0xff]  ;;  %v2897_v61 = vld [vmem:[#allocation6 + $0x1318] sm:$0xff]  ;;  %v3116_v37 = vld [vmem:[#allocation6 + $0x19f0] sm:$0xff] }
 0x3db   : > { %6612 = vmatprep.subr.bf16.mxu0 %v6611_v28  ;;  %6804 = vmatprep.subr.bf16.mxu1 %v6803_v16  ;;  %v6623_v28 = vpack.c.bf16 %v2870_v20, %v2863_v10  ;;  %v6815_v16 = vpack.c.bf16 %v3096_v38, %v3089_v3  ;;  %v3123_v33 = vld [vmem:[#allocation6 + $0x1a28] sm:$0xff]  ;;  %v2905_v10 = vld [vmem:[#allocation6 + $0x1358] sm:$0xff]  ;;  %v2912_v20 = vld [vmem:[#allocation6 + $0x1390] sm:$0xff] }
 0x3dc   : > { %v3131_v3 = vld [vmem:[#allocation6 + $0x1a68] sm:$0xff]  ;;  %v3138_v38 = vld [vmem:[#allocation6 + $0x1aa0] sm:$0xff] }
 0x3de   : > { %6614 = vmatpush1.bf16.msra.mxu0 %v6613_v8  ;;  %6806 = vmatpush1.bf16.msra.mxu1 %v6805_v35  ;;  %v6625_v8 = vpack.c.bf16 %v2869_v50, %v2862_v13  ;;  %v6817_v35 = vpack.c.bf16 %v3095_v43, %v3088_v7  ;;  %v2904_v13 = vld [vmem:[#allocation6 + $0x1350] sm:$0xff]  ;;  %v2911_v50 = vld [vmem:[#allocation6 + $0x1388] sm:$0xff]  ;;  %v3130_v7 = vld [vmem:[#allocation6 + $0x1a60] sm:$0xff] }
 0x3df   : > { %6616 = vmatprep.subr.bf16.mxu0 %v6615_v41  ;;  %6808 = vmatprep.subr.bf16.mxu1 %v6807_v26  ;;  %v6627_v41 = vpack.c.bf16 %v2884_v25, %v2877_v5  ;;  %v6819_v26 = vpack.c.bf16 %v3110_v52, %v3103_v62  ;;  %v3137_v43 = vld [vmem:[#allocation6 + $0x1a98] sm:$0xff]  ;;  %v2919_v5 = vld [vmem:[#allocation6 + $0x13c8] sm:$0xff]  ;;  %v2926_v25 = vld [vmem:[#allocation6 + $0x1400] sm:$0xff] }
 0x3e0   : > { %v3145_v62 = vld [vmem:[#allocation6 + $0x1ad8] sm:$0xff]  ;;  %v3152_v52 = vld [vmem:[#allocation6 + $0x1b10] sm:$0xff] }
 0x3e2   : > { %6618 = vmatpush1.bf16.msra.mxu0 %v6617_v30  ;;  %6810 = vmatpush1.bf16.msra.mxu1 %v6809_v39  ;;  %v6629_v30 = vpack.c.bf16 %v2883_v54, %v2876_v40  ;;  %v6821_v39 = vpack.c.bf16 %v3109_v47, %v3102_v42  ;;  %v2918_v40 = vld [vmem:[#allocation6 + $0x13c0] sm:$0xff]  ;;  %v2925_v54 = vld [vmem:[#allocation6 + $0x13f8] sm:$0xff]  ;;  %v3144_v42 = vld [vmem:[#allocation6 + $0x1ad0] sm:$0xff] }
 0x3e3   : > { %6620 = vmatprep.subr.bf16.mxu0 %v6619_v45  ;;  %6812 = vmatprep.subr.bf16.mxu1 %v6811_v22  ;;  %v6631_v45 = vpack.c.bf16 %v2898_v27, %v2891_v63  ;;  %v6823_v22 = vpack.c.bf16 %v3124_v14, %v3117_v29  ;;  %v3151_v47 = vld [vmem:[#allocation6 + $0x1b08] sm:$0xff]  ;;  %v2933_v63 = vld [vmem:[#allocation6 + $0x1438] sm:$0xff]  ;;  %v2940_v27 = vld [vmem:[#allocation6 + $0x1470] sm:$0xff] }
 0x3e4   : > { %v3159_v29 = vld [vmem:[#allocation6 + $0x1b48] sm:$0xff]  ;;  %v3166_v14 = vld [vmem:[#allocation6 + $0x1b80] sm:$0xff] }
 0x3e6   : > { %6622 = vmatpush1.bf16.msra.mxu0 %v6621_v48  ;;  %6814 = vmatpush1.bf16.msra.mxu1 %v6813_v4  ;;  %v6633_v48 = vpack.c.bf16 %v2897_v61, %v2890_v11  ;;  %v6825_v4 = vpack.c.bf16 %v3123_v33, %v3116_v37  ;;  %v2932_v11 = vld [vmem:[#allocation6 + $0x1430] sm:$0xff]  ;;  %v2939_v61 = vld [vmem:[#allocation6 + $0x1468] sm:$0xff]  ;;  %v3158_v37 = vld [vmem:[#allocation6 + $0x1b40] sm:$0xff] }
 0x3e7   : > { %6624 = vmatprep.subr.bf16.mxu0 %v6623_v28  ;;  %6816 = vmatprep.subr.bf16.mxu1 %v6815_v16  ;;  %v6635_v28 = vpack.c.bf16 %v2912_v20, %v2905_v10  ;;  %v6827_v16 = vpack.c.bf16 %v3138_v38, %v3131_v3  ;;  %v3165_v33 = vld [vmem:[#allocation6 + $0x1b78] sm:$0xff]  ;;  %v2947_v10 = vld [vmem:[#allocation6 + $0x14a8] sm:$0xff]  ;;  %v2954_v20 = vld [vmem:[#allocation6 + $0x14e0] sm:$0xff] }
 0x3e8   : > { %v3173_v3 = vld [vmem:[#allocation6 + $0x1bb8] sm:$0xff]  ;;  %v3180_v38 = vld [vmem:[#allocation6 + $0x1bf0] sm:$0xff] }
 0x3ea   : > { %6626 = vmatpush1.bf16.msra.mxu0 %v6625_v8  ;;  %6818 = vmatpush1.bf16.msra.mxu1 %v6817_v35  ;;  %v6637_v8 = vpack.c.bf16 %v2911_v50, %v2904_v13  ;;  %v6829_v35 = vpack.c.bf16 %v3137_v43, %v3130_v7  ;;  %v2946_v13 = vld [vmem:[#allocation6 + $0x14a0] sm:$0xff]  ;;  %v2953_v50 = vld [vmem:[#allocation6 + $0x14d8] sm:$0xff]  ;;  %v3172_v7 = vld [vmem:[#allocation6 + $0x1bb0] sm:$0xff] }
 0x3eb   : > { %6628 = vmatprep.subr.bf16.mxu0 %v6627_v41  ;;  %6820 = vmatprep.subr.bf16.mxu1 %v6819_v26  ;;  %v6639_v41 = vpack.c.bf16 %v2926_v25, %v2919_v5  ;;  %v6831_v26 = vpack.c.bf16 %v3152_v52, %v3145_v62  ;;  %v3179_v43 = vld [vmem:[#allocation6 + $0x1be8] sm:$0xff]  ;;  %v2961_v5 = vld [vmem:[#allocation6 + $0x1518] sm:$0xff]  ;;  %v2968_v25 = vld [vmem:[#allocation6 + $0x1550] sm:$0xff] }
 0x3ec   : > { %v2286_v62 = vld [vmem:[#allocation6 + $0x8] sm:$0xff]  ;;  %v2293_v52 = vld [vmem:[#allocation6 + $0x40] sm:$0xff] }
 0x3ee   : > { %6630 = vmatpush1.bf16.msra.mxu0 %v6629_v30  ;;  %6822 = vmatpush1.bf16.msra.mxu1 %v6821_v39  ;;  %v6641_v30 = vpack.c.bf16 %v2925_v54, %v2918_v40  ;;  %v6833_v39 = vpack.c.bf16 %v3151_v47, %v3144_v42  ;;  %v6651_v40 = vpack.c.bf16 %v2968_v25, %v2961_v5  ;;  %v2285_v42 = vld [vmem:[#allocation6] sm:$0xff]  ;;  %v2292_v47 = vld [vmem:[#allocation6 + $0x38] sm:$0xff]  ;;  %v3003_v25 = vld [vmem:[#allocation6 + $0x1668] sm:$0xff] }
 0x3ef   : > { %6632 = vmatprep.subr.bf16.mxu0 %v6631_v45  ;;  %6824 = vmatprep.subr.bf16.mxu1 %v6823_v22  ;;  %v6643_v45 = vpack.c.bf16 %v2940_v27, %v2933_v63  ;;  %v6835_v22 = vpack.c.bf16 %v3166_v14, %v3159_v29  ;;  %v6907_v54 = vpack.c.bf16 %v2293_v52, %v2286_v62  ;;  %v2975_v63 = vld [vmem:[#allocation6 + $0x1588] sm:$0xff]  ;;  %v2982_v27 = vld [vmem:[#allocation6 + $0x15c0] sm:$0xff]  ;;  %v2300_v29 = vld [vmem:[#allocation6 + $0x78] sm:$0xff] }
 0x3f0   : > { %v2307_v14 = vld [vmem:[#allocation6 + $0xb0] sm:$0xff]  ;;  %v2320_v5 = vld [vmem:[#allocation6 + $0x118] sm:$0xff]  ;;  %v3010_v62 = vld [vmem:[#allocation6 + $0x16a0] sm:$0xff] }
 0x3f1   : > { %v2328_v52 = vld [vmem:[#allocation6 + $0x158] sm:$0xff] }
 0x3f2   : > { %6634 = vmatpush1.bf16.msra.mxu0 %v6633_v48  ;;  %6826 = vmatpush1.bf16.msra.mxu1 %v6825_v4  ;;  %v6645_v48 = vpack.c.bf16 %v2939_v61, %v2932_v11  ;;  %v6837_v4 = vpack.c.bf16 %v3165_v33, %v3158_v37  ;;  %v2974_v11 = vld [vmem:[#allocation6 + $0x1580] sm:$0xff]  ;;  %v2981_v61 = vld [vmem:[#allocation6 + $0x15b8] sm:$0xff]  ;;  %v2299_v37 = vld [vmem:[#allocation6 + $0x70] sm:$0xff] }
 0x3f3   : > { %6636 = vmatprep.subr.bf16.mxu0 %v6635_v28  ;;  %6828 = vmatprep.subr.bf16.mxu1 %v6827_v16  ;;  %v6647_v28 = vpack.c.bf16 %v2954_v20, %v2947_v10  ;;  %v6839_v16 = vpack.c.bf16 %v3180_v38, %v3173_v3  ;;  %v2306_v33 = vld [vmem:[#allocation6 + $0xa8] sm:$0xff]  ;;  %v2989_v10 = vld [vmem:[#allocation6 + $0x15f8] sm:$0xff]  ;;  %v2996_v20 = vld [vmem:[#allocation6 + $0x1630] sm:$0xff] }
 0x3f4   : > { %v2314_v3 = vld [vmem:[#allocation6 + $0xe8] sm:$0xff]  ;;  %v2321_v38 = vld [vmem:[#allocation6 + $0x120] sm:$0xff] }
 0x3f6   : > { %6638 = vmatpush1.bf16.msra.mxu0 %v6637_v8  ;;  %6830 = vmatpush1.bf16.msra.mxu1 %v6829_v35  ;;  %v6649_v8 = vpack.c.bf16 %v2953_v50, %v2946_v13  ;;  %v6841_v35 = vpack.c.bf16 %v3179_v43, %v3172_v7  ;;  %v6913_v13 = vpack.c.bf16 %v2306_v33, %v2299_v37  ;;  %v2988_v50 = vld [vmem:[#allocation6 + $0x15f0] sm:$0xff]  ;;  %v2341_v37 = vld [vmem:[#allocation6 + $0x1c0] sm:$0xff] }
 0x3f7   : > { %6640 = vmatprep.subr.bf16.mxu0 %v6639_v41  ;;  %6832 = vmatprep.subr.bf16.mxu1 %v6831_v26  ;;  %v2960_v41 = vld [vmem:[#allocation6 + $0x1510] sm:$0xff]  ;;  %v2967_v26 = vld [vmem:[#allocation6 + $0x1548] sm:$0xff]  ;;  %v6659_v7 = vpack.c.bf16 %v2996_v20, %v2989_v10  ;;  %v6915_v43 = vpack.c.bf16 %v2321_v38, %v2314_v3  ;;  %v2348_v10 = vld [vmem:[#allocation6 + $0x1f8] sm:$0xff] }
 0x3f8   : > { %v3031_v20 = vld [vmem:[#allocation6 + $0x1748] sm:$0xff]  ;;  %v3038_v3 = vld [vmem:[#allocation6 + $0x1780] sm:$0xff]  ;;  %v2356_v38 = vld [vmem:[#allocation6 + $0x238] sm:$0xff] }
 0x3fa   : > { %6642 = vmatpush1.bf16.msra.mxu0 %v6641_v30  ;;  %6834 = vmatpush1.bf16.msra.mxu1 %v6833_v39  ;;  %v6653_v30 = vpack.c.bf16 %v2967_v26, %v2960_v41  ;;  %v6909_v39 = vpack.c.bf16 %v2292_v47, %v2285_v42  ;;  %v3002_v41 = vld [vmem:[#allocation6 + $0x1660] sm:$0xff]  ;;  %v3009_v26 = vld [vmem:[#allocation6 + $0x1698] sm:$0xff]  ;;  %v2327_v42 = vld [vmem:[#allocation6 + $0x150] sm:$0xff] }
 0x3fb   : > { %6644 = vmatprep.subr.bf16.mxu0 %v6643_v45  ;;  %6836 = vmatprep.subr.bf16.mxu1 %v6835_v22  ;;  %v6655_v45 = vpack.c.bf16 %v2982_v27, %v2975_v63  ;;  %v6911_v22 = vpack.c.bf16 %v2307_v14, %v2300_v29  ;;  %v2334_v63 = vld [vmem:[#allocation6 + $0x188] sm:$0xff]  ;;  %v3017_v27 = vld [vmem:[#allocation6 + $0x16d8] sm:$0xff]  ;;  %v3024_v29 = vld [vmem:[#allocation6 + $0x1710] sm:$0xff] }
 0x3fc   : > { %v2342_v14 = vld [vmem:[#allocation6 + $0x1c8] sm:$0xff] }
 0x3fe   : > { %6646 = vmatpush1.bf16.msra.mxu0 %v6645_v48  ;;  %6838 = vmatpush1.bf16.msra.mxu1 %v6837_v4  ;;  %v6657_v48 = vpack.c.bf16 %v2981_v61, %v2974_v11  ;;  %v6921_v11 = vpack.c.bf16 %v2334_v63, %v2327_v42  ;;  %v6667_v61 = vpack.c.bf16 %v3024_v29, %v3017_v27  ;;  %v3051_v42 = vld [vmem:[#allocation6 + $0x17e8] sm:$0xff]  ;;  %v2376_v27 = vld [vmem:[#allocation6 + $0x2d8] sm:$0xff]  ;;  %v4892_v4 = vrot.slane %v9073_v9, 2 }
 0x3ff   : > { %6648 = vmatprep.subr.bf16.mxu0 %v6647_v28  ;;  %6840 = vmatprep.subr.bf16.mxu1 %v6839_v16  ;;  %v2995_v28 = vld [vmem:[#allocation6 + $0x1628] sm:$0xff]  ;;  %v2313_v16 = vld [vmem:[#allocation6 + $0xe0] sm:$0xff] }
 0x400   : > { %v3059_v29 = vld [vmem:[#allocation6 + $0x1828] sm:$0xff] }
 0x401   : > { %v4480_v9 = vld [vmem:[#allocation6 + $0x1d68] sm:$0xff] }
 0x402   : > { %6650 = vmatpush1.bf16.msra.mxu0 %v6649_v8  ;;  %6842 = vmatpush1.bf16.msra.mxu1 %v6841_v35  ;;  %v2335_v8 = vld [vmem:[#allocation6 + $0x190] sm:$0xff]  ;;  %v6661_v35 = vpack.c.bf16 %v2995_v28, %v2988_v50  ;;  %v6925_v50 = vpack.c.bf16 %v2348_v10, %v2341_v37  ;;  %v6671_v28 = vpack.c.bf16 %v3038_v3, %v3031_v20  ;;  %v3065_v37 = vld [vmem:[#allocation6 + $0x1858] sm:$0xff]  ;;  %v2390_v20 = vld [vmem:[#allocation6 + $0x348] sm:$0xff] }
 0x403   : > { %6652 = vmatprep.subr.bf16.mxu0 %v6651_v40  ;;  %6908 = vmatprep.subr.bf16.mxu1 %v6907_v54  ;;  %v6917_v40 = vpack.c.bf16 %v2320_v5, %v2313_v16  ;;  %v6663_v54 = vpack.c.bf16 %v3010_v62, %v3003_v25  ;;  %v6919_v47 = vpack.c.bf16 %v2335_v8, %v2328_v52  ;;  %v3030_v16 = vld [vmem:[#allocation6 + $0x1740] sm:$0xff]  ;;  %v2362_v25 = vld [vmem:[#allocation6 + $0x268] sm:$0xff]  ;;  %v3045_v62 = vld [vmem:[#allocation6 + $0x17b8] sm:$0xff] }
 0x404   : > { %v3052_v52 = vld [vmem:[#allocation6 + $0x17f0] sm:$0xff]  ;;  %v2370_v8 = vld [vmem:[#allocation6 + $0x2a8] sm:$0xff]  ;;  %v3073_v3 = vld [vmem:[#allocation6 + $0x1898] sm:$0xff] }
 0x405   : > { %3429 = vmatmul.mubr.f32.vlgmr.msra.gmra.mrb[32].mxu0 %v9169_v56  ;;  %3660 = vmatmul.mubr.f32.vlgmr.msra.gmra.mrb[16].mxu1 %v9116_v57 }
 0x406   : > { %3434 = vmatprep.mubr.f32.mxu0 %v9159_v32  ;;  %6654 = vmatpush1.bf16.msra.mxu0 %v6653_v30  ;;  %v2349_v30 = vld [vmem:[#allocation6 + $0x200] sm:$0xff] }
 0x407   : > { %3665 = vmatprep.mubr.f32.mxu1 %v9090_v59  ;;  %6910 = vmatpush1.bf16.msra.mxu1 %v6909_v39  ;;  %v6665_v39 = vpack.c.bf16 %v3009_v26, %v3002_v41  ;;  %v6923_v33 = vpack.c.bf16 %v2349_v30, %v2342_v14  ;;  %v6675_v41 = vpack.c.bf16 %v3052_v52, %v3045_v62  ;;  %v3044_v26 = vld [vmem:[#allocation6 + $0x17b0] sm:$0xff]  ;;  %v3066_v14 = vld [vmem:[#allocation6 + $0x1860] sm:$0xff]  ;;  %v2384_v30 = vld [vmem:[#allocation6 + $0x318] sm:$0xff] }
 0x408   : > { %6656 = vmatprep.subr.bf16.mxu0 %v6655_v45  ;;  %6912 = vmatprep.subr.bf16.mxu1 %v6911_v22  ;;  %v3016_v45 = vld [vmem:[#allocation6 + $0x16d0] sm:$0xff]  ;;  %v3023_v22 = vld [vmem:[#allocation6 + $0x1708] sm:$0xff]  ;;  %v2404_v62 = vld [vmem:[#allocation6 + $0x3b8] sm:$0xff] }
 0x409   : > { %3435 = vmatmul.mubr.f32.gmra.mrb[34].mxu0 %v9156_v49  ;;  %3666 = vmatmul.mubr.f32.gmra.mrb[18].mxu1 %v9112_v12  ;;  %v3087_v52 = vld [vmem:[#allocation6 + $0x1908] sm:$0xff] }
 0x40a   : > { %6658 = vmatpush1.bf16.msra.mxu0 %v6657_v48  ;;  %3505 = vmatprep.mubr.f32.mxu0 %v9103_v46  ;;  %v2363_v48 = vld [vmem:[#allocation6 + $0x270] sm:$0xff] }
 0x40b   : > { %6914 = vmatpush1.bf16.msra.mxu1 %v6913_v13  ;;  %5994 = vmatprep.mubr.msk.f32.mxu1 %vm9185_vm13, %v9126_v34  ;;  %v6669_v13 = vpack.c.bf16 %v3023_v22, %v3016_v45  ;;  %v6927_v5 = vpack.c.bf16 %v2363_v48, %v2356_v38  ;;  %v6679_v45 = vpack.c.bf16 %v3066_v14, %v3059_v29  ;;  %v3058_v22 = vld [vmem:[#allocation6 + $0x1820] sm:$0xff]  ;;  %v3080_v38 = vld [vmem:[#allocation6 + $0x18d0] sm:$0xff]  ;;  %v2398_v48 = vld [vmem:[#allocation6 + $0x388] sm:$0xff] }
 0x40c   : > { %6660 = vmatprep.subr.bf16.mxu0 %v6659_v7  ;;  %6916 = vmatprep.subr.bf16.mxu1 %v6915_v43  ;;  %v3037_v7 = vld [vmem:[#allocation6 + $0x1778] sm:$0xff]  ;;  %v2355_v43 = vld [vmem:[#allocation6 + $0x230] sm:$0xff]  ;;  %v2418_v29 = vld [vmem:[#allocation6 + $0x428] sm:$0xff] }
 0x40d   : > { %v3101_v14 = vld [vmem:[#allocation6 + $0x1978] sm:$0xff] }
 0x40e   : > { %6662 = vmatpush1.bf16.msra.mxu0 %v6661_v35  ;;  %v2377_v35 = vld [vmem:[#allocation6 + $0x2e0] sm:$0xff] }
 0x40f   : > { %6918 = vmatpush1.bf16.msra.mxu1 %v6917_v40  ;;  %6664 = vmatprep.subr.bf16.mxu0 %v6663_v54  ;;  %v6673_v40 = vpack.c.bf16 %v3037_v7, %v3030_v16  ;;  %v6929_v54 = vpack.c.bf16 %v2362_v25, %v2355_v43  ;;  %v6931_v63 = vpack.c.bf16 %v2377_v35, %v2370_v8  ;;  %v3072_v7 = vld [vmem:[#allocation6 + $0x1890] sm:$0xff]  ;;  %v3079_v43 = vld [vmem:[#allocation6 + $0x18c8] sm:$0xff]  ;;  %v3094_v8 = vld [vmem:[#allocation6 + $0x1940] sm:$0xff] }
 0x410   : > { %6920 = vmatprep.subr.bf16.mxu1 %v6919_v47  ;;  %v2369_v47 = vld [vmem:[#allocation6 + $0x2a0] sm:$0xff]  ;;  %v6683_v16 = vpack.c.bf16 %v3080_v38, %v3073_v3  ;;  %v2412_v35 = vld [vmem:[#allocation6 + $0x3f8] sm:$0xff]  ;;  %v3115_v38 = vld [vmem:[#allocation6 + $0x19e8] sm:$0xff] }
 0x411   : > { %v2432_v3 = vld [vmem:[#allocation6 + $0x498] sm:$0xff] }
 0x412   : > { %6666 = vmatpush1.bf16.msra.mxu0 %v6665_v39  ;;  %v2391_v39 = vld [vmem:[#allocation6 + $0x350] sm:$0xff] }
 0x413   : > { %6922 = vmatpush1.bf16.msra.mxu1 %v6921_v11  ;;  %6668 = vmatprep.subr.bf16.mxu0 %v6667_v61  ;;  %v6677_v11 = vpack.c.bf16 %v3051_v42, %v3044_v26  ;;  %v6933_v61 = vpack.c.bf16 %v2376_v27, %v2369_v47  ;;  %v6935_v10 = vpack.c.bf16 %v2391_v39, %v2384_v30  ;;  %v3086_v42 = vld [vmem:[#allocation6 + $0x1900] sm:$0xff]  ;;  %v3093_v47 = vld [vmem:[#allocation6 + $0x1938] sm:$0xff]  ;;  %v3108_v30 = vld [vmem:[#allocation6 + $0x19b0] sm:$0xff] }
 0x414   : > { %6924 = vmatprep.subr.bf16.mxu1 %v6923_v33  ;;  %v2383_v33 = vld [vmem:[#allocation6 + $0x310] sm:$0xff]  ;;  %v6687_v26 = vpack.c.bf16 %v3094_v8, %v3087_v52  ;;  %v2426_v39 = vld [vmem:[#allocation6 + $0x468] sm:$0xff]  ;;  %v3129_v8 = vld [vmem:[#allocation6 + $0x1a58] sm:$0xff] }
 0x415   : > { %v2446_v52 = vld [vmem:[#allocation6 + $0x508] sm:$0xff] }
 0x416   : > { %6670 = vmatpush1.bf16.msra.mxu0 %v6669_v13  ;;  %v2405_v13 = vld [vmem:[#allocation6 + $0x3c0] sm:$0xff] }
 0x417   : > { %6926 = vmatpush1.bf16.msra.mxu1 %v6925_v50  ;;  %6672 = vmatprep.subr.bf16.mxu0 %v6671_v28  ;;  %v6681_v50 = vpack.c.bf16 %v3065_v37, %v3058_v22  ;;  %v6937_v28 = vpack.c.bf16 %v2390_v20, %v2383_v33  ;;  %v6939_v25 = vpack.c.bf16 %v2405_v13, %v2398_v48  ;;  %v3100_v37 = vld [vmem:[#allocation6 + $0x1970] sm:$0xff]  ;;  %v3107_v33 = vld [vmem:[#allocation6 + $0x19a8] sm:$0xff]  ;;  %v3122_v48 = vld [vmem:[#allocation6 + $0x1a20] sm:$0xff] }
 0x418   : > { %6928 = vmatprep.subr.bf16.mxu1 %v6927_v5  ;;  %v2397_v5 = vld [vmem:[#allocation6 + $0x380] sm:$0xff]  ;;  %v6691_v22 = vpack.c.bf16 %v3108_v30, %v3101_v14  ;;  %v2440_v13 = vld [vmem:[#allocation6 + $0x4d8] sm:$0xff]  ;;  %v3143_v30 = vld [vmem:[#allocation6 + $0x1ac8] sm:$0xff] }
 0x419   : > { %v2460_v14 = vld [vmem:[#allocation6 + $0x578] sm:$0xff] }
 0x41a   : > { %6674 = vmatpush1.bf16.msra.mxu0 %v6673_v40  ;;  %v2419_v40 = vld [vmem:[#allocation6 + $0x430] sm:$0xff] }
 0x41b   : > { %6930 = vmatpush1.bf16.msra.mxu1 %v6929_v54  ;;  %6676 = vmatprep.subr.bf16.mxu0 %v6675_v41  ;;  %v6685_v54 = vpack.c.bf16 %v3079_v43, %v3072_v7  ;;  %v6941_v41 = vpack.c.bf16 %v2404_v62, %v2397_v5  ;;  %v6943_v27 = vpack.c.bf16 %v2419_v40, %v2412_v35  ;;  %v3114_v43 = vld [vmem:[#allocation6 + $0x19e0] sm:$0xff]  ;;  %v3121_v5 = vld [vmem:[#allocation6 + $0x1a18] sm:$0xff]  ;;  %v3136_v35 = vld [vmem:[#allocation6 + $0x1a90] sm:$0xff] }
 0x41c   : > { %6932 = vmatprep.subr.bf16.mxu1 %v6931_v63  ;;  %v2411_v63 = vld [vmem:[#allocation6 + $0x3f0] sm:$0xff]  ;;  %v6695_v7 = vpack.c.bf16 %v3122_v48, %v3115_v38  ;;  %v2454_v40 = vld [vmem:[#allocation6 + $0x548] sm:$0xff]  ;;  %v3157_v48 = vld [vmem:[#allocation6 + $0x1b38] sm:$0xff] }
 0x41d   : > { %v2474_v38 = vld [vmem:[#allocation6 + $0x5e8] sm:$0xff] }
 0x41e   : > { %6678 = vmatpush1.bf16.msra.mxu0 %v6677_v11  ;;  %v2433_v11 = vld [vmem:[#allocation6 + $0x4a0] sm:$0xff] }
 0x41f   : > { %6934 = vmatpush1.bf16.msra.mxu1 %v6933_v61  ;;  %6680 = vmatprep.subr.bf16.mxu0 %v6679_v45  ;;  %v6689_v61 = vpack.c.bf16 %v3093_v47, %v3086_v42  ;;  %v6945_v45 = vpack.c.bf16 %v2418_v29, %v2411_v63  ;;  %v6947_v20 = vpack.c.bf16 %v2433_v11, %v2426_v39  ;;  %v3128_v47 = vld [vmem:[#allocation6 + $0x1a50] sm:$0xff]  ;;  %v3135_v63 = vld [vmem:[#allocation6 + $0x1a88] sm:$0xff]  ;;  %v3150_v39 = vld [vmem:[#allocation6 + $0x1b00] sm:$0xff] }
 0x420   : > { %6936 = vmatprep.subr.bf16.mxu1 %v6935_v10  ;;  %v2425_v10 = vld [vmem:[#allocation6 + $0x460] sm:$0xff]  ;;  %v6699_v42 = vpack.c.bf16 %v3136_v35, %v3129_v8  ;;  %v2468_v11 = vld [vmem:[#allocation6 + $0x5b8] sm:$0xff]  ;;  %v3171_v35 = vld [vmem:[#allocation6 + $0x1ba8] sm:$0xff] }
 0x421   : > { %v2488_v8 = vld [vmem:[#allocation6 + $0x658] sm:$0xff] }
 0x422   : > { %6682 = vmatpush1.bf16.msra.mxu0 %v6681_v50  ;;  %v2447_v50 = vld [vmem:[#allocation6 + $0x510] sm:$0xff] }
 0x423   : > { %6938 = vmatpush1.bf16.msra.mxu1 %v6937_v28  ;;  %6684 = vmatprep.subr.bf16.mxu0 %v6683_v16  ;;  %v6693_v28 = vpack.c.bf16 %v3107_v33, %v3100_v37  ;;  %v6949_v16 = vpack.c.bf16 %v2432_v3, %v2425_v10  ;;  %v6951_v62 = vpack.c.bf16 %v2447_v50, %v2440_v13  ;;  %v3142_v33 = vld [vmem:[#allocation6 + $0x1ac0] sm:$0xff]  ;;  %v3149_v10 = vld [vmem:[#allocation6 + $0x1af8] sm:$0xff]  ;;  %v3164_v13 = vld [vmem:[#allocation6 + $0x1b70] sm:$0xff] }
 0x424   : > { %6940 = vmatprep.subr.bf16.mxu1 %v6939_v25  ;;  %v2439_v25 = vld [vmem:[#allocation6 + $0x4d0] sm:$0xff]  ;;  %v6703_v37 = vpack.c.bf16 %v3150_v39, %v3143_v30  ;;  %v2482_v50 = vld [vmem:[#allocation6 + $0x628] sm:$0xff] }
 0x425   : > { %v2502_v30 = vld [vmem:[#allocation6 + $0x6c8] sm:$0xff]  ;;  %v2852_v39 = vld [vmem:[#allocation6 + $0x11b0] sm:$0xff] }
 0x426   : > { %6686 = vmatpush1.bf16.msra.mxu0 %v6685_v54  ;;  %v2461_v54 = vld [vmem:[#allocation6 + $0x580] sm:$0xff] }
 0x427   : > { %6942 = vmatpush1.bf16.msra.mxu1 %v6941_v41  ;;  %6688 = vmatprep.subr.bf16.mxu0 %v6687_v26  ;;  %v6697_v41 = vpack.c.bf16 %v3121_v5, %v3114_v43  ;;  %v6953_v26 = vpack.c.bf16 %v2446_v52, %v2439_v25  ;;  %v6955_v29 = vpack.c.bf16 %v2461_v54, %v2454_v40  ;;  %v3156_v5 = vld [vmem:[#allocation6 + $0x1b30] sm:$0xff]  ;;  %v3163_v25 = vld [vmem:[#allocation6 + $0x1b68] sm:$0xff]  ;;  %v3178_v40 = vld [vmem:[#allocation6 + $0x1be0] sm:$0xff] }
 0x428   : > { %6944 = vmatprep.subr.bf16.mxu1 %v6943_v27  ;;  %v2453_v27 = vld [vmem:[#allocation6 + $0x540] sm:$0xff]  ;;  %v6707_v43 = vpack.c.bf16 %v3164_v13, %v3157_v48  ;;  %v2496_v54 = vld [vmem:[#allocation6 + $0x698] sm:$0xff] }
 0x429   : > { %v2516_v48 = vld [vmem:[#allocation6 + $0x738] sm:$0xff]  ;;  %v2866_v13 = vld [vmem:[#allocation6 + $0x1220] sm:$0xff] }
 0x42a   : > { %6690 = vmatpush1.bf16.msra.mxu0 %v6689_v61  ;;  %v2475_v61 = vld [vmem:[#allocation6 + $0x5f0] sm:$0xff] }
 0x42b   : > { %6946 = vmatpush1.bf16.msra.mxu1 %v6945_v45  ;;  %6692 = vmatprep.subr.bf16.mxu0 %v6691_v22  ;;  %v6701_v45 = vpack.c.bf16 %v3135_v63, %v3128_v47  ;;  %v6957_v22 = vpack.c.bf16 %v2460_v14, %v2453_v27  ;;  %v6959_v3 = vpack.c.bf16 %v2475_v61, %v2468_v11  ;;  %v3170_v63 = vld [vmem:[#allocation6 + $0x1ba0] sm:$0xff]  ;;  %v3177_v27 = vld [vmem:[#allocation6 + $0x1bd8] sm:$0xff]  ;;  %v2859_v11 = vld [vmem:[#allocation6 + $0x11e8] sm:$0xff] }
 0x42c   : > { %6948 = vmatprep.subr.bf16.mxu1 %v6947_v20  ;;  %v2467_v20 = vld [vmem:[#allocation6 + $0x5b0] sm:$0xff]  ;;  %v6711_v47 = vpack.c.bf16 %v3178_v40, %v3171_v35  ;;  %v2510_v61 = vld [vmem:[#allocation6 + $0x708] sm:$0xff] }
 0x42d   : > { %v2530_v35 = vld [vmem:[#allocation6 + $0x7a8] sm:$0xff]  ;;  %v2880_v40 = vld [vmem:[#allocation6 + $0x1290] sm:$0xff] }
 0x42e   : > { %6694 = vmatpush1.bf16.msra.mxu0 %v6693_v28  ;;  %v2489_v28 = vld [vmem:[#allocation6 + $0x660] sm:$0xff] }
 0x42f   : > { %6950 = vmatpush1.bf16.msra.mxu1 %v6949_v16  ;;  %6696 = vmatprep.subr.bf16.mxu0 %v6695_v7  ;;  %v6705_v16 = vpack.c.bf16 %v3149_v10, %v3142_v33  ;;  %v6961_v7 = vpack.c.bf16 %v2474_v38, %v2467_v20  ;;  %v6963_v52 = vpack.c.bf16 %v2489_v28, %v2482_v50  ;;  %v2740_v20 = vld [vmem:[#allocation6 + $0xe30] sm:$0xff]  ;;  %v2509_v38 = vld [vmem:[#allocation6 + $0x700] sm:$0xff]  ;;  %v2873_v50 = vld [vmem:[#allocation6 + $0x1258] sm:$0xff] }
 0x430   : > { %6952 = vmatprep.subr.bf16.mxu1 %v6951_v62  ;;  %v2481_v62 = vld [vmem:[#allocation6 + $0x620] sm:$0xff]  ;;  %v6843_v33 = vpack.c.bf16 %v2859_v11, %v2852_v39  ;;  %v2524_v28 = vld [vmem:[#allocation6 + $0x778] sm:$0xff] }
 0x431   : > { %v2544_v39 = vld [vmem:[#allocation6 + $0x818] sm:$0xff]  ;;  %v2894_v11 = vld [vmem:[#allocation6 + $0x1300] sm:$0xff] }
 0x432   : > { %6698 = vmatpush1.bf16.msra.mxu0 %v6697_v41  ;;  %v2503_v41 = vld [vmem:[#allocation6 + $0x6d0] sm:$0xff] }
 0x433   : > { %6954 = vmatpush1.bf16.msra.mxu1 %v6953_v26  ;;  %6700 = vmatprep.subr.bf16.mxu0 %v6699_v42  ;;  %v6709_v26 = vpack.c.bf16 %v3163_v25, %v3156_v5  ;;  %v6965_v42 = vpack.c.bf16 %v2488_v8, %v2481_v62  ;;  %v6967_v14 = vpack.c.bf16 %v2503_v41, %v2496_v54  ;;  %v2754_v25 = vld [vmem:[#allocation6 + $0xea0] sm:$0xff]  ;;  %v2761_v62 = vld [vmem:[#allocation6 + $0xed8] sm:$0xff]  ;;  %v2887_v54 = vld [vmem:[#allocation6 + $0x12c8] sm:$0xff] }
 0x434   : > { %6956 = vmatprep.subr.bf16.mxu1 %v6955_v29  ;;  %v2495_v29 = vld [vmem:[#allocation6 + $0x690] sm:$0xff]  ;;  %v6847_v5 = vpack.c.bf16 %v2873_v50, %v2866_v13  ;;  %v2538_v41 = vld [vmem:[#allocation6 + $0x7e8] sm:$0xff] }
 0x435   : > { %v2558_v13 = vld [vmem:[#allocation6 + $0x888] sm:$0xff]  ;;  %v2908_v50 = vld [vmem:[#allocation6 + $0x1370] sm:$0xff] }
 0x436   : > { %6702 = vmatpush1.bf16.msra.mxu0 %v6701_v45  ;;  %v2517_v45 = vld [vmem:[#allocation6 + $0x740] sm:$0xff] }
 0x437   : > { %6958 = vmatpush1.bf16.msra.mxu1 %v6957_v22  ;;  %6704 = vmatprep.subr.bf16.mxu0 %v6703_v37  ;;  %v6713_v22 = vpack.c.bf16 %v3177_v27, %v3170_v63  ;;  %v6969_v37 = vpack.c.bf16 %v2502_v30, %v2495_v29  ;;  %v6971_v10 = vpack.c.bf16 %v2517_v45, %v2510_v61  ;;  %v2768_v27 = vld [vmem:[#allocation6 + $0xf10] sm:$0xff]  ;;  %v2775_v29 = vld [vmem:[#allocation6 + $0xf48] sm:$0xff]  ;;  %v2901_v61 = vld [vmem:[#allocation6 + $0x1338] sm:$0xff] }
 0x438   : > { %6960 = vmatprep.subr.bf16.mxu1 %v6959_v3  ;;  %v2747_v3 = vld [vmem:[#allocation6 + $0xe68] sm:$0xff]  ;;  %v6851_v63 = vpack.c.bf16 %v2887_v54, %v2880_v40  ;;  %v2552_v45 = vld [vmem:[#allocation6 + $0x858] sm:$0xff]  ;;  %v2922_v40 = vld [vmem:[#allocation6 + $0x13e0] sm:$0xff] }
 0x439   : > { %v2929_v54 = vld [vmem:[#allocation6 + $0x1418] sm:$0xff] }
 0x43a   : > { %6706 = vmatpush1.bf16.msra.mxu0 %v6705_v16  ;;  %v2531_v16 = vld [vmem:[#allocation6 + $0x7b0] sm:$0xff] }
 0x43b   : > { %6962 = vmatpush1.bf16.msra.mxu1 %v6961_v7  ;;  %6708 = vmatprep.subr.bf16.mxu0 %v6707_v43  ;;  %v6845_v7 = vpack.c.bf16 %v2747_v3, %v2740_v20  ;;  %v6973_v43 = vpack.c.bf16 %v2516_v48, %v2509_v38  ;;  %v6975_v8 = vpack.c.bf16 %v2531_v16, %v2524_v28  ;;  %v2782_v20 = vld [vmem:[#allocation6 + $0xf80] sm:$0xff]  ;;  %v2789_v3 = vld [vmem:[#allocation6 + $0xfb8] sm:$0xff]  ;;  %v2551_v38 = vld [vmem:[#allocation6 + $0x850] sm:$0xff] }
 0x43c   : > { %6964 = vmatprep.subr.bf16.mxu1 %v6963_v52  ;;  %v2523_v52 = vld [vmem:[#allocation6 + $0x770] sm:$0xff]  ;;  %v2566_v28 = vld [vmem:[#allocation6 + $0x8c8] sm:$0xff]  ;;  %v2573_v16 = vld [vmem:[#allocation6 + $0x900] sm:$0xff] }
 0x43e   : > { %6710 = vmatpush1.bf16.msra.mxu0 %v6709_v26  ;;  %v2545_v26 = vld [vmem:[#allocation6 + $0x820] sm:$0xff] }
 0x43f   : > { %6966 = vmatpush1.bf16.msra.mxu1 %v6965_v42  ;;  %6712 = vmatprep.subr.bf16.mxu0 %v6711_v47  ;;  %v6849_v42 = vpack.c.bf16 %v2761_v62, %v2754_v25  ;;  %v6977_v47 = vpack.c.bf16 %v2530_v35, %v2523_v52  ;;  %v6979_v30 = vpack.c.bf16 %v2545_v26, %v2538_v41  ;;  %v2796_v25 = vld [vmem:[#allocation6 + $0xff0] sm:$0xff]  ;;  %v2803_v62 = vld [vmem:[#allocation6 + $0x1028] sm:$0xff]  ;;  %v2565_v52 = vld [vmem:[#allocation6 + $0x8c0] sm:$0xff] }
 0x440   : > { %6968 = vmatprep.subr.bf16.mxu1 %v6967_v14  ;;  %v2537_v14 = vld [vmem:[#allocation6 + $0x7e0] sm:$0xff]  ;;  %v2572_v35 = vld [vmem:[#allocation6 + $0x8f8] sm:$0xff]  ;;  %v2587_v26 = vld [vmem:[#allocation6 + $0x970] sm:$0xff] }
 0x441   : > { %v2580_v41 = vld [vmem:[#allocation6 + $0x938] sm:$0xff] }
 0x442   : > { %6714 = vmatpush1.bf16.msra.mxu0 %v6713_v22  ;;  %v2559_v22 = vld [vmem:[#allocation6 + $0x890] sm:$0xff] }
 0x443   : > { %6970 = vmatpush1.bf16.msra.mxu1 %v6969_v37  ;;  %6844 = vmatprep.subr.bf16.mxu0 %v6843_v33  ;;  %v6853_v37 = vpack.c.bf16 %v2775_v29, %v2768_v27  ;;  %v6981_v33 = vpack.c.bf16 %v2544_v39, %v2537_v14  ;;  %v6983_v48 = vpack.c.bf16 %v2559_v22, %v2552_v45  ;;  %v2810_v27 = vld [vmem:[#allocation6 + $0x1060] sm:$0xff]  ;;  %v2817_v29 = vld [vmem:[#allocation6 + $0x1098] sm:$0xff]  ;;  %v2579_v14 = vld [vmem:[#allocation6 + $0x930] sm:$0xff] }
 0x444   : > { %6972 = vmatprep.subr.bf16.mxu1 %v6971_v10  ;;  %v6855_v10 = vpack.c.bf16 %v2901_v61, %v2894_v11  ;;  %v2586_v39 = vld [vmem:[#allocation6 + $0x968] sm:$0xff]  ;;  %v2936_v11 = vld [vmem:[#allocation6 + $0x1450] sm:$0xff]  ;;  %v2601_v22 = vld [vmem:[#allocation6 + $0x9e0] sm:$0xff] }
 0x445   : > { %3506 = vmatmul.mubr.f32.vlgmr.msra.gmra.mrb[32].mxu0 %v9116_v57  ;;  %v2943_v61 = vld [vmem:[#allocation6 + $0x1488] sm:$0xff] }
 0x446   : > { %5996 = vmatmul.mubr.msk.f32.vlgmr.msra.gmra.mrb[12].mxu1 %vm9185_vm13, %v9124_v17  ;;  %3511 = vmatprep.mubr.f32.mxu0 %v9090_v59  ;;  %v2594_v45 = vld [vmem:[#allocation6 + $0x9a8] sm:$0xff] }
 0x447   : > { %6846 = vmatpush3.bf16.msra.mxu0 %v6845_v7  ;;  %5997 = vmatprep.mubr.msk.f32.mxu1 %vm345_vm3, %v9145_v55  ;;  %v6857_v7 = vpack.c.bf16 %v2789_v3, %v2782_v20  ;;  %v2824_v20 = vld [vmem:[#allocation6 + $0x10d0] sm:$0xff]  ;;  %v2831_v3 = vld [vmem:[#allocation6 + $0x1108] sm:$0xff] }
 0x448   : > { %6974 = vmatpush1.bf16.msra.mxu1 %v6973_v43  ;;  %6848 = vmatprep.subr.bf16.mxu0 %v6847_v5  ;;  %v6985_v43 = vpack.c.bf16 %v2558_v13, %v2551_v38  ;;  %v2593_v38 = vld [vmem:[#allocation6 + $0x9a0] sm:$0xff]  ;;  %v2600_v13 = vld [vmem:[#allocation6 + $0x9d8] sm:$0xff] }
 0x449   : > { %3512 = vmatmul.mubr.f32.gmra.mrb[34].mxu0 %v9112_v12  ;;  %6976 = vmatprep.subr.bf16.mxu1 %v6975_v8  ;;  %v6987_v8 = vpack.c.bf16 %v2573_v16, %v2566_v28  ;;  %v2608_v28 = vld [vmem:[#allocation6 + $0xa18] sm:$0xff]  ;;  %v2615_v16 = vld [vmem:[#allocation6 + $0xa50] sm:$0xff] }
 0x44a   : > { %5998 = vmatmul.mubr.msk.f32.gmra.mrb[14].mxu1 %vm345_vm3, %v9141_v6  ;;  %3736 = vmatprep.mubr.f32.mxu0 %v9165_v24  ;;  %v2915_v24 = vld [vmem:[#allocation6 + $0x13a8] sm:$0xff] }
 0x44b   : > { %6850 = vmatpush3.bf16.msra.mxu0 %v6849_v42  ;;  %6000 = vmatprep.mubr.msk.f32.mxu1 %vm9185_vm13, %v9059_v58  ;;  %v6859_v5 = vpack.c.bf16 %v2915_v24, %v2908_v50  ;;  %v6861_v42 = vpack.c.bf16 %v2803_v62, %v2796_v25  ;;  %v2950_v50 = vld [vmem:[#allocation6 + $0x14c0] sm:$0xff]  ;;  %v2957_v24 = vld [vmem:[#allocation6 + $0x14f8] sm:$0xff] }
 0x44c   : > { %6978 = vmatpush1.bf16.msra.mxu1 %v6977_v47  ;;  %6852 = vmatprep.subr.bf16.mxu0 %v6851_v63  ;;  %v6989_v47 = vpack.c.bf16 %v2572_v35, %v2565_v52  ;;  %v6863_v63 = vpack.c.bf16 %v2929_v54, %v2922_v40  ;;  %v2838_v25 = vld [vmem:[#allocation6 + $0x1140] sm:$0xff]  ;;  %v2845_v62 = vld [vmem:[#allocation6 + $0x1178] sm:$0xff]  ;;  %v2607_v52 = vld [vmem:[#allocation6 + $0xa10] sm:$0xff] }
 0x44d   : > { %6980 = vmatprep.subr.bf16.mxu1 %v6979_v30  ;;  %v6991_v30 = vpack.c.bf16 %v2587_v26, %v2580_v41  ;;  %v2614_v35 = vld [vmem:[#allocation6 + $0xa48] sm:$0xff]  ;;  %v3076_v40 = vld [vmem:[#allocation6 + $0x18b0] sm:$0xff]  ;;  %v2629_v26 = vld [vmem:[#allocation6 + $0xac0] sm:$0xff] }
 0x44e   : > { %v3083_v54 = vld [vmem:[#allocation6 + $0x18e8] sm:$0xff] }
 0x44f   : > { %6854 = vmatpush3.bf16.msra.mxu0 %v6853_v37  ;;  %v6865_v37 = vpack.c.bf16 %v2817_v29, %v2810_v27  ;;  %v2622_v41 = vld [vmem:[#allocation6 + $0xa88] sm:$0xff]  ;;  %v2964_v27 = vld [vmem:[#allocation6 + $0x1530] sm:$0xff] }
 0x450   : > { %6982 = vmatpush1.bf16.msra.mxu1 %v6981_v33  ;;  %6856 = vmatprep.subr.bf16.mxu0 %v6855_v10  ;;  %v6993_v33 = vpack.c.bf16 %v2586_v39, %v2579_v14  ;;  %v6867_v10 = vpack.c.bf16 %v2943_v61, %v2936_v11  ;;  %v2971_v29 = vld [vmem:[#allocation6 + $0x1568] sm:$0xff]  ;;  %v2621_v14 = vld [vmem:[#allocation6 + $0xa80] sm:$0xff]  ;;  %v2628_v39 = vld [vmem:[#allocation6 + $0xab8] sm:$0xff] }
 0x451   : > { %6984 = vmatprep.subr.bf16.mxu1 %v6983_v48  ;;  %v6995_v48 = vpack.c.bf16 %v2601_v22, %v2594_v45  ;;  %v3090_v11 = vld [vmem:[#allocation6 + $0x1920] sm:$0xff]  ;;  %v3097_v61 = vld [vmem:[#allocation6 + $0x1958] sm:$0xff]  ;;  %v2643_v22 = vld [vmem:[#allocation6 + $0xb30] sm:$0xff] }
 0x452   : > { %v2636_v45 = vld [vmem:[#allocation6 + $0xaf8] sm:$0xff] }
 0x453   : > { %6858 = vmatpush3.bf16.msra.mxu0 %v6857_v7  ;;  %v6869_v7 = vpack.c.bf16 %v2831_v3, %v2824_v20  ;;  %v2978_v20 = vld [vmem:[#allocation6 + $0x15a0] sm:$0xff]  ;;  %v2985_v3 = vld [vmem:[#allocation6 + $0x15d8] sm:$0xff] }
 0x454   : > { %6986 = vmatpush1.bf16.msra.mxu1 %v6985_v43  ;;  %6860 = vmatprep.subr.bf16.mxu0 %v6859_v5  ;;  %v6997_v43 = vpack.c.bf16 %v2600_v13, %v2593_v38  ;;  %v6871_v5 = vpack.c.bf16 %v2957_v24, %v2950_v50  ;;  %v2635_v38 = vld [vmem:[#allocation6 + $0xaf0] sm:$0xff]  ;;  %v2642_v13 = vld [vmem:[#allocation6 + $0xb28] sm:$0xff] }
 0x455   : > { %6988 = vmatprep.subr.bf16.mxu1 %v6987_v8  ;;  %v6999_v8 = vpack.c.bf16 %v2615_v16, %v2608_v28  ;;  %v3104_v50 = vld [vmem:[#allocation6 + $0x1990] sm:$0xff]  ;;  %v3111_v24 = vld [vmem:[#allocation6 + $0x19c8] sm:$0xff]  ;;  %v2657_v16 = vld [vmem:[#allocation6 + $0xba0] sm:$0xff] }
 0x456   : > { %v2650_v28 = vld [vmem:[#allocation6 + $0xb68] sm:$0xff] }
 0x457   : > { %6862 = vmatpush3.bf16.msra.mxu0 %v6861_v42  ;;  %v6873_v42 = vpack.c.bf16 %v2845_v62, %v2838_v25  ;;  %v2992_v25 = vld [vmem:[#allocation6 + $0x1610] sm:$0xff]  ;;  %v2999_v62 = vld [vmem:[#allocation6 + $0x1648] sm:$0xff] }
 0x458   : > { %6990 = vmatpush1.bf16.msra.mxu1 %v6989_v47  ;;  %6864 = vmatprep.subr.bf16.mxu0 %v6863_v63  ;;  %v7001_v47 = vpack.c.bf16 %v2614_v35, %v2607_v52  ;;  %v6875_v63 = vpack.c.bf16 %v3083_v54, %v3076_v40  ;;  %v2649_v52 = vld [vmem:[#allocation6 + $0xb60] sm:$0xff]  ;;  %v2656_v35 = vld [vmem:[#allocation6 + $0xb98] sm:$0xff] }
 0x459   : > { %6992 = vmatprep.subr.bf16.mxu1 %v6991_v30  ;;  %v7003_v30 = vpack.c.bf16 %v2629_v26, %v2622_v41  ;;  %v3118_v40 = vld [vmem:[#allocation6 + $0x1a00] sm:$0xff]  ;;  %v3125_v54 = vld [vmem:[#allocation6 + $0x1a38] sm:$0xff]  ;;  %v2671_v41 = vld [vmem:[#allocation6 + $0xc10] sm:$0xff]  ;;  %v7013_v26 = vpack.c.bf16 %v2656_v35, %v2649_v52 }
 0x45a   : > { %v3167_v52 = vld [vmem:[#allocation6 + $0x1b88] sm:$0xff]  ;;  %v2713_v35 = vld [vmem:[#allocation6 + $0xd60] sm:$0xff] }
 0x45b   : > { %6866 = vmatpush3.bf16.msra.mxu0 %v6865_v37  ;;  %v6877_v37 = vpack.c.bf16 %v2971_v29, %v2964_v27  ;;  %v2663_v27 = vld [vmem:[#allocation6 + $0xbd0] sm:$0xff] }
 0x45c   : > { %6994 = vmatpush1.bf16.msra.mxu1 %v6993_v33  ;;  %6868 = vmatprep.subr.bf16.mxu0 %v6867_v10  ;;  %v7005_v33 = vpack.c.bf16 %v2628_v39, %v2621_v14  ;;  %v6879_v10 = vpack.c.bf16 %v3097_v61, %v3090_v11  ;;  %v2670_v14 = vld [vmem:[#allocation6 + $0xc08] sm:$0xff] }
 0x45d   : > { %6996 = vmatprep.subr.bf16.mxu1 %v6995_v48  ;;  %v7007_v48 = vpack.c.bf16 %v2643_v22, %v2636_v45  ;;  %v3139_v39 = vld [vmem:[#allocation6 + $0x1aa8] sm:$0xff]  ;;  %v3020_v22 = vld [vmem:[#allocation6 + $0x16f0] sm:$0xff] }
 0x45e   : > { %v2678_v11 = vld [vmem:[#allocation6 + $0xc48] sm:$0xff] }
 0x45f   : > { %6870 = vmatpush3.bf16.msra.mxu0 %v6869_v7  ;;  %v6881_v7 = vpack.c.bf16 %v2985_v3, %v2978_v20  ;;  %v2684_v20 = vld [vmem:[#allocation6 + $0xc78] sm:$0xff]  ;;  %v3146_v3 = vld [vmem:[#allocation6 + $0x1ae0] sm:$0xff] }
 0x460   : > { %6998 = vmatpush1.bf16.msra.mxu1 %v6997_v43  ;;  %6872 = vmatprep.subr.bf16.mxu0 %v6871_v5  ;;  %v7009_v43 = vpack.c.bf16 %v2642_v13, %v2635_v38  ;;  %v6883_v5 = vpack.c.bf16 %v3111_v24, %v3104_v50  ;;  %v3153_v38 = vld [vmem:[#allocation6 + $0x1b18] sm:$0xff]  ;;  %v2699_v13 = vld [vmem:[#allocation6 + $0xcf0] sm:$0xff] }
 0x461   : > { %7000 = vmatprep.subr.bf16.mxu1 %v6999_v8  ;;  %v7011_v8 = vpack.c.bf16 %v2657_v16, %v2650_v28  ;;  %v6895_v28 = vpack.c.bf16 %v3153_v38, %v3146_v3  ;;  %v3034_v16 = vld [vmem:[#allocation6 + $0x1760] sm:$0xff] }
 0x463   : > { %6874 = vmatpush3.bf16.msra.mxu0 %v6873_v42  ;;  %v6887_v42 = vpack.c.bf16 %v3125_v54, %v3118_v40 }
 0x464   : > { %7002 = vmatpush1.bf16.msra.mxu1 %v7001_v47  ;;  %6876 = vmatprep.subr.bf16.mxu0 %v6875_v63  ;;  %v3006_v47 = vld [vmem:[#allocation6 + $0x1680] sm:$0xff]  ;;  %v3013_v63 = vld [vmem:[#allocation6 + $0x16b8] sm:$0xff] }
 0x465   : > { %7004 = vmatprep.subr.bf16.mxu1 %v7003_v30  ;;  %v3132_v30 = vld [vmem:[#allocation6 + $0x1a70] sm:$0xff]  ;;  %v6889_v61 = vpack.c.bf16 %v3013_v63, %v3006_v47  ;;  %v2712_v47 = vld [vmem:[#allocation6 + $0xd58] sm:$0xff]  ;;  %v3174_v63 = vld [vmem:[#allocation6 + $0x1bc0] sm:$0xff] }
 0x466   : > { %3737 = vmatmul.mubr.f32.vlgmr.msra.gmra.mrb[36].mxu0 %v9169_v56  ;;  %v2664_v56 = vld [vmem:[#allocation6 + $0xbd8] sm:$0xff]  ;;  %v6891_v45 = vpack.c.bf16 %v3139_v39, %v3132_v30 }
 0x467   : > { %3741 = vmatprep.mubr.f32.mxu0 %v9159_v32  ;;  %6878 = vmatpush3.bf16.msra.mxu0 %v6877_v37  ;;  %v6885_v32 = vpack.c.bf16 %v2999_v62, %v2992_v25  ;;  %v7015_v29 = vpack.c.bf16 %v2671_v41, %v2664_v56  ;;  %v3027_v37 = vld [vmem:[#allocation6 + $0x1728] sm:$0xff]  ;;  %v3160_v62 = vld [vmem:[#allocation6 + $0x1b50] sm:$0xff] }
 0x468   : > { %7006 = vmatpush1.bf16.msra.mxu1 %v7005_v33  ;;  %6880 = vmatprep.subr.bf16.mxu0 %v6879_v10  ;;  %v2677_v33 = vld [vmem:[#allocation6 + $0xc40] sm:$0xff]  ;;  %v6893_v50 = vpack.c.bf16 %v3027_v37, %v3020_v22  ;;  %v2698_v25 = vld [vmem:[#allocation6 + $0xce8] sm:$0xff]  ;;  %v6899_v56 = vpack.c.bf16 %v3167_v52, %v3160_v62  ;;  %v3048_v41 = vld [vmem:[#allocation6 + $0x17d0] sm:$0xff] }
 0x469   : > { %7008 = vmatprep.subr.bf16.mxu1 %v7007_v48  ;;  %v2692_v48 = vld [vmem:[#allocation6 + $0xcb8] sm:$0xff]  ;;  %v7021_v24 = vpack.c.bf16 %v2684_v20, %v2677_v33  ;;  %v2726_v22 = vld [vmem:[#allocation6 + $0xdc8] sm:$0xff]  ;;  %v2295_v33 = vld [vmem:[#allocation6 + $0x50] sm:$0xff] }
 0x46a   : > { %3742 = vmatmul.mubr.f32.gmra.mrb[38].mxu0 %v9156_v49  ;;  %v2685_v49 = vld [vmem:[#allocation6 + $0xc80] sm:$0xff]  ;;  %v2288_v37 = vld [vmem:[#allocation6 + $0x18] sm:$0xff] }
 0x46b   : > { %6882 = vmatpush3.bf16.msra.mxu0 %v6881_v7  ;;  %3811 = vmatprep.mubr.f32.mxu0 %v9103_v46  ;;  %v7017_v46 = vpack.c.bf16 %v2670_v14, %v2663_v27  ;;  %v7019_v10 = vpack.c.bf16 %v2685_v49, %v2678_v11  ;;  %v3041_v7 = vld [vmem:[#allocation6 + $0x1798] sm:$0xff]  ;;  %v2727_v14 = vld [vmem:[#allocation6 + $0xdd0] sm:$0xff]  ;;  %v3062_v49 = vld [vmem:[#allocation6 + $0x1840] sm:$0xff] }
 0x46c   : > { %7010 = vmatpush1.bf16.msra.mxu1 %v7009_v43  ;;  %6884 = vmatprep.subr.bf16.mxu0 %v6883_v5  ;;  %v2691_v43 = vld [vmem:[#allocation6 + $0xcb0] sm:$0xff]  ;;  %v7023_v5 = vpack.c.bf16 %v2699_v13, %v2692_v48  ;;  %v6897_v40 = vpack.c.bf16 %v3041_v7, %v3034_v16  ;;  %v3181_v27 = vld [vmem:[#allocation6 + $0x1bf8] sm:$0xff]  ;;  %v2297_v20 = vld [vmem:[#allocation6 + $0x60] sm:$0xff]  ;;  %v7035_v48 = vpack.c.bf16 %v2295_v33, %v2288_v37 }
 0x46d   : > { %7012 = vmatprep.subr.bf16.mxu1 %v7011_v8  ;;  %v2706_v8 = vld [vmem:[#allocation6 + $0xd28] sm:$0xff]  ;;  %v7025_v54 = vpack.c.bf16 %v2698_v25, %v2691_v43  ;;  %v6903_v11 = vpack.c.bf16 %v3181_v27, %v3174_v63  ;;  %v2296_v16 = vld [vmem:[#allocation6 + $0x58] sm:$0xff]  ;;  %v2309_v43 = vld [vmem:[#allocation6 + $0xc0] sm:$0xff] }
 0x46e   : > { %v2302_v7 = vld [vmem:[#allocation6 + $0x88] sm:$0xff]  ;;  %v2311_v25 = vld [vmem:[#allocation6 + $0xd0] sm:$0xff]  ;;  %v2329_v37 = vld [vmem:[#allocation6 + $0x160] sm:$0xff] }
 0x46f   : > { %6886 = vmatpush3.bf16.msra.mxu0 %v6885_v32  ;;  %v3055_v32 = vld [vmem:[#allocation6 + $0x1808] sm:$0xff]  ;;  %v2336_v33 = vld [vmem:[#allocation6 + $0x198] sm:$0xff] }
 0x470   : > { %7014 = vmatpush1.bf16.msra.mxu1 %v7013_v26  ;;  %6888 = vmatprep.subr.bf16.mxu0 %v6887_v42  ;;  %v2705_v26 = vld [vmem:[#allocation6 + $0xd20] sm:$0xff]  ;;  %v7027_v42 = vpack.c.bf16 %v2713_v35, %v2706_v8  ;;  %v6901_v30 = vpack.c.bf16 %v3055_v32, %v3048_v41  ;;  %v7039_v8 = vpack.c.bf16 %v2309_v43, %v2302_v7  ;;  %v2310_v41 = vld [vmem:[#allocation6 + $0xc8] sm:$0xff]  ;;  %v2316_v32 = vld [vmem:[#allocation6 + $0xf8] sm:$0xff] }
 0x471   : > { %7016 = vmatprep.subr.bf16.mxu1 %v7015_v29  ;;  %v2720_v29 = vld [vmem:[#allocation6 + $0xd98] sm:$0xff]  ;;  %v7029_v39 = vpack.c.bf16 %v2712_v47, %v2705_v26  ;;  %v2301_v35 = vld [vmem:[#allocation6 + $0x80] sm:$0xff]  ;;  %v2323_v26 = vld [vmem:[#allocation6 + $0x130] sm:$0xff] }
 0x472   : > { %v2325_v47 = vld [vmem:[#allocation6 + $0x140] sm:$0xff]  ;;  %v7043_v27 = vpack.c.bf16 %v2323_v26, %v2316_v32  ;;  %v2343_v7 = vld [vmem:[#allocation6 + $0x1d0] sm:$0xff]  ;;  %v2350_v43 = vld [vmem:[#allocation6 + $0x208] sm:$0xff] }
 0x473   : > { %6890 = vmatpush3.bf16.msra.mxu0 %v6889_v61  ;;  %v3069_v61 = vld [vmem:[#allocation6 + $0x1878] sm:$0xff]  ;;  %v2357_v32 = vld [vmem:[#allocation6 + $0x240] sm:$0xff] }
 0x474   : > { %7018 = vmatpush1.bf16.msra.mxu1 %v7017_v46  ;;  %6892 = vmatprep.subr.bf16.mxu0 %v6891_v45  ;;  %v2719_v46 = vld [vmem:[#allocation6 + $0xd90] sm:$0xff]  ;;  %v7031_v45 = vpack.c.bf16 %v2727_v14, %v2720_v29  ;;  %v6905_v3 = vpack.c.bf16 %v3069_v61, %v3062_v49  ;;  %v2322_v14 = vld [vmem:[#allocation6 + $0x128] sm:$0xff]  ;;  %v2337_v49 = vld [vmem:[#allocation6 + $0x1a0] sm:$0xff] }
 0x475   : > { %7020 = vmatprep.subr.bf16.mxu1 %v7019_v10  ;;  %v2290_v10 = vld [vmem:[#allocation6 + $0x28] sm:$0xff]  ;;  %v7033_v38 = vpack.c.bf16 %v2726_v22, %v2719_v46  ;;  %v2315_v29 = vld [vmem:[#allocation6 + $0xf0] sm:$0xff]  ;;  %v2332_v61 = vld [vmem:[#allocation6 + $0x178] sm:$0xff] }
 0x476   : > { %v7163_v13 = vpack.c.bf16 %v2297_v20, %v2290_v10  ;;  %v2339_v46 = vld [vmem:[#allocation6 + $0x1b0] sm:$0xff]  ;;  %v2364_v26 = vld [vmem:[#allocation6 + $0x278] sm:$0xff] }
 0x477   : > { %6894 = vmatpush3.bf16.msra.mxu0 %v6893_v50  ;;  %v2287_v50 = vld [vmem:[#allocation6 + $0x10] sm:$0xff]  ;;  %v7175_v20 = vpack.c.bf16 %v2339_v46, %v2332_v61  ;;  %v2378_v46 = vld [vmem:[#allocation6 + $0x2e8] sm:$0xff] }
 0x478   : > { %7022 = vmatpush1.bf16.msra.mxu1 %v7021_v24  ;;  %6896 = vmatprep.subr.bf16.mxu0 %v6895_v28  ;;  %v2294_v24 = vld [vmem:[#allocation6 + $0x48] sm:$0xff]  ;;  %v2289_v28 = vld [vmem:[#allocation6 + $0x20] sm:$0xff]  ;;  %v2331_v10 = vld [vmem:[#allocation6 + $0x170] sm:$0xff] }
 0x479   : > { %7024 = vmatprep.subr.bf16.mxu1 %v7023_v5  ;;  %v2304_v5 = vld [vmem:[#allocation6 + $0x98] sm:$0xff]  ;;  %v7037_v62 = vpack.c.bf16 %v2294_v24, %v2287_v50  ;;  %v7165_v52 = vpack.c.bf16 %v2296_v16, %v2289_v28  ;;  %v2353_v50 = vld [vmem:[#allocation6 + $0x220] sm:$0xff]  ;;  %v7049_v24 = vpack.c.bf16 %v2336_v33, %v2329_v37  ;;  %v2371_v61 = vld [vmem:[#allocation6 + $0x2b0] sm:$0xff] }
 0x47a   : > { %v2386_v37 = vld [vmem:[#allocation6 + $0x328] sm:$0xff]  ;;  %v2393_v33 = vld [vmem:[#allocation6 + $0x360] sm:$0xff] }
 0x47b   : > { %6898 = vmatpush3.bf16.msra.mxu0 %v6897_v40  ;;  %v2308_v40 = vld [vmem:[#allocation6 + $0xb8] sm:$0xff] }
 0x47c   : > { %7026 = vmatpush1.bf16.msra.mxu1 %v7025_v54  ;;  %6900 = vmatprep.subr.bf16.mxu0 %v6899_v56  ;;  %v2303_v54 = vld [vmem:[#allocation6 + $0x90] sm:$0xff]  ;;  %v7167_v56 = vpack.c.bf16 %v2311_v25, %v2304_v5  ;;  %v7041_v63 = vpack.c.bf16 %v2308_v40, %v2301_v35  ;;  %v2345_v5 = vld [vmem:[#allocation6 + $0x1e0] sm:$0xff]  ;;  %v2360_v35 = vld [vmem:[#allocation6 + $0x258] sm:$0xff] }
 0x47d   : > { %7028 = vmatprep.subr.bf16.mxu1 %v7027_v42  ;;  %v2318_v42 = vld [vmem:[#allocation6 + $0x108] sm:$0xff]  ;;  %v2367_v40 = vld [vmem:[#allocation6 + $0x290] sm:$0xff] }
 0x47f   : > { %6902 = vmatpush3.bf16.msra.mxu0 %v6901_v30  ;;  %v2317_v30 = vld [vmem:[#allocation6 + $0x100] sm:$0xff] }
 0x480   : > { %7030 = vmatpush1.bf16.msra.mxu1 %v7029_v39  ;;  %6904 = vmatprep.subr.bf16.mxu0 %v6903_v11  ;;  %v7171_v39 = vpack.c.bf16 %v2325_v47, %v2318_v42  ;;  %v2324_v11 = vld [vmem:[#allocation6 + $0x138] sm:$0xff]  ;;  %v2359_v42 = vld [vmem:[#allocation6 + $0x250] sm:$0xff]  ;;  %v7183_v47 = vpack.c.bf16 %v2367_v40, %v2360_v35 }
 0x481   : > { %7032 = vmatprep.subr.bf16.mxu1 %v7031_v45  ;;  %v7173_v45 = vpack.c.bf16 %v2324_v11, %v2317_v30 }
 0x483   : > { %6906 = vmatpush3.bf16.msra.mxu0 %v6905_v3  ;;  %v2338_v3 = vld [vmem:[#allocation6 + $0x1a8] sm:$0xff] }
 0x484   : > { %7034 = vmatpush1.bf16.msra.mxu1 %v7033_v38  ;;  %7036 = vmatprep.subr.bf16.mxu0 %v7035_v48  ;;  %v2344_v38 = vld [vmem:[#allocation6 + $0x1d8] sm:$0xff]  ;;  %v2351_v48 = vld [vmem:[#allocation6 + $0x210] sm:$0xff]  ;;  %v7177_v28 = vpack.c.bf16 %v2338_v3, %v2331_v10 }
 0x485   : > { %7164 = vmatprep.subr.bf16.mxu1 %v7163_v13  ;;  %v2346_v13 = vld [vmem:[#allocation6 + $0x1e8] sm:$0xff]  ;;  %v7051_v16 = vpack.c.bf16 %v2351_v48, %v2344_v38  ;;  %v2388_v10 = vld [vmem:[#allocation6 + $0x338] sm:$0xff]  ;;  %v7061_v38 = vpack.c.bf16 %v2378_v46, %v2371_v61 }
 0x486   : > { %3812 = vmatmul.mubr.f32.vlgmr.msra.gmra.mrb[40].mxu0 %v9116_v57  ;;  %v7169_v57 = vpack.c.bf16 %v2310_v41, %v2303_v54  ;;  %v7179_v25 = vpack.c.bf16 %v2353_v50, %v2346_v13  ;;  %v7053_v54 = vpack.c.bf16 %v2350_v43, %v2343_v7  ;;  %v7063_v50 = vpack.c.bf16 %v2393_v33, %v2386_v37  ;;  %v2394_v43 = vld [vmem:[#allocation6 + $0x368] sm:$0xff]  ;;  %v2437_v37 = vld [vmem:[#allocation6 + $0x4c0] sm:$0xff] }
 0x487   : > { %6002 = vmatmul.mubr.msk.f32.vlgmr.msra.gmra.mrb[12].mxu1 %vm9185_vm13, %v9087_v19  ;;  %3816 = vmatprep.mubr.f32.mxu0 %v9090_v59  ;;  %v2330_v59 = vld [vmem:[#allocation6 + $0x168] sm:$0xff] }
 0x488   : > { %6003 = vmatprep.mubr.msk.f32.mxu1 %vm345_vm3, %v9077_v21  ;;  %7038 = vmatpush1.bf16.msra.mxu0 %v7037_v62  ;;  %v7047_v22 = vpack.c.bf16 %v2337_v49, %v2330_v59  ;;  %v2352_v62 = vld [vmem:[#allocation6 + $0x218] sm:$0xff]  ;;  %v2422_v46 = vld [vmem:[#allocation6 + $0x448] sm:$0xff] }
 0x489   : > { %7166 = vmatpush1.bf16.msra.mxu1 %v7165_v52  ;;  %7040 = vmatprep.subr.bf16.mxu0 %v7039_v8  ;;  %v2358_v52 = vld [vmem:[#allocation6 + $0x248] sm:$0xff]  ;;  %v2365_v8 = vld [vmem:[#allocation6 + $0x280] sm:$0xff] }
 0x48a   : > { %3817 = vmatmul.mubr.f32.gmra.mrb[42].mxu0 %v9112_v12  ;;  %7168 = vmatprep.subr.bf16.mxu1 %v7167_v56  ;;  %v7045_v12 = vpack.c.bf16 %v2322_v14, %v2315_v29  ;;  %v7181_v56 = vpack.c.bf16 %v2352_v62, %v2345_v5  ;;  %v7055_v41 = vpack.c.bf16 %v2365_v8, %v2358_v52  ;;  %v2374_v29 = vld [vmem:[#allocation6 + $0x2c8] sm:$0xff]  ;;  %v2381_v14 = vld [vmem:[#allocation6 + $0x300] sm:$0xff]  ;;  %v2400_v5 = vld [vmem:[#allocation6 + $0x398] sm:$0xff] }
 0x48b   : > { %6004 = vmatmul.mubr.msk.f32.gmra.mrb[14].mxu1 %vm345_vm3, %v9095_v2  ;;  %6006 = vmatprep.mubr.msk.f32.mxu0 %vm9185_vm13, %v9126_v34  ;;  %v2402_v62 = vld [vmem:[#allocation6 + $0x3a8] sm:$0xff]  ;;  %v2409_v52 = vld [vmem:[#allocation6 + $0x3e0] sm:$0xff] }
 0x48c   : > { %7042 = vmatpush1.bf16.msra.mxu0 %v7041_v63  ;;  %6018 = vmatprep.mubr.msk.f32.mxu1 %vm9185_vm13, %v9126_v34  ;;  %v2366_v63 = vld [vmem:[#allocation6 + $0x288] sm:$0xff] }
 0x48d   : > { %7170 = vmatpush1.bf16.msra.mxu1 %v7169_v57  ;;  %7044 = vmatprep.subr.bf16.mxu0 %v7043_v27  ;;  %v2372_v57 = vld [vmem:[#allocation6 + $0x2b8] sm:$0xff]  ;;  %v2379_v27 = vld [vmem:[#allocation6 + $0x2f0] sm:$0xff]  ;;  %v7185_v59 = vpack.c.bf16 %v2366_v63, %v2359_v42  ;;  %v2414_v42 = vld [vmem:[#allocation6 + $0x408] sm:$0xff] }
 0x48e   : > { %7172 = vmatprep.subr.bf16.mxu1 %v7171_v39  ;;  %v7057_v39 = vpack.c.bf16 %v2364_v26, %v2357_v32  ;;  %v7059_v49 = vpack.c.bf16 %v2379_v27, %v2372_v57  ;;  %v7195_v32 = vpack.c.bf16 %v2409_v52, %v2402_v62  ;;  %v2408_v26 = vld [vmem:[#allocation6 + $0x3d8] sm:$0xff]  ;;  %v2423_v57 = vld [vmem:[#allocation6 + $0x450] sm:$0xff] }
 0x48f   : > { %v2416_v63 = vld [vmem:[#allocation6 + $0x418] sm:$0xff] }
 0x490   : > { %7046 = vmatpush1.bf16.msra.mxu0 %v7045_v12  ;;  %v2373_v12 = vld [vmem:[#allocation6 + $0x2c0] sm:$0xff]  ;;  %v7199_v61 = vpack.c.bf16 %v2423_v57, %v2416_v63 }
 0x491   : > { %7174 = vmatpush1.bf16.msra.mxu1 %v7173_v45  ;;  %7048 = vmatprep.subr.bf16.mxu0 %v7047_v22  ;;  %v7187_v45 = vpack.c.bf16 %v2381_v14, %v2374_v29  ;;  %v2380_v22 = vld [vmem:[#allocation6 + $0x2f8] sm:$0xff] }
 0x492   : > { %7176 = vmatprep.subr.bf16.mxu1 %v7175_v20  ;;  %v2395_v20 = vld [vmem:[#allocation6 + $0x370] sm:$0xff]  ;;  %v7189_v13 = vpack.c.bf16 %v2380_v22, %v2373_v12  ;;  %v2428_v12 = vld [vmem:[#allocation6 + $0x478] sm:$0xff]  ;;  %v2430_v22 = vld [vmem:[#allocation6 + $0x488] sm:$0xff] }
 0x493   : > { %v7191_v7 = vpack.c.bf16 %v2395_v20, %v2388_v10 }
 0x494   : > { %7050 = vmatpush1.bf16.msra.mxu0 %v7049_v24  ;;  %v2385_v24 = vld [vmem:[#allocation6 + $0x320] sm:$0xff] }
 0x495   : > { %7178 = vmatpush1.bf16.msra.mxu1 %v7177_v28  ;;  %7052 = vmatprep.subr.bf16.mxu0 %v7051_v16  ;;  %v2392_v28 = vld [vmem:[#allocation6 + $0x358] sm:$0xff]  ;;  %v2387_v16 = vld [vmem:[#allocation6 + $0x330] sm:$0xff] }
 0x496   : > { %7180 = vmatprep.subr.bf16.mxu1 %v7179_v25  ;;  %v2407_v25 = vld [vmem:[#allocation6 + $0x3d0] sm:$0xff]  ;;  %v7065_v8 = vpack.c.bf16 %v2392_v28, %v2385_v24  ;;  %v7193_v35 = vpack.c.bf16 %v2394_v43, %v2387_v16  ;;  %v7203_v24 = vpack.c.bf16 %v2437_v37, %v2430_v22  ;;  %v2436_v28 = vld [vmem:[#allocation6 + $0x4b8] sm:$0xff]  ;;  %v2442_v16 = vld [vmem:[#allocation6 + $0x4e8] sm:$0xff] }
 0x497   : > { %v7067_v40 = vpack.c.bf16 %v2407_v25, %v2400_v5  ;;  %v2444_v43 = vld [vmem:[#allocation6 + $0x4f8] sm:$0xff]  ;;  %v2451_v5 = vld [vmem:[#allocation6 + $0x530] sm:$0xff] }
 0x498   : > { %7054 = vmatpush1.bf16.msra.mxu0 %v7053_v54  ;;  %v9230_v30 = vpop.f32.mrb[28].mxu0  ;;  %v2399_v54 = vld [vmem:[#allocation6 + $0x390] sm:$0xff] }
 0x499   : > { %7182 = vmatpush1.bf16.msra.mxu1 %v7181_v56  ;;  %7056 = vmatprep.subr.bf16.mxu0 %v7055_v41  ;;  %v9232_v11 = vpop.f32.mrb[29].mxu0  ;;  %v2406_v56 = vld [vmem:[#allocation6 + $0x3c8] sm:$0xff]  ;;  %v2401_v41 = vld [vmem:[#allocation6 + $0x3a0] sm:$0xff] }
 0x49a   : > { %7184 = vmatprep.subr.bf16.mxu1 %v7183_v47  ;;  %v2421_v47 = vld [vmem:[#allocation6 + $0x440] sm:$0xff]  ;;  %v7069_v27 = vpack.c.bf16 %v2406_v56, %v2399_v54  ;;  %v7197_v29 = vpack.c.bf16 %v2408_v26, %v2401_v41  ;;  %v7207_v54 = vpack.c.bf16 %v2451_v5, %v2444_v43  ;;  %v2450_v56 = vld [vmem:[#allocation6 + $0x528] sm:$0xff]  ;;  %v2456_v41 = vld [vmem:[#allocation6 + $0x558] sm:$0xff] }
 0x49b   : > { %v7071_v14 = vpack.c.bf16 %v2421_v47, %v2414_v42  ;;  %v2458_v26 = vld [vmem:[#allocation6 + $0x568] sm:$0xff]  ;;  %v2465_v42 = vld [vmem:[#allocation6 + $0x5a0] sm:$0xff] }
 0x49c   : > { %7058 = vmatpush1.bf16.msra.mxu0 %v7057_v39  ;;  %v9234_v3 = vpop.f32.mrb[30].mxu0  ;;  %v2413_v39 = vld [vmem:[#allocation6 + $0x400] sm:$0xff] }
 0x49d   : > { %7186 = vmatpush1.bf16.msra.mxu1 %v7185_v59  ;;  %7060 = vmatprep.subr.bf16.mxu0 %v7059_v49  ;;  %v9236_v48 = vpop.f32.mrb[31].mxu0  ;;  %v2420_v59 = vld [vmem:[#allocation6 + $0x438] sm:$0xff]  ;;  %v2415_v49 = vld [vmem:[#allocation6 + $0x410] sm:$0xff] }
 0x49e   : > { %7188 = vmatprep.subr.bf16.mxu1 %v7187_v45  ;;  %v2435_v45 = vld [vmem:[#allocation6 + $0x4b0] sm:$0xff]  ;;  %v7073_v33 = vpack.c.bf16 %v2420_v59, %v2413_v39  ;;  %v7201_v10 = vpack.c.bf16 %v2422_v46, %v2415_v49  ;;  %v7211_v39 = vpack.c.bf16 %v2465_v42, %v2458_v26  ;;  %v2464_v59 = vld [vmem:[#allocation6 + $0x598] sm:$0xff]  ;;  %v2470_v49 = vld [vmem:[#allocation6 + $0x5c8] sm:$0xff] }
 0x49f   : > { %v7075_v20 = vpack.c.bf16 %v2435_v45, %v2428_v12  ;;  %v2472_v46 = vld [vmem:[#allocation6 + $0x5d8] sm:$0xff]  ;;  %v2479_v12 = vld [vmem:[#allocation6 + $0x610] sm:$0xff] }
 0x4a0   : > { %7062 = vmatpush1.bf16.msra.mxu0 %v7061_v38  ;;  %v2427_v38 = vld [vmem:[#allocation6 + $0x470] sm:$0xff] }
 0x4a1   : > { %7190 = vmatpush1.bf16.msra.mxu1 %v7189_v13  ;;  %7064 = vmatprep.subr.bf16.mxu0 %v7063_v50  ;;  %v2434_v13 = vld [vmem:[#allocation6 + $0x4a8] sm:$0xff]  ;;  %v2429_v50 = vld [vmem:[#allocation6 + $0x480] sm:$0xff] }
 0x4a2   : > { %7192 = vmatprep.subr.bf16.mxu1 %v7191_v7  ;;  %v2449_v7 = vld [vmem:[#allocation6 + $0x520] sm:$0xff]  ;;  %v7077_v25 = vpack.c.bf16 %v2434_v13, %v2427_v38  ;;  %v7205_v62 = vpack.c.bf16 %v2436_v28, %v2429_v50  ;;  %v7215_v38 = vpack.c.bf16 %v2479_v12, %v2472_v46  ;;  %v2478_v13 = vld [vmem:[#allocation6 + $0x608] sm:$0xff]  ;;  %v2484_v50 = vld [vmem:[#allocation6 + $0x638] sm:$0xff] }
 0x4a3   : > { %v7079_v52 = vpack.c.bf16 %v2449_v7, %v2442_v16  ;;  %v2486_v28 = vld [vmem:[#allocation6 + $0x648] sm:$0xff]  ;;  %v2493_v16 = vld [vmem:[#allocation6 + $0x680] sm:$0xff] }
 0x4a4   : > { %7066 = vmatpush1.bf16.msra.mxu0 %v7065_v8  ;;  %v2441_v8 = vld [vmem:[#allocation6 + $0x4e0] sm:$0xff] }
 0x4a5   : > { %7194 = vmatpush1.bf16.msra.mxu1 %v7193_v35  ;;  %7068 = vmatprep.subr.bf16.mxu0 %v7067_v40  ;;  %v2448_v35 = vld [vmem:[#allocation6 + $0x518] sm:$0xff]  ;;  %v2443_v40 = vld [vmem:[#allocation6 + $0x4f0] sm:$0xff] }
 0x4a6   : > { %7196 = vmatprep.subr.bf16.mxu1 %v7195_v32  ;;  %v2463_v32 = vld [vmem:[#allocation6 + $0x590] sm:$0xff]  ;;  %v7081_v47 = vpack.c.bf16 %v2448_v35, %v2441_v8  ;;  %v7209_v63 = vpack.c.bf16 %v2450_v56, %v2443_v40  ;;  %v7219_v8 = vpack.c.bf16 %v2493_v16, %v2486_v28  ;;  %v2492_v35 = vld [vmem:[#allocation6 + $0x678] sm:$0xff]  ;;  %v2498_v40 = vld [vmem:[#allocation6 + $0x6a8] sm:$0xff] }
 0x4a7   : > { %v7083_v57 = vpack.c.bf16 %v2463_v32, %v2456_v41  ;;  %v2500_v56 = vld [vmem:[#allocation6 + $0x6b8] sm:$0xff]  ;;  %v2507_v41 = vld [vmem:[#allocation6 + $0x6f0] sm:$0xff] }
 0x4a8   : > { %7070 = vmatpush1.bf16.msra.mxu0 %v7069_v27  ;;  %v2455_v27 = vld [vmem:[#allocation6 + $0x550] sm:$0xff] }
 0x4a9   : > { %7198 = vmatpush1.bf16.msra.mxu1 %v7197_v29  ;;  %7072 = vmatprep.subr.bf16.mxu0 %v7071_v14  ;;  %v2462_v29 = vld [vmem:[#allocation6 + $0x588] sm:$0xff]  ;;  %v2457_v14 = vld [vmem:[#allocation6 + $0x560] sm:$0xff] }
 0x4aa   : > { %7200 = vmatprep.subr.bf16.mxu1 %v7199_v61  ;;  %v2477_v61 = vld [vmem:[#allocation6 + $0x600] sm:$0xff]  ;;  %v7085_v45 = vpack.c.bf16 %v2462_v29, %v2455_v27  ;;  %v7213_v22 = vpack.c.bf16 %v2464_v59, %v2457_v14  ;;  %v7223_v27 = vpack.c.bf16 %v2507_v41, %v2500_v56  ;;  %v2506_v29 = vld [vmem:[#allocation6 + $0x6e8] sm:$0xff]  ;;  %v2512_v14 = vld [vmem:[#allocation6 + $0x718] sm:$0xff] }
 0x4ab   : > { %v7087_v37 = vpack.c.bf16 %v2477_v61, %v2470_v49  ;;  %v2514_v59 = vld [vmem:[#allocation6 + $0x728] sm:$0xff]  ;;  %v2521_v49 = vld [vmem:[#allocation6 + $0x760] sm:$0xff] }
 0x4ac   : > { %7074 = vmatpush1.bf16.msra.mxu0 %v7073_v33  ;;  %v2469_v33 = vld [vmem:[#allocation6 + $0x5c0] sm:$0xff] }
 0x4ad   : > { %7202 = vmatpush1.bf16.msra.mxu1 %v7201_v10  ;;  %7076 = vmatprep.subr.bf16.mxu0 %v7075_v20  ;;  %v2476_v10 = vld [vmem:[#allocation6 + $0x5f8] sm:$0xff]  ;;  %v2471_v20 = vld [vmem:[#allocation6 + $0x5d0] sm:$0xff] }
 0x4ae   : > { %7204 = vmatprep.subr.bf16.mxu1 %v7203_v24  ;;  %v2491_v24 = vld [vmem:[#allocation6 + $0x670] sm:$0xff]  ;;  %v7089_v7 = vpack.c.bf16 %v2476_v10, %v2469_v33  ;;  %v7217_v43 = vpack.c.bf16 %v2478_v13, %v2471_v20  ;;  %v2513_v33 = vld [vmem:[#allocation6 + $0x720] sm:$0xff]  ;;  %v2520_v10 = vld [vmem:[#allocation6 + $0x758] sm:$0xff] }
 0x4af   : > { %v7091_v5 = vpack.c.bf16 %v2491_v24, %v2484_v50  ;;  %v2526_v20 = vld [vmem:[#allocation6 + $0x788] sm:$0xff]  ;;  %v2528_v13 = vld [vmem:[#allocation6 + $0x798] sm:$0xff]  ;;  %v2535_v50 = vld [vmem:[#allocation6 + $0x7d0] sm:$0xff]  ;;  %v7229_v28 = vpack.c.bf16 %v2520_v10, %v2513_v33 }
 0x4b0   : > { %7078 = vmatpush1.bf16.msra.mxu0 %v7077_v25  ;;  %v2483_v25 = vld [vmem:[#allocation6 + $0x630] sm:$0xff]  ;;  %v2570_v10 = vld [vmem:[#allocation6 + $0x8e8] sm:$0xff] }
 0x4b1   : > { %7206 = vmatpush1.bf16.msra.mxu1 %v7205_v62  ;;  %7080 = vmatprep.subr.bf16.mxu0 %v7079_v52  ;;  %v2490_v62 = vld [vmem:[#allocation6 + $0x668] sm:$0xff]  ;;  %v2485_v52 = vld [vmem:[#allocation6 + $0x640] sm:$0xff]  ;;  %v2575_v33 = vld [vmem:[#allocation6 + $0x910] sm:$0xff] }
 0x4b2   : > { %7208 = vmatprep.subr.bf16.mxu1 %v7207_v54  ;;  %v2505_v54 = vld [vmem:[#allocation6 + $0x6e0] sm:$0xff]  ;;  %v7093_v32 = vpack.c.bf16 %v2490_v62, %v2483_v25  ;;  %v7221_v26 = vpack.c.bf16 %v2492_v35, %v2485_v52  ;;  %v7231_v25 = vpack.c.bf16 %v2535_v50, %v2528_v13  ;;  %v2534_v62 = vld [vmem:[#allocation6 + $0x7c8] sm:$0xff]  ;;  %v2540_v52 = vld [vmem:[#allocation6 + $0x7f8] sm:$0xff] }
 0x4b3   : > { %v7095_v42 = vpack.c.bf16 %v2505_v54, %v2498_v40  ;;  %v2542_v35 = vld [vmem:[#allocation6 + $0x808] sm:$0xff]  ;;  %v2549_v40 = vld [vmem:[#allocation6 + $0x840] sm:$0xff] }
 0x4b4   : > { %7082 = vmatpush1.bf16.msra.mxu0 %v7081_v47  ;;  %v2497_v47 = vld [vmem:[#allocation6 + $0x6a0] sm:$0xff] }
 0x4b5   : > { %7210 = vmatpush1.bf16.msra.mxu1 %v7209_v63  ;;  %7084 = vmatprep.subr.bf16.mxu0 %v7083_v57  ;;  %v2504_v63 = vld [vmem:[#allocation6 + $0x6d8] sm:$0xff]  ;;  %v2499_v57 = vld [vmem:[#allocation6 + $0x6b0] sm:$0xff] }
 0x4b6   : > { %7212 = vmatprep.subr.bf16.mxu1 %v7211_v39  ;;  %v2519_v39 = vld [vmem:[#allocation6 + $0x750] sm:$0xff]  ;;  %v7097_v61 = vpack.c.bf16 %v2504_v63, %v2497_v47  ;;  %v7225_v46 = vpack.c.bf16 %v2506_v29, %v2499_v57  ;;  %v7235_v47 = vpack.c.bf16 %v2549_v40, %v2542_v35  ;;  %v2548_v63 = vld [vmem:[#allocation6 + $0x838] sm:$0xff]  ;;  %v2554_v57 = vld [vmem:[#allocation6 + $0x868] sm:$0xff] }
 0x4b7   : > { %v7099_v12 = vpack.c.bf16 %v2519_v39, %v2512_v14  ;;  %v2556_v29 = vld [vmem:[#allocation6 + $0x878] sm:$0xff]  ;;  %v2563_v14 = vld [vmem:[#allocation6 + $0x8b0] sm:$0xff] }
 0x4b8   : > { %7086 = vmatpush1.bf16.msra.mxu0 %v7085_v45  ;;  %v7227_v45 = vpack.c.bf16 %v2521_v49, %v2514_v59 }
 0x4b9   : > { %7214 = vmatpush1.bf16.msra.mxu1 %v7213_v22  ;;  %7088 = vmatprep.subr.bf16.mxu0 %v7087_v37  ;;  %v2511_v22 = vld [vmem:[#allocation6 + $0x710] sm:$0xff]  ;;  %v2518_v37 = vld [vmem:[#allocation6 + $0x748] sm:$0xff] }
 0x4ba   : > { %7216 = vmatprep.subr.bf16.mxu1 %v7215_v38  ;;  %v2533_v38 = vld [vmem:[#allocation6 + $0x7c0] sm:$0xff]  ;;  %v7101_v24 = vpack.c.bf16 %v2518_v37, %v2511_v22  ;;  %v2562_v22 = vld [vmem:[#allocation6 + $0x8a8] sm:$0xff]  ;;  %v2568_v37 = vld [vmem:[#allocation6 + $0x8d8] sm:$0xff] }
 0x4bb   : > { %v7103_v16 = vpack.c.bf16 %v2533_v38, %v2526_v20  ;;  %v2577_v20 = vld [vmem:[#allocation6 + $0x920] sm:$0xff]  ;;  %v7115_v50 = vpack.c.bf16 %v2575_v33, %v2568_v37  ;;  %v2619_v37 = vld [vmem:[#allocation6 + $0xa70] sm:$0xff] }
 0x4bc   : > { %7090 = vmatpush1.bf16.msra.mxu0 %v7089_v7  ;;  %v2525_v7 = vld [vmem:[#allocation6 + $0x780] sm:$0xff] }
 0x4bd   : > { %7218 = vmatpush1.bf16.msra.mxu1 %v7217_v43  ;;  %7092 = vmatprep.subr.bf16.mxu0 %v7091_v5  ;;  %v2532_v43 = vld [vmem:[#allocation6 + $0x7b8] sm:$0xff]  ;;  %v2527_v5 = vld [vmem:[#allocation6 + $0x790] sm:$0xff] }
 0x4be   : > { %7220 = vmatprep.subr.bf16.mxu1 %v7219_v8  ;;  %v2547_v8 = vld [vmem:[#allocation6 + $0x830] sm:$0xff]  ;;  %v7105_v54 = vpack.c.bf16 %v2532_v43, %v2525_v7  ;;  %v7233_v56 = vpack.c.bf16 %v2534_v62, %v2527_v5  ;;  %v7243_v7 = vpack.c.bf16 %v2577_v20, %v2570_v10  ;;  %v2576_v43 = vld [vmem:[#allocation6 + $0x918] sm:$0xff]  ;;  %v2582_v5 = vld [vmem:[#allocation6 + $0x948] sm:$0xff] }
 0x4bf   : > { %v7107_v41 = vpack.c.bf16 %v2547_v8, %v2540_v52  ;;  %v2584_v62 = vld [vmem:[#allocation6 + $0x958] sm:$0xff]  ;;  %v2591_v52 = vld [vmem:[#allocation6 + $0x990] sm:$0xff] }
 0x4c0   : > { %7094 = vmatpush1.bf16.msra.mxu0 %v7093_v32  ;;  %v2539_v32 = vld [vmem:[#allocation6 + $0x7f0] sm:$0xff] }
 0x4c1   : > { %7222 = vmatpush1.bf16.msra.mxu1 %v7221_v26  ;;  %7096 = vmatprep.subr.bf16.mxu0 %v7095_v42  ;;  %v2546_v26 = vld [vmem:[#allocation6 + $0x828] sm:$0xff]  ;;  %v2541_v42 = vld [vmem:[#allocation6 + $0x800] sm:$0xff] }
 0x4c2   : > { %7224 = vmatprep.subr.bf16.mxu1 %v7223_v27  ;;  %v2561_v27 = vld [vmem:[#allocation6 + $0x8a0] sm:$0xff]  ;;  %v7109_v39 = vpack.c.bf16 %v2546_v26, %v2539_v32  ;;  %v7237_v59 = vpack.c.bf16 %v2548_v63, %v2541_v42  ;;  %v7247_v32 = vpack.c.bf16 %v2591_v52, %v2584_v62  ;;  %v2590_v26 = vld [vmem:[#allocation6 + $0x988] sm:$0xff]  ;;  %v2596_v42 = vld [vmem:[#allocation6 + $0x9b8] sm:$0xff] }
 0x4c3   : > { %v7111_v49 = vpack.c.bf16 %v2561_v27, %v2554_v57  ;;  %v2598_v63 = vld [vmem:[#allocation6 + $0x9c8] sm:$0xff]  ;;  %v2605_v57 = vld [vmem:[#allocation6 + $0xa00] sm:$0xff] }
 0x4c4   : > { %7098 = vmatpush1.bf16.msra.mxu0 %v7097_v61  ;;  %v2553_v61 = vld [vmem:[#allocation6 + $0x860] sm:$0xff] }
 0x4c5   : > { %7226 = vmatpush1.bf16.msra.mxu1 %v7225_v46  ;;  %7100 = vmatprep.subr.bf16.mxu0 %v7099_v12  ;;  %v2560_v46 = vld [vmem:[#allocation6 + $0x898] sm:$0xff]  ;;  %v2555_v12 = vld [vmem:[#allocation6 + $0x870] sm:$0xff] }
 0x4c6   : > { %7228 = vmatprep.subr.bf16.mxu1 %v7227_v45  ;;  %v7239_v45 = vpack.c.bf16 %v2563_v14, %v2556_v29  ;;  %v7113_v38 = vpack.c.bf16 %v2560_v46, %v2553_v61  ;;  %v7241_v13 = vpack.c.bf16 %v2562_v22, %v2555_v12  ;;  %v7251_v61 = vpack.c.bf16 %v2605_v57, %v2598_v63  ;;  %v2604_v46 = vld [vmem:[#allocation6 + $0x9f8] sm:$0xff]  ;;  %v2610_v12 = vld [vmem:[#allocation6 + $0xa28] sm:$0xff] }
 0x4c7   : > { %6008 = vmatmul.mubr.msk.f32.vlgmr.msra.gmra.mrb[32].mxu0 %vm9185_vm13, %v9124_v17  ;;  %v2612_v22 = vld [vmem:[#allocation6 + $0xa38] sm:$0xff] }
 0x4c8   : > { %6020 = vmatmul.mubr.msk.f32.vlgmr.msra.gmra.mrb[16].mxu1 %vm9185_vm13, %v9124_v17  ;;  %6009 = vmatprep.mubr.msk.f32.mxu0 %vm345_vm3, %v9145_v55 }
 0x4c9   : > { %7102 = vmatpush1.bf16.msra.mxu0 %v7101_v24  ;;  %6021 = vmatprep.mubr.msk.f32.mxu1 %vm345_vm3, %v9145_v55  ;;  %v2567_v24 = vld [vmem:[#allocation6 + $0x8d0] sm:$0xff] }
 0x4ca   : > { %7230 = vmatpush1.bf16.msra.mxu1 %v7229_v28  ;;  %7104 = vmatprep.subr.bf16.mxu0 %v7103_v16  ;;  %v2574_v28 = vld [vmem:[#allocation6 + $0x908] sm:$0xff]  ;;  %v2569_v16 = vld [vmem:[#allocation6 + $0x8e0] sm:$0xff] }
 0x4cb   : > { %6010 = vmatmul.mubr.msk.f32.gmra.mrb[34].mxu0 %vm345_vm3, %v9141_v6  ;;  %7232 = vmatprep.subr.bf16.mxu1 %v7231_v25  ;;  %v2589_v25 = vld [vmem:[#allocation6 + $0x980] sm:$0xff]  ;;  %v7117_v8 = vpack.c.bf16 %v2574_v28, %v2567_v24  ;;  %v7245_v35 = vpack.c.bf16 %v2576_v43, %v2569_v16  ;;  %v7255_v24 = vpack.c.bf16 %v2619_v37, %v2612_v22  ;;  %v2618_v28 = vld [vmem:[#allocation6 + $0xa68] sm:$0xff]  ;;  %v2624_v16 = vld [vmem:[#allocation6 + $0xa98] sm:$0xff] }
 0x4cc   : > { %6022 = vmatmul.mubr.msk.f32.gmra.mrb[18].mxu1 %vm345_vm3, %v9141_v6  ;;  %6012 = vmatprep.mubr.msk.f32.mxu0 %vm9185_vm13, %v9059_v58  ;;  %v7119_v40 = vpack.c.bf16 %v2589_v25, %v2582_v5  ;;  %v2626_v43 = vld [vmem:[#allocation6 + $0xaa8] sm:$0xff]  ;;  %v2633_v5 = vld [vmem:[#allocation6 + $0xae0] sm:$0xff] }
 0x4cd   : > { %7106 = vmatpush1.bf16.msra.mxu0 %v7105_v54  ;;  %6024 = vmatprep.mubr.msk.f32.mxu1 %vm9185_vm13, %v9059_v58  ;;  %v2581_v54 = vld [vmem:[#allocation6 + $0x940] sm:$0xff] }
 0x4ce   : > { %7234 = vmatpush1.bf16.msra.mxu1 %v7233_v56  ;;  %7108 = vmatprep.subr.bf16.mxu0 %v7107_v41  ;;  %v2588_v56 = vld [vmem:[#allocation6 + $0x978] sm:$0xff]  ;;  %v2583_v41 = vld [vmem:[#allocation6 + $0x950] sm:$0xff] }
 0x4cf   : > { %7236 = vmatprep.subr.bf16.mxu1 %v7235_v47  ;;  %v2603_v47 = vld [vmem:[#allocation6 + $0x9f0] sm:$0xff]  ;;  %v7121_v27 = vpack.c.bf16 %v2588_v56, %v2581_v54  ;;  %v7249_v29 = vpack.c.bf16 %v2590_v26, %v2583_v41  ;;  %v7259_v54 = vpack.c.bf16 %v2633_v5, %v2626_v43  ;;  %v2632_v56 = vld [vmem:[#allocation6 + $0xad8] sm:$0xff]  ;;  %v2638_v41 = vld [vmem:[#allocation6 + $0xb08] sm:$0xff] }
 0x4d0   : > { %v7123_v14 = vpack.c.bf16 %v2603_v47, %v2596_v42  ;;  %v2640_v26 = vld [vmem:[#allocation6 + $0xb18] sm:$0xff]  ;;  %v2647_v42 = vld [vmem:[#allocation6 + $0xb50] sm:$0xff] }
 0x4d1   : > { %7110 = vmatpush1.bf16.msra.mxu0 %v7109_v39  ;;  %v2595_v39 = vld [vmem:[#allocation6 + $0x9b0] sm:$0xff] }
 0x4d2   : > { %7238 = vmatpush1.bf16.msra.mxu1 %v7237_v59  ;;  %7112 = vmatprep.subr.bf16.mxu0 %v7111_v49  ;;  %v2602_v59 = vld [vmem:[#allocation6 + $0x9e8] sm:$0xff]  ;;  %v2597_v49 = vld [vmem:[#allocation6 + $0x9c0] sm:$0xff] }
 0x4d3   : > { %7240 = vmatprep.subr.bf16.mxu1 %v7239_v45  ;;  %v2617_v45 = vld [vmem:[#allocation6 + $0xa60] sm:$0xff]  ;;  %v7125_v33 = vpack.c.bf16 %v2602_v59, %v2595_v39  ;;  %v7253_v10 = vpack.c.bf16 %v2604_v46, %v2597_v49  ;;  %v7263_v39 = vpack.c.bf16 %v2647_v42, %v2640_v26  ;;  %v2646_v59 = vld [vmem:[#allocation6 + $0xb48] sm:$0xff]  ;;  %v2652_v49 = vld [vmem:[#allocation6 + $0xb78] sm:$0xff] }
 0x4d4   : > { %v7127_v20 = vpack.c.bf16 %v2617_v45, %v2610_v12  ;;  %v2654_v46 = vld [vmem:[#allocation6 + $0xb88] sm:$0xff]  ;;  %v2661_v12 = vld [vmem:[#allocation6 + $0xbc0] sm:$0xff] }
 0x4d5   : > { %7114 = vmatpush1.bf16.msra.mxu0 %v7113_v38  ;;  %v2609_v38 = vld [vmem:[#allocation6 + $0xa20] sm:$0xff] }
 0x4d6   : > { %7242 = vmatpush1.bf16.msra.mxu1 %v7241_v13  ;;  %7116 = vmatprep.subr.bf16.mxu0 %v7115_v50  ;;  %v2616_v13 = vld [vmem:[#allocation6 + $0xa58] sm:$0xff]  ;;  %v2611_v50 = vld [vmem:[#allocation6 + $0xa30] sm:$0xff] }
 0x4d7   : > { %7244 = vmatprep.subr.bf16.mxu1 %v7243_v7  ;;  %v2631_v7 = vld [vmem:[#allocation6 + $0xad0] sm:$0xff]  ;;  %v7129_v25 = vpack.c.bf16 %v2616_v13, %v2609_v38  ;;  %v7257_v62 = vpack.c.bf16 %v2618_v28, %v2611_v50  ;;  %v7267_v38 = vpack.c.bf16 %v2661_v12, %v2654_v46  ;;  %v2660_v13 = vld [vmem:[#allocation6 + $0xbb8] sm:$0xff]  ;;  %v2666_v50 = vld [vmem:[#allocation6 + $0xbe8] sm:$0xff] }
 0x4d8   : > { %v7131_v52 = vpack.c.bf16 %v2631_v7, %v2624_v16  ;;  %v2668_v28 = vld [vmem:[#allocation6 + $0xbf8] sm:$0xff]  ;;  %v2675_v16 = vld [vmem:[#allocation6 + $0xc30] sm:$0xff] }
 0x4d9   : > { %7118 = vmatpush1.bf16.msra.mxu0 %v7117_v8  ;;  %v2623_v8 = vld [vmem:[#allocation6 + $0xa90] sm:$0xff] }
 0x4da   : > { %7246 = vmatpush1.bf16.msra.mxu1 %v7245_v35  ;;  %7120 = vmatprep.subr.bf16.mxu0 %v7119_v40  ;;  %v2630_v35 = vld [vmem:[#allocation6 + $0xac8] sm:$0xff]  ;;  %v2625_v40 = vld [vmem:[#allocation6 + $0xaa0] sm:$0xff] }
 0x4db   : > { %7248 = vmatprep.subr.bf16.mxu1 %v7247_v32  ;;  %v2645_v32 = vld [vmem:[#allocation6 + $0xb40] sm:$0xff]  ;;  %v7133_v47 = vpack.c.bf16 %v2630_v35, %v2623_v8  ;;  %v7261_v63 = vpack.c.bf16 %v2632_v56, %v2625_v40  ;;  %v7271_v8 = vpack.c.bf16 %v2675_v16, %v2668_v28  ;;  %v2674_v35 = vld [vmem:[#allocation6 + $0xc28] sm:$0xff]  ;;  %v2680_v40 = vld [vmem:[#allocation6 + $0xc58] sm:$0xff] }
 0x4dc   : > { %v7135_v57 = vpack.c.bf16 %v2645_v32, %v2638_v41  ;;  %v2682_v56 = vld [vmem:[#allocation6 + $0xc68] sm:$0xff]  ;;  %v2689_v41 = vld [vmem:[#allocation6 + $0xca0] sm:$0xff] }
 0x4dd   : > { %7122 = vmatpush1.bf16.msra.mxu0 %v7121_v27  ;;  %v2637_v27 = vld [vmem:[#allocation6 + $0xb00] sm:$0xff] }
 0x4de   : > { %7250 = vmatpush1.bf16.msra.mxu1 %v7249_v29  ;;  %7124 = vmatprep.subr.bf16.mxu0 %v7123_v14  ;;  %v2644_v29 = vld [vmem:[#allocation6 + $0xb38] sm:$0xff]  ;;  %v2639_v14 = vld [vmem:[#allocation6 + $0xb10] sm:$0xff] }
 0x4df   : > { %7252 = vmatprep.subr.bf16.mxu1 %v7251_v61  ;;  %v2659_v61 = vld [vmem:[#allocation6 + $0xbb0] sm:$0xff]  ;;  %v7137_v45 = vpack.c.bf16 %v2644_v29, %v2637_v27  ;;  %v7265_v22 = vpack.c.bf16 %v2646_v59, %v2639_v14  ;;  %v7275_v27 = vpack.c.bf16 %v2689_v41, %v2682_v56  ;;  %v2688_v29 = vld [vmem:[#allocation6 + $0xc98] sm:$0xff]  ;;  %v2694_v14 = vld [vmem:[#allocation6 + $0xcc8] sm:$0xff] }
 0x4e0   : > { %v7139_v37 = vpack.c.bf16 %v2659_v61, %v2652_v49  ;;  %v2696_v59 = vld [vmem:[#allocation6 + $0xcd8] sm:$0xff]  ;;  %v2703_v49 = vld [vmem:[#allocation6 + $0xd10] sm:$0xff] }
 0x4e1   : > { %7126 = vmatpush1.bf16.msra.mxu0 %v7125_v33  ;;  %v2651_v33 = vld [vmem:[#allocation6 + $0xb70] sm:$0xff] }
 0x4e2   : > { %7254 = vmatpush1.bf16.msra.mxu1 %v7253_v10  ;;  %7128 = vmatprep.subr.bf16.mxu0 %v7127_v20  ;;  %v2658_v10 = vld [vmem:[#allocation6 + $0xba8] sm:$0xff]  ;;  %v2653_v20 = vld [vmem:[#allocation6 + $0xb80] sm:$0xff] }
 0x4e3   : > { %7256 = vmatprep.subr.bf16.mxu1 %v7255_v24  ;;  %v2673_v24 = vld [vmem:[#allocation6 + $0xc20] sm:$0xff]  ;;  %v7141_v7 = vpack.c.bf16 %v2658_v10, %v2651_v33  ;;  %v7269_v43 = vpack.c.bf16 %v2660_v13, %v2653_v20  ;;  %v7279_v33 = vpack.c.bf16 %v2703_v49, %v2696_v59  ;;  %v2702_v10 = vld [vmem:[#allocation6 + $0xd08] sm:$0xff]  ;;  %v2708_v20 = vld [vmem:[#allocation6 + $0xd38] sm:$0xff] }
 0x4e4   : > { %v7143_v5 = vpack.c.bf16 %v2673_v24, %v2666_v50  ;;  %v2710_v13 = vld [vmem:[#allocation6 + $0xd48] sm:$0xff]  ;;  %v2717_v50 = vld [vmem:[#allocation6 + $0xd80] sm:$0xff] }
 0x4e5   : > { %7130 = vmatpush1.bf16.msra.mxu0 %v7129_v25  ;;  %v2665_v25 = vld [vmem:[#allocation6 + $0xbe0] sm:$0xff] }
 0x4e6   : > { %7258 = vmatpush1.bf16.msra.mxu1 %v7257_v62  ;;  %7132 = vmatprep.subr.bf16.mxu0 %v7131_v52  ;;  %v2672_v62 = vld [vmem:[#allocation6 + $0xc18] sm:$0xff]  ;;  %v2667_v52 = vld [vmem:[#allocation6 + $0xbf0] sm:$0xff] }
 0x4e7   : > { %7260 = vmatprep.subr.bf16.mxu1 %v7259_v54  ;;  %v2687_v54 = vld [vmem:[#allocation6 + $0xc90] sm:$0xff]  ;;  %v7145_v32 = vpack.c.bf16 %v2672_v62, %v2665_v25  ;;  %v7273_v26 = vpack.c.bf16 %v2674_v35, %v2667_v52  ;;  %v7283_v25 = vpack.c.bf16 %v2717_v50, %v2710_v13  ;;  %v2716_v62 = vld [vmem:[#allocation6 + $0xd78] sm:$0xff]  ;;  %v2722_v52 = vld [vmem:[#allocation6 + $0xda8] sm:$0xff] }
 0x4e8   : > { %v7147_v42 = vpack.c.bf16 %v2687_v54, %v2680_v40  ;;  %v2724_v35 = vld [vmem:[#allocation6 + $0xdb8] sm:$0xff]  ;;  %v2731_v40 = vld [vmem:[#allocation6 + $0xdf0] sm:$0xff] }
 0x4e9   : > { %7134 = vmatpush1.bf16.msra.mxu0 %v7133_v47  ;;  %v2679_v47 = vld [vmem:[#allocation6 + $0xc50] sm:$0xff] }
 0x4ea   : > { %7262 = vmatpush1.bf16.msra.mxu1 %v7261_v63  ;;  %7136 = vmatprep.subr.bf16.mxu0 %v7135_v57  ;;  %v2686_v63 = vld [vmem:[#allocation6 + $0xc88] sm:$0xff]  ;;  %v2681_v57 = vld [vmem:[#allocation6 + $0xc60] sm:$0xff] }
 0x4eb   : > { %7264 = vmatprep.subr.bf16.mxu1 %v7263_v39  ;;  %v2701_v39 = vld [vmem:[#allocation6 + $0xd00] sm:$0xff]  ;;  %v7149_v61 = vpack.c.bf16 %v2686_v63, %v2679_v47  ;;  %v7277_v46 = vpack.c.bf16 %v2688_v29, %v2681_v57  ;;  %v7287_v47 = vpack.c.bf16 %v2731_v40, %v2724_v35  ;;  %v2730_v63 = vld [vmem:[#allocation6 + $0xde8] sm:$0xff]  ;;  %v2403_v57 = vld [vmem:[#allocation6 + $0x3b0] sm:$0xff] }
 0x4ec   : > { %v7151_v12 = vpack.c.bf16 %v2701_v39, %v2694_v14  ;;  %v4436_v29 = vld [vmem:[#allocation6 + $0x1c08] sm:$0xff]  ;;  %v4443_v14 = vld [vmem:[#allocation6 + $0x1c40] sm:$0xff] }
 0x4ed   : > { %7138 = vmatpush1.bf16.msra.mxu0 %v7137_v45  ;;  %v2693_v45 = vld [vmem:[#allocation6 + $0xcc0] sm:$0xff] }
 0x4ee   : > { %7266 = vmatpush1.bf16.msra.mxu1 %v7265_v22  ;;  %7140 = vmatprep.subr.bf16.mxu0 %v7139_v37  ;;  %v2700_v22 = vld [vmem:[#allocation6 + $0xcf8] sm:$0xff]  ;;  %v2695_v37 = vld [vmem:[#allocation6 + $0xcd0] sm:$0xff] }
 0x4ef   : > { %7268 = vmatprep.subr.bf16.mxu1 %v7267_v38  ;;  %v2715_v38 = vld [vmem:[#allocation6 + $0xd70] sm:$0xff]  ;;  %v7153_v24 = vpack.c.bf16 %v2700_v22, %v2693_v45  ;;  %v7281_v28 = vpack.c.bf16 %v2702_v10, %v2695_v37  ;;  %v4435_v45 = vld [vmem:[#allocation6 + $0x1c00] sm:$0xff]  ;;  %v4442_v22 = vld [vmem:[#allocation6 + $0x1c38] sm:$0xff] }
 0x4f0   : > { %v7155_v16 = vpack.c.bf16 %v2715_v38, %v2708_v20  ;;  %v2417_v37 = vld [vmem:[#allocation6 + $0x420] sm:$0xff]  ;;  %v4450_v10 = vld [vmem:[#allocation6 + $0x1c78] sm:$0xff]  ;;  %v4457_v20 = vld [vmem:[#allocation6 + $0x1cb0] sm:$0xff]  ;;  %v7357_v13 = vpack.c.bf16 %v4442_v22, %v4435_v45 }
 0x4f1   : > { %7142 = vmatpush1.bf16.msra.mxu0 %v7141_v7  ;;  %v2707_v7 = vld [vmem:[#allocation6 + $0xd30] sm:$0xff]  ;;  %v2466_v45 = vld [vmem:[#allocation6 + $0x5a8] sm:$0xff] }
 0x4f2   : > { %7270 = vmatpush1.bf16.msra.mxu1 %v7269_v43  ;;  %7144 = vmatprep.subr.bf16.mxu0 %v7143_v5  ;;  %v2714_v43 = vld [vmem:[#allocation6 + $0xd68] sm:$0xff]  ;;  %v2709_v5 = vld [vmem:[#allocation6 + $0xd40] sm:$0xff] }
 0x4f3   : > { %7272 = vmatprep.subr.bf16.mxu1 %v7271_v8  ;;  %v2729_v8 = vld [vmem:[#allocation6 + $0xde0] sm:$0xff]  ;;  %v7157_v54 = vpack.c.bf16 %v2714_v43, %v2707_v7  ;;  %v7285_v56 = vpack.c.bf16 %v2716_v62, %v2709_v5  ;;  %v7359_v7 = vpack.c.bf16 %v4457_v20, %v4450_v10  ;;  %v4456_v43 = vld [vmem:[#allocation6 + $0x1ca8] sm:$0xff]  ;;  %v2431_v5 = vld [vmem:[#allocation6 + $0x490] sm:$0xff]  ;;  %v9262_v62 = vrot.slane %v9153_v18, 2 }
 0x4f4   : > { %v7159_v41 = vpack.c.bf16 %v2729_v8, %v2722_v52  ;;  %v4464_v52 = vld [vmem:[#allocation6 + $0x1ce8] sm:$0xff]  ;;  %v4471_v8 = vld [vmem:[#allocation6 + $0x1d20] sm:$0xff]  ;;  %v4886_v18 = vrot.slane %v9133_v44, 2 }
 0x4f5   : > { %7146 = vmatpush1.bf16.msra.mxu0 %v7145_v32  ;;  %v2721_v32 = vld [vmem:[#allocation6 + $0xda0] sm:$0xff]  ;;  %v4492_v22 = vld [vmem:[#allocation6 + $0x1dc8] sm:$0xff] }
 0x4f6   : > { %7274 = vmatpush1.bf16.msra.mxu1 %v7273_v26  ;;  %7148 = vmatprep.subr.bf16.mxu0 %v7147_v42  ;;  %v2728_v26 = vld [vmem:[#allocation6 + $0xdd8] sm:$0xff]  ;;  %v2723_v42 = vld [vmem:[#allocation6 + $0xdb0] sm:$0xff]  ;;  %v9281_v44 = vsel %vm362_vm0, %v4886_v18, %v9262_v62 }
 0x4f7   : > { %7276 = vmatprep.subr.bf16.mxu1 %v7275_v27  ;;  %v2410_v27 = vld [vmem:[#allocation6 + $0x3e8] sm:$0xff]  ;;  %v7161_v39 = vpack.c.bf16 %v2728_v26, %v2721_v32  ;;  %v7289_v59 = vpack.c.bf16 %v2730_v63, %v2723_v42  ;;  %v4463_v32 = vld [vmem:[#allocation6 + $0x1ce0] sm:$0xff]  ;;  %v7363_v26 = vpack.c.bf16 %v4471_v8, %v4464_v52  ;;  %v4470_v42 = vld [vmem:[#allocation6 + $0x1d18] sm:$0xff] }
 0x4f8   : > { %v7291_v49 = vpack.c.bf16 %v2410_v27, %v2403_v57  ;;  %v2452_v63 = vld [vmem:[#allocation6 + $0x538] sm:$0xff]  ;;  %v4485_v27 = vld [vmem:[#allocation6 + $0x1d90] sm:$0xff] }
 0x4f9   : > { %7150 = vmatpush1.bf16.msra.mxu0 %v7149_v61  ;;  %v7355_v61 = vpack.c.bf16 %v4443_v14, %v4436_v29  ;;  %v4478_v57 = vld [vmem:[#allocation6 + $0x1d58] sm:$0xff]  ;;  %v7365_v14 = vpack.c.bf16 %v4470_v42, %v4463_v32  ;;  %v4505_v18 = vld [vmem:[#allocation6 + $0x1e30] sm:$0xff]  ;;  %v2494_v32 = vld [vmem:[#allocation6 + $0x688] sm:$0xff] }
 0x4fa   : > { %7278 = vmatpush1.bf16.msra.mxu1 %v7277_v46  ;;  %7152 = vmatprep.subr.bf16.mxu0 %v7151_v12  ;;  %v2291_v46 = vld [vmem:[#allocation6 + $0x30] sm:$0xff]  ;;  %v2298_v12 = vld [vmem:[#allocation6 + $0x68] sm:$0xff]  ;;  %v4527_v42 = vld [vmem:[#allocation6 + $0x1ee0] sm:$0xff] }
 0x4fb   : > { %7280 = vmatprep.subr.bf16.mxu1 %v7279_v33  ;;  %v2424_v33 = vld [vmem:[#allocation6 + $0x458] sm:$0xff]  ;;  %v7293_v38 = vpack.c.bf16 %v2298_v12, %v2291_v46  ;;  %v7367_v46 = vpack.c.bf16 %v4485_v27, %v4478_v57  ;;  %v2459_v12 = vld [vmem:[#allocation6 + $0x570] sm:$0xff] }
 0x4fc   : > { %v7295_v50 = vpack.c.bf16 %v2424_v33, %v2417_v37  ;;  %v4499_v37 = vld [vmem:[#allocation6 + $0x1e00] sm:$0xff]  ;;  %v7307_v20 = vpack.c.bf16 %v2466_v45, %v2459_v12  ;;  %v2375_v27 = vld [vmem:[#allocation6 + $0x2d0] sm:$0xff] }
 0x4fd   : > { %7154 = vmatpush1.bf16.msra.mxu0 %v7153_v24  ;;  %v2305_v24 = vld [vmem:[#allocation6 + $0xa0] sm:$0xff] }
 0x4fe   : > { %7282 = vmatpush1.bf16.msra.mxu1 %v7281_v28  ;;  %7156 = vmatprep.subr.bf16.mxu0 %v7155_v16  ;;  %v2312_v28 = vld [vmem:[#allocation6 + $0xd8] sm:$0xff]  ;;  %v4449_v16 = vld [vmem:[#allocation6 + $0x1c70] sm:$0xff] }
 0x4ff   : > { %7284 = vmatprep.subr.bf16.mxu1 %v7283_v25  ;;  %v2438_v25 = vld [vmem:[#allocation6 + $0x4c8] sm:$0xff]  ;;  %v7297_v35 = vpack.c.bf16 %v2312_v28, %v2305_v24  ;;  %v7361_v40 = vpack.c.bf16 %v4456_v43, %v4449_v16  ;;  %v7371_v24 = vpack.c.bf16 %v4499_v37, %v4492_v22  ;;  %v4498_v28 = vld [vmem:[#allocation6 + $0x1df8] sm:$0xff]  ;;  %v2473_v16 = vld [vmem:[#allocation6 + $0x5e0] sm:$0xff] }
 0x500   : > { %v4506_v43 = vld [vmem:[#allocation6 + $0x1e38] sm:$0xff]  ;;  %v2389_v37 = vld [vmem:[#allocation6 + $0x340] sm:$0xff] }
 0x501   : > { %7158 = vmatpush1.bf16.msra.mxu0 %v7157_v54  ;;  %v7299_v54 = vpack.c.bf16 %v2438_v25, %v2431_v5  ;;  %v4513_v5 = vld [vmem:[#allocation6 + $0x1e70] sm:$0xff] }
 0x502   : > { %7286 = vmatpush1.bf16.msra.mxu1 %v7285_v56  ;;  %7160 = vmatprep.subr.bf16.mxu0 %v7159_v41  ;;  %v2319_v56 = vld [vmem:[#allocation6 + $0x110] sm:$0xff]  ;;  %v2326_v41 = vld [vmem:[#allocation6 + $0x148] sm:$0xff] }
 0x503   : > { %7288 = vmatprep.subr.bf16.mxu1 %v7287_v47  ;;  %v2445_v47 = vld [vmem:[#allocation6 + $0x500] sm:$0xff]  ;;  %v7301_v29 = vpack.c.bf16 %v2326_v41, %v2319_v56  ;;  %v4512_v56 = vld [vmem:[#allocation6 + $0x1e68] sm:$0xff]  ;;  %v2487_v41 = vld [vmem:[#allocation6 + $0x650] sm:$0xff] }
 0x504   : > { %v7315_v57 = vpack.c.bf16 %v2494_v32, %v2487_v41 }
 0x505   : > { %7162 = vmatpush1.bf16.msra.mxu0 %v7161_v39  ;;  %v7303_v39 = vpack.c.bf16 %v2452_v63, %v2445_v47  ;;  %v7377_v63 = vpack.c.bf16 %v4512_v56, %v4505_v18  ;;  %v2648_v18 = vld [vmem:[#allocation6 + $0xb58] sm:$0xff]  ;;  %v4569_v56 = vld [vmem:[#allocation6 + $0x2030] sm:$0xff] }
 0x506   : > { %7290 = vmatpush1.bf16.msra.mxu1 %v7289_v59  ;;  %7292 = vmatprep.subr.bf16.mxu0 %v7291_v49  ;;  %v2333_v59 = vld [vmem:[#allocation6 + $0x180] sm:$0xff]  ;;  %v2340_v49 = vld [vmem:[#allocation6 + $0x1b8] sm:$0xff] }
 0x507   : > { %7356 = vmatprep.subr.bf16.mxu1 %v7355_v61  ;;  %v4477_v61 = vld [vmem:[#allocation6 + $0x1d50] sm:$0xff]  ;;  %v7305_v33 = vpack.c.bf16 %v2340_v49, %v2333_v59  ;;  %v4526_v59 = vld [vmem:[#allocation6 + $0x1ed8] sm:$0xff]  ;;  %v2501_v49 = vld [vmem:[#allocation6 + $0x6c0] sm:$0xff] }
 0x508   : > { %6014 = vmatmul.mubr.msk.f32.vlgmr.msra.gmra.mrb[32].mxu0 %vm9185_vm13, %v9087_v19 }
 0x509   : > { %6026 = vmatmul.mubr.msk.f32.vlgmr.msra.gmra.mrb[16].mxu1 %vm9185_vm13, %v9087_v19  ;;  %6015 = vmatprep.mubr.msk.f32.mxu0 %vm345_vm3, %v9077_v21 }
 0x50a   : > { %6027 = vmatprep.mubr.msk.f32.mxu1 %vm345_vm3, %v9077_v21  ;;  %7294 = vmatpush3.bf16.msra.mxu0 %v7293_v38  ;;  %v2347_v38 = vld [vmem:[#allocation6 + $0x1f0] sm:$0xff] }
 0x50b   : > { %7358 = vmatpush1.bf16.msra.mxu1 %v7357_v13  ;;  %7296 = vmatprep.subr.bf16.mxu0 %v7295_v50  ;;  %v2354_v13 = vld [vmem:[#allocation6 + $0x228] sm:$0xff]  ;;  %v4491_v50 = vld [vmem:[#allocation6 + $0x1dc0] sm:$0xff] }
 0x50c   : > { %6016 = vmatmul.mubr.msk.f32.gmra.mrb[34].mxu0 %vm345_vm3, %v9095_v2  ;;  %7360 = vmatprep.subr.bf16.mxu1 %v7359_v7  ;;  %v2480_v7 = vld [vmem:[#allocation6 + $0x618] sm:$0xff]  ;;  %v7309_v25 = vpack.c.bf16 %v2354_v13, %v2347_v38  ;;  %v7373_v52 = vpack.c.bf16 %v4498_v28, %v4491_v50  ;;  %v4540_v38 = vld [vmem:[#allocation6 + $0x1f48] sm:$0xff]  ;;  %v2627_v13 = vld [vmem:[#allocation6 + $0xab0] sm:$0xff] }
 0x50d   : > { %6028 = vmatmul.mubr.msk.f32.gmra.mrb[18].mxu1 %vm345_vm3, %v9095_v2  ;;  %6030 = vmatprep.mubr.msk.f32.mxu0 %vm9185_vm13, %v9126_v34  ;;  %v4484_v34 = vld [vmem:[#allocation6 + $0x1d88] sm:$0xff]  ;;  %v7311_v8 = vpack.c.bf16 %v2480_v7, %v2473_v16  ;;  %v4555_v28 = vld [vmem:[#allocation6 + $0x1fc0] sm:$0xff] }
 0x50e   : > { %7298 = vmatpush3.bf16.msra.mxu0 %v7297_v35  ;;  %4967 = vmatprep.mubr.f32.mxu1 %v9281_v44  ;;  %v7369_v10 = vpack.c.bf16 %v4484_v34, %v4477_v61  ;;  %v2361_v35 = vld [vmem:[#allocation6 + $0x260] sm:$0xff]  ;;  %v2508_v61 = vld [vmem:[#allocation6 + $0x6f8] sm:$0xff]  ;;  %v4541_v34 = vld [vmem:[#allocation6 + $0x1f50] sm:$0xff] }
 0x50f   : > { %7362 = vmatpush1.bf16.msra.mxu1 %v7361_v40  ;;  %7300 = vmatprep.subr.bf16.mxu0 %v7299_v54  ;;  %v2368_v40 = vld [vmem:[#allocation6 + $0x298] sm:$0xff]  ;;  %v7375_v54 = vpack.c.bf16 %v4513_v5, %v4506_v43  ;;  %v7319_v22 = vpack.c.bf16 %v2508_v61, %v2501_v49  ;;  %v2634_v50 = vld [vmem:[#allocation6 + $0xae8] sm:$0xff]  ;;  %v2515_v5 = vld [vmem:[#allocation6 + $0x730] sm:$0xff] }
 0x510   : > { %7364 = vmatprep.subr.bf16.mxu1 %v7363_v26  ;;  %v4520_v26 = vld [vmem:[#allocation6 + $0x1ea8] sm:$0xff]  ;;  %v7313_v47 = vpack.c.bf16 %v2368_v40, %v2361_v35  ;;  %v7323_v43 = vpack.c.bf16 %v2634_v50, %v2627_v13  ;;  %v4554_v35 = vld [vmem:[#allocation6 + $0x1fb8] sm:$0xff]  ;;  %v2641_v40 = vld [vmem:[#allocation6 + $0xb20] sm:$0xff] }
 0x511   : > { %v2557_v50 = vld [vmem:[#allocation6 + $0x880] sm:$0xff] }
 0x512   : > { %7302 = vmatpush3.bf16.msra.mxu0 %v7301_v29  ;;  %v2382_v29 = vld [vmem:[#allocation6 + $0x308] sm:$0xff] }
 0x513   : > { %7366 = vmatpush1.bf16.msra.mxu1 %v7365_v14  ;;  %7304 = vmatprep.subr.bf16.mxu0 %v7303_v39  ;;  %v4519_v14 = vld [vmem:[#allocation6 + $0x1ea0] sm:$0xff]  ;;  %v7379_v39 = vpack.c.bf16 %v4527_v42, %v4520_v26  ;;  %v7317_v12 = vpack.c.bf16 %v2382_v29, %v2375_v27  ;;  %v7327_v26 = vpack.c.bf16 %v2648_v18, %v2641_v40  ;;  %v4568_v27 = vld [vmem:[#allocation6 + $0x2028] sm:$0xff]  ;;  %v2655_v29 = vld [vmem:[#allocation6 + $0xb90] sm:$0xff] }
 0x514   : > { %7368 = vmatprep.subr.bf16.mxu1 %v7367_v46  ;;  %v4534_v46 = vld [vmem:[#allocation6 + $0x1f18] sm:$0xff]  ;;  %v7381_v45 = vpack.c.bf16 %v4526_v59, %v4519_v14  ;;  %v2529_v42 = vld [vmem:[#allocation6 + $0x7a0] sm:$0xff]  ;;  %v2662_v14 = vld [vmem:[#allocation6 + $0xbc8] sm:$0xff] }
 0x515   : > { %v4583_v59 = vld [vmem:[#allocation6 + $0x20a0] sm:$0xff]  ;;  %v2578_v40 = vld [vmem:[#allocation6 + $0x928] sm:$0xff] }
 0x516   : > { %7306 = vmatpush3.bf16.msra.mxu0 %v7305_v33  ;;  %v2396_v33 = vld [vmem:[#allocation6 + $0x378] sm:$0xff]  ;;  %v4603_v18 = vld [vmem:[#allocation6 + $0x2140] sm:$0xff] }
 0x517   : > { %7370 = vmatpush1.bf16.msra.mxu1 %v7369_v10  ;;  %7308 = vmatprep.subr.bf16.mxu0 %v7307_v20  ;;  %v4533_v10 = vld [vmem:[#allocation6 + $0x1f10] sm:$0xff]  ;;  %v7383_v20 = vpack.c.bf16 %v4541_v34, %v4534_v46  ;;  %v7321_v16 = vpack.c.bf16 %v2396_v33, %v2389_v37  ;;  %v7331_v46 = vpack.c.bf16 %v2662_v14, %v2655_v29  ;;  %v4582_v37 = vld [vmem:[#allocation6 + $0x2098] sm:$0xff]  ;;  %v2669_v33 = vld [vmem:[#allocation6 + $0xc00] sm:$0xff] }
 0x518   : > { %7372 = vmatprep.subr.bf16.mxu1 %v7371_v24  ;;  %v4548_v24 = vld [vmem:[#allocation6 + $0x1f88] sm:$0xff]  ;;  %v7385_v7 = vpack.c.bf16 %v4540_v38, %v4533_v10  ;;  %v2543_v34 = vld [vmem:[#allocation6 + $0x810] sm:$0xff]  ;;  %v2676_v10 = vld [vmem:[#allocation6 + $0xc38] sm:$0xff] }
 0x519   : > { %v7335_v13 = vpack.c.bf16 %v2676_v10, %v2669_v33  ;;  %v2592_v29 = vld [vmem:[#allocation6 + $0x998] sm:$0xff]  ;;  %v4617_v14 = vld [vmem:[#allocation6 + $0x21b0] sm:$0xff] }
 0x51a   : > { %7310 = vmatpush3.bf16.msra.mxu0 %v7309_v25  ;;  %v2522_v25 = vld [vmem:[#allocation6 + $0x768] sm:$0xff] }
 0x51b   : > { %7374 = vmatpush1.bf16.msra.mxu1 %v7373_v52  ;;  %7312 = vmatprep.subr.bf16.mxu0 %v7311_v8  ;;  %v4547_v52 = vld [vmem:[#allocation6 + $0x1f80] sm:$0xff]  ;;  %v7387_v8 = vpack.c.bf16 %v4555_v28, %v4548_v24  ;;  %v7325_v41 = vpack.c.bf16 %v2522_v25, %v2515_v5  ;;  %v2564_v24 = vld [vmem:[#allocation6 + $0x8b8] sm:$0xff]  ;;  %v4589_v28 = vld [vmem:[#allocation6 + $0x20d0] sm:$0xff] }
 0x51c   : > { %7376 = vmatprep.subr.bf16.mxu1 %v7375_v54  ;;  %v4562_v54 = vld [vmem:[#allocation6 + $0x1ff8] sm:$0xff]  ;;  %v7389_v32 = vpack.c.bf16 %v4554_v35, %v4547_v52  ;;  %v4604_v5 = vld [vmem:[#allocation6 + $0x2148] sm:$0xff]  ;;  %v4611_v25 = vld [vmem:[#allocation6 + $0x2180] sm:$0xff]  ;;  %v7337_v52 = vpack.c.bf16 %v2564_v24, %v2557_v50 }
 0x51d   : > { %v2571_v35 = vld [vmem:[#allocation6 + $0x8f0] sm:$0xff]  ;;  %v2725_v50 = vld [vmem:[#allocation6 + $0xdc0] sm:$0xff]  ;;  %v2732_v24 = vld [vmem:[#allocation6 + $0xdf8] sm:$0xff] }
 0x51e   : > { %7314 = vmatpush3.bf16.msra.mxu0 %v7313_v47  ;;  %v2536_v47 = vld [vmem:[#allocation6 + $0x7d8] sm:$0xff] }
 0x51f   : > { %7378 = vmatpush1.bf16.msra.mxu1 %v7377_v63  ;;  %7316 = vmatprep.subr.bf16.mxu0 %v7315_v57  ;;  %v4561_v63 = vld [vmem:[#allocation6 + $0x1ff0] sm:$0xff]  ;;  %v7391_v57 = vpack.c.bf16 %v4569_v56, %v4562_v54  ;;  %v7329_v49 = vpack.c.bf16 %v2536_v47, %v2529_v42  ;;  %v7403_v54 = vpack.c.bf16 %v4611_v25, %v4604_v5  ;;  %v4610_v56 = vld [vmem:[#allocation6 + $0x2178] sm:$0xff] }
 0x520   : > { %7380 = vmatprep.subr.bf16.mxu1 %v7379_v39  ;;  %v4576_v39 = vld [vmem:[#allocation6 + $0x2068] sm:$0xff]  ;;  %v7393_v61 = vpack.c.bf16 %v4568_v27, %v4561_v63  ;;  %v4625_v42 = vld [vmem:[#allocation6 + $0x21f0] sm:$0xff]  ;;  %v7341_v47 = vpack.c.bf16 %v2578_v40, %v2571_v35  ;;  %v7405_v63 = vpack.c.bf16 %v4610_v56, %v4603_v18  ;;  %v2585_v27 = vld [vmem:[#allocation6 + $0x960] sm:$0xff] }
 0x521   : > { %v4645_v35 = vld [vmem:[#allocation6 + $0x2290] sm:$0xff]  ;;  %v4652_v18 = vld [vmem:[#allocation6 + $0x22c8] sm:$0xff] }
 0x522   : > { %7318 = vmatpush3.bf16.msra.mxu0 %v7317_v12  ;;  %v2550_v12 = vld [vmem:[#allocation6 + $0x848] sm:$0xff]  ;;  %v4445_v56 = vld [vmem:[#allocation6 + $0x1c50] sm:$0xff] }
 0x523   : > { %7382 = vmatpush1.bf16.msra.mxu1 %v7381_v45  ;;  %7320 = vmatprep.subr.bf16.mxu0 %v7319_v22  ;;  %v4575_v45 = vld [vmem:[#allocation6 + $0x2060] sm:$0xff]  ;;  %v7395_v22 = vpack.c.bf16 %v4583_v59, %v4576_v39  ;;  %v4624_v59 = vld [vmem:[#allocation6 + $0x21e8] sm:$0xff] }
 0x524   : > { %7384 = vmatprep.subr.bf16.mxu1 %v7383_v20  ;;  %v4597_v20 = vld [vmem:[#allocation6 + $0x2110] sm:$0xff]  ;;  %v7397_v38 = vpack.c.bf16 %v4582_v37, %v4575_v45  ;;  %v7409_v33 = vpack.c.bf16 %v4624_v59, %v4617_v14  ;;  %v9299_v14 = vrot.slane %v9149_v51, 2  ;;  %v4674_v59 = vld [vmem:[#allocation6 + $0x2378] sm:$0xff] }
 0x526   : > { %7322 = vmatpush3.bf16.msra.mxu0 %v7321_v16 }
 0x527   : > { %7386 = vmatpush1.bf16.msra.mxu1 %v7385_v7  ;;  %7324 = vmatprep.subr.bf16.mxu0 %v7323_v43  ;;  %v4596_v7 = vld [vmem:[#allocation6 + $0x2108] sm:$0xff]  ;;  %v2683_v43 = vld [vmem:[#allocation6 + $0xc70] sm:$0xff] }
 0x528   : > { %7388 = vmatprep.subr.bf16.mxu1 %v7387_v8 }
 0x529   : > { %6032 = vmatmul.mubr.msk.f32.vlgmr.msra.gmra.mrb[44].mxu0 %vm9185_vm13, %v9124_v17  ;;  %v4590_v17 = vld [vmem:[#allocation6 + $0x20d8] sm:$0xff] }
 0x52a   : > { %6033 = vmatprep.mubr.msk.f32.mxu0 %vm345_vm3, %v9145_v55  ;;  %7326 = vmatpush3.bf16.msra.mxu0 %v7325_v41  ;;  %v7333_v55 = vpack.c.bf16 %v2550_v12, %v2543_v34  ;;  %v7399_v16 = vpack.c.bf16 %v4597_v20, %v4590_v17  ;;  %v2697_v41 = vld [vmem:[#allocation6 + $0xce0] sm:$0xff]  ;;  %v4632_v34 = vld [vmem:[#allocation6 + $0x2228] sm:$0xff]  ;;  %v2599_v17 = vld [vmem:[#allocation6 + $0x9d0] sm:$0xff] }
 0x52b   : > { %7390 = vmatpush1.bf16.msra.mxu1 %v7389_v32  ;;  %7328 = vmatprep.subr.bf16.mxu0 %v7327_v26  ;;  %v2704_v32 = vld [vmem:[#allocation6 + $0xd18] sm:$0xff]  ;;  %v4639_v12 = vld [vmem:[#allocation6 + $0x2260] sm:$0xff]  ;;  %v2606_v20 = vld [vmem:[#allocation6 + $0xa08] sm:$0xff] }
 0x52c   : > { %7392 = vmatprep.subr.bf16.mxu1 %v7391_v57  ;;  %v4618_v26 = vld [vmem:[#allocation6 + $0x21b8] sm:$0xff]  ;;  %v7343_v57 = vpack.c.bf16 %v2704_v32, %v2697_v41  ;;  %v4660_v41 = vld [vmem:[#allocation6 + $0x2308] sm:$0xff]  ;;  %v4667_v32 = vld [vmem:[#allocation6 + $0x2340] sm:$0xff] }
 0x52d   : > { %6034 = vmatmul.mubr.msk.f32.gmra.mrb[46].mxu0 %vm345_vm3, %v9141_v6  ;;  %v2690_v6 = vld [vmem:[#allocation6 + $0xca8] sm:$0xff]  ;;  %v7407_v39 = vpack.c.bf16 %v4625_v42, %v4618_v26  ;;  %v7417_v42 = vpack.c.bf16 %v4652_v18, %v4645_v35  ;;  %v4701_v18 = vld [vmem:[#allocation6 + $0x2450] sm:$0xff] }
 0x52e   : > { %7330 = vmatpush3.bf16.msra.mxu0 %v7329_v49  ;;  %6036 = vmatprep.mubr.msk.f32.mxu0 %vm9185_vm13, %v9059_v58  ;;  %v7401_v58 = vpack.c.bf16 %v4596_v7, %v4589_v28  ;;  %v7339_v8 = vpack.c.bf16 %v2690_v6, %v2683_v43  ;;  %v2711_v49 = vld [vmem:[#allocation6 + $0xd50] sm:$0xff]  ;;  %v7349_v6 = vpack.c.bf16 %v2606_v20, %v2599_v17  ;;  %v4451_v17 = vld [vmem:[#allocation6 + $0x1c80] sm:$0xff] }
 0x52f   : > { %7394 = vmatpush1.bf16.msra.mxu1 %v7393_v61  ;;  %7332 = vmatprep.subr.bf16.mxu0 %v7331_v46  ;;  %v2718_v61 = vld [vmem:[#allocation6 + $0xd88] sm:$0xff]  ;;  %v4653_v7 = vld [vmem:[#allocation6 + $0x22d0] sm:$0xff] }
 0x530   : > { %7396 = vmatprep.subr.bf16.mxu1 %v7395_v22  ;;  %v7345_v22 = vpack.c.bf16 %v2592_v29, %v2585_v27  ;;  %v7347_v10 = vpack.c.bf16 %v2718_v61, %v2711_v49  ;;  %v4666_v27 = vld [vmem:[#allocation6 + $0x2338] sm:$0xff]  ;;  %v4437_v29 = vld [vmem:[#allocation6 + $0x1c10] sm:$0xff]  ;;  %v4452_v61 = vld [vmem:[#allocation6 + $0x1c88] sm:$0xff] }
 0x531   : > { %v4681_v49 = vld [vmem:[#allocation6 + $0x23b0] sm:$0xff] }
 0x532   : > { %7334 = vmatpush3.bf16.msra.mxu0 %v7333_v55  ;;  %v4631_v55 = vld [vmem:[#allocation6 + $0x2220] sm:$0xff] }
 0x533   : > { %7398 = vmatpush1.bf16.msra.mxu1 %v7397_v38  ;;  %7336 = vmatprep.subr.bf16.mxu0 %v7335_v13  ;;  %v7411_v38 = vpack.c.bf16 %v4639_v12, %v4632_v34  ;;  %v4638_v13 = vld [vmem:[#allocation6 + $0x2258] sm:$0xff]  ;;  %v4883_v34 = vrot.slane %v9137_v15, 2  ;;  %v4695_v15 = vld [vmem:[#allocation6 + $0x2420] sm:$0xff] }
 0x534   : > { %7400 = vmatprep.subr.bf16.mxu1 %v7399_v16  ;;  %v4646_v16 = vld [vmem:[#allocation6 + $0x2298] sm:$0xff]  ;;  %v7413_v25 = vpack.c.bf16 %v4638_v13, %v4631_v55  ;;  %v9310_v13 = vrot.slane %v9085_v1, 2 }
 0x535   : > { %v7415_v40 = vpack.c.bf16 %v4653_v7, %v4646_v16  ;;  %v9307_v51 = vsel %vm362_vm0, %v4883_v34, %v9299_v14  ;;  %v4458_v55 = vld [vmem:[#allocation6 + $0x1cb8] sm:$0xff]  ;;  %v4687_v7 = vld [vmem:[#allocation6 + $0x23e0] sm:$0xff] }
 0x536   : > { %7338 = vmatpush3.bf16.msra.mxu0 %v7337_v52  ;;  %v7351_v52 = vpack.c.bf16 %v2732_v24, %v2725_v50  ;;  %v4466_v50 = vld [vmem:[#allocation6 + $0x1cf8] sm:$0xff]  ;;  %v4473_v24 = vld [vmem:[#allocation6 + $0x1d30] sm:$0xff] }
 0x537   : > { %7402 = vmatpush1.bf16.msra.mxu1 %v7401_v58  ;;  %7340 = vmatprep.subr.bf16.mxu0 %v7339_v8  ;;  %v2613_v58 = vld [vmem:[#allocation6 + $0xa40] sm:$0xff]  ;;  %v2620_v8 = vld [vmem:[#allocation6 + $0xa78] sm:$0xff] }
 0x538   : > { %7404 = vmatprep.subr.bf16.mxu1 %v7403_v54  ;;  %v4438_v54 = vld [vmem:[#allocation6 + $0x1c18] sm:$0xff]  ;;  %v7353_v26 = vpack.c.bf16 %v2620_v8, %v2613_v58  ;;  %v9322_v58 = vsel %vm362_vm0, %v4892_v4, %v9310_v13  ;;  %v4487_v8 = vld [vmem:[#allocation6 + $0x1da0] sm:$0xff] }
 0x539   : > { %v6101_v46 = vpop.f32.mrb[36].mxu0  ;;  %v4694_v1 = vld [vmem:[#allocation6 + $0x2418] sm:$0xff]  ;;  %v4751_v4 = vld [vmem:[#allocation6 + $0x25e0] sm:$0xff] }
 0x53a   : > { %7342 = vmatpush3.bf16.msra.mxu0 %v7341_v47  ;;  %v6102_v45 = vpop.f32.mrb[37].mxu0  ;;  %v7483_v47 = vpack.c.bf16 %v4445_v56, %v4438_v54  ;;  %v7429_v35 = vpack.c.bf16 %v4694_v1, %v4687_v7  ;;  %v4708_v54 = vld [vmem:[#allocation6 + $0x2488] sm:$0xff]  ;;  %v4479_v56 = vld [vmem:[#allocation6 + $0x1d60] sm:$0xff]  ;;  %v4730_v34 = vld [vmem:[#allocation6 + $0x2538] sm:$0xff] }
 0x53b   : > { %7406 = vmatpush1.bf16.msra.mxu1 %v7405_v63  ;;  %v9294_v37 = vadd.f32 %v6102_v45, %v6101_v46  ;;  %7344 = vmatprep.subr.bf16.mxu0 %v7343_v57  ;;  %v7419_v63 = vpack.c.bf16 %v4667_v32, %v4660_v41  ;;  %v4659_v57 = vld [vmem:[#allocation6 + $0x2300] sm:$0xff]  ;;  %v7495_v41 = vpack.c.bf16 %v4487_v8, %v4480_v9  ;;  %v4486_v32 = vld [vmem:[#allocation6 + $0x1d98] sm:$0xff]  ;;  %v4529_v7 = vld [vmem:[#allocation6 + $0x1ef0] sm:$0xff] }
 0x53c   : > { %7408 = vmatprep.subr.bf16.mxu1 %v7407_v39  ;;  %v4444_v39 = vld [vmem:[#allocation6 + $0x1c48] sm:$0xff]  ;;  %v4459_v46 = vld [vmem:[#allocation6 + $0x1cc0] sm:$0xff]  ;;  %v7421_v12 = vpack.c.bf16 %v4666_v27, %v4659_v57  ;;  %v7433_v57 = vpack.c.bf16 %v4708_v54, %v4701_v18  ;;  %v7497_v27 = vpack.c.bf16 %v4486_v32, %v4479_v56  ;;  %v4521_v9 = vld [vmem:[#allocation6 + $0x1eb0] sm:$0xff] }
 0x53d   : > { %v6104_v28 = vpop.f32.mrb[38].mxu0  ;;  %v7485_v45 = vpack.c.bf16 %v4444_v39, %v4437_v29  ;;  %v7487_v20 = vpack.c.bf16 %v4459_v46, %v4452_v61  ;;  %v4715_v39 = vld [vmem:[#allocation6 + $0x24c0] sm:$0xff]  ;;  %v4500_v46 = vld [vmem:[#allocation6 + $0x1e08] sm:$0xff]  ;;  %v4758_v18 = vld [vmem:[#allocation6 + $0x2618] sm:$0xff] }
 0x53e   : > { %7346 = vmatpush3.bf16.msra.mxu0 %v7345_v22  ;;  %v6105_v43 = vpop.f32.mrb[39].mxu0  ;;  %v7423_v22 = vpack.c.bf16 %v4681_v49, %v4674_v59  ;;  %v4722_v59 = vld [vmem:[#allocation6 + $0x24f8] sm:$0xff]  ;;  %v4493_v49 = vld [vmem:[#allocation6 + $0x1dd0] sm:$0xff]  ;;  %v4543_v32 = vld [vmem:[#allocation6 + $0x1f60] sm:$0xff] }
 0x53f   : > { %7410 = vmatpush1.bf16.msra.mxu1 %v7409_v33  ;;  %v9296_v5 = vadd.f32 %v6105_v43, %v6104_v28  ;;  %7348 = vmatprep.subr.bf16.mxu0 %v7347_v10  ;;  %v4673_v33 = vld [vmem:[#allocation6 + $0x2370] sm:$0xff]  ;;  %v4680_v10 = vld [vmem:[#allocation6 + $0x23a8] sm:$0xff]  ;;  %v7489_v28 = vpack.c.bf16 %v4458_v55, %v4451_v17 }
 0x540   : > { %7412 = vmatprep.subr.bf16.mxu1 %v7411_v38  ;;  %v4688_v38 = vld [vmem:[#allocation6 + $0x23e8] sm:$0xff]  ;;  %v4465_v43 = vld [vmem:[#allocation6 + $0x1cf0] sm:$0xff] }
 0x541   : > { %v7427_v16 = vpack.c.bf16 %v4695_v15, %v4688_v38  ;;  %v4736_v55 = vld [vmem:[#allocation6 + $0x2568] sm:$0xff]  ;;  %v4507_v38 = vld [vmem:[#allocation6 + $0x1e40] sm:$0xff]  ;;  %v4765_v54 = vld [vmem:[#allocation6 + $0x2650] sm:$0xff] }
 0x542   : > { %7350 = vmatpush3.bf16.msra.mxu0 %v7349_v6  ;;  %v4472_v6 = vld [vmem:[#allocation6 + $0x1d28] sm:$0xff] }
 0x543   : > { %7414 = vmatpush1.bf16.msra.mxu1 %v7413_v25  ;;  %7352 = vmatprep.subr.bf16.mxu0 %v7351_v52  ;;  %v4702_v25 = vld [vmem:[#allocation6 + $0x2458] sm:$0xff]  ;;  %v4709_v52 = vld [vmem:[#allocation6 + $0x2490] sm:$0xff] }
 0x544   : > { %7416 = vmatprep.subr.bf16.mxu1 %v7415_v40  ;;  %v7431_v40 = vpack.c.bf16 %v4709_v52, %v4702_v25  ;;  %v4743_v25 = vld [vmem:[#allocation6 + $0x25a0] sm:$0xff]  ;;  %v4750_v52 = vld [vmem:[#allocation6 + $0x25d8] sm:$0xff] }
 0x546   : > { %7354 = vmatpush3.bf16.msra.mxu0 %v7353_v26  ;;  %v4716_v26 = vld [vmem:[#allocation6 + $0x24c8] sm:$0xff] }
 0x547   : > { %7418 = vmatpush1.bf16.msra.mxu1 %v7417_v42  ;;  %7484 = vmatprep.subr.bf16.mxu0 %v7483_v47  ;;  %v4723_v42 = vld [vmem:[#allocation6 + $0x2500] sm:$0xff]  ;;  %v4494_v47 = vld [vmem:[#allocation6 + $0x1dd8] sm:$0xff] }
 0x548   : > { %7420 = vmatprep.subr.bf16.mxu1 %v7419_v63  ;;  %v4501_v63 = vld [vmem:[#allocation6 + $0x1e10] sm:$0xff]  ;;  %v7435_v29 = vpack.c.bf16 %v4723_v42, %v4716_v26  ;;  %v7445_v42 = vpack.c.bf16 %v4750_v52, %v4743_v25  ;;  %v4578_v25 = vld [vmem:[#allocation6 + $0x2078] sm:$0xff] }
 0x549   : > { %6038 = vmatmul.mubr.msk.f32.vlgmr.msra.gmra.mrb[48].mxu0 %vm9185_vm13, %v9087_v19  ;;  %v7425_v19 = vpack.c.bf16 %v4680_v10, %v4673_v33  ;;  %v7499_v61 = vpack.c.bf16 %v4501_v63, %v4494_v47  ;;  %v7437_v33 = vpack.c.bf16 %v4722_v59, %v4715_v39  ;;  %v7501_v10 = vpack.c.bf16 %v4500_v46, %v4493_v49  ;;  %v4542_v59 = vld [vmem:[#allocation6 + $0x1f58] sm:$0xff]  ;;  %v4772_v49 = vld [vmem:[#allocation6 + $0x2688] sm:$0xff]  ;;  %v4585_v52 = vld [vmem:[#allocation6 + $0x20b0] sm:$0xff] }
 0x54a   : > { %4968 = vmatmul.mubr.f32.vlgmr.msra.gmra.mrb[12].mxu1 %v9307_v51  ;;  %6039 = vmatprep.mubr.msk.f32.mxu0 %vm345_vm3, %v9077_v21  ;;  %v7491_v21 = vpack.c.bf16 %v4473_v24, %v4466_v50  ;;  %v4514_v24 = vld [vmem:[#allocation6 + $0x1e78] sm:$0xff]  ;;  %v7447_v63 = vpack.c.bf16 %v4765_v54, %v4758_v18  ;;  %v4577_v54 = vld [vmem:[#allocation6 + $0x2070] sm:$0xff] }
 0x54b   : > { %4973 = vmatprep.mubr.f32.mxu1 %v9262_v62  ;;  %7422 = vmatpush1.bf16.msra.mxu1 %v7421_v12  ;;  %v4737_v12 = vld [vmem:[#allocation6 + $0x2570] sm:$0xff]  ;;  %v4550_v46 = vld [vmem:[#allocation6 + $0x1f98] sm:$0xff] }
 0x54c   : > { %7486 = vmatpush1.bf16.msra.mxu0 %v7485_v45  ;;  %7424 = vmatprep.subr.bf16.mxu1 %v7423_v22  ;;  %v4508_v45 = vld [vmem:[#allocation6 + $0x1e48] sm:$0xff]  ;;  %v4515_v22 = vld [vmem:[#allocation6 + $0x1e80] sm:$0xff]  ;;  %v7439_v17 = vpack.c.bf16 %v4737_v12, %v4730_v34  ;;  %v4557_v34 = vld [vmem:[#allocation6 + $0x1fd0] sm:$0xff] }
 0x54d   : > { %6040 = vmatmul.mubr.msk.f32.gmra.mrb[50].mxu0 %vm345_vm3, %v9095_v2  ;;  %7488 = vmatprep.subr.bf16.mxu0 %v7487_v20  ;;  %v7493_v2 = vpack.c.bf16 %v4472_v6, %v4465_v43  ;;  %v4729_v20 = vld [vmem:[#allocation6 + $0x2530] sm:$0xff]  ;;  %v7503_v50 = vpack.c.bf16 %v4515_v22, %v4508_v45  ;;  %v4806_v18 = vld [vmem:[#allocation6 + $0x2798] sm:$0xff] }
 0x54e   : > { %4974 = vmatmul.mubr.f32.gmra.mrb[14].mxu1 %v9299_v14  ;;  %5121 = vmatprep.mubr.f32.mxu0 %v9281_v44  ;;  %v7441_v43 = vpack.c.bf16 %v4736_v55, %v4729_v20  ;;  %v7515_v20 = vpack.c.bf16 %v4557_v34, %v4550_v46  ;;  %v4786_v55 = vld [vmem:[#allocation6 + $0x26f8] sm:$0xff]  ;;  %v4828_v46 = vld [vmem:[#allocation6 + $0x2848] sm:$0xff]  ;;  %v4835_v34 = vld [vmem:[#allocation6 + $0x2880] sm:$0xff] }
 0x54f   : > { %7426 = vmatpush1.bf16.msra.mxu1 %v7425_v19  ;;  %5044 = vmatprep.mubr.f32.mxu1 %v9322_v58  ;;  %v4744_v19 = vld [vmem:[#allocation6 + $0x25a8] sm:$0xff] }
 0x550   : > { %7490 = vmatpush1.bf16.msra.mxu0 %v7489_v28  ;;  %7428 = vmatprep.subr.bf16.mxu1 %v7427_v16  ;;  %v4522_v16 = vld [vmem:[#allocation6 + $0x1eb8] sm:$0xff]  ;;  %v7443_v6 = vpack.c.bf16 %v4751_v4, %v4744_v19 }
 0x551   : > { %7492 = vmatprep.subr.bf16.mxu0 %v7491_v21  ;;  %v7505_v21 = vpack.c.bf16 %v4514_v24, %v4507_v38  ;;  %v4793_v38 = vld [vmem:[#allocation6 + $0x2730] sm:$0xff] }
 0x552   : > { %v7455_v4 = vpack.c.bf16 %v4793_v38, %v4786_v55  ;;  %v4612_v38 = vld [vmem:[#allocation6 + $0x2188] sm:$0xff] }
 0x553   : > { %7430 = vmatpush1.bf16.msra.mxu1 %v7429_v35 }
 0x554   : > { %7494 = vmatpush1.bf16.msra.mxu0 %v7493_v2  ;;  %7432 = vmatprep.subr.bf16.mxu1 %v7431_v40  ;;  %v7507_v2 = vpack.c.bf16 %v4529_v7, %v4522_v16  ;;  %v4528_v40 = vld [vmem:[#allocation6 + $0x1ee8] sm:$0xff]  ;;  %v4563_v7 = vld [vmem:[#allocation6 + $0x2000] sm:$0xff] }
 0x555   : > { %7496 = vmatprep.subr.bf16.mxu0 %v7495_v41  ;;  %v4536_v41 = vld [vmem:[#allocation6 + $0x1f28] sm:$0xff]  ;;  %v7509_v47 = vpack.c.bf16 %v4528_v40, %v4521_v9  ;;  %v4799_v40 = vld [vmem:[#allocation6 + $0x2760] sm:$0xff] }
 0x556   : > { %v7511_v39 = vpack.c.bf16 %v4543_v32, %v4536_v41  ;;  %v4792_v16 = vld [vmem:[#allocation6 + $0x2728] sm:$0xff]  ;;  %v4814_v32 = vld [vmem:[#allocation6 + $0x27d8] sm:$0xff] }
 0x557   : > { %7434 = vmatpush1.bf16.msra.mxu1 %v7433_v57  ;;  %v4757_v57 = vld [vmem:[#allocation6 + $0x2610] sm:$0xff]  ;;  %v4584_v41 = vld [vmem:[#allocation6 + $0x20a8] sm:$0xff] }
 0x558   : > { %7498 = vmatpush1.bf16.msra.mxu0 %v7497_v27  ;;  %7436 = vmatprep.subr.bf16.mxu1 %v7435_v29  ;;  %v4764_v27 = vld [vmem:[#allocation6 + $0x2648] sm:$0xff] }
 0x559   : > { %7500 = vmatprep.subr.bf16.mxu0 %v7499_v61  ;;  %v6139_v15 = vpop.f32.mrb[40].mxu0  ;;  %v4779_v61 = vld [vmem:[#allocation6 + $0x26c0] sm:$0xff]  ;;  %v7449_v12 = vpack.c.bf16 %v4764_v27, %v4757_v57  ;;  %v7525_v57 = vpack.c.bf16 %v4584_v41, %v4577_v54  ;;  %v4633_v41 = vld [vmem:[#allocation6 + $0x2230] sm:$0xff] }
 0x55a   : > { %v6140_v28 = vpop.f32.mrb[41].mxu0  ;;  %v7451_v22 = vpack.c.bf16 %v4779_v61, %v4772_v49  ;;  %v4598_v61 = vld [vmem:[#allocation6 + $0x2118] sm:$0xff]  ;;  %v4855_v54 = vld [vmem:[#allocation6 + $0x2920] sm:$0xff] }
 0x55b   : > { %7438 = vmatpush1.bf16.msra.mxu1 %v7437_v33  ;;  %v6141_v1 = vadd.f32 %v6140_v28, %v6139_v15  ;;  %v4771_v33 = vld [vmem:[#allocation6 + $0x2680] sm:$0xff]  ;;  %v4564_v15 = vld [vmem:[#allocation6 + $0x2008] sm:$0xff]  ;;  %v4785_v28 = vld [vmem:[#allocation6 + $0x26f0] sm:$0xff] }
 0x55c   : > { %7502 = vmatpush1.bf16.msra.mxu0 %v7501_v10  ;;  %7440 = vmatprep.subr.bf16.mxu1 %v7439_v17  ;;  %v4778_v10 = vld [vmem:[#allocation6 + $0x26b8] sm:$0xff]  ;;  %v4549_v17 = vld [vmem:[#allocation6 + $0x1f90] sm:$0xff]  ;;  %v7457_v9 = vpack.c.bf16 %v4792_v16, %v4785_v28 }
 0x55d   : > { %v9327_v8 = vadd.f32 %v6141_v1, %v9294_v37  ;;  %7504 = vmatprep.subr.bf16.mxu0 %v7503_v50  ;;  %v6142_v35 = vpop.f32.mrb[42].mxu0  ;;  %v4535_v37 = vld [vmem:[#allocation6 + $0x1f20] sm:$0xff]  ;;  %v7453_v24 = vpack.c.bf16 %v4778_v10, %v4771_v33  ;;  %v7467_v10 = vpack.c.bf16 %v4835_v34, %v4828_v46  ;;  %v4654_v34 = vld [vmem:[#allocation6 + $0x22d8] sm:$0xff] }
 0x55e   : > { %v6143_v56 = vpop.f32.mrb[43].mxu0  ;;  %v7513_v45 = vpack.c.bf16 %v4542_v59, %v4535_v37  ;;  %v4571_v50 = vld [vmem:[#allocation6 + $0x2040] sm:$0xff]  ;;  %v4813_v37 = vld [vmem:[#allocation6 + $0x27d0] sm:$0xff] }
 0x55f   : > { %7442 = vmatpush1.bf16.msra.mxu1 %v7441_v43  ;;  %v6144_v26 = vadd.f32 %v6143_v56, %v6142_v35  ;;  %v7519_v1 = vpack.c.bf16 %v4571_v50, %v4564_v15  ;;  %v4570_v43 = vld [vmem:[#allocation6 + $0x2038] sm:$0xff]  ;;  %v7523_v56 = vpack.c.bf16 %v4585_v52, %v4578_v25  ;;  %v4591_v59 = vld [vmem:[#allocation6 + $0x20e0] sm:$0xff]  ;;  %v4849_v50 = vld [vmem:[#allocation6 + $0x28f0] sm:$0xff] }
 0x560   : > { %7506 = vmatpush1.bf16.msra.mxu0 %v7505_v21  ;;  %7444 = vmatprep.subr.bf16.mxu1 %v7443_v6  ;;  %v4800_v21 = vld [vmem:[#allocation6 + $0x2768] sm:$0xff]  ;;  %v4807_v6 = vld [vmem:[#allocation6 + $0x27a0] sm:$0xff]  ;;  %v7521_v35 = vpack.c.bf16 %v4570_v43, %v4563_v7  ;;  %v7529_v33 = vpack.c.bf16 %v4598_v61, %v4591_v59  ;;  %v4842_v15 = vld [vmem:[#allocation6 + $0x28b8] sm:$0xff] }
 0x561   : > { %v9330_v29 = vadd.f32 %v6144_v26, %v9296_v5  ;;  %7508 = vmatprep.subr.bf16.mxu0 %v7507_v2  ;;  %v4556_v5 = vld [vmem:[#allocation6 + $0x1fc8] sm:$0xff]  ;;  %v7459_v2 = vpack.c.bf16 %v4807_v6, %v4800_v21  ;;  %v4821_v26 = vld [vmem:[#allocation6 + $0x2810] sm:$0xff]  ;;  %v7471_v16 = vpack.c.bf16 %v4849_v50, %v4842_v15  ;;  %v4619_v43 = vld [vmem:[#allocation6 + $0x21c0] sm:$0xff] }
 0x562   : > { %v7517_v19 = vpack.c.bf16 %v4556_v5, %v4549_v17  ;;  %v7463_v27 = vpack.c.bf16 %v4821_v26, %v4814_v32  ;;  %v4827_v17 = vld [vmem:[#allocation6 + $0x2840] sm:$0xff]  ;;  %v4605_v5 = vld [vmem:[#allocation6 + $0x2150] sm:$0xff]  ;;  %v4626_v6 = vld [vmem:[#allocation6 + $0x21f8] sm:$0xff] }
 0x563   : > { %7446 = vmatpush1.bf16.msra.mxu1 %v7445_v42  ;;  %v4592_v42 = vld [vmem:[#allocation6 + $0x20e8] sm:$0xff]  ;;  %v7533_v28 = vpack.c.bf16 %v4612_v38, %v4605_v5  ;;  %v4841_v7 = vld [vmem:[#allocation6 + $0x28b0] sm:$0xff]  ;;  %v4863_v52 = vld [vmem:[#allocation6 + $0x2960] sm:$0xff]  ;;  %v4889_v5 = vrot.slane %v9099_v60, 2 }
 0x564   : > { %7510 = vmatpush1.bf16.msra.mxu0 %v7509_v47  ;;  %7448 = vmatprep.subr.bf16.mxu1 %v7447_v63  ;;  %v4599_v47 = vld [vmem:[#allocation6 + $0x2120] sm:$0xff]  ;;  %v7461_v63 = vpack.c.bf16 %v4806_v18, %v4799_v40  ;;  %v4856_v25 = vld [vmem:[#allocation6 + $0x2928] sm:$0xff]  ;;  %v7537_v40 = vpack.c.bf16 %v4626_v6, %v4619_v43  ;;  %v4869_v59 = vld [vmem:[#allocation6 + $0x2990] sm:$0xff] }
 0x565   : > { %7512 = vmatprep.subr.bf16.mxu0 %v7511_v39  ;;  %v4820_v39 = vld [vmem:[#allocation6 + $0x2808] sm:$0xff]  ;;  %v7527_v49 = vpack.c.bf16 %v4599_v47, %v4592_v42  ;;  %v7475_v18 = vpack.c.bf16 %v4863_v52, %v4856_v25  ;;  %v4870_v42 = vld [vmem:[#allocation6 + $0x2998] sm:$0xff]  ;;  %v4877_v47 = vld [vmem:[#allocation6 + $0x29d0] sm:$0xff] }
 0x566   : > { %v4640_v26 = vld [vmem:[#allocation6 + $0x2268] sm:$0xff]  ;;  %v4647_v61 = vld [vmem:[#allocation6 + $0x22a0] sm:$0xff]  ;;  %v4661_v15 = vld [vmem:[#allocation6 + $0x2310] sm:$0xff] }
 0x567   : > { %7450 = vmatpush1.bf16.msra.mxu1 %v7449_v12  ;;  %v4606_v12 = vld [vmem:[#allocation6 + $0x2158] sm:$0xff]  ;;  %v4668_v50 = vld [vmem:[#allocation6 + $0x2348] sm:$0xff]  ;;  %v4453_v25 = vld [vmem:[#allocation6 + $0x1c90] sm:$0xff] }
 0x568   : > { %7514 = vmatpush1.bf16.msra.mxu0 %v7513_v45  ;;  %7452 = vmatprep.subr.bf16.mxu1 %v7451_v22  ;;  %v4613_v45 = vld [vmem:[#allocation6 + $0x2190] sm:$0xff]  ;;  %v7465_v22 = vpack.c.bf16 %v4820_v39, %v4813_v37  ;;  %v7541_v37 = vpack.c.bf16 %v4640_v26, %v4633_v41  ;;  %v7479_v39 = vpack.c.bf16 %v4877_v47, %v4870_v42  ;;  %v4682_v6 = vld [vmem:[#allocation6 + $0x23b8] sm:$0xff]  ;;  %v4696_v26 = vld [vmem:[#allocation6 + $0x2428] sm:$0xff] }
 0x569   : > { %7516 = vmatprep.subr.bf16.mxu0 %v7515_v20  ;;  %v4834_v20 = vld [vmem:[#allocation6 + $0x2878] sm:$0xff]  ;;  %v7531_v55 = vpack.c.bf16 %v4613_v45, %v4606_v12  ;;  %v4440_v12 = vld [vmem:[#allocation6 + $0x1c28] sm:$0xff]  ;;  %v4447_v45 = vld [vmem:[#allocation6 + $0x1c60] sm:$0xff] }
 0x56a   : > { %v4467_v42 = vld [vmem:[#allocation6 + $0x1d00] sm:$0xff] }
 0x56b   : > { %7454 = vmatpush1.bf16.msra.mxu1 %v7453_v24  ;;  %v4620_v24 = vld [vmem:[#allocation6 + $0x21c8] sm:$0xff] }
 0x56c   : > { %7518 = vmatpush1.bf16.msra.mxu0 %v7517_v19  ;;  %7456 = vmatprep.subr.bf16.mxu1 %v7455_v4  ;;  %v4627_v19 = vld [vmem:[#allocation6 + $0x2200] sm:$0xff]  ;;  %v7469_v4 = vpack.c.bf16 %v4834_v20, %v4827_v17  ;;  %v7545_v17 = vpack.c.bf16 %v4654_v34, %v4647_v61  ;;  %v7611_v20 = vpack.c.bf16 %v4447_v45, %v4440_v12  ;;  %v4710_v34 = vld [vmem:[#allocation6 + $0x2498] sm:$0xff]  ;;  %v4481_v12 = vld [vmem:[#allocation6 + $0x1d70] sm:$0xff] }
 0x56d   : > { %7520 = vmatprep.subr.bf16.mxu0 %v7519_v1  ;;  %v4848_v1 = vld [vmem:[#allocation6 + $0x28e8] sm:$0xff]  ;;  %v7535_v21 = vpack.c.bf16 %v4627_v19, %v4620_v24  ;;  %v4439_v24 = vld [vmem:[#allocation6 + $0x1c20] sm:$0xff]  ;;  %v4446_v19 = vld [vmem:[#allocation6 + $0x1c58] sm:$0xff] }
 0x56e   : > { %v7613_v60 = vpack.c.bf16 %v4446_v19, %v4439_v24  ;;  %v4724_v24 = vld [vmem:[#allocation6 + $0x2508] sm:$0xff]  ;;  %v4495_v19 = vld [vmem:[#allocation6 + $0x1de0] sm:$0xff] }
 0x56f   : > { %7458 = vmatpush1.bf16.msra.mxu1 %v7457_v9  ;;  %v4634_v9 = vld [vmem:[#allocation6 + $0x2238] sm:$0xff] }
 0x570   : > { %7522 = vmatpush1.bf16.msra.mxu0 %v7521_v35  ;;  %7460 = vmatprep.subr.bf16.mxu1 %v7459_v2  ;;  %v4641_v35 = vld [vmem:[#allocation6 + $0x2270] sm:$0xff]  ;;  %v7473_v2 = vpack.c.bf16 %v4848_v1, %v4841_v7  ;;  %v7549_v1 = vpack.c.bf16 %v4668_v50, %v4661_v15 }
 0x571   : > { %7524 = vmatprep.subr.bf16.mxu0 %v7523_v56  ;;  %v4862_v56 = vld [vmem:[#allocation6 + $0x2958] sm:$0xff]  ;;  %v7539_v32 = vpack.c.bf16 %v4641_v35, %v4634_v9  ;;  %v4461_v7 = vld [vmem:[#allocation6 + $0x1cd0] sm:$0xff]  ;;  %v4460_v9 = vld [vmem:[#allocation6 + $0x1cc8] sm:$0xff] }
 0x572   : > { %v4690_v35 = vld [vmem:[#allocation6 + $0x23f8] sm:$0xff]  ;;  %v4717_v50 = vld [vmem:[#allocation6 + $0x24d0] sm:$0xff] }
 0x573   : > { %7462 = vmatpush1.bf16.msra.mxu1 %v7461_v63  ;;  %v4648_v63 = vld [vmem:[#allocation6 + $0x22a8] sm:$0xff] }
 0x574   : > { %7526 = vmatpush1.bf16.msra.mxu0 %v7525_v57  ;;  %7464 = vmatprep.subr.bf16.mxu1 %v7463_v27  ;;  %v4655_v57 = vld [vmem:[#allocation6 + $0x22e0] sm:$0xff]  ;;  %v7477_v27 = vpack.c.bf16 %v4862_v56, %v4855_v54  ;;  %v7617_v56 = vpack.c.bf16 %v4460_v9, %v4453_v25  ;;  %v4509_v9 = vld [vmem:[#allocation6 + $0x1e50] sm:$0xff] }
 0x575   : > { %7528 = vmatprep.subr.bf16.mxu0 %v7527_v49  ;;  %v4876_v49 = vld [vmem:[#allocation6 + $0x29c8] sm:$0xff]  ;;  %v7543_v46 = vpack.c.bf16 %v4655_v57, %v4648_v63  ;;  %v4474_v63 = vld [vmem:[#allocation6 + $0x1d38] sm:$0xff]  ;;  %v4731_v25 = vld [vmem:[#allocation6 + $0x2540] sm:$0xff] }
 0x576   : > { %v4704_v57 = vld [vmem:[#allocation6 + $0x2468] sm:$0xff] }
 0x577   : > { %7466 = vmatpush1.bf16.msra.mxu1 %v7465_v22  ;;  %v4662_v22 = vld [vmem:[#allocation6 + $0x2318] sm:$0xff] }
 0x578   : > { %7530 = vmatpush1.bf16.msra.mxu0 %v7529_v33  ;;  %7468 = vmatprep.subr.bf16.mxu1 %v7467_v10  ;;  %v4669_v33 = vld [vmem:[#allocation6 + $0x2350] sm:$0xff]  ;;  %v7481_v10 = vpack.c.bf16 %v4876_v49, %v4869_v59  ;;  %v7621_v49 = vpack.c.bf16 %v4474_v63, %v4467_v42  ;;  %v4523_v63 = vld [vmem:[#allocation6 + $0x1ec0] sm:$0xff] }
 0x579   : > { %7532 = vmatprep.subr.bf16.mxu0 %v7531_v55  ;;  %v9334_v55 = vrot.slane %v9107_v53, 2  ;;  %v7547_v38 = vpack.c.bf16 %v4669_v33, %v4662_v22  ;;  %v4488_v22 = vld [vmem:[#allocation6 + $0x1da8] sm:$0xff]  ;;  %v4718_v33 = vld [vmem:[#allocation6 + $0x24d8] sm:$0xff]  ;;  %v4745_v42 = vld [vmem:[#allocation6 + $0x25b0] sm:$0xff] }
 0x57b   : > { %7470 = vmatpush1.bf16.msra.mxu1 %v7469_v4  ;;  %v4676_v4 = vld [vmem:[#allocation6 + $0x2388] sm:$0xff]  ;;  %v9338_v43 = vsel %vm362_vm0, %v4889_v5, %v9334_v55 }
 0x57c   : > { %7534 = vmatpush1.bf16.msra.mxu0 %v7533_v28  ;;  %7472 = vmatprep.subr.bf16.mxu1 %v7471_v16  ;;  %v4683_v28 = vld [vmem:[#allocation6 + $0x23c0] sm:$0xff]  ;;  %v4454_v16 = vld [vmem:[#allocation6 + $0x1c98] sm:$0xff] }
 0x57d   : > { %7536 = vmatprep.subr.bf16.mxu0 %v7535_v21  ;;  %v7551_v53 = vpack.c.bf16 %v4683_v28, %v4676_v4  ;;  %v4675_v21 = vld [vmem:[#allocation6 + $0x2380] sm:$0xff]  ;;  %v7615_v52 = vpack.c.bf16 %v4461_v7, %v4454_v16  ;;  %v4502_v28 = vld [vmem:[#allocation6 + $0x1e18] sm:$0xff]  ;;  %v4732_v16 = vld [vmem:[#allocation6 + $0x2548] sm:$0xff] }
 0x57e   : > { %v7553_v54 = vpack.c.bf16 %v4682_v6, %v4675_v21  ;;  %v4739_v7 = vld [vmem:[#allocation6 + $0x2580] sm:$0xff]  ;;  %v7629_v21 = vpack.c.bf16 %v4502_v28, %v4495_v19  ;;  %v4773_v19 = vld [vmem:[#allocation6 + $0x2690] sm:$0xff] }
 0x57f   : > { %7474 = vmatpush1.bf16.msra.mxu1 %v7473_v2  ;;  %v4697_v2 = vld [vmem:[#allocation6 + $0x2430] sm:$0xff]  ;;  %v7567_v6 = vpack.c.bf16 %v4739_v7, %v4732_v16  ;;  %v4551_v28 = vld [vmem:[#allocation6 + $0x1fa0] sm:$0xff]  ;;  %v4558_v7 = vld [vmem:[#allocation6 + $0x1fd8] sm:$0xff] }
 0x580   : > { %7538 = vmatpush1.bf16.msra.mxu0 %v7537_v40  ;;  %7476 = vmatprep.subr.bf16.mxu1 %v7475_v18  ;;  %v4468_v40 = vld [vmem:[#allocation6 + $0x1d08] sm:$0xff]  ;;  %v4475_v18 = vld [vmem:[#allocation6 + $0x1d40] sm:$0xff]  ;;  %v7555_v41 = vpack.c.bf16 %v4697_v2, %v4690_v35 }
 0x581   : > { %7540 = vmatprep.subr.bf16.mxu0 %v7539_v32  ;;  %v4689_v32 = vld [vmem:[#allocation6 + $0x23f0] sm:$0xff]  ;;  %v7619_v47 = vpack.c.bf16 %v4475_v18, %v4468_v40  ;;  %v4516_v2 = vld [vmem:[#allocation6 + $0x1e88] sm:$0xff]  ;;  %v4746_v40 = vld [vmem:[#allocation6 + $0x25b8] sm:$0xff] }
 0x582   : > { %v7557_v59 = vpack.c.bf16 %v4696_v26, %v4689_v32  ;;  %v4753_v18 = vld [vmem:[#allocation6 + $0x25f0] sm:$0xff]  ;;  %v7633_v32 = vpack.c.bf16 %v4516_v2, %v4509_v9  ;;  %v4787_v9 = vld [vmem:[#allocation6 + $0x2700] sm:$0xff] }
 0x583   : > { %7478 = vmatpush1.bf16.msra.mxu1 %v7477_v27  ;;  %v4711_v27 = vld [vmem:[#allocation6 + $0x24a0] sm:$0xff]  ;;  %v7571_v26 = vpack.c.bf16 %v4753_v18, %v4746_v40  ;;  %v4565_v2 = vld [vmem:[#allocation6 + $0x2010] sm:$0xff]  ;;  %v4572_v18 = vld [vmem:[#allocation6 + $0x2048] sm:$0xff] }
 0x584   : > { %7542 = vmatpush1.bf16.msra.mxu0 %v7541_v37  ;;  %7480 = vmatprep.subr.bf16.mxu1 %v7479_v39  ;;  %v4482_v37 = vld [vmem:[#allocation6 + $0x1d78] sm:$0xff]  ;;  %v4489_v39 = vld [vmem:[#allocation6 + $0x1db0] sm:$0xff]  ;;  %v7559_v61 = vpack.c.bf16 %v4711_v27, %v4704_v57 }
 0x585   : > { %7544 = vmatprep.subr.bf16.mxu0 %v7543_v46  ;;  %v4703_v46 = vld [vmem:[#allocation6 + $0x2460] sm:$0xff]  ;;  %v7623_v45 = vpack.c.bf16 %v4489_v39, %v4482_v37  ;;  %v4530_v27 = vld [vmem:[#allocation6 + $0x1ef8] sm:$0xff]  ;;  %v4760_v37 = vld [vmem:[#allocation6 + $0x2628] sm:$0xff] }
 0x586   : > { %v7561_v5 = vpack.c.bf16 %v4710_v34, %v4703_v46  ;;  %v4767_v39 = vld [vmem:[#allocation6 + $0x2660] sm:$0xff]  ;;  %v7637_v46 = vpack.c.bf16 %v4530_v27, %v4523_v63  ;;  %v4801_v63 = vld [vmem:[#allocation6 + $0x2770] sm:$0xff] }
 0x587   : > { %7482 = vmatpush1.bf16.msra.mxu1 %v7481_v10  ;;  %v4725_v10 = vld [vmem:[#allocation6 + $0x2510] sm:$0xff]  ;;  %v7575_v34 = vpack.c.bf16 %v4767_v39, %v4760_v37  ;;  %v4579_v27 = vld [vmem:[#allocation6 + $0x2080] sm:$0xff]  ;;  %v4586_v39 = vld [vmem:[#allocation6 + $0x20b8] sm:$0xff] }
 0x588   : > { %7546 = vmatpush1.bf16.msra.mxu0 %v7545_v17  ;;  %7612 = vmatprep.subr.bf16.mxu1 %v7611_v20  ;;  %v4496_v17 = vld [vmem:[#allocation6 + $0x1de8] sm:$0xff]  ;;  %v4503_v20 = vld [vmem:[#allocation6 + $0x1e20] sm:$0xff]  ;;  %v7563_v15 = vpack.c.bf16 %v4725_v10, %v4718_v33 }
 0x589   : > { %7548 = vmatprep.subr.bf16.mxu0 %v7547_v38  ;;  %v7625_v38 = vpack.c.bf16 %v4488_v22, %v4481_v12  ;;  %v7627_v4 = vpack.c.bf16 %v4503_v20, %v4496_v17  ;;  %v4759_v12 = vld [vmem:[#allocation6 + $0x2620] sm:$0xff]  ;;  %v4537_v22 = vld [vmem:[#allocation6 + $0x1f30] sm:$0xff]  ;;  %v4544_v10 = vld [vmem:[#allocation6 + $0x1f68] sm:$0xff] }
 0x58a   : > { %5045 = vmatmul.mubr.f32.vlgmr.msra.gmra.mrb[12].mxu1 %v9338_v43  ;;  %v4774_v17 = vld [vmem:[#allocation6 + $0x2698] sm:$0xff]  ;;  %v4781_v20 = vld [vmem:[#allocation6 + $0x26d0] sm:$0xff] }
 0x58b   : > { %5122 = vmatmul.mubr.f32.vlgmr.msra.gmra.mrb[32].mxu0 %v9307_v51  ;;  %5050 = vmatprep.mubr.f32.mxu1 %v9310_v13 }
 0x58c   : > { %5127 = vmatprep.mubr.f32.mxu0 %v9262_v62  ;;  %7550 = vmatpush1.bf16.msra.mxu0 %v7549_v1  ;;  %v4510_v1 = vld [vmem:[#allocation6 + $0x1e58] sm:$0xff] }
 0x58d   : > { %7614 = vmatpush1.bf16.msra.mxu1 %v7613_v60  ;;  %7552 = vmatprep.subr.bf16.mxu0 %v7551_v53  ;;  %v4517_v60 = vld [vmem:[#allocation6 + $0x1e90] sm:$0xff]  ;;  %v7565_v53 = vpack.c.bf16 %v4724_v24, %v4717_v50  ;;  %v7641_v50 = vpack.c.bf16 %v4544_v10, %v4537_v22  ;;  %v7579_v24 = vpack.c.bf16 %v4781_v20, %v4774_v17  ;;  %v4815_v22 = vld [vmem:[#allocation6 + $0x27e0] sm:$0xff]  ;;  %v4600_v20 = vld [vmem:[#allocation6 + $0x2128] sm:$0xff] }
 0x58e   : > { %5051 = vmatmul.mubr.f32.gmra.mrb[14].mxu1 %v9334_v55  ;;  %7616 = vmatprep.subr.bf16.mxu1 %v7615_v52  ;;  %v4738_v52 = vld [vmem:[#allocation6 + $0x2578] sm:$0xff]  ;;  %v7631_v35 = vpack.c.bf16 %v4517_v60, %v4510_v1  ;;  %v4788_v1 = vld [vmem:[#allocation6 + $0x2708] sm:$0xff]  ;;  %v4795_v60 = vld [vmem:[#allocation6 + $0x2740] sm:$0xff] }
 0x58f   : > { %5128 = vmatmul.mubr.f32.gmra.mrb[34].mxu0 %v9299_v14  ;;  %5275 = vmatprep.mubr.f32.mxu1 %v9281_v44  ;;  %v4593_v10 = vld [vmem:[#allocation6 + $0x20f0] sm:$0xff] }
 0x590   : > { %7554 = vmatpush1.bf16.msra.mxu0 %v7553_v54  ;;  %5198 = vmatprep.mubr.f32.mxu0 %v9322_v58  ;;  %v4524_v54 = vld [vmem:[#allocation6 + $0x1ec8] sm:$0xff] }
 0x591   : > { %7618 = vmatpush1.bf16.msra.mxu1 %v7617_v56  ;;  %7556 = vmatprep.subr.bf16.mxu0 %v7555_v41  ;;  %v4531_v56 = vld [vmem:[#allocation6 + $0x1f00] sm:$0xff]  ;;  %v7569_v41 = vpack.c.bf16 %v4738_v52, %v4731_v25  ;;  %v7645_v25 = vpack.c.bf16 %v4558_v7, %v4551_v28  ;;  %v7583_v52 = vpack.c.bf16 %v4795_v60, %v4788_v1  ;;  %v4829_v28 = vld [vmem:[#allocation6 + $0x2850] sm:$0xff]  ;;  %v4614_v60 = vld [vmem:[#allocation6 + $0x2198] sm:$0xff] }
 0x592   : > { %7620 = vmatprep.subr.bf16.mxu1 %v7619_v47  ;;  %v4752_v47 = vld [vmem:[#allocation6 + $0x25e8] sm:$0xff]  ;;  %v7635_v57 = vpack.c.bf16 %v4531_v56, %v4524_v54  ;;  %v4802_v54 = vld [vmem:[#allocation6 + $0x2778] sm:$0xff]  ;;  %v4809_v56 = vld [vmem:[#allocation6 + $0x27b0] sm:$0xff] }
 0x593   : > { %v4607_v7 = vld [vmem:[#allocation6 + $0x2160] sm:$0xff] }
 0x594   : > { %7558 = vmatpush1.bf16.msra.mxu0 %v7557_v59  ;;  %v4538_v59 = vld [vmem:[#allocation6 + $0x1f38] sm:$0xff] }
 0x595   : > { %7622 = vmatpush1.bf16.msra.mxu1 %v7621_v49  ;;  %7560 = vmatprep.subr.bf16.mxu0 %v7559_v61  ;;  %v4545_v49 = vld [vmem:[#allocation6 + $0x1f70] sm:$0xff]  ;;  %v7573_v61 = vpack.c.bf16 %v4752_v47, %v4745_v42  ;;  %v7649_v42 = vpack.c.bf16 %v4572_v18, %v4565_v2  ;;  %v7587_v47 = vpack.c.bf16 %v4809_v56, %v4802_v54  ;;  %v4843_v2 = vld [vmem:[#allocation6 + $0x28c0] sm:$0xff]  ;;  %v4628_v56 = vld [vmem:[#allocation6 + $0x2208] sm:$0xff] }
 0x596   : > { %7624 = vmatprep.subr.bf16.mxu1 %v7623_v45  ;;  %v4766_v45 = vld [vmem:[#allocation6 + $0x2658] sm:$0xff]  ;;  %v7639_v33 = vpack.c.bf16 %v4545_v49, %v4538_v59  ;;  %v4816_v59 = vld [vmem:[#allocation6 + $0x27e8] sm:$0xff]  ;;  %v4823_v49 = vld [vmem:[#allocation6 + $0x2820] sm:$0xff] }
 0x597   : > { %v4621_v18 = vld [vmem:[#allocation6 + $0x21d0] sm:$0xff] }
 0x598   : > { %7562 = vmatpush1.bf16.msra.mxu0 %v7561_v5  ;;  %v4552_v5 = vld [vmem:[#allocation6 + $0x1fa8] sm:$0xff] }
 0x599   : > { %7626 = vmatpush1.bf16.msra.mxu1 %v7625_v38  ;;  %7564 = vmatprep.subr.bf16.mxu0 %v7563_v15  ;;  %v4559_v38 = vld [vmem:[#allocation6 + $0x1fe0] sm:$0xff]  ;;  %v7577_v15 = vpack.c.bf16 %v4766_v45, %v4759_v12  ;;  %v7653_v12 = vpack.c.bf16 %v4586_v39, %v4579_v27  ;;  %v7591_v45 = vpack.c.bf16 %v4823_v49, %v4816_v59  ;;  %v4857_v27 = vld [vmem:[#allocation6 + $0x2930] sm:$0xff]  ;;  %v4642_v49 = vld [vmem:[#allocation6 + $0x2278] sm:$0xff] }
 0x59a   : > { %7628 = vmatprep.subr.bf16.mxu1 %v7627_v4  ;;  %v4780_v4 = vld [vmem:[#allocation6 + $0x26c8] sm:$0xff]  ;;  %v7643_v16 = vpack.c.bf16 %v4559_v38, %v4552_v5  ;;  %v4830_v5 = vld [vmem:[#allocation6 + $0x2858] sm:$0xff]  ;;  %v4837_v38 = vld [vmem:[#allocation6 + $0x2890] sm:$0xff] }
 0x59b   : > { %v4635_v39 = vld [vmem:[#allocation6 + $0x2240] sm:$0xff] }
 0x59c   : > { %7566 = vmatpush1.bf16.msra.mxu0 %v7565_v53  ;;  %v4566_v53 = vld [vmem:[#allocation6 + $0x2018] sm:$0xff] }
 0x59d   : > { %7630 = vmatpush1.bf16.msra.mxu1 %v7629_v21  ;;  %7568 = vmatprep.subr.bf16.mxu0 %v7567_v6  ;;  %v4573_v21 = vld [vmem:[#allocation6 + $0x2050] sm:$0xff]  ;;  %v7581_v6 = vpack.c.bf16 %v4780_v4, %v4773_v19  ;;  %v7657_v19 = vpack.c.bf16 %v4600_v20, %v4593_v10  ;;  %v7595_v4 = vpack.c.bf16 %v4837_v38, %v4830_v5  ;;  %v4871_v10 = vld [vmem:[#allocation6 + $0x29a0] sm:$0xff]  ;;  %v4656_v38 = vld [vmem:[#allocation6 + $0x22e8] sm:$0xff] }
 0x59e   : > { %7632 = vmatprep.subr.bf16.mxu1 %v7631_v35  ;;  %v4794_v35 = vld [vmem:[#allocation6 + $0x2738] sm:$0xff]  ;;  %v7647_v40 = vpack.c.bf16 %v4573_v21, %v4566_v53  ;;  %v4844_v53 = vld [vmem:[#allocation6 + $0x28c8] sm:$0xff]  ;;  %v4851_v21 = vld [vmem:[#allocation6 + $0x2900] sm:$0xff] }
 0x59f   : > { %v4649_v20 = vld [vmem:[#allocation6 + $0x22b0] sm:$0xff] }
 0x5a0   : > { %7570 = vmatpush1.bf16.msra.mxu0 %v7569_v41  ;;  %v4580_v41 = vld [vmem:[#allocation6 + $0x2088] sm:$0xff] }
 0x5a1   : > { %7634 = vmatpush1.bf16.msra.mxu1 %v7633_v32  ;;  %7572 = vmatprep.subr.bf16.mxu0 %v7571_v26  ;;  %v4587_v32 = vld [vmem:[#allocation6 + $0x20c0] sm:$0xff]  ;;  %v7585_v26 = vpack.c.bf16 %v4794_v35, %v4787_v9  ;;  %v7661_v9 = vpack.c.bf16 %v4614_v60, %v4607_v7  ;;  %v7599_v35 = vpack.c.bf16 %v4851_v21, %v4844_v53  ;;  %v4670_v60 = vld [vmem:[#allocation6 + $0x2358] sm:$0xff]  ;;  %v4441_v53 = vld [vmem:[#allocation6 + $0x1c30] sm:$0xff] }
 0x5a2   : > { %7636 = vmatprep.subr.bf16.mxu1 %v7635_v57  ;;  %v4808_v57 = vld [vmem:[#allocation6 + $0x27a8] sm:$0xff]  ;;  %v7651_v37 = vpack.c.bf16 %v4587_v32, %v4580_v41  ;;  %v4858_v41 = vld [vmem:[#allocation6 + $0x2938] sm:$0xff]  ;;  %v4865_v32 = vld [vmem:[#allocation6 + $0x2970] sm:$0xff] }
 0x5a3   : > { %v4448_v21 = vld [vmem:[#allocation6 + $0x1c68] sm:$0xff] }
 0x5a4   : > { %7574 = vmatpush1.bf16.msra.mxu0 %v7573_v61  ;;  %v4594_v61 = vld [vmem:[#allocation6 + $0x20f8] sm:$0xff] }
 0x5a5   : > { %7638 = vmatpush1.bf16.msra.mxu1 %v7637_v46  ;;  %7576 = vmatprep.subr.bf16.mxu0 %v7575_v34  ;;  %v4601_v46 = vld [vmem:[#allocation6 + $0x2130] sm:$0xff]  ;;  %v7589_v34 = vpack.c.bf16 %v4808_v57, %v4801_v63  ;;  %v7665_v63 = vpack.c.bf16 %v4628_v56, %v4621_v18  ;;  %v7603_v57 = vpack.c.bf16 %v4865_v32, %v4858_v41  ;;  %v4455_v56 = vld [vmem:[#allocation6 + $0x1ca0] sm:$0xff]  ;;  %v4462_v32 = vld [vmem:[#allocation6 + $0x1cd8] sm:$0xff] }
 0x5a6   : > { %7640 = vmatprep.subr.bf16.mxu1 %v7639_v33  ;;  %v4822_v33 = vld [vmem:[#allocation6 + $0x2818] sm:$0xff]  ;;  %v7655_v17 = vpack.c.bf16 %v4601_v46, %v4594_v61  ;;  %v4872_v61 = vld [vmem:[#allocation6 + $0x29a8] sm:$0xff]  ;;  %v4879_v46 = vld [vmem:[#allocation6 + $0x29e0] sm:$0xff] }
 0x5a7   : > { %v4677_v18 = vld [vmem:[#allocation6 + $0x2390] sm:$0xff] }
 0x5a8   : > { %7578 = vmatpush1.bf16.msra.mxu0 %v7577_v15  ;;  %v4608_v15 = vld [vmem:[#allocation6 + $0x2168] sm:$0xff] }
 0x5a9   : > { %7642 = vmatpush1.bf16.msra.mxu1 %v7641_v50  ;;  %7580 = vmatprep.subr.bf16.mxu0 %v7579_v24  ;;  %v4615_v50 = vld [vmem:[#allocation6 + $0x21a0] sm:$0xff]  ;;  %v7593_v24 = vpack.c.bf16 %v4822_v33, %v4815_v22  ;;  %v7669_v22 = vpack.c.bf16 %v4642_v49, %v4635_v39  ;;  %v7607_v33 = vpack.c.bf16 %v4879_v46, %v4872_v61  ;;  %v4469_v49 = vld [vmem:[#allocation6 + $0x1d10] sm:$0xff]  ;;  %v4476_v46 = vld [vmem:[#allocation6 + $0x1d48] sm:$0xff] }
 0x5aa   : > { %7644 = vmatprep.subr.bf16.mxu1 %v7643_v16  ;;  %v4836_v16 = vld [vmem:[#allocation6 + $0x2888] sm:$0xff]  ;;  %v7659_v1 = vpack.c.bf16 %v4615_v50, %v4608_v15  ;;  %v4553_v15 = vld [vmem:[#allocation6 + $0x1fb0] sm:$0xff]  ;;  %v4691_v39 = vld [vmem:[#allocation6 + $0x2400] sm:$0xff] }
 0x5ab   : > { %v4560_v50 = vld [vmem:[#allocation6 + $0x1fe8] sm:$0xff] }
 0x5ac   : > { %7582 = vmatpush1.bf16.msra.mxu0 %v7581_v6  ;;  %v4622_v6 = vld [vmem:[#allocation6 + $0x21d8] sm:$0xff] }
 0x5ad   : > { %7646 = vmatpush1.bf16.msra.mxu1 %v7645_v25  ;;  %7584 = vmatprep.subr.bf16.mxu0 %v7583_v52  ;;  %v4629_v25 = vld [vmem:[#allocation6 + $0x2210] sm:$0xff]  ;;  %v7597_v52 = vpack.c.bf16 %v4836_v16, %v4829_v28  ;;  %v7673_v28 = vpack.c.bf16 %v4656_v38, %v4649_v20  ;;  %v7739_v16 = vpack.c.bf16 %v4560_v50, %v4553_v15  ;;  %v4483_v38 = vld [vmem:[#allocation6 + $0x1d80] sm:$0xff]  ;;  %v4490_v50 = vld [vmem:[#allocation6 + $0x1db8] sm:$0xff] }
 0x5ae   : > { %7648 = vmatprep.subr.bf16.mxu1 %v7647_v40  ;;  %v4850_v40 = vld [vmem:[#allocation6 + $0x28f8] sm:$0xff]  ;;  %v7663_v54 = vpack.c.bf16 %v4629_v25, %v4622_v6  ;;  %v4685_v25 = vld [vmem:[#allocation6 + $0x23d0] sm:$0xff] }
 0x5af   : > { %v4678_v6 = vld [vmem:[#allocation6 + $0x2398] sm:$0xff]  ;;  %v4705_v20 = vld [vmem:[#allocation6 + $0x2470] sm:$0xff] }
 0x5b0   : > { %7586 = vmatpush1.bf16.msra.mxu0 %v7585_v26  ;;  %v4636_v26 = vld [vmem:[#allocation6 + $0x2248] sm:$0xff] }
 0x5b1   : > { %7650 = vmatpush1.bf16.msra.mxu1 %v7649_v42  ;;  %7588 = vmatprep.subr.bf16.mxu0 %v7587_v47  ;;  %v4643_v42 = vld [vmem:[#allocation6 + $0x2280] sm:$0xff]  ;;  %v7601_v47 = vpack.c.bf16 %v4850_v40, %v4843_v2  ;;  %v7741_v2 = vpack.c.bf16 %v4448_v21, %v4441_v53  ;;  %v7679_v40 = vpack.c.bf16 %v4685_v25, %v4678_v6  ;;  %v4497_v53 = vld [vmem:[#allocation6 + $0x1df0] sm:$0xff]  ;;  %v4504_v6 = vld [vmem:[#allocation6 + $0x1e28] sm:$0xff] }
 0x5b2   : > { %7652 = vmatprep.subr.bf16.mxu1 %v7651_v37  ;;  %v4864_v37 = vld [vmem:[#allocation6 + $0x2968] sm:$0xff]  ;;  %v7667_v59 = vpack.c.bf16 %v4643_v42, %v4636_v26  ;;  %v4699_v42 = vld [vmem:[#allocation6 + $0x2440] sm:$0xff]  ;;  %v4734_v25 = vld [vmem:[#allocation6 + $0x2558] sm:$0xff] }
 0x5b3   : > { %v4692_v26 = vld [vmem:[#allocation6 + $0x2408] sm:$0xff] }
 0x5b4   : > { %7590 = vmatpush1.bf16.msra.mxu0 %v7589_v34  ;;  %v4650_v34 = vld [vmem:[#allocation6 + $0x22b8] sm:$0xff] }
 0x5b5   : > { %7654 = vmatpush1.bf16.msra.mxu1 %v7653_v12  ;;  %7592 = vmatprep.subr.bf16.mxu0 %v7591_v45  ;;  %v4657_v12 = vld [vmem:[#allocation6 + $0x22f0] sm:$0xff]  ;;  %v7605_v45 = vpack.c.bf16 %v4864_v37, %v4857_v27  ;;  %v7745_v27 = vpack.c.bf16 %v4462_v32, %v4455_v56  ;;  %v7683_v37 = vpack.c.bf16 %v4699_v42, %v4692_v26  ;;  %v4740_v56 = vld [vmem:[#allocation6 + $0x2588] sm:$0xff]  ;;  %v4518_v26 = vld [vmem:[#allocation6 + $0x1e98] sm:$0xff] }
 0x5b6   : > { %7656 = vmatprep.subr.bf16.mxu1 %v7655_v17  ;;  %v4878_v17 = vld [vmem:[#allocation6 + $0x29d8] sm:$0xff]  ;;  %v7671_v5 = vpack.c.bf16 %v4657_v12, %v4650_v34  ;;  %v4713_v12 = vld [vmem:[#allocation6 + $0x24b0] sm:$0xff]  ;;  %v4748_v42 = vld [vmem:[#allocation6 + $0x25c8] sm:$0xff] }
 0x5b7   : > { %v4706_v34 = vld [vmem:[#allocation6 + $0x2478] sm:$0xff] }
 0x5b8   : > { %7594 = vmatpush1.bf16.msra.mxu0 %v7593_v24  ;;  %v4664_v24 = vld [vmem:[#allocation6 + $0x2328] sm:$0xff] }
 0x5b9   : > { %7658 = vmatpush1.bf16.msra.mxu1 %v7657_v19  ;;  %7596 = vmatprep.subr.bf16.mxu0 %v7595_v4  ;;  %v4671_v19 = vld [vmem:[#allocation6 + $0x2360] sm:$0xff]  ;;  %v7609_v4 = vpack.c.bf16 %v4878_v17, %v4871_v10  ;;  %v7749_v10 = vpack.c.bf16 %v4476_v46, %v4469_v49  ;;  %v7687_v17 = vpack.c.bf16 %v4713_v12, %v4706_v34  ;;  %v4754_v49 = vld [vmem:[#allocation6 + $0x25f8] sm:$0xff]  ;;  %v4532_v34 = vld [vmem:[#allocation6 + $0x1f08] sm:$0xff] }
 0x5ba   : > { %7660 = vmatprep.subr.bf16.mxu1 %v7659_v1  ;;  %v7675_v7 = vpack.c.bf16 %v4671_v19, %v4664_v24  ;;  %v4663_v1 = vld [vmem:[#allocation6 + $0x2320] sm:$0xff]  ;;  %v4720_v24 = vld [vmem:[#allocation6 + $0x24e8] sm:$0xff]  ;;  %v4762_v12 = vld [vmem:[#allocation6 + $0x2638] sm:$0xff] }
 0x5bb   : > { %v4727_v19 = vld [vmem:[#allocation6 + $0x2520] sm:$0xff] }
 0x5bc   : > { %7598 = vmatpush1.bf16.msra.mxu0 %v7597_v52  ;;  %v4567_v52 = vld [vmem:[#allocation6 + $0x2020] sm:$0xff] }
 0x5bd   : > { %7662 = vmatpush1.bf16.msra.mxu1 %v7661_v9  ;;  %7600 = vmatprep.subr.bf16.mxu0 %v7599_v35  ;;  %v4574_v9 = vld [vmem:[#allocation6 + $0x2058] sm:$0xff]  ;;  %v7677_v35 = vpack.c.bf16 %v4670_v60, %v4663_v1  ;;  %v4719_v1 = vld [vmem:[#allocation6 + $0x24e0] sm:$0xff] }
 0x5be   : > { %7664 = vmatprep.subr.bf16.mxu1 %v7663_v54  ;;  %v4684_v54 = vld [vmem:[#allocation6 + $0x23c8] sm:$0xff]  ;;  %v7743_v41 = vpack.c.bf16 %v4574_v9, %v4567_v52  ;;  %v4726_v60 = vld [vmem:[#allocation6 + $0x2518] sm:$0xff]  ;;  %v4741_v52 = vld [vmem:[#allocation6 + $0x2590] sm:$0xff] }
 0x5bf   : > { %v4623_v9 = vld [vmem:[#allocation6 + $0x21e0] sm:$0xff] }
 0x5c0   : > { %7602 = vmatpush1.bf16.msra.mxu0 %v7601_v47  ;;  %v4581_v47 = vld [vmem:[#allocation6 + $0x2090] sm:$0xff] }
 0x5c1   : > { %7666 = vmatpush1.bf16.msra.mxu1 %v7665_v63  ;;  %7604 = vmatprep.subr.bf16.mxu0 %v7603_v57  ;;  %v4588_v63 = vld [vmem:[#allocation6 + $0x20c8] sm:$0xff]  ;;  %v7681_v57 = vpack.c.bf16 %v4684_v54, %v4677_v18  ;;  %v7695_v18 = vpack.c.bf16 %v4741_v52, %v4734_v25  ;;  %v4733_v54 = vld [vmem:[#allocation6 + $0x2550] sm:$0xff]  ;;  %v4790_v52 = vld [vmem:[#allocation6 + $0x2718] sm:$0xff] }
 0x5c2   : > { %7668 = vmatprep.subr.bf16.mxu1 %v7667_v59  ;;  %v4698_v59 = vld [vmem:[#allocation6 + $0x2438] sm:$0xff]  ;;  %v7747_v61 = vpack.c.bf16 %v4588_v63, %v4581_v47  ;;  %v4755_v47 = vld [vmem:[#allocation6 + $0x2600] sm:$0xff]  ;;  %v4637_v63 = vld [vmem:[#allocation6 + $0x2250] sm:$0xff] }
 0x5c3   : > { %v4672_v25 = vld [vmem:[#allocation6 + $0x2368] sm:$0xff] }
 0x5c4   : > { %7606 = vmatpush1.bf16.msra.mxu0 %v7605_v45  ;;  %v4595_v45 = vld [vmem:[#allocation6 + $0x2100] sm:$0xff] }
 0x5c5   : > { %7670 = vmatpush1.bf16.msra.mxu1 %v7669_v22  ;;  %7608 = vmatprep.subr.bf16.mxu0 %v7607_v33  ;;  %v4602_v22 = vld [vmem:[#allocation6 + $0x2138] sm:$0xff]  ;;  %v7685_v33 = vpack.c.bf16 %v4698_v59, %v4691_v39  ;;  %v7699_v39 = vpack.c.bf16 %v4755_v47, %v4748_v42  ;;  %v4747_v59 = vld [vmem:[#allocation6 + $0x25c0] sm:$0xff]  ;;  %v4804_v47 = vld [vmem:[#allocation6 + $0x2788] sm:$0xff] }
 0x5c6   : > { %7672 = vmatprep.subr.bf16.mxu1 %v7671_v5  ;;  %v4712_v5 = vld [vmem:[#allocation6 + $0x24a8] sm:$0xff]  ;;  %v7751_v15 = vpack.c.bf16 %v4602_v22, %v4595_v45  ;;  %v4769_v45 = vld [vmem:[#allocation6 + $0x2670] sm:$0xff]  ;;  %v4651_v22 = vld [vmem:[#allocation6 + $0x22c0] sm:$0xff] }
 0x5c7   : > { %v4686_v42 = vld [vmem:[#allocation6 + $0x23d8] sm:$0xff] }
 0x5c8   : > { %7610 = vmatpush1.bf16.msra.mxu0 %v7609_v4  ;;  %v4609_v4 = vld [vmem:[#allocation6 + $0x2170] sm:$0xff] }
 0x5c9   : > { %7674 = vmatpush1.bf16.msra.mxu1 %v7673_v28  ;;  %7740 = vmatprep.subr.bf16.mxu0 %v7739_v16  ;;  %v7689_v28 = vpack.c.bf16 %v4712_v5, %v4705_v20  ;;  %v7753_v16 = vpack.c.bf16 %v4490_v50, %v4483_v38  ;;  %v7703_v20 = vpack.c.bf16 %v4769_v45, %v4762_v12  ;;  %v4761_v5 = vld [vmem:[#allocation6 + $0x2630] sm:$0xff]  ;;  %v4768_v38 = vld [vmem:[#allocation6 + $0x2668] sm:$0xff]  ;;  %v4818_v45 = vld [vmem:[#allocation6 + $0x27f8] sm:$0xff] }
 0x5ca   : > { %7676 = vmatprep.subr.bf16.mxu1 %v7675_v7  ;;  %v7691_v7 = vpack.c.bf16 %v4727_v19, %v4720_v24  ;;  %v4546_v24 = vld [vmem:[#allocation6 + $0x1f78] sm:$0xff]  ;;  %v4776_v19 = vld [vmem:[#allocation6 + $0x26a8] sm:$0xff] }
 0x5cb   : > { %5199 = vmatmul.mubr.f32.vlgmr.msra.gmra.mrb[32].mxu0 %v9338_v43  ;;  %v4700_v12 = vld [vmem:[#allocation6 + $0x2448] sm:$0xff] }
 0x5cc   : > { %5276 = vmatmul.mubr.f32.vlgmr.msra.gmra.mrb[16].mxu1 %v9307_v51  ;;  %5204 = vmatprep.mubr.f32.mxu0 %v9310_v13 }
 0x5cd   : > { %5281 = vmatprep.mubr.f32.mxu1 %v9262_v62  ;;  %7678 = vmatpush1.bf16.msra.mxu1 %v7677_v35  ;;  %v4630_v35 = vld [vmem:[#allocation6 + $0x2218] sm:$0xff] }
 0x5ce   : > { %7742 = vmatpush3.bf16.msra.mxu0 %v7741_v2  ;;  %7680 = vmatprep.subr.bf16.mxu1 %v7679_v40  ;;  %v7693_v2 = vpack.c.bf16 %v4726_v60, %v4719_v1  ;;  %v7757_v40 = vpack.c.bf16 %v4504_v6, %v4497_v53  ;;  %v7759_v32 = vpack.c.bf16 %v4630_v35, %v4623_v9  ;;  %v4775_v60 = vld [vmem:[#allocation6 + $0x26a0] sm:$0xff]  ;;  %v4782_v53 = vld [vmem:[#allocation6 + $0x26d8] sm:$0xff]  ;;  %v4665_v6 = vld [vmem:[#allocation6 + $0x2330] sm:$0xff] }
 0x5cf   : > { %5205 = vmatmul.mubr.f32.gmra.mrb[34].mxu0 %v9334_v55  ;;  %7744 = vmatprep.subr.bf16.mxu0 %v7743_v41  ;;  %v4511_v41 = vld [vmem:[#allocation6 + $0x1e60] sm:$0xff]  ;;  %v4797_v9 = vld [vmem:[#allocation6 + $0x2750] sm:$0xff] }
 0x5d0   : > { %5282 = vmatmul.mubr.f32.gmra.mrb[18].mxu1 %v9299_v14  ;;  %5429 = vmatprep.mubr.f32.mxu0 %v9281_v44  ;;  %v4616_v44 = vld [vmem:[#allocation6 + $0x21a8] sm:$0xff]  ;;  %v4791_v35 = vld [vmem:[#allocation6 + $0x2720] sm:$0xff] }
 0x5d1   : > { %7682 = vmatpush1.bf16.msra.mxu1 %v7681_v57  ;;  %5352 = vmatprep.mubr.f32.mxu1 %v9322_v58  ;;  %v7755_v21 = vpack.c.bf16 %v4616_v44, %v4609_v4  ;;  %v4644_v57 = vld [vmem:[#allocation6 + $0x2288] sm:$0xff]  ;;  %v4783_v4 = vld [vmem:[#allocation6 + $0x26e0] sm:$0xff]  ;;  %v4777_v44 = vld [vmem:[#allocation6 + $0x26b0] sm:$0xff] }
 0x5d2   : > { %7746 = vmatpush3.bf16.msra.mxu0 %v7745_v27  ;;  %7684 = vmatprep.subr.bf16.mxu1 %v7683_v37  ;;  %v7697_v27 = vpack.c.bf16 %v4740_v56, %v4733_v54  ;;  %v7761_v37 = vpack.c.bf16 %v4518_v26, %v4511_v41  ;;  %v7763_v46 = vpack.c.bf16 %v4644_v57, %v4637_v63  ;;  %v4789_v54 = vld [vmem:[#allocation6 + $0x2710] sm:$0xff]  ;;  %v4796_v56 = vld [vmem:[#allocation6 + $0x2748] sm:$0xff]  ;;  %v4679_v26 = vld [vmem:[#allocation6 + $0x23a0] sm:$0xff] }
 0x5d3   : > { %7748 = vmatprep.subr.bf16.mxu0 %v7747_v61  ;;  %v4525_v61 = vld [vmem:[#allocation6 + $0x1ed0] sm:$0xff]  ;;  %v7707_v1 = vpack.c.bf16 %v4783_v4, %v4776_v19  ;;  %v7711_v41 = vpack.c.bf16 %v4797_v9, %v4790_v52  ;;  %v4811_v63 = vld [vmem:[#allocation6 + $0x27c0] sm:$0xff]  ;;  %v4854_v52 = vld [vmem:[#allocation6 + $0x2918] sm:$0xff] }
 0x5d4   : > { %v4805_v57 = vld [vmem:[#allocation6 + $0x2790] sm:$0xff]  ;;  %v4839_v19 = vld [vmem:[#allocation6 + $0x28a0] sm:$0xff] }
 0x5d5   : > { %7686 = vmatpush1.bf16.msra.mxu1 %v7685_v33  ;;  %v4658_v33 = vld [vmem:[#allocation6 + $0x22f8] sm:$0xff]  ;;  %v4833_v4 = vld [vmem:[#allocation6 + $0x2870] sm:$0xff] }
 0x5d6   : > { %7750 = vmatpush3.bf16.msra.mxu0 %v7749_v10  ;;  %7688 = vmatprep.subr.bf16.mxu1 %v7687_v17  ;;  %v7701_v10 = vpack.c.bf16 %v4754_v49, %v4747_v59  ;;  %v7765_v17 = vpack.c.bf16 %v4532_v34, %v4525_v61  ;;  %v7767_v50 = vpack.c.bf16 %v4658_v33, %v4651_v22  ;;  %v4803_v59 = vld [vmem:[#allocation6 + $0x2780] sm:$0xff]  ;;  %v4810_v49 = vld [vmem:[#allocation6 + $0x27b8] sm:$0xff]  ;;  %v4693_v61 = vld [vmem:[#allocation6 + $0x2410] sm:$0xff] }
 0x5d7   : > { %7752 = vmatprep.subr.bf16.mxu0 %v7751_v15  ;;  %v4539_v15 = vld [vmem:[#allocation6 + $0x1f40] sm:$0xff]  ;;  %v4825_v22 = vld [vmem:[#allocation6 + $0x2830] sm:$0xff] }
 0x5d8   : > { %v4819_v33 = vld [vmem:[#allocation6 + $0x2800] sm:$0xff] }
 0x5d9   : > { %7690 = vmatpush1.bf16.msra.mxu1 %v7689_v28  ;;  %v4784_v28 = vld [vmem:[#allocation6 + $0x26e8] sm:$0xff] }
 0x5da   : > { %7754 = vmatpush3.bf16.msra.mxu0 %v7753_v16  ;;  %7692 = vmatprep.subr.bf16.mxu1 %v7691_v7  ;;  %v7705_v16 = vpack.c.bf16 %v4768_v38, %v4761_v5  ;;  %v7769_v7 = vpack.c.bf16 %v4546_v24, %v4539_v15  ;;  %v4824_v5 = vld [vmem:[#allocation6 + $0x2828] sm:$0xff]  ;;  %v4707_v38 = vld [vmem:[#allocation6 + $0x2480] sm:$0xff] }
 0x5db   : > { %7756 = vmatprep.subr.bf16.mxu0 %v7755_v21  ;;  %v7771_v21 = vpack.c.bf16 %v4784_v28, %v4777_v44  ;;  %v4832_v24 = vld [vmem:[#allocation6 + $0x2868] sm:$0xff] }
 0x5dc   : > { %v4840_v44 = vld [vmem:[#allocation6 + $0x28a8] sm:$0xff] }
 0x5dd   : > { %7694 = vmatpush1.bf16.msra.mxu1 %v7693_v2  ;;  %v4798_v2 = vld [vmem:[#allocation6 + $0x2758] sm:$0xff] }
 0x5de   : > { %7758 = vmatpush3.bf16.msra.mxu0 %v7757_v40  ;;  %7696 = vmatprep.subr.bf16.mxu1 %v7695_v18  ;;  %v7709_v40 = vpack.c.bf16 %v4782_v53, %v4775_v60  ;;  %v7773_v18 = vpack.c.bf16 %v4672_v25, %v4665_v6  ;;  %v7787_v60 = vpack.c.bf16 %v4840_v44, %v4833_v4  ;;  %v4728_v53 = vld [vmem:[#allocation6 + $0x2528] sm:$0xff]  ;;  %v4853_v6 = vld [vmem:[#allocation6 + $0x2910] sm:$0xff]  ;;  %v4847_v25 = vld [vmem:[#allocation6 + $0x28e0] sm:$0xff] }
 0x5df   : > { %7760 = vmatprep.subr.bf16.mxu0 %v7759_v32  ;;  %v7775_v32 = vpack.c.bf16 %v4798_v2, %v4791_v35  ;;  %v4763_v4 = vld [vmem:[#allocation6 + $0x2640] sm:$0xff]  ;;  %v4770_v44 = vld [vmem:[#allocation6 + $0x2678] sm:$0xff] }
 0x5e1   : > { %7698 = vmatpush1.bf16.msra.mxu1 %v7697_v27  ;;  %v4812_v27 = vld [vmem:[#allocation6 + $0x27c8] sm:$0xff] }
 0x5e2   : > { %7762 = vmatpush3.bf16.msra.mxu0 %v7761_v37  ;;  %7700 = vmatprep.subr.bf16.mxu1 %v7699_v39  ;;  %v7713_v37 = vpack.c.bf16 %v4796_v56, %v4789_v54  ;;  %v7777_v39 = vpack.c.bf16 %v4686_v42, %v4679_v26  ;;  %v7779_v34 = vpack.c.bf16 %v4812_v27, %v4805_v57  ;;  %v4735_v54 = vld [vmem:[#allocation6 + $0x2560] sm:$0xff] }
 0x5e3   : > { %7764 = vmatprep.subr.bf16.mxu0 %v7763_v46  ;;  %v7715_v46 = vpack.c.bf16 %v4811_v63, %v4804_v47  ;;  %v7791_v56 = vpack.c.bf16 %v4854_v52, %v4847_v25  ;;  %v4867_v26 = vld [vmem:[#allocation6 + $0x2980] sm:$0xff]  ;;  %v4861_v47 = vld [vmem:[#allocation6 + $0x2950] sm:$0xff]  ;;  %v4868_v63 = vld [vmem:[#allocation6 + $0x2988] sm:$0xff] }
 0x5e5   : > { %7702 = vmatpush1.bf16.msra.mxu1 %v7701_v10  ;;  %v4826_v10 = vld [vmem:[#allocation6 + $0x2838] sm:$0xff] }
 0x5e6   : > { %7766 = vmatpush3.bf16.msra.mxu0 %v7765_v17  ;;  %7704 = vmatprep.subr.bf16.mxu1 %v7703_v20  ;;  %v7719_v17 = vpack.c.bf16 %v4825_v22, %v4818_v45  ;;  %v4817_v20 = vld [vmem:[#allocation6 + $0x27f0] sm:$0xff]  ;;  %v7783_v15 = vpack.c.bf16 %v4826_v10, %v4819_v33  ;;  %v4874_v45 = vld [vmem:[#allocation6 + $0x29b8] sm:$0xff] }
 0x5e7   : > { %7768 = vmatprep.subr.bf16.mxu0 %v7767_v50  ;;  %v4714_v50 = vld [vmem:[#allocation6 + $0x24b8] sm:$0xff]  ;;  %v4881_v22 = vld [vmem:[#allocation6 + $0x29f0] sm:$0xff] }
 0x5e8   : > { %v7785_v28 = vpack.c.bf16 %v4714_v50, %v4707_v38  ;;  %v4873_v50 = vld [vmem:[#allocation6 + $0x29b0] sm:$0xff] }
 0x5e9   : > { %7706 = vmatpush1.bf16.msra.mxu1 %v7705_v16  ;;  %v7723_v16 = vpack.c.bf16 %v4839_v19, %v4832_v24  ;;  %v4880_v24 = vld [vmem:[#allocation6 + $0x29e8] sm:$0xff] }
 0x5ea   : > { %7770 = vmatpush3.bf16.msra.mxu0 %v7769_v7  ;;  %7708 = vmatprep.subr.bf16.mxu1 %v7707_v1  ;;  %v4838_v7 = vld [vmem:[#allocation6 + $0x2898] sm:$0xff]  ;;  %v4721_v1 = vld [vmem:[#allocation6 + $0x24f0] sm:$0xff] }
 0x5eb   : > { %7772 = vmatprep.subr.bf16.mxu0 %v7771_v21  ;;  %v4846_v21 = vld [vmem:[#allocation6 + $0x28d8] sm:$0xff]  ;;  %v7789_v35 = vpack.c.bf16 %v4728_v53, %v4721_v1 }
 0x5ec   : > { %v7727_v2 = vpack.c.bf16 %v4853_v6, %v4846_v21  ;;  %v5529_v6 = vld [vmem:[#allocation7] sm:$0xff] }
 0x5ed   : > { %5430 = vmatmul.mubr.f32.vlgmr.msra.gmra.mrb[52].mxu0 %v9307_v51  ;;  %7710 = vmatpush1.bf16.msra.mxu1 %v7709_v40  ;;  %v7717_v51 = vpack.c.bf16 %v4810_v49, %v4803_v59  ;;  %v4845_v40 = vld [vmem:[#allocation6 + $0x28d0] sm:$0xff]  ;;  %v4859_v49 = vld [vmem:[#allocation6 + $0x2940] sm:$0xff] }
 0x5ee   : > { %5434 = vmatprep.mubr.f32.mxu0 %v9262_v62  ;;  %7774 = vmatpush3.bf16.msra.mxu0 %v7773_v18  ;;  %v7781_v62 = vpack.c.bf16 %v4700_v12, %v4693_v61  ;;  %v4852_v18 = vld [vmem:[#allocation6 + $0x2908] sm:$0xff]  ;;  %v4866_v61 = vld [vmem:[#allocation6 + $0x2978] sm:$0xff] }
 0x5ef   : > { %7712 = vmatprep.subr.bf16.mxu1 %v7711_v41  ;;  %7776 = vmatprep.subr.bf16.mxu0 %v7775_v32  ;;  %v4742_v41 = vld [vmem:[#allocation6 + $0x2598] sm:$0xff]  ;;  %v4860_v32 = vld [vmem:[#allocation6 + $0x2948] sm:$0xff]  ;;  %v7729_v27 = vpack.c.bf16 %v4852_v18, %v4845_v40 }
 0x5f0   : > { %v7731_v59 = vpack.c.bf16 %v4867_v26, %v4860_v32  ;;  %v4756_v12 = vld [vmem:[#allocation6 + $0x2608] sm:$0xff] }
 0x5f1   : > { %5435 = vmatmul.mubr.f32.gmra.mrb[54].mxu0 %v9299_v14  ;;  %7714 = vmatpush1.bf16.msra.mxu1 %v7713_v37  ;;  %v7721_v14 = vpack.c.bf16 %v4824_v5, %v4817_v20  ;;  %v7733_v20 = vpack.c.bf16 %v4866_v61, %v4859_v49 }
 0x5f2   : > { %7778 = vmatpush3.bf16.msra.mxu0 %v7777_v39  ;;  %5504 = vmatprep.mubr.f32.mxu0 %v9322_v58  ;;  %v4831_v58 = vld [vmem:[#allocation6 + $0x2860] sm:$0xff]  ;;  %v7793_v39 = vpack.c.bf16 %v4742_v41, %v4735_v54 }
 0x5f3   : > { %7716 = vmatprep.subr.bf16.mxu1 %v7715_v46  ;;  %7780 = vmatprep.subr.bf16.mxu0 %v7779_v34  ;;  %v7725_v9 = vpack.c.bf16 %v4838_v7, %v4831_v58  ;;  %v4749_v46 = vld [vmem:[#allocation6 + $0x25d0] sm:$0xff]  ;;  %v7795_v34 = vpack.c.bf16 %v4868_v63, %v4861_v47 }
 0x5f4   : > { %v7797_v38 = vpack.c.bf16 %v4756_v12, %v4749_v46  ;;  %v9534_v12 = vsub.s32 0, %v8529_v23 }
 0x5f5   : > { %7718 = vmatpush1.bf16.msra.mxu1 %v7717_v51  ;;  %v4875_v51 = vld [vmem:[#allocation6 + $0x29c0] sm:$0xff] }
 0x5f6   : > { %7782 = vmatpush3.bf16.msra.mxu0 %v7781_v62  ;;  %7720 = vmatprep.subr.bf16.mxu1 %v7719_v17  ;;  %v4882_v62 = vld [vmem:[#allocation6 + $0x29f8] sm:$0xff] }
 0x5f7   : > { %7784 = vmatprep.subr.bf16.mxu0 %v7783_v15  ;;  %v7735_v15 = vpack.c.bf16 %v4881_v22, %v4874_v45  ;;  %v7799_v19 = vpack.c.bf16 %v4882_v62, %v4875_v51  ;;  %v5534_v45 = vrot.slane %v5529_v6, %v9534_v12 }
 0x5f9   : > { %7722 = vmatpush1.bf16.msra.mxu1 %v7721_v14 }
 0x5fa   : > { %7786 = vmatpush3.bf16.msra.mxu0 %v7785_v28  ;;  %7724 = vmatprep.subr.bf16.mxu1 %v7723_v16  ;;  %v7801_v28 = vpack.c.bf16 %v4770_v44, %v4763_v4 }
 0x5fb   : > { %7788 = vmatprep.subr.bf16.mxu0 %v7787_v60 }
 0x5fc   : > { %v6177_v42 = vpop.f32.mrb[44].mxu0 }
 0x5fd   : > { %7726 = vmatpush1.bf16.msra.mxu1 %v7725_v9  ;;  %v6178_v57 = vpop.f32.mrb[45].mxu0 }
 0x5fe   : > { %7790 = vmatpush3.bf16.msra.mxu0 %v7789_v35  ;;  %v6179_v37 = vadd.f32 %v6178_v57, %v6177_v42  ;;  %7728 = vmatprep.subr.bf16.mxu1 %v7727_v2 }
 0x5ff   : > { %7792 = vmatprep.subr.bf16.mxu0 %v7791_v56 }
 0x600   : > { %v4351_v33 = vadd.f32 %v6179_v37, %v9327_v8  ;;  %v6180_v10 = vpop.f32.mrb[46].mxu0  ;;  %v7737_v8 = vpack.c.bf16 %v4880_v24, %v4873_v50  ;;  %v9536_v50 = vsub.s32 4, %v8529_v23 }
 0x601   : > { %7730 = vmatpush1.bf16.msra.mxu1 %v7729_v27  ;;  %v6181_v17 = vpop.f32.mrb[47].mxu0 }
 0x602   : > { %7794 = vmatpush3.bf16.msra.mxu0 %v7793_v39  ;;  %v6182_v5 = vadd.f32 %v6181_v17, %v6180_v10  ;;  %7732 = vmatprep.subr.bf16.mxu1 %v7731_v59  ;;  %v5554_v39 = vrot.slane %v5529_v6, %v1586_v36  ;;  %v5550_v24 = vrot.slane %v5529_v6, %v9536_v50 }
 0x603   : > { %7796 = vmatprep.subr.bf16.mxu0 %v7795_v34 }
 0x604   : > { %v4356_v14 = vadd.f32 %v6182_v5, %v9330_v29 }
 0x605   : > { %7734 = vmatpush1.bf16.msra.mxu1 %v7733_v20 }
 0x606   : > { %7798 = vmatpush3.bf16.msra.mxu0 %v7797_v38  ;;  %7736 = vmatprep.subr.bf16.mxu1 %v7735_v15 }
 0x607   : > { %7800 = vmatprep.subr.bf16.mxu0 %v7799_v19 }
 0x609   : > { %7738 = vmatpush1.bf16.msra.mxu1 %v7737_v8 }
 0x60a   : > { %7802 = vmatpush3.bf16.msra.mxu0 %v7801_v28  ;;  %v9537_v28 = vsub.s32 6, %v8529_v23 }
 0x60c   : > { %5353 = vmatmul.mubr.f32.vlgmr.msra.gmra.mrb[16].mxu1 %v9338_v43 }
 0x60d   : > { %5505 = vmatmul.mubr.f32.vlgmr.msra.gmra.mrb[56].mxu0 %v9338_v43  ;;  %5358 = vmatprep.mubr.f32.mxu1 %v9310_v13  ;;  %v5538_v43 = vrot.slane %v5529_v6, %v1570_v0  ;;  %v5546_v0 = vrot.slane %v5529_v6, %v1578_v31 }
 0x60e   : > { %5509 = vmatprep.mubr.f32.mxu0 %v9310_v13 }
 0x610   : > { %5359 = vmatmul.mubr.f32.gmra.mrb[18].mxu1 %v9334_v55 }
 0x611   : > { %5510 = vmatmul.mubr.f32.gmra.mrb[58].mxu0 %v9334_v55 }
 0x61c   : > { %v6215_v29 = vpop.f32.mrb[48].mxu0 }
 0x61d   : > { %v6216_v16 = vpop.f32.mrb[49].mxu0 }
 0x61e   : > { %v6217_v58 = vadd.f32 %v6216_v16, %v6215_v29  ;;  %v5558_v29 = vrot.slane %v5529_v6, %v9537_v28 }
 0x620   : > { %v4426_v7 = vadd.f32 %v6217_v58, %v4351_v33  ;;  %v6218_v1 = vpop.f32.mrb[50].mxu0  ;;  %v9535_v33 = vsub.s32 2, %v8529_v23 }
 0x621   : > { %v6219_v60 = vpop.f32.mrb[51].mxu0 }
 0x622   : > { %v6220_v53 = vadd.f32 %v6219_v60, %v6218_v1  ;;  %v5542_v10 = vrot.slane %v5529_v6, %v9535_v33 }
 0x624   : > { %v4431_v21 = vadd.f32 %v6220_v53, %v4356_v14 }
 0x65d   : > { %v5046_v25 = vpop.f32.mrb[12].mxu1 }
 0x65e   : > { %v7815_v52 = vadd.f32 %v5046_v25, %v9230_v30  ;;  %v5048_v13 = vpop.f32.mrb[13].mxu1 }
 0x65f   : > { %v7816_v9 = vadd.f32 %v5048_v13, %v9232_v11 }
 0x660   : > { %v9403_v36 = vadd.f32 %v7815_v52, %v5534_v45 }
 0x661   : > { %v9372_v35 = vadd.f32 %v7816_v9, %v5538_v43  ;;  %v5052_v55 = vpop.f32.mrb[14].mxu1 }
 0x662   : > { %v9375_v2 = vadd.f32 %v5052_v55, %v9234_v3  ;;  %v5054_v40 = vpop.f32.mrb[15].mxu1  ;;  %v5580_v1 = vmax.f32 %v9403_v36, 0.0 }
 0x663   : > { %v5581_v18 = vmax.f32 %v9372_v35, 0.0  ;;  %v7818_v54 = vadd.f32 %v5054_v40, %v9236_v48 }
 0x664   : > { %v5573_v55 = vadd.f32 %v9375_v2, %v5534_v45 }
 0x665   : > { %v9379_v56 = vadd.f32 %v7818_v54, %v5538_v43  ;;  %5606 = vrot.lane.b32.xlu0 %v5581_v18, %s8116_s15 }
 0x667   : > { %v5588_v48 = vmax.f32 %v9379_v56, 0.0 }
 0x69e   : > { %v5200_v30 = vpop.f32.mrb[32].mxu0 }
 0x69f   : > { %v5202_v11 = vpop.f32.mrb[33].mxu0  ;;  %v9407_v44 = vadd.f32 %v5542_v10, %v5200_v30 }
 0x6a0   : > { %v9384_v41 = vadd.f32 %v5546_v0, %v5202_v11 }
 0x6a1   : > { %v5582_v60 = vmax.f32 %v9407_v44, 0.0 }
 0x6a2   : > { %v5583_v32 = vmax.f32 %v9384_v41, 0.0  ;;  %v5206_v3 = vpop.f32.mrb[34].mxu0 }
 0x6a3   : > { %v5208_v26 = vpop.f32.mrb[35].mxu0 }
 0x6a4   : > { %v9387_v42 = vadd.f32 %v5546_v0, %v5208_v26  ;;  %5626 = vrot.lane.b32.xlu1 %v5583_v32, %s8116_s15 }
 0x6a6   : > { %v5590_v14 = vmax.f32 %v9387_v42, 0.0 }
 0x6a8   : > { %5608 = vrot.lane.b32.xlu1 %v5588_v48, %s8116_s15 }
 0x6c0   : > { %v6253_v31 = vpop.f32.mrb[52].mxu0 }
 0x6c1   : > { %v6254_v47 = vpop.f32.mrb[53].mxu0 }
 0x6c2   : > { %v6255_v63 = vadd.f32 %v6254_v47, %v6253_v31 }
 0x6c4   : > { %v6256_v57 = vpop.f32.mrb[54].mxu0 }
 0x6c5   : > { %v6257_v27 = vpop.f32.mrb[55].mxu0 }
 0x6c6   : > { %v6258_v37 = vadd.f32 %v6257_v27, %v6256_v57 }
 0x6d7   : > { %v5607_v25 = vpop.permute.xlu0 %5606 }
 0x6d8   : > { %v5612_v43 = vmax.f32 %v5581_v18, %v5607_v25  ;;  %v5587_v18 = vmax.f32 %v5573_v55, 0.0 }
 0x6df   : > { %v5354_v59 = vpop.f32.mrb[16].mxu1 }
 0x6e0   : > { %v6291_v49 = vpop.f32.mrb[56].mxu0  ;;  %v5356_v61 = vpop.f32.mrb[17].mxu1 }
 0x6e1   : > { %v5571_v46 = vadd.f32 %v5554_v39, %v5356_v61  ;;  %v6292_v34 = vpop.f32.mrb[57].mxu0 }
 0x6e2   : > { %v6293_v22 = vadd.f32 %v6292_v34, %v6291_v49 }
 0x6e3   : > { %v5585_v51 = vmax.f32 %v5571_v46, 0.0  ;;  %v5360_v62 = vpop.f32.mrb[18].mxu1 }
 0x6e4   : > { %v5507_v17 = vadd.f32 %v6293_v22, %v6255_v63  ;;  %v6294_v20 = vpop.f32.mrb[58].mxu0  ;;  %v5362_v5 = vpop.f32.mrb[19].mxu1  ;;  %v9441_v54 = vadd.f32 %v5550_v24, %v5360_v62 }
 0x6e5   : > { %v5578_v38 = vadd.f32 %v5554_v39, %v5362_v5  ;;  %v6295_v15 = vpop.f32.mrb[59].mxu0  ;;  %5646 = vrot.lane.b32.xlu0 %v5585_v51, %s8116_s15 }
 0x6e6   : > { %v5521_v19 = vadd.f32 %v5507_v17, %v4426_v7  ;;  %v6296_v4 = vadd.f32 %v6295_v15, %v6294_v20  ;;  %v9416_v7 = vadd.f32 %v5550_v24, %v5354_v59  ;;  %v5591_v0 = vmax.f32 %v9441_v54, 0.0 }
 0x6e7   : > { %v5592_v8 = vmax.f32 %v5578_v38, 0.0 }
 0x6e8   : > { %v5512_v16 = vadd.f32 %v6296_v4, %v6258_v37  ;;  %v5572_v53 = vadd.f32 %v5558_v29, %v5521_v19  ;;  %v5584_v23 = vmax.f32 %v9416_v7, 0.0 }
 0x6e9   : > { %5648 = vrot.lane.b32.xlu1 %v5592_v8, %s8116_s15  ;;  %5628 = vrot.lane.b32.xlu0 %v5590_v14, %s8116_s15 }
 0x6ea   : > { %v5528_v58 = vadd.f32 %v5512_v16, %v4431_v21  ;;  %v5586_v6 = vmax.f32 %v5572_v53, 0.0  ;;  %v9429_v21 = vadd.f32 %v5542_v10, %v5206_v3 }
 0x6ec   : > { %v5589_v52 = vmax.f32 %v9429_v21, 0.0  ;;  %v5579_v13 = vadd.f32 %v5558_v29, %v5528_v58 }
 0x6ed   : > { %5616 = vrot.lane.b32.xlu1 %v5582_v60, %s8116_s15  ;;  %5596 = vrot.lane.b32.xlu0 %v5580_v1, %s8116_s15 }
 0x6ee   : > { %v5593_v9 = vmax.f32 %v5579_v13, 0.0 }
 0x6f1   : > { %5636 = vrot.lane.b32.xlu0 %v5584_v23, %s8116_s15  ;;  %5656 = vrot.lane.b32.xlu1 %v5586_v6, %s8116_s15 }
 0x6f5   : > { %5666 = vrot.lane.b32.xlu0 %v5612_v43, %s8116_s15 }
 0x6f9   : > { %5618 = vrot.lane.b32.xlu0 %v5589_v52, %s8116_s15 }
 0x6fd   : > { %5658 = vrot.lane.b32.xlu0 %v5593_v9, %s8116_s15 }
 0x716   : > { %v5627_v35 = vpop.permute.xlu1 %5626 }
 0x717   : > { %v5632_v40 = vmax.f32 %v5583_v32, %v5627_v35 }
 0x719   : > { %5674 = vrot.lane.b32.xlu1 %v5632_v40, %s8116_s15 }
 0x71a   : > { %v5609_v30 = vpop.permute.xlu1 %5608 }
 0x71b   : > { %v5613_v2 = vmax.f32 %v5588_v48, %v5609_v30 }
 0x71d   : > { %5598 = vrot.lane.b32.xlu1 %v5587_v18, %s8116_s15 }
 0x721   : > { %5638 = vrot.lane.b32.xlu1 %v5591_v0, %s8116_s15 }
 0x725   : > { %5668 = vrot.lane.b32.xlu1 %v5613_v2, %s8116_s15 }
 0x757   : > { %v5647_v11 = vpop.permute.xlu0 %5646 }
 0x758   : > { %v5652_v41 = vmax.f32 %v5585_v51, %v5647_v11 }
 0x75a   : > { %5682 = vrot.lane.b32.xlu0 %v5652_v41, %s8116_s15 }
 0x75b   : > { %v5649_v32 = vpop.permute.xlu1 %5648  ;;  %v5629_v3 = vpop.permute.xlu0 %5628 }
 0x75c   : > { %v5653_v26 = vmax.f32 %v5592_v8, %v5649_v32  ;;  %v5633_v42 = vmax.f32 %v5590_v14, %v5629_v3 }
 0x75e   : > { %5676 = vrot.lane.b32.xlu0 %v5633_v42, %s8116_s15  ;;  %5684 = vrot.lane.b32.xlu1 %v5653_v26, %s8116_s15 }
 0x75f   : > { %v5617_v31 = vpop.permute.xlu1 %5616  ;;  %v5597_v47 = vpop.permute.xlu0 %5596 }
 0x760   : > { %v5602_v15 = vmax.f32 %v5580_v1, %v5597_v47  ;;  %v5622_v24 = vmax.f32 %v5582_v60, %v5617_v31 }
 0x763   : > { %v5637_v63 = vpop.permute.xlu0 %5636  ;;  %v5657_v57 = vpop.permute.xlu1 %5656 }
 0x764   : > { %v5662_v56 = vmax.f32 %v5586_v6, %v5657_v57  ;;  %v5642_v41 = vmax.f32 %v5584_v23, %v5637_v63 }
 0x766   : > { %v5701_v48 = vrot.slane %v5662_v56, 1 }
 0x767   : > { %v5667_v27 = vpop.permute.xlu0 %5666 }
 0x768   : > { %v5709_v37 = vmax.f32 %v5662_v56, %v5701_v48  ;;  %v5688_v50 = vsel %vm1948_vm6, %v5602_v15, %v5667_v27 }
 0x769   : > { %v5698_v4 = vrot.slane %v5688_v50, 1 }
 0x76a   : > { %v5733_v59 = vrot.slane %v5709_v37, 1  ;;  %v5741_v61 = vrot.slane %v5709_v37, 2  ;;  %v5749_v33 = vrot.slane %v5709_v37, 3 }
 0x76b   : > { %v5619_v39 = vpop.permute.xlu0 %5618  ;;  %v5706_v28 = vmax.f32 %v5688_v50, %v5698_v4 }
 0x76c   : > { %v5785_v34 = vsel %vm2162_vm8, %v5709_v37, %v5733_v59  ;;  %v5623_v31 = vmax.f32 %v5589_v52, %v5619_v39 }
 0x76d   : > { %v5789_v45 = vsel %vm2167_vm9, %v5785_v34, %v5741_v61  ;;  %v5730_v16 = vrot.slane %v5706_v28, 1  ;;  %v5738_v53 = vrot.slane %v5706_v28, 2  ;;  %v5746_v43 = vrot.slane %v5706_v28, 3 }
 0x76e   : > { %v5793_v62 = vsel %vm2172_vm10, %v5789_v45, %v5749_v33 }
 0x76f   : > { %v5659_v49 = vpop.permute.xlu0 %5658  ;;  %v5782_v36 = vsel %vm2162_vm8, %v5706_v28, %v5730_v16 }
 0x770   : > { %v5663_v46 = vmax.f32 %v5593_v9, %v5659_v49  ;;  %v5786_v44 = vsel %vm2167_vm9, %v5782_v36, %v5738_v53 }
 0x771   : > { %v5790_v35 = vsel %vm2172_vm10, %v5786_v44, %v5746_v43 }
 0x772   : > { %v5717_v12 = vrot.slane %v5663_v46, 1 }
 0x774   : > { %v5725_v22 = vmax.f32 %v5663_v46, %v5717_v12 }
 0x776   : > { %v5761_v10 = vrot.slane %v5725_v22, 4  ;;  %v5769_v51 = vrot.slane %v5725_v22, 5  ;;  %v5777_v17 = vrot.slane %v5725_v22, 6 }
 0x778   : > { %v5797_v20 = vsel %vm2177_vm11, %v5793_v62, %v5761_v10 }
 0x779   : > { %v5801_v5 = vsel %vm2182_vm12, %v5797_v20, %v5769_v51 }
 0x77a   : > { %v5805_v38 = vsel %vm362_vm0, %v5801_v5, %v5777_v17 }
 0x77b   : > { %5810 = vst.msk [vmem:[%s9462_s24 + $0x18] sm:$0x7f] %vm5809_vm14, %v5805_v38 }
 0x78b   : > { %v5675_v19 = vpop.permute.xlu1 %5674 }
 0x78c   : > { %v5690_v14 = vsel %vm1948_vm6, %v5622_v24, %v5675_v19 }
 0x78d   : > { %v5699_v2 = vrot.slane %v5690_v14, 1 }
 0x78f   : > { %v5599_v8 = vpop.permute.xlu1 %5598  ;;  %v5707_v11 = vmax.f32 %v5690_v14, %v5699_v2 }
 0x790   : > { %v5603_v58 = vmax.f32 %v5587_v18, %v5599_v8 }
 0x791   : > { %v5731_v3 = vrot.slane %v5707_v11, 1  ;;  %v5739_v57 = vrot.slane %v5707_v11, 2  ;;  %v5747_v39 = vrot.slane %v5707_v11, 3 }
 0x793   : > { %v5639_v29 = vpop.permute.xlu1 %5638  ;;  %v5783_v37 = vsel %vm2162_vm8, %v5707_v11, %v5731_v3 }
 0x794   : > { %v5643_v47 = vmax.f32 %v5591_v0, %v5639_v29  ;;  %v5787_v21 = vsel %vm2167_vm9, %v5783_v37, %v5739_v57 }
 0x795   : > { %v5791_v33 = vsel %vm2172_vm10, %v5787_v21, %v5747_v39 }
 0x797   : > { %v5669_v6 = vpop.permute.xlu1 %5668 }
 0x798   : > { %v5689_v1 = vsel %vm1948_vm6, %v5603_v58, %v5669_v6 }
 0x799   : > { %v5714_v25 = vrot.slane %v5689_v1, 1 }
 0x79b   : > { %v5722_v60 = vmax.f32 %v5689_v1, %v5714_v25 }
 0x79d   : > { %v5758_v13 = vrot.slane %v5722_v60, 4  ;;  %v5766_v9 = vrot.slane %v5722_v60, 5  ;;  %v5774_v55 = vrot.slane %v5722_v60, 6 }
 0x79f   : > { %v5794_v40 = vsel %vm2177_vm11, %v5790_v35, %v5758_v13 }
 0x7a0   : > { %v5798_v18 = vsel %vm2182_vm12, %v5794_v40, %v5766_v9 }
 0x7a1   : > { %v5802_v30 = vsel %vm362_vm0, %v5798_v18, %v5774_v55 }
 0x7a2   : > { %5806 = vst [vmem:[%s9462_s24] sm:$0x7f] %v5802_v30 }
 0x7cc   : > { %v5683_v32 = vpop.permute.xlu0 %5682 }
 0x7cd   : > { %v5692_v26 = vsel %vm1948_vm6, %v5642_v41, %v5683_v32 }
 0x7ce   : > { %v5700_v42 = vrot.slane %v5692_v26, 1 }
 0x7d0   : > { %v5708_v56 = vmax.f32 %v5692_v26, %v5700_v42  ;;  %v5677_v48 = vpop.permute.xlu0 %5676  ;;  %v5685_v27 = vpop.permute.xlu1 %5684 }
 0x7d1   : > { %v5691_v7 = vsel %vm1948_vm6, %v5623_v31, %v5677_v48  ;;  %v5693_v23 = vsel %vm1948_vm6, %v5643_v47, %v5685_v27 }
 0x7d2   : > { %v5732_v63 = vrot.slane %v5708_v56, 1  ;;  %v5740_v59 = vrot.slane %v5708_v56, 2  ;;  %v5715_v49 = vrot.slane %v5691_v7, 1  ;;  %v5716_v61 = vrot.slane %v5693_v23, 1 }
 0x7d3   : > { %v5748_v52 = vrot.slane %v5708_v56, 3 }
 0x7d4   : > { %v5784_v54 = vsel %vm2162_vm8, %v5708_v56, %v5732_v63  ;;  %v5723_v0 = vmax.f32 %v5691_v7, %v5715_v49  ;;  %v5724_v34 = vmax.f32 %v5693_v23, %v5716_v61 }
 0x7d5   : > { %v5788_v46 = vsel %vm2167_vm9, %v5784_v54, %v5740_v59 }
 0x7d6   : > { %v5759_v12 = vrot.slane %v5723_v0, 4  ;;  %v5767_v45 = vrot.slane %v5723_v0, 5  ;;  %v5792_v22 = vsel %vm2172_vm10, %v5788_v46, %v5748_v52  ;;  %v5760_v10 = vrot.slane %v5724_v34, 4 }
 0x7d7   : > { %v5768_v51 = vrot.slane %v5724_v34, 5  ;;  %v5775_v62 = vrot.slane %v5723_v0, 6  ;;  %v5776_v5 = vrot.slane %v5724_v34, 6 }
 0x7d8   : > { %v5795_v17 = vsel %vm2177_vm11, %v5791_v33, %v5759_v12  ;;  %v5796_v38 = vsel %vm2177_vm11, %v5792_v22, %v5760_v10 }
 0x7d9   : > { %v5799_v20 = vsel %vm2182_vm12, %v5795_v17, %v5767_v45  ;;  %v5800_v50 = vsel %vm2182_vm12, %v5796_v38, %v5768_v51 }
 0x7da   : > { %v5803_v15 = vsel %vm362_vm0, %v5799_v20, %v5775_v62  ;;  %v5804_v24 = vsel %vm362_vm0, %v5800_v50, %v5776_v5 }
 0x7db   : > { %5807 = vst [vmem:[%s9462_s24 + $0x8] sm:$0x7f] %v5803_v15  ;;  %5808 = vst [vmem:[%s9462_s24 + $0x10] sm:$0x7f] %v5804_v24 }
 0x7dc PF: > { %s18_s18 = sadd.s32 1, %s8105_s18  }
 0x7dd   : > { %p15_p6 = scmp.ge.s32.totalorder %s18_s18, 4  }
 0x7df   :  { %17 = sbr.rel (!%p15_p6) target bundleno = 3 (0x3), region = 91 }
 0x7e6   :  { %5832 = vsyncpa [#allocation3], 1 }
 0x7e7   :  { %5834 = vsyncpa [#allocation3 + $0x1], 1 }
 0x7e8   :  { %5835 = vsyncpa [#allocation5], 1 }
 0x7e9   :  { %5836 = vsyncpa [#allocation8], 1 }

</bundles_post_ra>
